<compile_context>
chip_gen: v7x
topology: tpu7x:2x2x1
jax: 0.10.0
libtpu: 0.0.40
codegen_flags: <defaults>
</compile_context>

<pallas_src>
import numpy as np
import jax
import jax.numpy as jnp
from jax.experimental import pallas as pl
from jax.experimental.pallas import tpu as pltpu


_WEIGHT_ORDER = ("EB0",
                 "EB1.w1", "EB1.w2", "EB1.ws",
                 "EB2.w1", "EB2.w2", "EB2.ws",
                 "EB3.w1", "EB3.w2", "EB3.ws",
                 "DB0", "DB1", "DB2", "DB3")

_CONST_ORDER = ("mask7", "mask3", "sub_full",
                "g_eb1_c2", "g_eb2_c1", "sub_half",
                "g_eb2_c2", "g_eb3_c1", "sub_quart",
                "g_eb3_c2", "g_db0", "g_db1", "dup_half")


# ----------------------------------------------------------------------------
# In-kernel helpers (all shapes / loop bounds are Python statics -> fully unrolled)
# ----------------------------------------------------------------------------
def _relu(a):
    return jnp.maximum(a, 0.0)


def _instance_norm(a, eps=1e-5):
    """Non-affine InstanceNorm over the spatial (lane) axis.  a: (C, S) f32."""
    inv_n = 1.0 / a.shape[1]
    mean = jnp.sum(a, axis=1, keepdims=True) * inv_n
    var = jnp.sum(a * a, axis=1, keepdims=True) * inv_n - mean * mean
    return (a - mean) * jax.lax.rsqrt(jnp.maximum(var, 0.0) + eps)


def _conv_roll(x, w_ref, mask_ref, h, w, k):
    """Stride-1 kxk conv at full resolution (S = h*w, S % 128 == 0).

    Taps are gathered with pltpu.roll (XLU slot), masked with host-precomputed border
    masks, stacked along the contraction axis, and contracted against the host-packed
    (Cout, k*k*Cin) weight in 1 (3x3) or k (7x7) fused MXU matmuls.
    x: (Cin, S) f32.  w_ref: (Cout, k*k*Cin) bf16.  mask_ref: (k*k, S) f32.
    """
    s = h * w
    p = (k - 1) // 2
    cin = x.shape[0]
    cout = w_ref.shape[0]
    group = k * k if k * k * cin <= 80 else k       # cap live f32 tap vregs
    acc = jnp.zeros((cout, s), jnp.float32)
    taps, start = [], 0
    for t in range(k * k):
        dy, dx = divmod(t, k)
        shift = (dy - p) * w + (dx - p)
        piece = x if shift == 0 else pltpu.roll(x, shift=(-shift) % s, axis=1)
        if not (dy == p and dx == p):               # centre tap: mask is all-ones
            piece = piece * mask_ref[t:t + 1, :]
        taps.append(piece)
        if len(taps) == group or t == k * k - 1:
            stacked = jnp.concatenate(taps, axis=0).astype(jnp.bfloat16)
            w_blk = w_ref[:, start * cin:(start + len(taps)) * cin]
            acc = acc + jnp.dot(w_blk, stacked, preferred_element_type=jnp.float32)
            start += len(taps)
            taps = []
    return acc


def _conv_gather(x, w_ref, g_ref):
    """Conv at small spatial sizes (S <= 64 lanes).

    g_ref: (k*k, S_src, S_out) bf16 host-precomputed 0/1 matrices fusing tap shift +
    border mask + stride-2 subsample + (decoder) nearest-2x upsample.  One tiny gather
    matmul per tap, then ONE weight matmul against the (Cout, k*k*Cin) packed weight.
    """
    xb = x.astype(jnp.bfloat16)
    taps = [jnp.dot(xb, g_ref[t], preferred_element_type=jnp.float32)
            for t in range(g_ref.shape[0])]
    stacked = jnp.concatenate(taps, axis=0).astype(jnp.bfloat16)
    return jnp.dot(w_ref[...], stacked, preferred_element_type=jnp.float32)


def _matmul_const(x, c):
    """x (C, S_in) f32 @ host constant (S_in, S_out) bf16 -> (C, S_out) f32 (MXU)."""
    return jnp.dot(x.astype(jnp.bfloat16), c, preferred_element_type=jnp.float32)


def _make_kernel(h, w):
    n_w, n_c = len(_WEIGHT_ORDER), len(_CONST_ORDER)

    def kernel(x_ref, *refs):
        wr = refs[:n_w]
        cr = refs[n_w:n_w + n_c]
        o_ref = refs[n_w + n_c]
        (w_eb0, w11, w12, w1s, w21, w22, w2s, w31, w32, w3s,
         wd0, wd1, wd2, wd3) = wr
        (mask7, mask3, sub256, g_e1c2, g_e2c1, sub64, g_e2c2,
         g_e3c1, sub16, g_e3c2, g_db0, g_db1, dup64) = cr

        x = x_ref[0]                                              # (Cin, h*w) f32

        # ---------------- encoder ----------------
        eb0 = _relu(_instance_norm(_conv_roll(x, w_eb0, mask7, h, w, 7)))

        # EB1: residual downsample (h,w) -> (h/2,w/2)
        y = _conv_roll(eb0, w11, mask3, h, w, 3)                  # 3x3 at full res
        hid = _relu(_instance_norm(_matmul_const(y, sub256[0])))  # stride-2 subsample
        main = _instance_norm(_conv_gather(hid, w12, g_e1c2))
        sc = _instance_norm(_conv_gather(eb0, w1s, sub256))       # 1x1 s2 shortcut
        eb1 = _relu(main + sc)

        # EB2: (h/2,w/2) -> (h/4,w/4)
        hid = _relu(_instance_norm(_conv_gather(eb1, w21, g_e2c1)))
        main = _instance_norm(_conv_gather(hid, w22, g_e2c2))
        sc = _instance_norm(_conv_gather(eb1, w2s, sub64))
        eb2 = _relu(main + sc)

        # EB3: (h/4,w/4) -> (h/8,w/8)
        hid = _relu(_instance_norm(_conv_gather(eb2, w31, g_e3c1)))
        main = _instance_norm(_conv_gather(hid, w32, g_e3c2))
        sc = _instance_norm(_conv_gather(eb2, w3s, sub16))
        eb3 = _relu(main + sc)

        # ---------------- decoder ----------------
        # DB0 / DB1: nearest-2x upsample folded into the conv gather constants
        db0 = _relu(_instance_norm(_conv_gather(eb3, wd0, g_db0)) + eb2)
        db1 = _relu(_instance_norm(_conv_gather(db0, wd1, g_db1)) + eb1)
        # DB2: explicit nearest-2x dup matmul up to full res, then roll-path conv
        up = _matmul_const(db1, dup64[0])
        db2 = _relu(_instance_norm(_conv_roll(up, wd2, mask3, h, w, 3)) + eb0)
        # DB3: 7x7 conv -> IN, tanh
        db3 = _instance_norm(_conv_roll(db2, wd3, mask7, h, w, 7))
        o_ref[0] = jnp.tanh(db3)

    return kernel


# ----------------------------------------------------------------------------
# Host-side constant / weight preparation (deterministic, in-script)
# ----------------------------------------------------------------------------
def _tap_masks(h, w, k):
    """(k*k, h*w) f32 border-validity masks for the roll-based tap gather."""
    p = (k - 1) // 2
    idx = np.arange(h * w)
    r, c = idx // w, idx % w
    m = np.zeros((k * k, h * w), np.float32)
    for t in range(k * k):
        dy, dx = divmod(t, k)
        m[t] = ((r + dy - p >= 0) & (r + dy - p < h)
                & (c + dx - p >= 0) & (c + dx - p < w)).astype(np.float32)
    return jnp.asarray(m)


def _gather_mats(h_src, w_src, k, stride, up):
    """(k*k, S_src, S_out) bf16 0/1 matrices: [nearest-up x `up`] -> kxk conv tap
    gather -> stride subsample, with out-of-bound taps zeroed."""
    h_in, w_in = h_src * up, w_src * up
    p = (k - 1) // 2
    h_out = (h_in + 2 * p - k) // stride + 1
    w_out = (w_in + 2 * p - k) // stride + 1
    s_src, s_out = h_src * w_src, h_out * w_out
    o = np.arange(s_out)
    ro, co = o // w_out, o % w_out
    g = np.zeros((k * k, s_src, s_out), np.float32)
    for t in range(k * k):
        dy, dx = divmod(t, k)
        r_in = stride * ro + dy - p
        c_in = stride * co + dx - p
        valid = (r_in >= 0) & (r_in < h_in) & (c_in >= 0) & (c_in < w_in)
        src = (np.clip(r_in, 0, h_in - 1) // up) * w_src + (np.clip(c_in, 0, w_in - 1) // up)
        g[t, src[valid], o[valid]] = 1.0
    return jnp.asarray(g, dtype=jnp.bfloat16)


def build_gather_constants(h, w):
    h2, w2, h4, w4, h8, w8 = h // 2, w // 2, h // 4, w // 4, h // 8, w // 8
    return {
        "mask7":     _tap_masks(h, w, 7),
        "mask3":     _tap_masks(h, w, 3),
        "sub_full":  _gather_mats(h, w, 1, 2, 1),      # full -> half subsample / 1x1 s2
        "g_eb1_c2":  _gather_mats(h2, w2, 3, 1, 1),
        "g_eb2_c1":  _gather_mats(h2, w2, 3, 2, 1),
        "sub_half":  _gather_mats(h2, w2, 1, 2, 1),
        "g_eb2_c2":  _gather_mats(h4, w4, 3, 1, 1),
        "g_eb3_c1":  _gather_mats(h4, w4, 3, 2, 1),
        "sub_quart": _gather_mats(h4, w4, 1, 2, 1),
        "g_eb3_c2":  _gather_mats(h8, w8, 3, 1, 1),
        "g_db0":     _gather_mats(h8, w8, 3, 1, 2),    # up2x folded into conv gather
        "g_db1":     _gather_mats(h4, w4, 3, 1, 2),    # up2x folded into conv gather
        "dup_half":  _gather_mats(h2, w2, 1, 1, 2),    # nearest-2x dup to full res
    }


def _init_packed_conv(key, k, cin, cout):
    """Conv weight ~ N(0, 1/fan_in), host-packed tap-major to (Cout, k*k*Cin) bf16.
    Biases omitted: every conv feeds a non-affine InstanceNorm which cancels them."""
    fan_in = k * k * cin
    wt = jax.random.normal(key, (cout, cin, k, k), jnp.float32) / np.sqrt(fan_in)
    return jnp.transpose(wt, (0, 2, 3, 1)).reshape(cout, k * k * cin).astype(jnp.bfloat16)


def init_autoencoder_params(key, input_dim, channels):
    c = channels
    ks = iter(jax.random.split(key, 16))
    params = {"EB0": _init_packed_conv(next(ks), 7, input_dim, c)}
    for name, cin, cout in (("EB1", c, 2 * c), ("EB2", 2 * c, 4 * c), ("EB3", 4 * c, 4 * c)):
        params[f"{name}.w1"] = _init_packed_conv(next(ks), 3, cin, cout)
        params[f"{name}.w2"] = _init_packed_conv(next(ks), 3, cout, cout)
        params[f"{name}.ws"] = _init_packed_conv(next(ks), 1, cin, cout)
    for name, cin, cout in (("DB0", 4 * c, 4 * c), ("DB1", 4 * c, 2 * c), ("DB2", 2 * c, c)):
        params[name] = _init_packed_conv(next(ks), 3, cin, cout)
    params["DB3"] = _init_packed_conv(next(ks), 7, c, input_dim)
    return params


# ----------------------------------------------------------------------------
# Forward pass: one pallas_call for the whole network
# ----------------------------------------------------------------------------
@jax.jit
def autoencoder_forward(params, consts, x_nchw):
    """x_nchw: (B, inputDim, H, W) f32 (PyTorch layout). Returns (B, inputDim, H, W)."""
    b, cin, h, w = x_nchw.shape
    assert h % 8 == 0 and w % 8 == 0 and (h * w) % 128 == 0

    x_flat = x_nchw.reshape(b, cin, h * w).astype(jnp.float32)
    weights = [params[k] for k in _WEIGHT_ORDER]
    cvals = [consts[k] for k in _CONST_ORDER]
    operands = weights + cvals

    def _fixed(a):
        return pl.BlockSpec(a.shape, lambda i, nd=a.ndim: (0,) * nd)

    # Advisory cost hint so XLA schedules the surrounding reshapes/casts correctly.
    s = h * w
    flops = 2 * b * sum(int(a.shape[0]) * int(a.shape[1]) * s for a in weights)
    flops += 2 * b * sum(16 * int(a.shape[0]) * int(a.shape[1]) * int(a.shape[2])
                         for a in cvals if a.ndim == 3)
    bytes_accessed = int(sum(int(np.prod(a.shape)) * a.dtype.itemsize for a in operands)
                         + 2 * b * cin * s * 4)
    cost = pl.CostEstimate(flops=int(flops),
                           transcendentals=int(b * cin * s),
                           bytes_accessed=bytes_accessed)

    out = pl.pallas_call(
        _make_kernel(h, w),
        out_shape=jax.ShapeDtypeStruct((b, cin, h * w), jnp.float32),
        grid=(b,),
        in_specs=[pl.BlockSpec((1, cin, h * w), lambda i: (i, 0, 0))]
                + [_fixed(a) for a in operands],
        out_specs=pl.BlockSpec((1, cin, h * w), lambda i: (i, 0, 0)),
        compiler_params=pltpu.CompilerParams(
            dimension_semantics=("parallel",),
            vmem_limit_bytes=32 * 1024 * 1024),
        cost_estimate=cost,
    )(x_flat, *operands)
    return out.reshape(b, cin, h, w)


if __name__ == "__main__":
    B, INPUT_DIM, CHANNELS, H, W = 2, 3, 4, 16, 16

    root = jax.random.PRNGKey(0)
    k_params, k_x = jax.random.split(root)
    params = init_autoencoder_params(k_params, INPUT_DIM, CHANNELS)
    consts = build_gather_constants(H, W)

    # PyTorch-style NCHW input (B, inputDim, H, W).
    x = jax.random.normal(k_x, (B, INPUT_DIM, H, W), jnp.float32)

    y = autoencoder_forward(params, consts, x)
    y = jax.block_until_ready(y)

    assert y.shape == (B, INPUT_DIM, H, W), y.shape
    assert bool(jnp.all(jnp.isfinite(y)))
    assert bool(jnp.all(jnp.abs(y) <= 1.0 + 1e-6))   # tanh output range
    print("KERNEL_OK")
</pallas_src>

<mosaic_0001>
module attributes {stable_mosaic.version = 11 : i64} {
  func.func @kernel(%arg0: i32, %arg1: memref<1x3x256xf32, #tpu.memory_space<vmem>>, %arg2: memref<4x147xbf16, #tpu.memory_space<vmem>>, %arg3: memref<8x36xbf16, #tpu.memory_space<vmem>>, %arg4: memref<8x72xbf16, #tpu.memory_space<vmem>>, %arg5: memref<8x4xbf16, #tpu.memory_space<vmem>>, %arg6: memref<16x72xbf16, #tpu.memory_space<vmem>>, %arg7: memref<16x144xbf16, #tpu.memory_space<vmem>>, %arg8: memref<16x8xbf16, #tpu.memory_space<vmem>>, %arg9: memref<16x144xbf16, #tpu.memory_space<vmem>>, %arg10: memref<16x144xbf16, #tpu.memory_space<vmem>>, %arg11: memref<16x16xbf16, #tpu.memory_space<vmem>>, %arg12: memref<16x144xbf16, #tpu.memory_space<vmem>>, %arg13: memref<8x144xbf16, #tpu.memory_space<vmem>>, %arg14: memref<4x72xbf16, #tpu.memory_space<vmem>>, %arg15: memref<3x196xbf16, #tpu.memory_space<vmem>>, %arg16: memref<49x256xf32, #tpu.memory_space<vmem>>, %arg17: memref<9x256xf32, #tpu.memory_space<vmem>>, %arg18: memref<1x256x64xbf16, #tpu.memory_space<vmem>>, %arg19: memref<9x64x64xbf16, #tpu.memory_space<vmem>>, %arg20: memref<9x64x16xbf16, #tpu.memory_space<vmem>>, %arg21: memref<1x64x16xbf16, #tpu.memory_space<vmem>>, %arg22: memref<9x16x16xbf16, #tpu.memory_space<vmem>>, %arg23: memref<9x16x4xbf16, #tpu.memory_space<vmem>>, %arg24: memref<1x16x4xbf16, #tpu.memory_space<vmem>>, %arg25: memref<9x4x4xbf16, #tpu.memory_space<vmem>>, %arg26: memref<9x4x16xbf16, #tpu.memory_space<vmem>>, %arg27: memref<9x16x64xbf16, #tpu.memory_space<vmem>>, %arg28: memref<1x64x256xbf16, #tpu.memory_space<vmem>>, %arg29: memref<1x3x256xf32, #tpu.memory_space<vmem>>) attributes {dimension_semantics = [#tpu.dimension_semantics<parallel>], iteration_bounds = array<i64: 2>, scalar_prefetch = 0 : i64, scratch_operands = 0 : i64, tpu.core_type = #tpu.core_type<tc>, window_params = [{transform_indices = @transform_0, window_bounds = array<i64: 1, 3, 256>}, {pipeline_mode = #tpu.pipeline_mode<synchronous>, transform_indices = @transform_1, window_bounds = array<i64: 4, 147>}, {pipeline_mode = #tpu.pipeline_mode<synchronous>, transform_indices = @transform_2, window_bounds = array<i64: 8, 36>}, {pipeline_mode = #tpu.pipeline_mode<synchronous>, transform_indices = @transform_3, window_bounds = array<i64: 8, 72>}, {pipeline_mode = #tpu.pipeline_mode<synchronous>, transform_indices = @transform_4, window_bounds = array<i64: 8, 4>}, {pipeline_mode = #tpu.pipeline_mode<synchronous>, transform_indices = @transform_5, window_bounds = array<i64: 16, 72>}, {pipeline_mode = #tpu.pipeline_mode<synchronous>, transform_indices = @transform_6, window_bounds = array<i64: 16, 144>}, {pipeline_mode = #tpu.pipeline_mode<synchronous>, transform_indices = @transform_7, window_bounds = array<i64: 16, 8>}, {pipeline_mode = #tpu.pipeline_mode<synchronous>, transform_indices = @transform_8, window_bounds = array<i64: 16, 144>}, {pipeline_mode = #tpu.pipeline_mode<synchronous>, transform_indices = @transform_9, window_bounds = array<i64: 16, 144>}, {pipeline_mode = #tpu.pipeline_mode<synchronous>, transform_indices = @transform_10, window_bounds = array<i64: 16, 16>}, {pipeline_mode = #tpu.pipeline_mode<synchronous>, transform_indices = @transform_11, window_bounds = array<i64: 16, 144>}, {pipeline_mode = #tpu.pipeline_mode<synchronous>, transform_indices = @transform_12, window_bounds = array<i64: 8, 144>}, {pipeline_mode = #tpu.pipeline_mode<synchronous>, transform_indices = @transform_13, window_bounds = array<i64: 4, 72>}, {pipeline_mode = #tpu.pipeline_mode<synchronous>, transform_indices = @transform_14, window_bounds = array<i64: 3, 196>}, {pipeline_mode = #tpu.pipeline_mode<synchronous>, transform_indices = @transform_15, window_bounds = array<i64: 49, 256>}, {pipeline_mode = #tpu.pipeline_mode<synchronous>, transform_indices = @transform_16, window_bounds = array<i64: 9, 256>}, {pipeline_mode = #tpu.pipeline_mode<synchronous>, transform_indices = @transform_17, window_bounds = array<i64: 1, 256, 64>}, {pipeline_mode = #tpu.pipeline_mode<synchronous>, transform_indices = @transform_18, window_bounds = array<i64: 9, 64, 64>}, {pipeline_mode = #tpu.pipeline_mode<synchronous>, transform_indices = @transform_19, window_bounds = array<i64: 9, 64, 16>}, {pipeline_mode = #tpu.pipeline_mode<synchronous>, transform_indices = @transform_20, window_bounds = array<i64: 1, 64, 16>}, {pipeline_mode = #tpu.pipeline_mode<synchronous>, transform_indices = @transform_21, window_bounds = array<i64: 9, 16, 16>}, {pipeline_mode = #tpu.pipeline_mode<synchronous>, transform_indices = @transform_22, window_bounds = array<i64: 9, 16, 4>}, {pipeline_mode = #tpu.pipeline_mode<synchronous>, transform_indices = @transform_23, window_bounds = array<i64: 1, 16, 4>}, {pipeline_mode = #tpu.pipeline_mode<synchronous>, transform_indices = @transform_24, window_bounds = array<i64: 9, 4, 4>}, {pipeline_mode = #tpu.pipeline_mode<synchronous>, transform_indices = @transform_25, window_bounds = array<i64: 9, 4, 16>}, {pipeline_mode = #tpu.pipeline_mode<synchronous>, transform_indices = @transform_26, window_bounds = array<i64: 9, 16, 64>}, {pipeline_mode = #tpu.pipeline_mode<synchronous>, transform_indices = @transform_27, window_bounds = array<i64: 1, 64, 256>}, {transform_indices = @transform_28, window_bounds = array<i64: 1, 3, 256>}]} {
    %c0 = arith.constant 0 : index
    %c0_0 = arith.constant 0 : index
    %c0_1 = arith.constant 0 : index
    %0 = vector.load %arg1[%c0, %c0_0, %c0_1] : memref<1x3x256xf32, #tpu.memory_space<vmem>>, vector<1x3x256xf32>
    %1 = vector.shape_cast %0 : vector<1x3x256xf32> to vector<3x256xf32>
    %cst = arith.constant 0.000000e+00 : f32
    %2 = vector.broadcast %cst : f32 to vector<4x256xf32>
    %c51_i32 = arith.constant 51 : i32
    %3 = tpu.dynamic_rotate %1 by %c51_i32 dim 1 : vector<3x256xf32>, i32 -> vector<3x256xf32>
    %c0_2 = arith.constant 0 : index
    %c0_3 = arith.constant 0 : index
    %4 = vector.load %arg16[%c0_2, %c0_3] : memref<49x256xf32, #tpu.memory_space<vmem>>, vector<1x256xf32>
    %5 = vector.broadcast %4 : vector<1x256xf32> to vector<3x256xf32>
    %6 = arith.mulf %3, %5 : vector<3x256xf32>
    %c50_i32 = arith.constant 50 : i32
    %7 = tpu.dynamic_rotate %1 by %c50_i32 dim 1 : vector<3x256xf32>, i32 -> vector<3x256xf32>
    %c1 = arith.constant 1 : index
    %c0_4 = arith.constant 0 : index
    %8 = vector.load %arg16[%c1, %c0_4] : memref<49x256xf32, #tpu.memory_space<vmem>>, vector<1x256xf32>
    %9 = vector.broadcast %8 : vector<1x256xf32> to vector<3x256xf32>
    %10 = arith.mulf %7, %9 : vector<3x256xf32>
    %c49_i32 = arith.constant 49 : i32
    %11 = tpu.dynamic_rotate %1 by %c49_i32 dim 1 : vector<3x256xf32>, i32 -> vector<3x256xf32>
    %c2 = arith.constant 2 : index
    %c0_5 = arith.constant 0 : index
    %12 = vector.load %arg16[%c2, %c0_5] : memref<49x256xf32, #tpu.memory_space<vmem>>, vector<1x256xf32>
    %13 = vector.broadcast %12 : vector<1x256xf32> to vector<3x256xf32>
    %14 = arith.mulf %11, %13 : vector<3x256xf32>
    %c48_i32 = arith.constant 48 : i32
    %15 = tpu.dynamic_rotate %1 by %c48_i32 dim 1 : vector<3x256xf32>, i32 -> vector<3x256xf32>
    %c3 = arith.constant 3 : index
    %c0_6 = arith.constant 0 : index
    %16 = vector.load %arg16[%c3, %c0_6] : memref<49x256xf32, #tpu.memory_space<vmem>>, vector<1x256xf32>
    %17 = vector.broadcast %16 : vector<1x256xf32> to vector<3x256xf32>
    %18 = arith.mulf %15, %17 : vector<3x256xf32>
    %c47_i32 = arith.constant 47 : i32
    %19 = tpu.dynamic_rotate %1 by %c47_i32 dim 1 : vector<3x256xf32>, i32 -> vector<3x256xf32>
    %c4 = arith.constant 4 : index
    %c0_7 = arith.constant 0 : index
    %20 = vector.load %arg16[%c4, %c0_7] : memref<49x256xf32, #tpu.memory_space<vmem>>, vector<1x256xf32>
    %21 = vector.broadcast %20 : vector<1x256xf32> to vector<3x256xf32>
    %22 = arith.mulf %19, %21 : vector<3x256xf32>
    %c46_i32 = arith.constant 46 : i32
    %23 = tpu.dynamic_rotate %1 by %c46_i32 dim 1 : vector<3x256xf32>, i32 -> vector<3x256xf32>
    %c5 = arith.constant 5 : index
    %c0_8 = arith.constant 0 : index
    %24 = vector.load %arg16[%c5, %c0_8] : memref<49x256xf32, #tpu.memory_space<vmem>>, vector<1x256xf32>
    %25 = vector.broadcast %24 : vector<1x256xf32> to vector<3x256xf32>
    %26 = arith.mulf %23, %25 : vector<3x256xf32>
    %c45_i32 = arith.constant 45 : i32
    %27 = tpu.dynamic_rotate %1 by %c45_i32 dim 1 : vector<3x256xf32>, i32 -> vector<3x256xf32>
    %c6 = arith.constant 6 : index
    %c0_9 = arith.constant 0 : index
    %28 = vector.load %arg16[%c6, %c0_9] : memref<49x256xf32, #tpu.memory_space<vmem>>, vector<1x256xf32>
    %29 = vector.broadcast %28 : vector<1x256xf32> to vector<3x256xf32>
    %30 = arith.mulf %27, %29 : vector<3x256xf32>
    %31 = tpu.concatenate %6, %10, %14, %18, %22, %26, %30 in 0 : vector<3x256xf32>, vector<3x256xf32>, vector<3x256xf32>, vector<3x256xf32>, vector<3x256xf32>, vector<3x256xf32>, vector<3x256xf32> -> vector<21x256xf32>
    %32 = arith.truncf %31 : vector<21x256xf32> to vector<21x256xbf16>
    %c0_10 = arith.constant 0 : index
    %c0_11 = arith.constant 0 : index
    %33 = vector.load %arg2[%c0_10, %c0_11] : memref<4x147xbf16, #tpu.memory_space<vmem>>, vector<4x21xbf16>
    %cst_12 = arith.constant dense<0.000000e+00> : vector<4x256xf32>
    %34 = tpu.matmul %33, %32, %cst_12 {dimension_numbers = #tpu.dot_dimension_numbers<[1], [0], [0], [1], [0, 0, 1, 1], [], []>} : vector<4x21xbf16>, vector<21x256xbf16>, vector<4x256xf32> -> vector<4x256xf32>
    %35 = arith.addf %2, %34 : vector<4x256xf32>
    %c35_i32 = arith.constant 35 : i32
    %36 = tpu.dynamic_rotate %1 by %c35_i32 dim 1 : vector<3x256xf32>, i32 -> vector<3x256xf32>
    %c7 = arith.constant 7 : index
    %c0_13 = arith.constant 0 : index
    %37 = vector.load %arg16[%c7, %c0_13] : memref<49x256xf32, #tpu.memory_space<vmem>>, vector<1x256xf32>
    %38 = vector.broadcast %37 : vector<1x256xf32> to vector<3x256xf32>
    %39 = arith.mulf %36, %38 : vector<3x256xf32>
    %c34_i32 = arith.constant 34 : i32
    %40 = tpu.dynamic_rotate %1 by %c34_i32 dim 1 : vector<3x256xf32>, i32 -> vector<3x256xf32>
    %c8 = arith.constant 8 : index
    %c0_14 = arith.constant 0 : index
    %41 = vector.load %arg16[%c8, %c0_14] : memref<49x256xf32, #tpu.memory_space<vmem>>, vector<1x256xf32>
    %42 = vector.broadcast %41 : vector<1x256xf32> to vector<3x256xf32>
    %43 = arith.mulf %40, %42 : vector<3x256xf32>
    %c33_i32 = arith.constant 33 : i32
    %44 = tpu.dynamic_rotate %1 by %c33_i32 dim 1 : vector<3x256xf32>, i32 -> vector<3x256xf32>
    %c9 = arith.constant 9 : index
    %c0_15 = arith.constant 0 : index
    %45 = vector.load %arg16[%c9, %c0_15] : memref<49x256xf32, #tpu.memory_space<vmem>>, vector<1x256xf32>
    %46 = vector.broadcast %45 : vector<1x256xf32> to vector<3x256xf32>
    %47 = arith.mulf %44, %46 : vector<3x256xf32>
    %c32_i32 = arith.constant 32 : i32
    %48 = tpu.dynamic_rotate %1 by %c32_i32 dim 1 : vector<3x256xf32>, i32 -> vector<3x256xf32>
    %c10 = arith.constant 10 : index
    %c0_16 = arith.constant 0 : index
    %49 = vector.load %arg16[%c10, %c0_16] : memref<49x256xf32, #tpu.memory_space<vmem>>, vector<1x256xf32>
    %50 = vector.broadcast %49 : vector<1x256xf32> to vector<3x256xf32>
    %51 = arith.mulf %48, %50 : vector<3x256xf32>
    %c31_i32 = arith.constant 31 : i32
    %52 = tpu.dynamic_rotate %1 by %c31_i32 dim 1 : vector<3x256xf32>, i32 -> vector<3x256xf32>
    %c11 = arith.constant 11 : index
    %c0_17 = arith.constant 0 : index
    %53 = vector.load %arg16[%c11, %c0_17] : memref<49x256xf32, #tpu.memory_space<vmem>>, vector<1x256xf32>
    %54 = vector.broadcast %53 : vector<1x256xf32> to vector<3x256xf32>
    %55 = arith.mulf %52, %54 : vector<3x256xf32>
    %c30_i32 = arith.constant 30 : i32
    %56 = tpu.dynamic_rotate %1 by %c30_i32 dim 1 : vector<3x256xf32>, i32 -> vector<3x256xf32>
    %c12 = arith.constant 12 : index
    %c0_18 = arith.constant 0 : index
    %57 = vector.load %arg16[%c12, %c0_18] : memref<49x256xf32, #tpu.memory_space<vmem>>, vector<1x256xf32>
    %58 = vector.broadcast %57 : vector<1x256xf32> to vector<3x256xf32>
    %59 = arith.mulf %56, %58 : vector<3x256xf32>
    %c29_i32 = arith.constant 29 : i32
    %60 = tpu.dynamic_rotate %1 by %c29_i32 dim 1 : vector<3x256xf32>, i32 -> vector<3x256xf32>
    %c13 = arith.constant 13 : index
    %c0_19 = arith.constant 0 : index
    %61 = vector.load %arg16[%c13, %c0_19] : memref<49x256xf32, #tpu.memory_space<vmem>>, vector<1x256xf32>
    %62 = vector.broadcast %61 : vector<1x256xf32> to vector<3x256xf32>
    %63 = arith.mulf %60, %62 : vector<3x256xf32>
    %64 = tpu.concatenate %39, %43, %47, %51, %55, %59, %63 in 0 : vector<3x256xf32>, vector<3x256xf32>, vector<3x256xf32>, vector<3x256xf32>, vector<3x256xf32>, vector<3x256xf32>, vector<3x256xf32> -> vector<21x256xf32>
    %65 = arith.truncf %64 : vector<21x256xf32> to vector<21x256xbf16>
    %c0_20 = arith.constant 0 : index
    %c21 = arith.constant 21 : index
    %66 = vector.load %arg2[%c0_20, %c21] : memref<4x147xbf16, #tpu.memory_space<vmem>>, vector<4x21xbf16>
    %cst_21 = arith.constant dense<0.000000e+00> : vector<4x256xf32>
    %67 = tpu.matmul %66, %65, %cst_21 {dimension_numbers = #tpu.dot_dimension_numbers<[1], [0], [0], [1], [0, 0, 1, 1], [], []>} : vector<4x21xbf16>, vector<21x256xbf16>, vector<4x256xf32> -> vector<4x256xf32>
    %68 = arith.addf %35, %67 : vector<4x256xf32>
    %c19_i32 = arith.constant 19 : i32
    %69 = tpu.dynamic_rotate %1 by %c19_i32 dim 1 : vector<3x256xf32>, i32 -> vector<3x256xf32>
    %c14 = arith.constant 14 : index
    %c0_22 = arith.constant 0 : index
    %70 = vector.load %arg16[%c14, %c0_22] : memref<49x256xf32, #tpu.memory_space<vmem>>, vector<1x256xf32>
    %71 = vector.broadcast %70 : vector<1x256xf32> to vector<3x256xf32>
    %72 = arith.mulf %69, %71 : vector<3x256xf32>
    %c18_i32 = arith.constant 18 : i32
    %73 = tpu.dynamic_rotate %1 by %c18_i32 dim 1 : vector<3x256xf32>, i32 -> vector<3x256xf32>
    %c15 = arith.constant 15 : index
    %c0_23 = arith.constant 0 : index
    %74 = vector.load %arg16[%c15, %c0_23] : memref<49x256xf32, #tpu.memory_space<vmem>>, vector<1x256xf32>
    %75 = vector.broadcast %74 : vector<1x256xf32> to vector<3x256xf32>
    %76 = arith.mulf %73, %75 : vector<3x256xf32>
    %c17_i32 = arith.constant 17 : i32
    %77 = tpu.dynamic_rotate %1 by %c17_i32 dim 1 : vector<3x256xf32>, i32 -> vector<3x256xf32>
    %c16 = arith.constant 16 : index
    %c0_24 = arith.constant 0 : index
    %78 = vector.load %arg16[%c16, %c0_24] : memref<49x256xf32, #tpu.memory_space<vmem>>, vector<1x256xf32>
    %79 = vector.broadcast %78 : vector<1x256xf32> to vector<3x256xf32>
    %80 = arith.mulf %77, %79 : vector<3x256xf32>
    %c16_i32 = arith.constant 16 : i32
    %81 = tpu.dynamic_rotate %1 by %c16_i32 dim 1 : vector<3x256xf32>, i32 -> vector<3x256xf32>
    %c17 = arith.constant 17 : index
    %c0_25 = arith.constant 0 : index
    %82 = vector.load %arg16[%c17, %c0_25] : memref<49x256xf32, #tpu.memory_space<vmem>>, vector<1x256xf32>
    %83 = vector.broadcast %82 : vector<1x256xf32> to vector<3x256xf32>
    %84 = arith.mulf %81, %83 : vector<3x256xf32>
    %c15_i32 = arith.constant 15 : i32
    %85 = tpu.dynamic_rotate %1 by %c15_i32 dim 1 : vector<3x256xf32>, i32 -> vector<3x256xf32>
    %c18 = arith.constant 18 : index
    %c0_26 = arith.constant 0 : index
    %86 = vector.load %arg16[%c18, %c0_26] : memref<49x256xf32, #tpu.memory_space<vmem>>, vector<1x256xf32>
    %87 = vector.broadcast %86 : vector<1x256xf32> to vector<3x256xf32>
    %88 = arith.mulf %85, %87 : vector<3x256xf32>
    %c14_i32 = arith.constant 14 : i32
    %89 = tpu.dynamic_rotate %1 by %c14_i32 dim 1 : vector<3x256xf32>, i32 -> vector<3x256xf32>
    %c19 = arith.constant 19 : index
    %c0_27 = arith.constant 0 : index
    %90 = vector.load %arg16[%c19, %c0_27] : memref<49x256xf32, #tpu.memory_space<vmem>>, vector<1x256xf32>
    %91 = vector.broadcast %90 : vector<1x256xf32> to vector<3x256xf32>
    %92 = arith.mulf %89, %91 : vector<3x256xf32>
    %c13_i32 = arith.constant 13 : i32
    %93 = tpu.dynamic_rotate %1 by %c13_i32 dim 1 : vector<3x256xf32>, i32 -> vector<3x256xf32>
    %c20 = arith.constant 20 : index
    %c0_28 = arith.constant 0 : index
    %94 = vector.load %arg16[%c20, %c0_28] : memref<49x256xf32, #tpu.memory_space<vmem>>, vector<1x256xf32>
    %95 = vector.broadcast %94 : vector<1x256xf32> to vector<3x256xf32>
    %96 = arith.mulf %93, %95 : vector<3x256xf32>
    %97 = tpu.concatenate %72, %76, %80, %84, %88, %92, %96 in 0 : vector<3x256xf32>, vector<3x256xf32>, vector<3x256xf32>, vector<3x256xf32>, vector<3x256xf32>, vector<3x256xf32>, vector<3x256xf32> -> vector<21x256xf32>
    %98 = arith.truncf %97 : vector<21x256xf32> to vector<21x256xbf16>
    %c0_29 = arith.constant 0 : index
    %c42 = arith.constant 42 : index
    %99 = vector.load %arg2[%c0_29, %c42] : memref<4x147xbf16, #tpu.memory_space<vmem>>, vector<4x21xbf16>
    %cst_30 = arith.constant dense<0.000000e+00> : vector<4x256xf32>
    %100 = tpu.matmul %99, %98, %cst_30 {dimension_numbers = #tpu.dot_dimension_numbers<[1], [0], [0], [1], [0, 0, 1, 1], [], []>} : vector<4x21xbf16>, vector<21x256xbf16>, vector<4x256xf32> -> vector<4x256xf32>
    %101 = arith.addf %68, %100 : vector<4x256xf32>
    %c3_i32 = arith.constant 3 : i32
    %102 = tpu.dynamic_rotate %1 by %c3_i32 dim 1 : vector<3x256xf32>, i32 -> vector<3x256xf32>
    %c21_31 = arith.constant 21 : index
    %c0_32 = arith.constant 0 : index
    %103 = vector.load %arg16[%c21_31, %c0_32] : memref<49x256xf32, #tpu.memory_space<vmem>>, vector<1x256xf32>
    %104 = vector.broadcast %103 : vector<1x256xf32> to vector<3x256xf32>
    %105 = arith.mulf %102, %104 : vector<3x256xf32>
    %c2_i32 = arith.constant 2 : i32
    %106 = tpu.dynamic_rotate %1 by %c2_i32 dim 1 : vector<3x256xf32>, i32 -> vector<3x256xf32>
    %c22 = arith.constant 22 : index
    %c0_33 = arith.constant 0 : index
    %107 = vector.load %arg16[%c22, %c0_33] : memref<49x256xf32, #tpu.memory_space<vmem>>, vector<1x256xf32>
    %108 = vector.broadcast %107 : vector<1x256xf32> to vector<3x256xf32>
    %109 = arith.mulf %106, %108 : vector<3x256xf32>
    %c1_i32 = arith.constant 1 : i32
    %110 = tpu.dynamic_rotate %1 by %c1_i32 dim 1 : vector<3x256xf32>, i32 -> vector<3x256xf32>
    %c23 = arith.constant 23 : index
    %c0_34 = arith.constant 0 : index
    %111 = vector.load %arg16[%c23, %c0_34] : memref<49x256xf32, #tpu.memory_space<vmem>>, vector<1x256xf32>
    %112 = vector.broadcast %111 : vector<1x256xf32> to vector<3x256xf32>
    %113 = arith.mulf %110, %112 : vector<3x256xf32>
    %c255_i32 = arith.constant 255 : i32
    %114 = tpu.dynamic_rotate %1 by %c255_i32 dim 1 : vector<3x256xf32>, i32 -> vector<3x256xf32>
    %c25 = arith.constant 25 : index
    %c0_35 = arith.constant 0 : index
    %115 = vector.load %arg16[%c25, %c0_35] : memref<49x256xf32, #tpu.memory_space<vmem>>, vector<1x256xf32>
    %116 = vector.broadcast %115 : vector<1x256xf32> to vector<3x256xf32>
    %117 = arith.mulf %114, %116 : vector<3x256xf32>
    %c254_i32 = arith.constant 254 : i32
    %118 = tpu.dynamic_rotate %1 by %c254_i32 dim 1 : vector<3x256xf32>, i32 -> vector<3x256xf32>
    %c26 = arith.constant 26 : index
    %c0_36 = arith.constant 0 : index
    %119 = vector.load %arg16[%c26, %c0_36] : memref<49x256xf32, #tpu.memory_space<vmem>>, vector<1x256xf32>
    %120 = vector.broadcast %119 : vector<1x256xf32> to vector<3x256xf32>
    %121 = arith.mulf %118, %120 : vector<3x256xf32>
    %c253_i32 = arith.constant 253 : i32
    %122 = tpu.dynamic_rotate %1 by %c253_i32 dim 1 : vector<3x256xf32>, i32 -> vector<3x256xf32>
    %c27 = arith.constant 27 : index
    %c0_37 = arith.constant 0 : index
    %123 = vector.load %arg16[%c27, %c0_37] : memref<49x256xf32, #tpu.memory_space<vmem>>, vector<1x256xf32>
    %124 = vector.broadcast %123 : vector<1x256xf32> to vector<3x256xf32>
    %125 = arith.mulf %122, %124 : vector<3x256xf32>
    %126 = tpu.concatenate %105, %109, %113, %1, %117, %121, %125 in 0 : vector<3x256xf32>, vector<3x256xf32>, vector<3x256xf32>, vector<3x256xf32>, vector<3x256xf32>, vector<3x256xf32>, vector<3x256xf32> -> vector<21x256xf32>
    %127 = arith.truncf %126 : vector<21x256xf32> to vector<21x256xbf16>
    %c0_38 = arith.constant 0 : index
    %c63 = arith.constant 63 : index
    %128 = vector.load %arg2[%c0_38, %c63] : memref<4x147xbf16, #tpu.memory_space<vmem>>, vector<4x21xbf16>
    %cst_39 = arith.constant dense<0.000000e+00> : vector<4x256xf32>
    %129 = tpu.matmul %128, %127, %cst_39 {dimension_numbers = #tpu.dot_dimension_numbers<[1], [0], [0], [1], [0, 0, 1, 1], [], []>} : vector<4x21xbf16>, vector<21x256xbf16>, vector<4x256xf32> -> vector<4x256xf32>
    %130 = arith.addf %101, %129 : vector<4x256xf32>
    %c243_i32 = arith.constant 243 : i32
    %131 = tpu.dynamic_rotate %1 by %c243_i32 dim 1 : vector<3x256xf32>, i32 -> vector<3x256xf32>
    %c28 = arith.constant 28 : index
    %c0_40 = arith.constant 0 : index
    %132 = vector.load %arg16[%c28, %c0_40] : memref<49x256xf32, #tpu.memory_space<vmem>>, vector<1x256xf32>
    %133 = vector.broadcast %132 : vector<1x256xf32> to vector<3x256xf32>
    %134 = arith.mulf %131, %133 : vector<3x256xf32>
    %c242_i32 = arith.constant 242 : i32
    %135 = tpu.dynamic_rotate %1 by %c242_i32 dim 1 : vector<3x256xf32>, i32 -> vector<3x256xf32>
    %c29 = arith.constant 29 : index
    %c0_41 = arith.constant 0 : index
    %136 = vector.load %arg16[%c29, %c0_41] : memref<49x256xf32, #tpu.memory_space<vmem>>, vector<1x256xf32>
    %137 = vector.broadcast %136 : vector<1x256xf32> to vector<3x256xf32>
    %138 = arith.mulf %135, %137 : vector<3x256xf32>
    %c241_i32 = arith.constant 241 : i32
    %139 = tpu.dynamic_rotate %1 by %c241_i32 dim 1 : vector<3x256xf32>, i32 -> vector<3x256xf32>
    %c30 = arith.constant 30 : index
    %c0_42 = arith.constant 0 : index
    %140 = vector.load %arg16[%c30, %c0_42] : memref<49x256xf32, #tpu.memory_space<vmem>>, vector<1x256xf32>
    %141 = vector.broadcast %140 : vector<1x256xf32> to vector<3x256xf32>
    %142 = arith.mulf %139, %141 : vector<3x256xf32>
    %c240_i32 = arith.constant 240 : i32
    %143 = tpu.dynamic_rotate %1 by %c240_i32 dim 1 : vector<3x256xf32>, i32 -> vector<3x256xf32>
    %c31 = arith.constant 31 : index
    %c0_43 = arith.constant 0 : index
    %144 = vector.load %arg16[%c31, %c0_43] : memref<49x256xf32, #tpu.memory_space<vmem>>, vector<1x256xf32>
    %145 = vector.broadcast %144 : vector<1x256xf32> to vector<3x256xf32>
    %146 = arith.mulf %143, %145 : vector<3x256xf32>
    %c239_i32 = arith.constant 239 : i32
    %147 = tpu.dynamic_rotate %1 by %c239_i32 dim 1 : vector<3x256xf32>, i32 -> vector<3x256xf32>
    %c32 = arith.constant 32 : index
    %c0_44 = arith.constant 0 : index
    %148 = vector.load %arg16[%c32, %c0_44] : memref<49x256xf32, #tpu.memory_space<vmem>>, vector<1x256xf32>
    %149 = vector.broadcast %148 : vector<1x256xf32> to vector<3x256xf32>
    %150 = arith.mulf %147, %149 : vector<3x256xf32>
    %c238_i32 = arith.constant 238 : i32
    %151 = tpu.dynamic_rotate %1 by %c238_i32 dim 1 : vector<3x256xf32>, i32 -> vector<3x256xf32>
    %c33 = arith.constant 33 : index
    %c0_45 = arith.constant 0 : index
    %152 = vector.load %arg16[%c33, %c0_45] : memref<49x256xf32, #tpu.memory_space<vmem>>, vector<1x256xf32>
    %153 = vector.broadcast %152 : vector<1x256xf32> to vector<3x256xf32>
    %154 = arith.mulf %151, %153 : vector<3x256xf32>
    %c237_i32 = arith.constant 237 : i32
    %155 = tpu.dynamic_rotate %1 by %c237_i32 dim 1 : vector<3x256xf32>, i32 -> vector<3x256xf32>
    %c34 = arith.constant 34 : index
    %c0_46 = arith.constant 0 : index
    %156 = vector.load %arg16[%c34, %c0_46] : memref<49x256xf32, #tpu.memory_space<vmem>>, vector<1x256xf32>
    %157 = vector.broadcast %156 : vector<1x256xf32> to vector<3x256xf32>
    %158 = arith.mulf %155, %157 : vector<3x256xf32>
    %159 = tpu.concatenate %134, %138, %142, %146, %150, %154, %158 in 0 : vector<3x256xf32>, vector<3x256xf32>, vector<3x256xf32>, vector<3x256xf32>, vector<3x256xf32>, vector<3x256xf32>, vector<3x256xf32> -> vector<21x256xf32>
    %160 = arith.truncf %159 : vector<21x256xf32> to vector<21x256xbf16>
    %c0_47 = arith.constant 0 : index
    %c84 = arith.constant 84 : index
    %161 = vector.load %arg2[%c0_47, %c84] : memref<4x147xbf16, #tpu.memory_space<vmem>>, vector<4x21xbf16>
    %cst_48 = arith.constant dense<0.000000e+00> : vector<4x256xf32>
    %162 = tpu.matmul %161, %160, %cst_48 {dimension_numbers = #tpu.dot_dimension_numbers<[1], [0], [0], [1], [0, 0, 1, 1], [], []>} : vector<4x21xbf16>, vector<21x256xbf16>, vector<4x256xf32> -> vector<4x256xf32>
    %163 = arith.addf %130, %162 : vector<4x256xf32>
    %c227_i32 = arith.constant 227 : i32
    %164 = tpu.dynamic_rotate %1 by %c227_i32 dim 1 : vector<3x256xf32>, i32 -> vector<3x256xf32>
    %c35 = arith.constant 35 : index
    %c0_49 = arith.constant 0 : index
    %165 = vector.load %arg16[%c35, %c0_49] : memref<49x256xf32, #tpu.memory_space<vmem>>, vector<1x256xf32>
    %166 = vector.broadcast %165 : vector<1x256xf32> to vector<3x256xf32>
    %167 = arith.mulf %164, %166 : vector<3x256xf32>
    %c226_i32 = arith.constant 226 : i32
    %168 = tpu.dynamic_rotate %1 by %c226_i32 dim 1 : vector<3x256xf32>, i32 -> vector<3x256xf32>
    %c36 = arith.constant 36 : index
    %c0_50 = arith.constant 0 : index
    %169 = vector.load %arg16[%c36, %c0_50] : memref<49x256xf32, #tpu.memory_space<vmem>>, vector<1x256xf32>
    %170 = vector.broadcast %169 : vector<1x256xf32> to vector<3x256xf32>
    %171 = arith.mulf %168, %170 : vector<3x256xf32>
    %c225_i32 = arith.constant 225 : i32
    %172 = tpu.dynamic_rotate %1 by %c225_i32 dim 1 : vector<3x256xf32>, i32 -> vector<3x256xf32>
    %c37 = arith.constant 37 : index
    %c0_51 = arith.constant 0 : index
    %173 = vector.load %arg16[%c37, %c0_51] : memref<49x256xf32, #tpu.memory_space<vmem>>, vector<1x256xf32>
    %174 = vector.broadcast %173 : vector<1x256xf32> to vector<3x256xf32>
    %175 = arith.mulf %172, %174 : vector<3x256xf32>
    %c224_i32 = arith.constant 224 : i32
    %176 = tpu.dynamic_rotate %1 by %c224_i32 dim 1 : vector<3x256xf32>, i32 -> vector<3x256xf32>
    %c38 = arith.constant 38 : index
    %c0_52 = arith.constant 0 : index
    %177 = vector.load %arg16[%c38, %c0_52] : memref<49x256xf32, #tpu.memory_space<vmem>>, vector<1x256xf32>
    %178 = vector.broadcast %177 : vector<1x256xf32> to vector<3x256xf32>
    %179 = arith.mulf %176, %178 : vector<3x256xf32>
    %c223_i32 = arith.constant 223 : i32
    %180 = tpu.dynamic_rotate %1 by %c223_i32 dim 1 : vector<3x256xf32>, i32 -> vector<3x256xf32>
    %c39 = arith.constant 39 : index
    %c0_53 = arith.constant 0 : index
    %181 = vector.load %arg16[%c39, %c0_53] : memref<49x256xf32, #tpu.memory_space<vmem>>, vector<1x256xf32>
    %182 = vector.broadcast %181 : vector<1x256xf32> to vector<3x256xf32>
    %183 = arith.mulf %180, %182 : vector<3x256xf32>
    %c222_i32 = arith.constant 222 : i32
    %184 = tpu.dynamic_rotate %1 by %c222_i32 dim 1 : vector<3x256xf32>, i32 -> vector<3x256xf32>
    %c40 = arith.constant 40 : index
    %c0_54 = arith.constant 0 : index
    %185 = vector.load %arg16[%c40, %c0_54] : memref<49x256xf32, #tpu.memory_space<vmem>>, vector<1x256xf32>
    %186 = vector.broadcast %185 : vector<1x256xf32> to vector<3x256xf32>
    %187 = arith.mulf %184, %186 : vector<3x256xf32>
    %c221_i32 = arith.constant 221 : i32
    %188 = tpu.dynamic_rotate %1 by %c221_i32 dim 1 : vector<3x256xf32>, i32 -> vector<3x256xf32>
    %c41 = arith.constant 41 : index
    %c0_55 = arith.constant 0 : index
    %189 = vector.load %arg16[%c41, %c0_55] : memref<49x256xf32, #tpu.memory_space<vmem>>, vector<1x256xf32>
    %190 = vector.broadcast %189 : vector<1x256xf32> to vector<3x256xf32>
    %191 = arith.mulf %188, %190 : vector<3x256xf32>
    %192 = tpu.concatenate %167, %171, %175, %179, %183, %187, %191 in 0 : vector<3x256xf32>, vector<3x256xf32>, vector<3x256xf32>, vector<3x256xf32>, vector<3x256xf32>, vector<3x256xf32>, vector<3x256xf32> -> vector<21x256xf32>
    %193 = arith.truncf %192 : vector<21x256xf32> to vector<21x256xbf16>
    %c0_56 = arith.constant 0 : index
    %c105 = arith.constant 105 : index
    %194 = vector.load %arg2[%c0_56, %c105] : memref<4x147xbf16, #tpu.memory_space<vmem>>, vector<4x21xbf16>
    %cst_57 = arith.constant dense<0.000000e+00> : vector<4x256xf32>
    %195 = tpu.matmul %194, %193, %cst_57 {dimension_numbers = #tpu.dot_dimension_numbers<[1], [0], [0], [1], [0, 0, 1, 1], [], []>} : vector<4x21xbf16>, vector<21x256xbf16>, vector<4x256xf32> -> vector<4x256xf32>
    %196 = arith.addf %163, %195 : vector<4x256xf32>
    %c211_i32 = arith.constant 211 : i32
    %197 = tpu.dynamic_rotate %1 by %c211_i32 dim 1 : vector<3x256xf32>, i32 -> vector<3x256xf32>
    %c42_58 = arith.constant 42 : index
    %c0_59 = arith.constant 0 : index
    %198 = vector.load %arg16[%c42_58, %c0_59] : memref<49x256xf32, #tpu.memory_space<vmem>>, vector<1x256xf32>
    %199 = vector.broadcast %198 : vector<1x256xf32> to vector<3x256xf32>
    %200 = arith.mulf %197, %199 : vector<3x256xf32>
    %c210_i32 = arith.constant 210 : i32
    %201 = tpu.dynamic_rotate %1 by %c210_i32 dim 1 : vector<3x256xf32>, i32 -> vector<3x256xf32>
    %c43 = arith.constant 43 : index
    %c0_60 = arith.constant 0 : index
    %202 = vector.load %arg16[%c43, %c0_60] : memref<49x256xf32, #tpu.memory_space<vmem>>, vector<1x256xf32>
    %203 = vector.broadcast %202 : vector<1x256xf32> to vector<3x256xf32>
    %204 = arith.mulf %201, %203 : vector<3x256xf32>
    %c209_i32 = arith.constant 209 : i32
    %205 = tpu.dynamic_rotate %1 by %c209_i32 dim 1 : vector<3x256xf32>, i32 -> vector<3x256xf32>
    %c44 = arith.constant 44 : index
    %c0_61 = arith.constant 0 : index
    %206 = vector.load %arg16[%c44, %c0_61] : memref<49x256xf32, #tpu.memory_space<vmem>>, vector<1x256xf32>
    %207 = vector.broadcast %206 : vector<1x256xf32> to vector<3x256xf32>
    %208 = arith.mulf %205, %207 : vector<3x256xf32>
    %c208_i32 = arith.constant 208 : i32
    %209 = tpu.dynamic_rotate %1 by %c208_i32 dim 1 : vector<3x256xf32>, i32 -> vector<3x256xf32>
    %c45 = arith.constant 45 : index
    %c0_62 = arith.constant 0 : index
    %210 = vector.load %arg16[%c45, %c0_62] : memref<49x256xf32, #tpu.memory_space<vmem>>, vector<1x256xf32>
    %211 = vector.broadcast %210 : vector<1x256xf32> to vector<3x256xf32>
    %212 = arith.mulf %209, %211 : vector<3x256xf32>
    %c207_i32 = arith.constant 207 : i32
    %213 = tpu.dynamic_rotate %1 by %c207_i32 dim 1 : vector<3x256xf32>, i32 -> vector<3x256xf32>
    %c46 = arith.constant 46 : index
    %c0_63 = arith.constant 0 : index
    %214 = vector.load %arg16[%c46, %c0_63] : memref<49x256xf32, #tpu.memory_space<vmem>>, vector<1x256xf32>
    %215 = vector.broadcast %214 : vector<1x256xf32> to vector<3x256xf32>
    %216 = arith.mulf %213, %215 : vector<3x256xf32>
    %c206_i32 = arith.constant 206 : i32
    %217 = tpu.dynamic_rotate %1 by %c206_i32 dim 1 : vector<3x256xf32>, i32 -> vector<3x256xf32>
    %c47 = arith.constant 47 : index
    %c0_64 = arith.constant 0 : index
    %218 = vector.load %arg16[%c47, %c0_64] : memref<49x256xf32, #tpu.memory_space<vmem>>, vector<1x256xf32>
    %219 = vector.broadcast %218 : vector<1x256xf32> to vector<3x256xf32>
    %220 = arith.mulf %217, %219 : vector<3x256xf32>
    %c205_i32 = arith.constant 205 : i32
    %221 = tpu.dynamic_rotate %1 by %c205_i32 dim 1 : vector<3x256xf32>, i32 -> vector<3x256xf32>
    %c48 = arith.constant 48 : index
    %c0_65 = arith.constant 0 : index
    %222 = vector.load %arg16[%c48, %c0_65] : memref<49x256xf32, #tpu.memory_space<vmem>>, vector<1x256xf32>
    %223 = vector.broadcast %222 : vector<1x256xf32> to vector<3x256xf32>
    %224 = arith.mulf %221, %223 : vector<3x256xf32>
    %225 = tpu.concatenate %200, %204, %208, %212, %216, %220, %224 in 0 : vector<3x256xf32>, vector<3x256xf32>, vector<3x256xf32>, vector<3x256xf32>, vector<3x256xf32>, vector<3x256xf32>, vector<3x256xf32> -> vector<21x256xf32>
    %226 = arith.truncf %225 : vector<21x256xf32> to vector<21x256xbf16>
    %c0_66 = arith.constant 0 : index
    %c126 = arith.constant 126 : index
    %227 = vector.load %arg2[%c0_66, %c126] : memref<4x147xbf16, #tpu.memory_space<vmem>>, vector<4x21xbf16>
    %cst_67 = arith.constant dense<0.000000e+00> : vector<4x256xf32>
    %228 = tpu.matmul %227, %226, %cst_67 {dimension_numbers = #tpu.dot_dimension_numbers<[1], [0], [0], [1], [0, 0, 1, 1], [], []>} : vector<4x21xbf16>, vector<21x256xbf16>, vector<4x256xf32> -> vector<4x256xf32>
    %229 = arith.addf %196, %228 : vector<4x256xf32>
    %cst_68 = arith.constant dense<0.000000e+00> : vector<4xf32>
    %230 = vector.multi_reduction <add>, %229, %cst_68 [1] : vector<4x256xf32> to vector<4xf32>
    %231 = vector.shape_cast %230 : vector<4xf32> to vector<4x1xf32>
    %cst_69 = arith.constant 3.906250e-03 : f32
    %232 = vector.broadcast %cst_69 : f32 to vector<4x1xf32>
    %233 = arith.mulf %231, %232 : vector<4x1xf32>
    %234 = arith.mulf %229, %229 : vector<4x256xf32>
    %cst_70 = arith.constant dense<0.000000e+00> : vector<4xf32>
    %235 = vector.multi_reduction <add>, %234, %cst_70 [1] : vector<4x256xf32> to vector<4xf32>
    %236 = vector.shape_cast %235 : vector<4xf32> to vector<4x1xf32>
    %cst_71 = arith.constant 3.906250e-03 : f32
    %237 = vector.broadcast %cst_71 : f32 to vector<4x1xf32>
    %238 = arith.mulf %236, %237 : vector<4x1xf32>
    %239 = arith.mulf %233, %233 : vector<4x1xf32>
    %240 = arith.subf %238, %239 : vector<4x1xf32>
    %241 = vector.broadcast %233 : vector<4x1xf32> to vector<4x256xf32>
    %242 = arith.subf %229, %241 : vector<4x256xf32>
    %cst_72 = arith.constant 0.000000e+00 : f32
    %243 = vector.broadcast %cst_72 : f32 to vector<4x1xf32>
    %244 = arith.maximumf %240, %243 : vector<4x1xf32>
    %cst_73 = arith.constant 9.99999974E-6 : f32
    %245 = vector.broadcast %cst_73 : f32 to vector<4x1xf32>
    %246 = arith.addf %244, %245 : vector<4x1xf32>
    %247 = math.rsqrt %246 : vector<4x1xf32>
    %248 = vector.broadcast %247 : vector<4x1xf32> to vector<4x256xf32>
    %249 = arith.mulf %242, %248 : vector<4x256xf32>
    %cst_74 = arith.constant 0.000000e+00 : f32
    %250 = vector.broadcast %cst_74 : f32 to vector<4x256xf32>
    %251 = arith.maximumf %249, %250 : vector<4x256xf32>
    %cst_75 = arith.constant 0.000000e+00 : f32
    %252 = vector.broadcast %cst_75 : f32 to vector<8x256xf32>
    %c17_i32_76 = arith.constant 17 : i32
    %253 = tpu.dynamic_rotate %251 by %c17_i32_76 dim 1 : vector<4x256xf32>, i32 -> vector<4x256xf32>
    %c0_77 = arith.constant 0 : index
    %c0_78 = arith.constant 0 : index
    %254 = vector.load %arg17[%c0_77, %c0_78] : memref<9x256xf32, #tpu.memory_space<vmem>>, vector<1x256xf32>
    %255 = vector.broadcast %254 : vector<1x256xf32> to vector<4x256xf32>
    %256 = arith.mulf %253, %255 : vector<4x256xf32>
    %c16_i32_79 = arith.constant 16 : i32
    %257 = tpu.dynamic_rotate %251 by %c16_i32_79 dim 1 : vector<4x256xf32>, i32 -> vector<4x256xf32>
    %c1_80 = arith.constant 1 : index
    %c0_81 = arith.constant 0 : index
    %258 = vector.load %arg17[%c1_80, %c0_81] : memref<9x256xf32, #tpu.memory_space<vmem>>, vector<1x256xf32>
    %259 = vector.broadcast %258 : vector<1x256xf32> to vector<4x256xf32>
    %260 = arith.mulf %257, %259 : vector<4x256xf32>
    %c15_i32_82 = arith.constant 15 : i32
    %261 = tpu.dynamic_rotate %251 by %c15_i32_82 dim 1 : vector<4x256xf32>, i32 -> vector<4x256xf32>
    %c2_83 = arith.constant 2 : index
    %c0_84 = arith.constant 0 : index
    %262 = vector.load %arg17[%c2_83, %c0_84] : memref<9x256xf32, #tpu.memory_space<vmem>>, vector<1x256xf32>
    %263 = vector.broadcast %262 : vector<1x256xf32> to vector<4x256xf32>
    %264 = arith.mulf %261, %263 : vector<4x256xf32>
    %c1_i32_85 = arith.constant 1 : i32
    %265 = tpu.dynamic_rotate %251 by %c1_i32_85 dim 1 : vector<4x256xf32>, i32 -> vector<4x256xf32>
    %c3_86 = arith.constant 3 : index
    %c0_87 = arith.constant 0 : index
    %266 = vector.load %arg17[%c3_86, %c0_87] : memref<9x256xf32, #tpu.memory_space<vmem>>, vector<1x256xf32>
    %267 = vector.broadcast %266 : vector<1x256xf32> to vector<4x256xf32>
    %268 = arith.mulf %265, %267 : vector<4x256xf32>
    %c255_i32_88 = arith.constant 255 : i32
    %269 = tpu.dynamic_rotate %251 by %c255_i32_88 dim 1 : vector<4x256xf32>, i32 -> vector<4x256xf32>
    %c5_89 = arith.constant 5 : index
    %c0_90 = arith.constant 0 : index
    %270 = vector.load %arg17[%c5_89, %c0_90] : memref<9x256xf32, #tpu.memory_space<vmem>>, vector<1x256xf32>
    %271 = vector.broadcast %270 : vector<1x256xf32> to vector<4x256xf32>
    %272 = arith.mulf %269, %271 : vector<4x256xf32>
    %c241_i32_91 = arith.constant 241 : i32
    %273 = tpu.dynamic_rotate %251 by %c241_i32_91 dim 1 : vector<4x256xf32>, i32 -> vector<4x256xf32>
    %c6_92 = arith.constant 6 : index
    %c0_93 = arith.constant 0 : index
    %274 = vector.load %arg17[%c6_92, %c0_93] : memref<9x256xf32, #tpu.memory_space<vmem>>, vector<1x256xf32>
    %275 = vector.broadcast %274 : vector<1x256xf32> to vector<4x256xf32>
    %276 = arith.mulf %273, %275 : vector<4x256xf32>
    %c240_i32_94 = arith.constant 240 : i32
    %277 = tpu.dynamic_rotate %251 by %c240_i32_94 dim 1 : vector<4x256xf32>, i32 -> vector<4x256xf32>
    %c7_95 = arith.constant 7 : index
    %c0_96 = arith.constant 0 : index
    %278 = vector.load %arg17[%c7_95, %c0_96] : memref<9x256xf32, #tpu.memory_space<vmem>>, vector<1x256xf32>
    %279 = vector.broadcast %278 : vector<1x256xf32> to vector<4x256xf32>
    %280 = arith.mulf %277, %279 : vector<4x256xf32>
    %c239_i32_97 = arith.constant 239 : i32
    %281 = tpu.dynamic_rotate %251 by %c239_i32_97 dim 1 : vector<4x256xf32>, i32 -> vector<4x256xf32>
    %c8_98 = arith.constant 8 : index
    %c0_99 = arith.constant 0 : index
    %282 = vector.load %arg17[%c8_98, %c0_99] : memref<9x256xf32, #tpu.memory_space<vmem>>, vector<1x256xf32>
    %283 = vector.broadcast %282 : vector<1x256xf32> to vector<4x256xf32>
    %284 = arith.mulf %281, %283 : vector<4x256xf32>
    %285 = tpu.concatenate %256, %260, %264, %268, %251, %272, %276, %280, %284 in 0 : vector<4x256xf32>, vector<4x256xf32>, vector<4x256xf32>, vector<4x256xf32>, vector<4x256xf32>, vector<4x256xf32>, vector<4x256xf32>, vector<4x256xf32>, vector<4x256xf32> -> vector<36x256xf32>
    %286 = arith.truncf %285 : vector<36x256xf32> to vector<36x256xbf16>
    %c0_100 = arith.constant 0 : index
    %c0_101 = arith.constant 0 : index
    %287 = vector.load %arg3[%c0_100, %c0_101] : memref<8x36xbf16, #tpu.memory_space<vmem>>, vector<8x36xbf16>
    %cst_102 = arith.constant dense<0.000000e+00> : vector<8x256xf32>
    %288 = tpu.matmul %287, %286, %cst_102 {dimension_numbers = #tpu.dot_dimension_numbers<[1], [0], [0], [1], [0, 0, 1, 1], [], []>} : vector<8x36xbf16>, vector<36x256xbf16>, vector<8x256xf32> -> vector<8x256xf32>
    %289 = arith.addf %252, %288 : vector<8x256xf32>
    %c0_103 = arith.constant 0 : index
    %c0_104 = arith.constant 0 : index
    %c0_105 = arith.constant 0 : index
    %290 = vector.load %arg18[%c0_103, %c0_104, %c0_105] : memref<1x256x64xbf16, #tpu.memory_space<vmem>>, vector<1x256x64xbf16>
    %291 = vector.shape_cast %290 : vector<1x256x64xbf16> to vector<256x64xbf16>
    %292 = arith.truncf %289 : vector<8x256xf32> to vector<8x256xbf16>
    %cst_106 = arith.constant dense<0.000000e+00> : vector<8x64xf32>
    %293 = tpu.matmul %292, %291, %cst_106 {dimension_numbers = #tpu.dot_dimension_numbers<[1], [0], [0], [1], [0, 0, 1, 1], [], []>} : vector<8x256xbf16>, vector<256x64xbf16>, vector<8x64xf32> -> vector<8x64xf32>
    %cst_107 = arith.constant dense<0.000000e+00> : vector<8xf32>
    %294 = vector.multi_reduction <add>, %293, %cst_107 [1] : vector<8x64xf32> to vector<8xf32>
    %295 = vector.shape_cast %294 : vector<8xf32> to vector<8x1xf32>
    %cst_108 = arith.constant 1.562500e-02 : f32
    %296 = vector.broadcast %cst_108 : f32 to vector<8x1xf32>
    %297 = arith.mulf %295, %296 : vector<8x1xf32>
    %298 = arith.mulf %293, %293 : vector<8x64xf32>
    %cst_109 = arith.constant dense<0.000000e+00> : vector<8xf32>
    %299 = vector.multi_reduction <add>, %298, %cst_109 [1] : vector<8x64xf32> to vector<8xf32>
    %300 = vector.shape_cast %299 : vector<8xf32> to vector<8x1xf32>
    %cst_110 = arith.constant 1.562500e-02 : f32
    %301 = vector.broadcast %cst_110 : f32 to vector<8x1xf32>
    %302 = arith.mulf %300, %301 : vector<8x1xf32>
    %303 = arith.mulf %297, %297 : vector<8x1xf32>
    %304 = arith.subf %302, %303 : vector<8x1xf32>
    %305 = vector.broadcast %297 : vector<8x1xf32> to vector<8x64xf32>
    %306 = arith.subf %293, %305 : vector<8x64xf32>
    %cst_111 = arith.constant 0.000000e+00 : f32
    %307 = vector.broadcast %cst_111 : f32 to vector<8x1xf32>
    %308 = arith.maximumf %304, %307 : vector<8x1xf32>
    %cst_112 = arith.constant 9.99999974E-6 : f32
    %309 = vector.broadcast %cst_112 : f32 to vector<8x1xf32>
    %310 = arith.addf %308, %309 : vector<8x1xf32>
    %311 = math.rsqrt %310 : vector<8x1xf32>
    %312 = vector.broadcast %311 : vector<8x1xf32> to vector<8x64xf32>
    %313 = arith.mulf %306, %312 : vector<8x64xf32>
    %cst_113 = arith.constant 0.000000e+00 : f32
    %314 = vector.broadcast %cst_113 : f32 to vector<8x64xf32>
    %315 = arith.maximumf %313, %314 : vector<8x64xf32>
    %316 = arith.truncf %315 : vector<8x64xf32> to vector<8x64xbf16>
    %c0_114 = arith.constant 0 : index
    %c0_115 = arith.constant 0 : index
    %c0_116 = arith.constant 0 : index
    %317 = vector.load %arg19[%c0_114, %c0_115, %c0_116] : memref<9x64x64xbf16, #tpu.memory_space<vmem>>, vector<1x64x64xbf16>
    %318 = vector.shape_cast %317 : vector<1x64x64xbf16> to vector<64x64xbf16>
    %cst_117 = arith.constant dense<0.000000e+00> : vector<8x64xf32>
    %319 = tpu.matmul %316, %318, %cst_117 {dimension_numbers = #tpu.dot_dimension_numbers<[1], [0], [0], [1], [0, 0, 1, 1], [], []>} : vector<8x64xbf16>, vector<64x64xbf16>, vector<8x64xf32> -> vector<8x64xf32>
    %c1_118 = arith.constant 1 : index
    %c0_119 = arith.constant 0 : index
    %c0_120 = arith.constant 0 : index
    %320 = vector.load %arg19[%c1_118, %c0_119, %c0_120] : memref<9x64x64xbf16, #tpu.memory_space<vmem>>, vector<1x64x64xbf16>
    %321 = vector.shape_cast %320 : vector<1x64x64xbf16> to vector<64x64xbf16>
    %cst_121 = arith.constant dense<0.000000e+00> : vector<8x64xf32>
    %322 = tpu.matmul %316, %321, %cst_121 {dimension_numbers = #tpu.dot_dimension_numbers<[1], [0], [0], [1], [0, 0, 1, 1], [], []>} : vector<8x64xbf16>, vector<64x64xbf16>, vector<8x64xf32> -> vector<8x64xf32>
    %c2_122 = arith.constant 2 : index
    %c0_123 = arith.constant 0 : index
    %c0_124 = arith.constant 0 : index
    %323 = vector.load %arg19[%c2_122, %c0_123, %c0_124] : memref<9x64x64xbf16, #tpu.memory_space<vmem>>, vector<1x64x64xbf16>
    %324 = vector.shape_cast %323 : vector<1x64x64xbf16> to vector<64x64xbf16>
    %cst_125 = arith.constant dense<0.000000e+00> : vector<8x64xf32>
    %325 = tpu.matmul %316, %324, %cst_125 {dimension_numbers = #tpu.dot_dimension_numbers<[1], [0], [0], [1], [0, 0, 1, 1], [], []>} : vector<8x64xbf16>, vector<64x64xbf16>, vector<8x64xf32> -> vector<8x64xf32>
    %c3_126 = arith.constant 3 : index
    %c0_127 = arith.constant 0 : index
    %c0_128 = arith.constant 0 : index
    %326 = vector.load %arg19[%c3_126, %c0_127, %c0_128] : memref<9x64x64xbf16, #tpu.memory_space<vmem>>, vector<1x64x64xbf16>
    %327 = vector.shape_cast %326 : vector<1x64x64xbf16> to vector<64x64xbf16>
    %cst_129 = arith.constant dense<0.000000e+00> : vector<8x64xf32>
    %328 = tpu.matmul %316, %327, %cst_129 {dimension_numbers = #tpu.dot_dimension_numbers<[1], [0], [0], [1], [0, 0, 1, 1], [], []>} : vector<8x64xbf16>, vector<64x64xbf16>, vector<8x64xf32> -> vector<8x64xf32>
    %c4_130 = arith.constant 4 : index
    %c0_131 = arith.constant 0 : index
    %c0_132 = arith.constant 0 : index
    %329 = vector.load %arg19[%c4_130, %c0_131, %c0_132] : memref<9x64x64xbf16, #tpu.memory_space<vmem>>, vector<1x64x64xbf16>
    %330 = vector.shape_cast %329 : vector<1x64x64xbf16> to vector<64x64xbf16>
    %cst_133 = arith.constant dense<0.000000e+00> : vector<8x64xf32>
    %331 = tpu.matmul %316, %330, %cst_133 {dimension_numbers = #tpu.dot_dimension_numbers<[1], [0], [0], [1], [0, 0, 1, 1], [], []>} : vector<8x64xbf16>, vector<64x64xbf16>, vector<8x64xf32> -> vector<8x64xf32>
    %c5_134 = arith.constant 5 : index
    %c0_135 = arith.constant 0 : index
    %c0_136 = arith.constant 0 : index
    %332 = vector.load %arg19[%c5_134, %c0_135, %c0_136] : memref<9x64x64xbf16, #tpu.memory_space<vmem>>, vector<1x64x64xbf16>
    %333 = vector.shape_cast %332 : vector<1x64x64xbf16> to vector<64x64xbf16>
    %cst_137 = arith.constant dense<0.000000e+00> : vector<8x64xf32>
    %334 = tpu.matmul %316, %333, %cst_137 {dimension_numbers = #tpu.dot_dimension_numbers<[1], [0], [0], [1], [0, 0, 1, 1], [], []>} : vector<8x64xbf16>, vector<64x64xbf16>, vector<8x64xf32> -> vector<8x64xf32>
    %c6_138 = arith.constant 6 : index
    %c0_139 = arith.constant 0 : index
    %c0_140 = arith.constant 0 : index
    %335 = vector.load %arg19[%c6_138, %c0_139, %c0_140] : memref<9x64x64xbf16, #tpu.memory_space<vmem>>, vector<1x64x64xbf16>
    %336 = vector.shape_cast %335 : vector<1x64x64xbf16> to vector<64x64xbf16>
    %cst_141 = arith.constant dense<0.000000e+00> : vector<8x64xf32>
    %337 = tpu.matmul %316, %336, %cst_141 {dimension_numbers = #tpu.dot_dimension_numbers<[1], [0], [0], [1], [0, 0, 1, 1], [], []>} : vector<8x64xbf16>, vector<64x64xbf16>, vector<8x64xf32> -> vector<8x64xf32>
    %c7_142 = arith.constant 7 : index
    %c0_143 = arith.constant 0 : index
    %c0_144 = arith.constant 0 : index
    %338 = vector.load %arg19[%c7_142, %c0_143, %c0_144] : memref<9x64x64xbf16, #tpu.memory_space<vmem>>, vector<1x64x64xbf16>
    %339 = vector.shape_cast %338 : vector<1x64x64xbf16> to vector<64x64xbf16>
    %cst_145 = arith.constant dense<0.000000e+00> : vector<8x64xf32>
    %340 = tpu.matmul %316, %339, %cst_145 {dimension_numbers = #tpu.dot_dimension_numbers<[1], [0], [0], [1], [0, 0, 1, 1], [], []>} : vector<8x64xbf16>, vector<64x64xbf16>, vector<8x64xf32> -> vector<8x64xf32>
    %c8_146 = arith.constant 8 : index
    %c0_147 = arith.constant 0 : index
    %c0_148 = arith.constant 0 : index
    %341 = vector.load %arg19[%c8_146, %c0_147, %c0_148] : memref<9x64x64xbf16, #tpu.memory_space<vmem>>, vector<1x64x64xbf16>
    %342 = vector.shape_cast %341 : vector<1x64x64xbf16> to vector<64x64xbf16>
    %cst_149 = arith.constant dense<0.000000e+00> : vector<8x64xf32>
    %343 = tpu.matmul %316, %342, %cst_149 {dimension_numbers = #tpu.dot_dimension_numbers<[1], [0], [0], [1], [0, 0, 1, 1], [], []>} : vector<8x64xbf16>, vector<64x64xbf16>, vector<8x64xf32> -> vector<8x64xf32>
    %344 = tpu.concatenate %319, %322, %325, %328, %331, %334, %337, %340, %343 in 0 : vector<8x64xf32>, vector<8x64xf32>, vector<8x64xf32>, vector<8x64xf32>, vector<8x64xf32>, vector<8x64xf32>, vector<8x64xf32>, vector<8x64xf32>, vector<8x64xf32> -> vector<72x64xf32>
    %345 = arith.truncf %344 : vector<72x64xf32> to vector<72x64xbf16>
    %c0_150 = arith.constant 0 : index
    %c0_151 = arith.constant 0 : index
    %346 = vector.load %arg4[%c0_150, %c0_151] : memref<8x72xbf16, #tpu.memory_space<vmem>>, vector<8x72xbf16>
    %cst_152 = arith.constant dense<0.000000e+00> : vector<8x64xf32>
    %347 = tpu.matmul %346, %345, %cst_152 {dimension_numbers = #tpu.dot_dimension_numbers<[1], [0], [0], [1], [0, 0, 1, 1], [], []>} : vector<8x72xbf16>, vector<72x64xbf16>, vector<8x64xf32> -> vector<8x64xf32>
    %cst_153 = arith.constant dense<0.000000e+00> : vector<8xf32>
    %348 = vector.multi_reduction <add>, %347, %cst_153 [1] : vector<8x64xf32> to vector<8xf32>
    %349 = vector.shape_cast %348 : vector<8xf32> to vector<8x1xf32>
    %cst_154 = arith.constant 1.562500e-02 : f32
    %350 = vector.broadcast %cst_154 : f32 to vector<8x1xf32>
    %351 = arith.mulf %349, %350 : vector<8x1xf32>
    %352 = arith.mulf %347, %347 : vector<8x64xf32>
    %cst_155 = arith.constant dense<0.000000e+00> : vector<8xf32>
    %353 = vector.multi_reduction <add>, %352, %cst_155 [1] : vector<8x64xf32> to vector<8xf32>
    %354 = vector.shape_cast %353 : vector<8xf32> to vector<8x1xf32>
    %cst_156 = arith.constant 1.562500e-02 : f32
    %355 = vector.broadcast %cst_156 : f32 to vector<8x1xf32>
    %356 = arith.mulf %354, %355 : vector<8x1xf32>
    %357 = arith.mulf %351, %351 : vector<8x1xf32>
    %358 = arith.subf %356, %357 : vector<8x1xf32>
    %359 = vector.broadcast %351 : vector<8x1xf32> to vector<8x64xf32>
    %360 = arith.subf %347, %359 : vector<8x64xf32>
    %cst_157 = arith.constant 0.000000e+00 : f32
    %361 = vector.broadcast %cst_157 : f32 to vector<8x1xf32>
    %362 = arith.maximumf %358, %361 : vector<8x1xf32>
    %cst_158 = arith.constant 9.99999974E-6 : f32
    %363 = vector.broadcast %cst_158 : f32 to vector<8x1xf32>
    %364 = arith.addf %362, %363 : vector<8x1xf32>
    %365 = math.rsqrt %364 : vector<8x1xf32>
    %366 = vector.broadcast %365 : vector<8x1xf32> to vector<8x64xf32>
    %367 = arith.mulf %360, %366 : vector<8x64xf32>
    %368 = arith.truncf %251 : vector<4x256xf32> to vector<4x256xbf16>
    %c0_159 = arith.constant 0 : index
    %c0_160 = arith.constant 0 : index
    %c0_161 = arith.constant 0 : index
    %369 = vector.load %arg18[%c0_159, %c0_160, %c0_161] : memref<1x256x64xbf16, #tpu.memory_space<vmem>>, vector<1x256x64xbf16>
    %370 = vector.shape_cast %369 : vector<1x256x64xbf16> to vector<256x64xbf16>
    %cst_162 = arith.constant dense<0.000000e+00> : vector<4x64xf32>
    %371 = tpu.matmul %368, %370, %cst_162 {dimension_numbers = #tpu.dot_dimension_numbers<[1], [0], [0], [1], [0, 0, 1, 1], [], []>} : vector<4x256xbf16>, vector<256x64xbf16>, vector<4x64xf32> -> vector<4x64xf32>
    %372 = arith.truncf %371 : vector<4x64xf32> to vector<4x64xbf16>
    %c0_163 = arith.constant 0 : index
    %c0_164 = arith.constant 0 : index
    %373 = vector.load %arg5[%c0_163, %c0_164] : memref<8x4xbf16, #tpu.memory_space<vmem>>, vector<8x4xbf16>
    %cst_165 = arith.constant dense<0.000000e+00> : vector<8x64xf32>
    %374 = tpu.matmul %373, %372, %cst_165 {dimension_numbers = #tpu.dot_dimension_numbers<[1], [0], [0], [1], [0, 0, 1, 1], [], []>} : vector<8x4xbf16>, vector<4x64xbf16>, vector<8x64xf32> -> vector<8x64xf32>
    %cst_166 = arith.constant dense<0.000000e+00> : vector<8xf32>
    %375 = vector.multi_reduction <add>, %374, %cst_166 [1] : vector<8x64xf32> to vector<8xf32>
    %376 = vector.shape_cast %375 : vector<8xf32> to vector<8x1xf32>
    %cst_167 = arith.constant 1.562500e-02 : f32
    %377 = vector.broadcast %cst_167 : f32 to vector<8x1xf32>
    %378 = arith.mulf %376, %377 : vector<8x1xf32>
    %379 = arith.mulf %374, %374 : vector<8x64xf32>
    %cst_168 = arith.constant dense<0.000000e+00> : vector<8xf32>
    %380 = vector.multi_reduction <add>, %379, %cst_168 [1] : vector<8x64xf32> to vector<8xf32>
    %381 = vector.shape_cast %380 : vector<8xf32> to vector<8x1xf32>
    %cst_169 = arith.constant 1.562500e-02 : f32
    %382 = vector.broadcast %cst_169 : f32 to vector<8x1xf32>
    %383 = arith.mulf %381, %382 : vector<8x1xf32>
    %384 = arith.mulf %378, %378 : vector<8x1xf32>
    %385 = arith.subf %383, %384 : vector<8x1xf32>
    %386 = vector.broadcast %378 : vector<8x1xf32> to vector<8x64xf32>
    %387 = arith.subf %374, %386 : vector<8x64xf32>
    %cst_170 = arith.constant 0.000000e+00 : f32
    %388 = vector.broadcast %cst_170 : f32 to vector<8x1xf32>
    %389 = arith.maximumf %385, %388 : vector<8x1xf32>
    %cst_171 = arith.constant 9.99999974E-6 : f32
    %390 = vector.broadcast %cst_171 : f32 to vector<8x1xf32>
    %391 = arith.addf %389, %390 : vector<8x1xf32>
    %392 = math.rsqrt %391 : vector<8x1xf32>
    %393 = vector.broadcast %392 : vector<8x1xf32> to vector<8x64xf32>
    %394 = arith.mulf %387, %393 : vector<8x64xf32>
    %395 = arith.addf %367, %394 : vector<8x64xf32>
    %cst_172 = arith.constant 0.000000e+00 : f32
    %396 = vector.broadcast %cst_172 : f32 to vector<8x64xf32>
    %397 = arith.maximumf %395, %396 : vector<8x64xf32>
    %398 = arith.truncf %397 : vector<8x64xf32> to vector<8x64xbf16>
    %c0_173 = arith.constant 0 : index
    %c0_174 = arith.constant 0 : index
    %c0_175 = arith.constant 0 : index
    %399 = vector.load %arg20[%c0_173, %c0_174, %c0_175] : memref<9x64x16xbf16, #tpu.memory_space<vmem>>, vector<1x64x16xbf16>
    %400 = vector.shape_cast %399 : vector<1x64x16xbf16> to vector<64x16xbf16>
    %cst_176 = arith.constant dense<0.000000e+00> : vector<8x16xf32>
    %401 = tpu.matmul %398, %400, %cst_176 {dimension_numbers = #tpu.dot_dimension_numbers<[1], [0], [0], [1], [0, 0, 1, 1], [], []>} : vector<8x64xbf16>, vector<64x16xbf16>, vector<8x16xf32> -> vector<8x16xf32>
    %c1_177 = arith.constant 1 : index
    %c0_178 = arith.constant 0 : index
    %c0_179 = arith.constant 0 : index
    %402 = vector.load %arg20[%c1_177, %c0_178, %c0_179] : memref<9x64x16xbf16, #tpu.memory_space<vmem>>, vector<1x64x16xbf16>
    %403 = vector.shape_cast %402 : vector<1x64x16xbf16> to vector<64x16xbf16>
    %cst_180 = arith.constant dense<0.000000e+00> : vector<8x16xf32>
    %404 = tpu.matmul %398, %403, %cst_180 {dimension_numbers = #tpu.dot_dimension_numbers<[1], [0], [0], [1], [0, 0, 1, 1], [], []>} : vector<8x64xbf16>, vector<64x16xbf16>, vector<8x16xf32> -> vector<8x16xf32>
    %c2_181 = arith.constant 2 : index
    %c0_182 = arith.constant 0 : index
    %c0_183 = arith.constant 0 : index
    %405 = vector.load %arg20[%c2_181, %c0_182, %c0_183] : memref<9x64x16xbf16, #tpu.memory_space<vmem>>, vector<1x64x16xbf16>
    %406 = vector.shape_cast %405 : vector<1x64x16xbf16> to vector<64x16xbf16>
    %cst_184 = arith.constant dense<0.000000e+00> : vector<8x16xf32>
    %407 = tpu.matmul %398, %406, %cst_184 {dimension_numbers = #tpu.dot_dimension_numbers<[1], [0], [0], [1], [0, 0, 1, 1], [], []>} : vector<8x64xbf16>, vector<64x16xbf16>, vector<8x16xf32> -> vector<8x16xf32>
    %c3_185 = arith.constant 3 : index
    %c0_186 = arith.constant 0 : index
    %c0_187 = arith.constant 0 : index
    %408 = vector.load %arg20[%c3_185, %c0_186, %c0_187] : memref<9x64x16xbf16, #tpu.memory_space<vmem>>, vector<1x64x16xbf16>
    %409 = vector.shape_cast %408 : vector<1x64x16xbf16> to vector<64x16xbf16>
    %cst_188 = arith.constant dense<0.000000e+00> : vector<8x16xf32>
    %410 = tpu.matmul %398, %409, %cst_188 {dimension_numbers = #tpu.dot_dimension_numbers<[1], [0], [0], [1], [0, 0, 1, 1], [], []>} : vector<8x64xbf16>, vector<64x16xbf16>, vector<8x16xf32> -> vector<8x16xf32>
    %c4_189 = arith.constant 4 : index
    %c0_190 = arith.constant 0 : index
    %c0_191 = arith.constant 0 : index
    %411 = vector.load %arg20[%c4_189, %c0_190, %c0_191] : memref<9x64x16xbf16, #tpu.memory_space<vmem>>, vector<1x64x16xbf16>
    %412 = vector.shape_cast %411 : vector<1x64x16xbf16> to vector<64x16xbf16>
    %cst_192 = arith.constant dense<0.000000e+00> : vector<8x16xf32>
    %413 = tpu.matmul %398, %412, %cst_192 {dimension_numbers = #tpu.dot_dimension_numbers<[1], [0], [0], [1], [0, 0, 1, 1], [], []>} : vector<8x64xbf16>, vector<64x16xbf16>, vector<8x16xf32> -> vector<8x16xf32>
    %c5_193 = arith.constant 5 : index
    %c0_194 = arith.constant 0 : index
    %c0_195 = arith.constant 0 : index
    %414 = vector.load %arg20[%c5_193, %c0_194, %c0_195] : memref<9x64x16xbf16, #tpu.memory_space<vmem>>, vector<1x64x16xbf16>
    %415 = vector.shape_cast %414 : vector<1x64x16xbf16> to vector<64x16xbf16>
    %cst_196 = arith.constant dense<0.000000e+00> : vector<8x16xf32>
    %416 = tpu.matmul %398, %415, %cst_196 {dimension_numbers = #tpu.dot_dimension_numbers<[1], [0], [0], [1], [0, 0, 1, 1], [], []>} : vector<8x64xbf16>, vector<64x16xbf16>, vector<8x16xf32> -> vector<8x16xf32>
    %c6_197 = arith.constant 6 : index
    %c0_198 = arith.constant 0 : index
    %c0_199 = arith.constant 0 : index
    %417 = vector.load %arg20[%c6_197, %c0_198, %c0_199] : memref<9x64x16xbf16, #tpu.memory_space<vmem>>, vector<1x64x16xbf16>
    %418 = vector.shape_cast %417 : vector<1x64x16xbf16> to vector<64x16xbf16>
    %cst_200 = arith.constant dense<0.000000e+00> : vector<8x16xf32>
    %419 = tpu.matmul %398, %418, %cst_200 {dimension_numbers = #tpu.dot_dimension_numbers<[1], [0], [0], [1], [0, 0, 1, 1], [], []>} : vector<8x64xbf16>, vector<64x16xbf16>, vector<8x16xf32> -> vector<8x16xf32>
    %c7_201 = arith.constant 7 : index
    %c0_202 = arith.constant 0 : index
    %c0_203 = arith.constant 0 : index
    %420 = vector.load %arg20[%c7_201, %c0_202, %c0_203] : memref<9x64x16xbf16, #tpu.memory_space<vmem>>, vector<1x64x16xbf16>
    %421 = vector.shape_cast %420 : vector<1x64x16xbf16> to vector<64x16xbf16>
    %cst_204 = arith.constant dense<0.000000e+00> : vector<8x16xf32>
    %422 = tpu.matmul %398, %421, %cst_204 {dimension_numbers = #tpu.dot_dimension_numbers<[1], [0], [0], [1], [0, 0, 1, 1], [], []>} : vector<8x64xbf16>, vector<64x16xbf16>, vector<8x16xf32> -> vector<8x16xf32>
    %c8_205 = arith.constant 8 : index
    %c0_206 = arith.constant 0 : index
    %c0_207 = arith.constant 0 : index
    %423 = vector.load %arg20[%c8_205, %c0_206, %c0_207] : memref<9x64x16xbf16, #tpu.memory_space<vmem>>, vector<1x64x16xbf16>
    %424 = vector.shape_cast %423 : vector<1x64x16xbf16> to vector<64x16xbf16>
    %cst_208 = arith.constant dense<0.000000e+00> : vector<8x16xf32>
    %425 = tpu.matmul %398, %424, %cst_208 {dimension_numbers = #tpu.dot_dimension_numbers<[1], [0], [0], [1], [0, 0, 1, 1], [], []>} : vector<8x64xbf16>, vector<64x16xbf16>, vector<8x16xf32> -> vector<8x16xf32>
    %426 = tpu.concatenate %401, %404, %407, %410, %413, %416, %419, %422, %425 in 0 : vector<8x16xf32>, vector<8x16xf32>, vector<8x16xf32>, vector<8x16xf32>, vector<8x16xf32>, vector<8x16xf32>, vector<8x16xf32>, vector<8x16xf32>, vector<8x16xf32> -> vector<72x16xf32>
    %427 = arith.truncf %426 : vector<72x16xf32> to vector<72x16xbf16>
    %c0_209 = arith.constant 0 : index
    %c0_210 = arith.constant 0 : index
    %428 = vector.load %arg6[%c0_209, %c0_210] : memref<16x72xbf16, #tpu.memory_space<vmem>>, vector<16x72xbf16>
    %cst_211 = arith.constant dense<0.000000e+00> : vector<16x16xf32>
    %429 = tpu.matmul %428, %427, %cst_211 {dimension_numbers = #tpu.dot_dimension_numbers<[1], [0], [0], [1], [0, 0, 1, 1], [], []>} : vector<16x72xbf16>, vector<72x16xbf16>, vector<16x16xf32> -> vector<16x16xf32>
    %cst_212 = arith.constant dense<0.000000e+00> : vector<16xf32>
    %430 = vector.multi_reduction <add>, %429, %cst_212 [1] : vector<16x16xf32> to vector<16xf32>
    %431 = vector.shape_cast %430 : vector<16xf32> to vector<16x1xf32>
    %cst_213 = arith.constant 6.250000e-02 : f32
    %432 = vector.broadcast %cst_213 : f32 to vector<16x1xf32>
    %433 = arith.mulf %431, %432 : vector<16x1xf32>
    %434 = arith.mulf %429, %429 : vector<16x16xf32>
    %cst_214 = arith.constant dense<0.000000e+00> : vector<16xf32>
    %435 = vector.multi_reduction <add>, %434, %cst_214 [1] : vector<16x16xf32> to vector<16xf32>
    %436 = vector.shape_cast %435 : vector<16xf32> to vector<16x1xf32>
    %cst_215 = arith.constant 6.250000e-02 : f32
    %437 = vector.broadcast %cst_215 : f32 to vector<16x1xf32>
    %438 = arith.mulf %436, %437 : vector<16x1xf32>
    %439 = arith.mulf %433, %433 : vector<16x1xf32>
    %440 = arith.subf %438, %439 : vector<16x1xf32>
    %441 = vector.broadcast %433 : vector<16x1xf32> to vector<16x16xf32>
    %442 = arith.subf %429, %441 : vector<16x16xf32>
    %cst_216 = arith.constant 0.000000e+00 : f32
    %443 = vector.broadcast %cst_216 : f32 to vector<16x1xf32>
    %444 = arith.maximumf %440, %443 : vector<16x1xf32>
    %cst_217 = arith.constant 9.99999974E-6 : f32
    %445 = vector.broadcast %cst_217 : f32 to vector<16x1xf32>
    %446 = arith.addf %444, %445 : vector<16x1xf32>
    %447 = math.rsqrt %446 : vector<16x1xf32>
    %448 = vector.broadcast %447 : vector<16x1xf32> to vector<16x16xf32>
    %449 = arith.mulf %442, %448 : vector<16x16xf32>
    %cst_218 = arith.constant 0.000000e+00 : f32
    %450 = vector.broadcast %cst_218 : f32 to vector<16x16xf32>
    %451 = arith.maximumf %449, %450 : vector<16x16xf32>
    %452 = arith.truncf %451 : vector<16x16xf32> to vector<16x16xbf16>
    %c0_219 = arith.constant 0 : index
    %c0_220 = arith.constant 0 : index
    %c0_221 = arith.constant 0 : index
    %453 = vector.load %arg22[%c0_219, %c0_220, %c0_221] : memref<9x16x16xbf16, #tpu.memory_space<vmem>>, vector<1x16x16xbf16>
    %454 = vector.shape_cast %453 : vector<1x16x16xbf16> to vector<16x16xbf16>
    %cst_222 = arith.constant dense<0.000000e+00> : vector<16x16xf32>
    %455 = tpu.matmul %452, %454, %cst_222 {dimension_numbers = #tpu.dot_dimension_numbers<[1], [0], [0], [1], [0, 0, 1, 1], [], []>} : vector<16x16xbf16>, vector<16x16xbf16>, vector<16x16xf32> -> vector<16x16xf32>
    %c1_223 = arith.constant 1 : index
    %c0_224 = arith.constant 0 : index
    %c0_225 = arith.constant 0 : index
    %456 = vector.load %arg22[%c1_223, %c0_224, %c0_225] : memref<9x16x16xbf16, #tpu.memory_space<vmem>>, vector<1x16x16xbf16>
    %457 = vector.shape_cast %456 : vector<1x16x16xbf16> to vector<16x16xbf16>
    %cst_226 = arith.constant dense<0.000000e+00> : vector<16x16xf32>
    %458 = tpu.matmul %452, %457, %cst_226 {dimension_numbers = #tpu.dot_dimension_numbers<[1], [0], [0], [1], [0, 0, 1, 1], [], []>} : vector<16x16xbf16>, vector<16x16xbf16>, vector<16x16xf32> -> vector<16x16xf32>
    %c2_227 = arith.constant 2 : index
    %c0_228 = arith.constant 0 : index
    %c0_229 = arith.constant 0 : index
    %459 = vector.load %arg22[%c2_227, %c0_228, %c0_229] : memref<9x16x16xbf16, #tpu.memory_space<vmem>>, vector<1x16x16xbf16>
    %460 = vector.shape_cast %459 : vector<1x16x16xbf16> to vector<16x16xbf16>
    %cst_230 = arith.constant dense<0.000000e+00> : vector<16x16xf32>
    %461 = tpu.matmul %452, %460, %cst_230 {dimension_numbers = #tpu.dot_dimension_numbers<[1], [0], [0], [1], [0, 0, 1, 1], [], []>} : vector<16x16xbf16>, vector<16x16xbf16>, vector<16x16xf32> -> vector<16x16xf32>
    %c3_231 = arith.constant 3 : index
    %c0_232 = arith.constant 0 : index
    %c0_233 = arith.constant 0 : index
    %462 = vector.load %arg22[%c3_231, %c0_232, %c0_233] : memref<9x16x16xbf16, #tpu.memory_space<vmem>>, vector<1x16x16xbf16>
    %463 = vector.shape_cast %462 : vector<1x16x16xbf16> to vector<16x16xbf16>
    %cst_234 = arith.constant dense<0.000000e+00> : vector<16x16xf32>
    %464 = tpu.matmul %452, %463, %cst_234 {dimension_numbers = #tpu.dot_dimension_numbers<[1], [0], [0], [1], [0, 0, 1, 1], [], []>} : vector<16x16xbf16>, vector<16x16xbf16>, vector<16x16xf32> -> vector<16x16xf32>
    %c4_235 = arith.constant 4 : index
    %c0_236 = arith.constant 0 : index
    %c0_237 = arith.constant 0 : index
    %465 = vector.load %arg22[%c4_235, %c0_236, %c0_237] : memref<9x16x16xbf16, #tpu.memory_space<vmem>>, vector<1x16x16xbf16>
    %466 = vector.shape_cast %465 : vector<1x16x16xbf16> to vector<16x16xbf16>
    %cst_238 = arith.constant dense<0.000000e+00> : vector<16x16xf32>
    %467 = tpu.matmul %452, %466, %cst_238 {dimension_numbers = #tpu.dot_dimension_numbers<[1], [0], [0], [1], [0, 0, 1, 1], [], []>} : vector<16x16xbf16>, vector<16x16xbf16>, vector<16x16xf32> -> vector<16x16xf32>
    %c5_239 = arith.constant 5 : index
    %c0_240 = arith.constant 0 : index
    %c0_241 = arith.constant 0 : index
    %468 = vector.load %arg22[%c5_239, %c0_240, %c0_241] : memref<9x16x16xbf16, #tpu.memory_space<vmem>>, vector<1x16x16xbf16>
    %469 = vector.shape_cast %468 : vector<1x16x16xbf16> to vector<16x16xbf16>
    %cst_242 = arith.constant dense<0.000000e+00> : vector<16x16xf32>
    %470 = tpu.matmul %452, %469, %cst_242 {dimension_numbers = #tpu.dot_dimension_numbers<[1], [0], [0], [1], [0, 0, 1, 1], [], []>} : vector<16x16xbf16>, vector<16x16xbf16>, vector<16x16xf32> -> vector<16x16xf32>
    %c6_243 = arith.constant 6 : index
    %c0_244 = arith.constant 0 : index
    %c0_245 = arith.constant 0 : index
    %471 = vector.load %arg22[%c6_243, %c0_244, %c0_245] : memref<9x16x16xbf16, #tpu.memory_space<vmem>>, vector<1x16x16xbf16>
    %472 = vector.shape_cast %471 : vector<1x16x16xbf16> to vector<16x16xbf16>
    %cst_246 = arith.constant dense<0.000000e+00> : vector<16x16xf32>
    %473 = tpu.matmul %452, %472, %cst_246 {dimension_numbers = #tpu.dot_dimension_numbers<[1], [0], [0], [1], [0, 0, 1, 1], [], []>} : vector<16x16xbf16>, vector<16x16xbf16>, vector<16x16xf32> -> vector<16x16xf32>
    %c7_247 = arith.constant 7 : index
    %c0_248 = arith.constant 0 : index
    %c0_249 = arith.constant 0 : index
    %474 = vector.load %arg22[%c7_247, %c0_248, %c0_249] : memref<9x16x16xbf16, #tpu.memory_space<vmem>>, vector<1x16x16xbf16>
    %475 = vector.shape_cast %474 : vector<1x16x16xbf16> to vector<16x16xbf16>
    %cst_250 = arith.constant dense<0.000000e+00> : vector<16x16xf32>
    %476 = tpu.matmul %452, %475, %cst_250 {dimension_numbers = #tpu.dot_dimension_numbers<[1], [0], [0], [1], [0, 0, 1, 1], [], []>} : vector<16x16xbf16>, vector<16x16xbf16>, vector<16x16xf32> -> vector<16x16xf32>
    %c8_251 = arith.constant 8 : index
    %c0_252 = arith.constant 0 : index
    %c0_253 = arith.constant 0 : index
    %477 = vector.load %arg22[%c8_251, %c0_252, %c0_253] : memref<9x16x16xbf16, #tpu.memory_space<vmem>>, vector<1x16x16xbf16>
    %478 = vector.shape_cast %477 : vector<1x16x16xbf16> to vector<16x16xbf16>
    %cst_254 = arith.constant dense<0.000000e+00> : vector<16x16xf32>
    %479 = tpu.matmul %452, %478, %cst_254 {dimension_numbers = #tpu.dot_dimension_numbers<[1], [0], [0], [1], [0, 0, 1, 1], [], []>} : vector<16x16xbf16>, vector<16x16xbf16>, vector<16x16xf32> -> vector<16x16xf32>
    %480 = tpu.concatenate %455, %458, %461, %464, %467, %470, %473, %476, %479 in 0 : vector<16x16xf32>, vector<16x16xf32>, vector<16x16xf32>, vector<16x16xf32>, vector<16x16xf32>, vector<16x16xf32>, vector<16x16xf32>, vector<16x16xf32>, vector<16x16xf32> -> vector<144x16xf32>
    %481 = arith.truncf %480 : vector<144x16xf32> to vector<144x16xbf16>
    %c0_255 = arith.constant 0 : index
    %c0_256 = arith.constant 0 : index
    %482 = vector.load %arg7[%c0_255, %c0_256] : memref<16x144xbf16, #tpu.memory_space<vmem>>, vector<16x144xbf16>
    %cst_257 = arith.constant dense<0.000000e+00> : vector<16x16xf32>
    %483 = tpu.matmul %482, %481, %cst_257 {dimension_numbers = #tpu.dot_dimension_numbers<[1], [0], [0], [1], [0, 0, 1, 1], [], []>} : vector<16x144xbf16>, vector<144x16xbf16>, vector<16x16xf32> -> vector<16x16xf32>
    %cst_258 = arith.constant dense<0.000000e+00> : vector<16xf32>
    %484 = vector.multi_reduction <add>, %483, %cst_258 [1] : vector<16x16xf32> to vector<16xf32>
    %485 = vector.shape_cast %484 : vector<16xf32> to vector<16x1xf32>
    %cst_259 = arith.constant 6.250000e-02 : f32
    %486 = vector.broadcast %cst_259 : f32 to vector<16x1xf32>
    %487 = arith.mulf %485, %486 : vector<16x1xf32>
    %488 = arith.mulf %483, %483 : vector<16x16xf32>
    %cst_260 = arith.constant dense<0.000000e+00> : vector<16xf32>
    %489 = vector.multi_reduction <add>, %488, %cst_260 [1] : vector<16x16xf32> to vector<16xf32>
    %490 = vector.shape_cast %489 : vector<16xf32> to vector<16x1xf32>
    %cst_261 = arith.constant 6.250000e-02 : f32
    %491 = vector.broadcast %cst_261 : f32 to vector<16x1xf32>
    %492 = arith.mulf %490, %491 : vector<16x1xf32>
    %493 = arith.mulf %487, %487 : vector<16x1xf32>
    %494 = arith.subf %492, %493 : vector<16x1xf32>
    %495 = vector.broadcast %487 : vector<16x1xf32> to vector<16x16xf32>
    %496 = arith.subf %483, %495 : vector<16x16xf32>
    %cst_262 = arith.constant 0.000000e+00 : f32
    %497 = vector.broadcast %cst_262 : f32 to vector<16x1xf32>
    %498 = arith.maximumf %494, %497 : vector<16x1xf32>
    %cst_263 = arith.constant 9.99999974E-6 : f32
    %499 = vector.broadcast %cst_263 : f32 to vector<16x1xf32>
    %500 = arith.addf %498, %499 : vector<16x1xf32>
    %501 = math.rsqrt %500 : vector<16x1xf32>
    %502 = vector.broadcast %501 : vector<16x1xf32> to vector<16x16xf32>
    %503 = arith.mulf %496, %502 : vector<16x16xf32>
    %504 = arith.truncf %397 : vector<8x64xf32> to vector<8x64xbf16>
    %c0_264 = arith.constant 0 : index
    %c0_265 = arith.constant 0 : index
    %c0_266 = arith.constant 0 : index
    %505 = vector.load %arg21[%c0_264, %c0_265, %c0_266] : memref<1x64x16xbf16, #tpu.memory_space<vmem>>, vector<1x64x16xbf16>
    %506 = vector.shape_cast %505 : vector<1x64x16xbf16> to vector<64x16xbf16>
    %cst_267 = arith.constant dense<0.000000e+00> : vector<8x16xf32>
    %507 = tpu.matmul %504, %506, %cst_267 {dimension_numbers = #tpu.dot_dimension_numbers<[1], [0], [0], [1], [0, 0, 1, 1], [], []>} : vector<8x64xbf16>, vector<64x16xbf16>, vector<8x16xf32> -> vector<8x16xf32>
    %508 = arith.truncf %507 : vector<8x16xf32> to vector<8x16xbf16>
    %c0_268 = arith.constant 0 : index
    %c0_269 = arith.constant 0 : index
    %509 = vector.load %arg8[%c0_268, %c0_269] : memref<16x8xbf16, #tpu.memory_space<vmem>>, vector<16x8xbf16>
    %cst_270 = arith.constant dense<0.000000e+00> : vector<16x16xf32>
    %510 = tpu.matmul %509, %508, %cst_270 {dimension_numbers = #tpu.dot_dimension_numbers<[1], [0], [0], [1], [0, 0, 1, 1], [], []>} : vector<16x8xbf16>, vector<8x16xbf16>, vector<16x16xf32> -> vector<16x16xf32>
    %cst_271 = arith.constant dense<0.000000e+00> : vector<16xf32>
    %511 = vector.multi_reduction <add>, %510, %cst_271 [1] : vector<16x16xf32> to vector<16xf32>
    %512 = vector.shape_cast %511 : vector<16xf32> to vector<16x1xf32>
    %cst_272 = arith.constant 6.250000e-02 : f32
    %513 = vector.broadcast %cst_272 : f32 to vector<16x1xf32>
    %514 = arith.mulf %512, %513 : vector<16x1xf32>
    %515 = arith.mulf %510, %510 : vector<16x16xf32>
    %cst_273 = arith.constant dense<0.000000e+00> : vector<16xf32>
    %516 = vector.multi_reduction <add>, %515, %cst_273 [1] : vector<16x16xf32> to vector<16xf32>
    %517 = vector.shape_cast %516 : vector<16xf32> to vector<16x1xf32>
    %cst_274 = arith.constant 6.250000e-02 : f32
    %518 = vector.broadcast %cst_274 : f32 to vector<16x1xf32>
    %519 = arith.mulf %517, %518 : vector<16x1xf32>
    %520 = arith.mulf %514, %514 : vector<16x1xf32>
    %521 = arith.subf %519, %520 : vector<16x1xf32>
    %522 = vector.broadcast %514 : vector<16x1xf32> to vector<16x16xf32>
    %523 = arith.subf %510, %522 : vector<16x16xf32>
    %cst_275 = arith.constant 0.000000e+00 : f32
    %524 = vector.broadcast %cst_275 : f32 to vector<16x1xf32>
    %525 = arith.maximumf %521, %524 : vector<16x1xf32>
    %cst_276 = arith.constant 9.99999974E-6 : f32
    %526 = vector.broadcast %cst_276 : f32 to vector<16x1xf32>
    %527 = arith.addf %525, %526 : vector<16x1xf32>
    %528 = math.rsqrt %527 : vector<16x1xf32>
    %529 = vector.broadcast %528 : vector<16x1xf32> to vector<16x16xf32>
    %530 = arith.mulf %523, %529 : vector<16x16xf32>
    %531 = arith.addf %503, %530 : vector<16x16xf32>
    %cst_277 = arith.constant 0.000000e+00 : f32
    %532 = vector.broadcast %cst_277 : f32 to vector<16x16xf32>
    %533 = arith.maximumf %531, %532 : vector<16x16xf32>
    %534 = arith.truncf %533 : vector<16x16xf32> to vector<16x16xbf16>
    %c0_278 = arith.constant 0 : index
    %c0_279 = arith.constant 0 : index
    %c0_280 = arith.constant 0 : index
    %535 = vector.load %arg23[%c0_278, %c0_279, %c0_280] : memref<9x16x4xbf16, #tpu.memory_space<vmem>>, vector<1x16x4xbf16>
    %536 = vector.shape_cast %535 : vector<1x16x4xbf16> to vector<16x4xbf16>
    %cst_281 = arith.constant dense<0.000000e+00> : vector<16x4xf32>
    %537 = tpu.matmul %534, %536, %cst_281 {dimension_numbers = #tpu.dot_dimension_numbers<[1], [0], [0], [1], [0, 0, 1, 1], [], []>} : vector<16x16xbf16>, vector<16x4xbf16>, vector<16x4xf32> -> vector<16x4xf32>
    %c1_282 = arith.constant 1 : index
    %c0_283 = arith.constant 0 : index
    %c0_284 = arith.constant 0 : index
    %538 = vector.load %arg23[%c1_282, %c0_283, %c0_284] : memref<9x16x4xbf16, #tpu.memory_space<vmem>>, vector<1x16x4xbf16>
    %539 = vector.shape_cast %538 : vector<1x16x4xbf16> to vector<16x4xbf16>
    %cst_285 = arith.constant dense<0.000000e+00> : vector<16x4xf32>
    %540 = tpu.matmul %534, %539, %cst_285 {dimension_numbers = #tpu.dot_dimension_numbers<[1], [0], [0], [1], [0, 0, 1, 1], [], []>} : vector<16x16xbf16>, vector<16x4xbf16>, vector<16x4xf32> -> vector<16x4xf32>
    %c2_286 = arith.constant 2 : index
    %c0_287 = arith.constant 0 : index
    %c0_288 = arith.constant 0 : index
    %541 = vector.load %arg23[%c2_286, %c0_287, %c0_288] : memref<9x16x4xbf16, #tpu.memory_space<vmem>>, vector<1x16x4xbf16>
    %542 = vector.shape_cast %541 : vector<1x16x4xbf16> to vector<16x4xbf16>
    %cst_289 = arith.constant dense<0.000000e+00> : vector<16x4xf32>
    %543 = tpu.matmul %534, %542, %cst_289 {dimension_numbers = #tpu.dot_dimension_numbers<[1], [0], [0], [1], [0, 0, 1, 1], [], []>} : vector<16x16xbf16>, vector<16x4xbf16>, vector<16x4xf32> -> vector<16x4xf32>
    %c3_290 = arith.constant 3 : index
    %c0_291 = arith.constant 0 : index
    %c0_292 = arith.constant 0 : index
    %544 = vector.load %arg23[%c3_290, %c0_291, %c0_292] : memref<9x16x4xbf16, #tpu.memory_space<vmem>>, vector<1x16x4xbf16>
    %545 = vector.shape_cast %544 : vector<1x16x4xbf16> to vector<16x4xbf16>
    %cst_293 = arith.constant dense<0.000000e+00> : vector<16x4xf32>
    %546 = tpu.matmul %534, %545, %cst_293 {dimension_numbers = #tpu.dot_dimension_numbers<[1], [0], [0], [1], [0, 0, 1, 1], [], []>} : vector<16x16xbf16>, vector<16x4xbf16>, vector<16x4xf32> -> vector<16x4xf32>
    %c4_294 = arith.constant 4 : index
    %c0_295 = arith.constant 0 : index
    %c0_296 = arith.constant 0 : index
    %547 = vector.load %arg23[%c4_294, %c0_295, %c0_296] : memref<9x16x4xbf16, #tpu.memory_space<vmem>>, vector<1x16x4xbf16>
    %548 = vector.shape_cast %547 : vector<1x16x4xbf16> to vector<16x4xbf16>
    %cst_297 = arith.constant dense<0.000000e+00> : vector<16x4xf32>
    %549 = tpu.matmul %534, %548, %cst_297 {dimension_numbers = #tpu.dot_dimension_numbers<[1], [0], [0], [1], [0, 0, 1, 1], [], []>} : vector<16x16xbf16>, vector<16x4xbf16>, vector<16x4xf32> -> vector<16x4xf32>
    %c5_298 = arith.constant 5 : index
    %c0_299 = arith.constant 0 : index
    %c0_300 = arith.constant 0 : index
    %550 = vector.load %arg23[%c5_298, %c0_299, %c0_300] : memref<9x16x4xbf16, #tpu.memory_space<vmem>>, vector<1x16x4xbf16>
    %551 = vector.shape_cast %550 : vector<1x16x4xbf16> to vector<16x4xbf16>
    %cst_301 = arith.constant dense<0.000000e+00> : vector<16x4xf32>
    %552 = tpu.matmul %534, %551, %cst_301 {dimension_numbers = #tpu.dot_dimension_numbers<[1], [0], [0], [1], [0, 0, 1, 1], [], []>} : vector<16x16xbf16>, vector<16x4xbf16>, vector<16x4xf32> -> vector<16x4xf32>
    %c6_302 = arith.constant 6 : index
    %c0_303 = arith.constant 0 : index
    %c0_304 = arith.constant 0 : index
    %553 = vector.load %arg23[%c6_302, %c0_303, %c0_304] : memref<9x16x4xbf16, #tpu.memory_space<vmem>>, vector<1x16x4xbf16>
    %554 = vector.shape_cast %553 : vector<1x16x4xbf16> to vector<16x4xbf16>
    %cst_305 = arith.constant dense<0.000000e+00> : vector<16x4xf32>
    %555 = tpu.matmul %534, %554, %cst_305 {dimension_numbers = #tpu.dot_dimension_numbers<[1], [0], [0], [1], [0, 0, 1, 1], [], []>} : vector<16x16xbf16>, vector<16x4xbf16>, vector<16x4xf32> -> vector<16x4xf32>
    %c7_306 = arith.constant 7 : index
    %c0_307 = arith.constant 0 : index
    %c0_308 = arith.constant 0 : index
    %556 = vector.load %arg23[%c7_306, %c0_307, %c0_308] : memref<9x16x4xbf16, #tpu.memory_space<vmem>>, vector<1x16x4xbf16>
    %557 = vector.shape_cast %556 : vector<1x16x4xbf16> to vector<16x4xbf16>
    %cst_309 = arith.constant dense<0.000000e+00> : vector<16x4xf32>
    %558 = tpu.matmul %534, %557, %cst_309 {dimension_numbers = #tpu.dot_dimension_numbers<[1], [0], [0], [1], [0, 0, 1, 1], [], []>} : vector<16x16xbf16>, vector<16x4xbf16>, vector<16x4xf32> -> vector<16x4xf32>
    %c8_310 = arith.constant 8 : index
    %c0_311 = arith.constant 0 : index
    %c0_312 = arith.constant 0 : index
    %559 = vector.load %arg23[%c8_310, %c0_311, %c0_312] : memref<9x16x4xbf16, #tpu.memory_space<vmem>>, vector<1x16x4xbf16>
    %560 = vector.shape_cast %559 : vector<1x16x4xbf16> to vector<16x4xbf16>
    %cst_313 = arith.constant dense<0.000000e+00> : vector<16x4xf32>
    %561 = tpu.matmul %534, %560, %cst_313 {dimension_numbers = #tpu.dot_dimension_numbers<[1], [0], [0], [1], [0, 0, 1, 1], [], []>} : vector<16x16xbf16>, vector<16x4xbf16>, vector<16x4xf32> -> vector<16x4xf32>
    %562 = tpu.concatenate %537, %540, %543, %546, %549, %552, %555, %558, %561 in 0 : vector<16x4xf32>, vector<16x4xf32>, vector<16x4xf32>, vector<16x4xf32>, vector<16x4xf32>, vector<16x4xf32>, vector<16x4xf32>, vector<16x4xf32>, vector<16x4xf32> -> vector<144x4xf32>
    %563 = arith.truncf %562 : vector<144x4xf32> to vector<144x4xbf16>
    %c0_314 = arith.constant 0 : index
    %c0_315 = arith.constant 0 : index
    %564 = vector.load %arg9[%c0_314, %c0_315] : memref<16x144xbf16, #tpu.memory_space<vmem>>, vector<16x144xbf16>
    %cst_316 = arith.constant dense<0.000000e+00> : vector<16x4xf32>
    %565 = tpu.matmul %564, %563, %cst_316 {dimension_numbers = #tpu.dot_dimension_numbers<[1], [0], [0], [1], [0, 0, 1, 1], [], []>} : vector<16x144xbf16>, vector<144x4xbf16>, vector<16x4xf32> -> vector<16x4xf32>
    %cst_317 = arith.constant dense<0.000000e+00> : vector<16xf32>
    %566 = vector.multi_reduction <add>, %565, %cst_317 [1] : vector<16x4xf32> to vector<16xf32>
    %567 = vector.shape_cast %566 : vector<16xf32> to vector<16x1xf32>
    %cst_318 = arith.constant 2.500000e-01 : f32
    %568 = vector.broadcast %cst_318 : f32 to vector<16x1xf32>
    %569 = arith.mulf %567, %568 : vector<16x1xf32>
    %570 = arith.mulf %565, %565 : vector<16x4xf32>
    %cst_319 = arith.constant dense<0.000000e+00> : vector<16xf32>
    %571 = vector.multi_reduction <add>, %570, %cst_319 [1] : vector<16x4xf32> to vector<16xf32>
    %572 = vector.shape_cast %571 : vector<16xf32> to vector<16x1xf32>
    %cst_320 = arith.constant 2.500000e-01 : f32
    %573 = vector.broadcast %cst_320 : f32 to vector<16x1xf32>
    %574 = arith.mulf %572, %573 : vector<16x1xf32>
    %575 = arith.mulf %569, %569 : vector<16x1xf32>
    %576 = arith.subf %574, %575 : vector<16x1xf32>
    %577 = vector.broadcast %569 : vector<16x1xf32> to vector<16x4xf32>
    %578 = arith.subf %565, %577 : vector<16x4xf32>
    %cst_321 = arith.constant 0.000000e+00 : f32
    %579 = vector.broadcast %cst_321 : f32 to vector<16x1xf32>
    %580 = arith.maximumf %576, %579 : vector<16x1xf32>
    %cst_322 = arith.constant 9.99999974E-6 : f32
    %581 = vector.broadcast %cst_322 : f32 to vector<16x1xf32>
    %582 = arith.addf %580, %581 : vector<16x1xf32>
    %583 = math.rsqrt %582 : vector<16x1xf32>
    %584 = vector.broadcast %583 : vector<16x1xf32> to vector<16x4xf32>
    %585 = arith.mulf %578, %584 : vector<16x4xf32>
    %cst_323 = arith.constant 0.000000e+00 : f32
    %586 = vector.broadcast %cst_323 : f32 to vector<16x4xf32>
    %587 = arith.maximumf %585, %586 : vector<16x4xf32>
    %588 = arith.truncf %587 : vector<16x4xf32> to vector<16x4xbf16>
    %c0_324 = arith.constant 0 : index
    %c0_325 = arith.constant 0 : index
    %c0_326 = arith.constant 0 : index
    %589 = vector.load %arg25[%c0_324, %c0_325, %c0_326] : memref<9x4x4xbf16, #tpu.memory_space<vmem>>, vector<1x4x4xbf16>
    %590 = vector.shape_cast %589 : vector<1x4x4xbf16> to vector<4x4xbf16>
    %cst_327 = arith.constant dense<0.000000e+00> : vector<16x4xf32>
    %591 = tpu.matmul %588, %590, %cst_327 {dimension_numbers = #tpu.dot_dimension_numbers<[1], [0], [0], [1], [0, 0, 1, 1], [], []>} : vector<16x4xbf16>, vector<4x4xbf16>, vector<16x4xf32> -> vector<16x4xf32>
    %c1_328 = arith.constant 1 : index
    %c0_329 = arith.constant 0 : index
    %c0_330 = arith.constant 0 : index
    %592 = vector.load %arg25[%c1_328, %c0_329, %c0_330] : memref<9x4x4xbf16, #tpu.memory_space<vmem>>, vector<1x4x4xbf16>
    %593 = vector.shape_cast %592 : vector<1x4x4xbf16> to vector<4x4xbf16>
    %cst_331 = arith.constant dense<0.000000e+00> : vector<16x4xf32>
    %594 = tpu.matmul %588, %593, %cst_331 {dimension_numbers = #tpu.dot_dimension_numbers<[1], [0], [0], [1], [0, 0, 1, 1], [], []>} : vector<16x4xbf16>, vector<4x4xbf16>, vector<16x4xf32> -> vector<16x4xf32>
    %c2_332 = arith.constant 2 : index
    %c0_333 = arith.constant 0 : index
    %c0_334 = arith.constant 0 : index
    %595 = vector.load %arg25[%c2_332, %c0_333, %c0_334] : memref<9x4x4xbf16, #tpu.memory_space<vmem>>, vector<1x4x4xbf16>
    %596 = vector.shape_cast %595 : vector<1x4x4xbf16> to vector<4x4xbf16>
    %cst_335 = arith.constant dense<0.000000e+00> : vector<16x4xf32>
    %597 = tpu.matmul %588, %596, %cst_335 {dimension_numbers = #tpu.dot_dimension_numbers<[1], [0], [0], [1], [0, 0, 1, 1], [], []>} : vector<16x4xbf16>, vector<4x4xbf16>, vector<16x4xf32> -> vector<16x4xf32>
    %c3_336 = arith.constant 3 : index
    %c0_337 = arith.constant 0 : index
    %c0_338 = arith.constant 0 : index
    %598 = vector.load %arg25[%c3_336, %c0_337, %c0_338] : memref<9x4x4xbf16, #tpu.memory_space<vmem>>, vector<1x4x4xbf16>
    %599 = vector.shape_cast %598 : vector<1x4x4xbf16> to vector<4x4xbf16>
    %cst_339 = arith.constant dense<0.000000e+00> : vector<16x4xf32>
    %600 = tpu.matmul %588, %599, %cst_339 {dimension_numbers = #tpu.dot_dimension_numbers<[1], [0], [0], [1], [0, 0, 1, 1], [], []>} : vector<16x4xbf16>, vector<4x4xbf16>, vector<16x4xf32> -> vector<16x4xf32>
    %c4_340 = arith.constant 4 : index
    %c0_341 = arith.constant 0 : index
    %c0_342 = arith.constant 0 : index
    %601 = vector.load %arg25[%c4_340, %c0_341, %c0_342] : memref<9x4x4xbf16, #tpu.memory_space<vmem>>, vector<1x4x4xbf16>
    %602 = vector.shape_cast %601 : vector<1x4x4xbf16> to vector<4x4xbf16>
    %cst_343 = arith.constant dense<0.000000e+00> : vector<16x4xf32>
    %603 = tpu.matmul %588, %602, %cst_343 {dimension_numbers = #tpu.dot_dimension_numbers<[1], [0], [0], [1], [0, 0, 1, 1], [], []>} : vector<16x4xbf16>, vector<4x4xbf16>, vector<16x4xf32> -> vector<16x4xf32>
    %c5_344 = arith.constant 5 : index
    %c0_345 = arith.constant 0 : index
    %c0_346 = arith.constant 0 : index
    %604 = vector.load %arg25[%c5_344, %c0_345, %c0_346] : memref<9x4x4xbf16, #tpu.memory_space<vmem>>, vector<1x4x4xbf16>
    %605 = vector.shape_cast %604 : vector<1x4x4xbf16> to vector<4x4xbf16>
    %cst_347 = arith.constant dense<0.000000e+00> : vector<16x4xf32>
    %606 = tpu.matmul %588, %605, %cst_347 {dimension_numbers = #tpu.dot_dimension_numbers<[1], [0], [0], [1], [0, 0, 1, 1], [], []>} : vector<16x4xbf16>, vector<4x4xbf16>, vector<16x4xf32> -> vector<16x4xf32>
    %c6_348 = arith.constant 6 : index
    %c0_349 = arith.constant 0 : index
    %c0_350 = arith.constant 0 : index
    %607 = vector.load %arg25[%c6_348, %c0_349, %c0_350] : memref<9x4x4xbf16, #tpu.memory_space<vmem>>, vector<1x4x4xbf16>
    %608 = vector.shape_cast %607 : vector<1x4x4xbf16> to vector<4x4xbf16>
    %cst_351 = arith.constant dense<0.000000e+00> : vector<16x4xf32>
    %609 = tpu.matmul %588, %608, %cst_351 {dimension_numbers = #tpu.dot_dimension_numbers<[1], [0], [0], [1], [0, 0, 1, 1], [], []>} : vector<16x4xbf16>, vector<4x4xbf16>, vector<16x4xf32> -> vector<16x4xf32>
    %c7_352 = arith.constant 7 : index
    %c0_353 = arith.constant 0 : index
    %c0_354 = arith.constant 0 : index
    %610 = vector.load %arg25[%c7_352, %c0_353, %c0_354] : memref<9x4x4xbf16, #tpu.memory_space<vmem>>, vector<1x4x4xbf16>
    %611 = vector.shape_cast %610 : vector<1x4x4xbf16> to vector<4x4xbf16>
    %cst_355 = arith.constant dense<0.000000e+00> : vector<16x4xf32>
    %612 = tpu.matmul %588, %611, %cst_355 {dimension_numbers = #tpu.dot_dimension_numbers<[1], [0], [0], [1], [0, 0, 1, 1], [], []>} : vector<16x4xbf16>, vector<4x4xbf16>, vector<16x4xf32> -> vector<16x4xf32>
    %c8_356 = arith.constant 8 : index
    %c0_357 = arith.constant 0 : index
    %c0_358 = arith.constant 0 : index
    %613 = vector.load %arg25[%c8_356, %c0_357, %c0_358] : memref<9x4x4xbf16, #tpu.memory_space<vmem>>, vector<1x4x4xbf16>
    %614 = vector.shape_cast %613 : vector<1x4x4xbf16> to vector<4x4xbf16>
    %cst_359 = arith.constant dense<0.000000e+00> : vector<16x4xf32>
    %615 = tpu.matmul %588, %614, %cst_359 {dimension_numbers = #tpu.dot_dimension_numbers<[1], [0], [0], [1], [0, 0, 1, 1], [], []>} : vector<16x4xbf16>, vector<4x4xbf16>, vector<16x4xf32> -> vector<16x4xf32>
    %616 = tpu.concatenate %591, %594, %597, %600, %603, %606, %609, %612, %615 in 0 : vector<16x4xf32>, vector<16x4xf32>, vector<16x4xf32>, vector<16x4xf32>, vector<16x4xf32>, vector<16x4xf32>, vector<16x4xf32>, vector<16x4xf32>, vector<16x4xf32> -> vector<144x4xf32>
    %617 = arith.truncf %616 : vector<144x4xf32> to vector<144x4xbf16>
    %c0_360 = arith.constant 0 : index
    %c0_361 = arith.constant 0 : index
    %618 = vector.load %arg10[%c0_360, %c0_361] : memref<16x144xbf16, #tpu.memory_space<vmem>>, vector<16x144xbf16>
    %cst_362 = arith.constant dense<0.000000e+00> : vector<16x4xf32>
    %619 = tpu.matmul %618, %617, %cst_362 {dimension_numbers = #tpu.dot_dimension_numbers<[1], [0], [0], [1], [0, 0, 1, 1], [], []>} : vector<16x144xbf16>, vector<144x4xbf16>, vector<16x4xf32> -> vector<16x4xf32>
    %cst_363 = arith.constant dense<0.000000e+00> : vector<16xf32>
    %620 = vector.multi_reduction <add>, %619, %cst_363 [1] : vector<16x4xf32> to vector<16xf32>
    %621 = vector.shape_cast %620 : vector<16xf32> to vector<16x1xf32>
    %cst_364 = arith.constant 2.500000e-01 : f32
    %622 = vector.broadcast %cst_364 : f32 to vector<16x1xf32>
    %623 = arith.mulf %621, %622 : vector<16x1xf32>
    %624 = arith.mulf %619, %619 : vector<16x4xf32>
    %cst_365 = arith.constant dense<0.000000e+00> : vector<16xf32>
    %625 = vector.multi_reduction <add>, %624, %cst_365 [1] : vector<16x4xf32> to vector<16xf32>
    %626 = vector.shape_cast %625 : vector<16xf32> to vector<16x1xf32>
    %cst_366 = arith.constant 2.500000e-01 : f32
    %627 = vector.broadcast %cst_366 : f32 to vector<16x1xf32>
    %628 = arith.mulf %626, %627 : vector<16x1xf32>
    %629 = arith.mulf %623, %623 : vector<16x1xf32>
    %630 = arith.subf %628, %629 : vector<16x1xf32>
    %631 = vector.broadcast %623 : vector<16x1xf32> to vector<16x4xf32>
    %632 = arith.subf %619, %631 : vector<16x4xf32>
    %cst_367 = arith.constant 0.000000e+00 : f32
    %633 = vector.broadcast %cst_367 : f32 to vector<16x1xf32>
    %634 = arith.maximumf %630, %633 : vector<16x1xf32>
    %cst_368 = arith.constant 9.99999974E-6 : f32
    %635 = vector.broadcast %cst_368 : f32 to vector<16x1xf32>
    %636 = arith.addf %634, %635 : vector<16x1xf32>
    %637 = math.rsqrt %636 : vector<16x1xf32>
    %638 = vector.broadcast %637 : vector<16x1xf32> to vector<16x4xf32>
    %639 = arith.mulf %632, %638 : vector<16x4xf32>
    %640 = arith.truncf %533 : vector<16x16xf32> to vector<16x16xbf16>
    %c0_369 = arith.constant 0 : index
    %c0_370 = arith.constant 0 : index
    %c0_371 = arith.constant 0 : index
    %641 = vector.load %arg24[%c0_369, %c0_370, %c0_371] : memref<1x16x4xbf16, #tpu.memory_space<vmem>>, vector<1x16x4xbf16>
    %642 = vector.shape_cast %641 : vector<1x16x4xbf16> to vector<16x4xbf16>
    %cst_372 = arith.constant dense<0.000000e+00> : vector<16x4xf32>
    %643 = tpu.matmul %640, %642, %cst_372 {dimension_numbers = #tpu.dot_dimension_numbers<[1], [0], [0], [1], [0, 0, 1, 1], [], []>} : vector<16x16xbf16>, vector<16x4xbf16>, vector<16x4xf32> -> vector<16x4xf32>
    %644 = arith.truncf %643 : vector<16x4xf32> to vector<16x4xbf16>
    %c0_373 = arith.constant 0 : index
    %c0_374 = arith.constant 0 : index
    %645 = vector.load %arg11[%c0_373, %c0_374] : memref<16x16xbf16, #tpu.memory_space<vmem>>, vector<16x16xbf16>
    %cst_375 = arith.constant dense<0.000000e+00> : vector<16x4xf32>
    %646 = tpu.matmul %645, %644, %cst_375 {dimension_numbers = #tpu.dot_dimension_numbers<[1], [0], [0], [1], [0, 0, 1, 1], [], []>} : vector<16x16xbf16>, vector<16x4xbf16>, vector<16x4xf32> -> vector<16x4xf32>
    %cst_376 = arith.constant dense<0.000000e+00> : vector<16xf32>
    %647 = vector.multi_reduction <add>, %646, %cst_376 [1] : vector<16x4xf32> to vector<16xf32>
    %648 = vector.shape_cast %647 : vector<16xf32> to vector<16x1xf32>
    %cst_377 = arith.constant 2.500000e-01 : f32
    %649 = vector.broadcast %cst_377 : f32 to vector<16x1xf32>
    %650 = arith.mulf %648, %649 : vector<16x1xf32>
    %651 = arith.mulf %646, %646 : vector<16x4xf32>
    %cst_378 = arith.constant dense<0.000000e+00> : vector<16xf32>
    %652 = vector.multi_reduction <add>, %651, %cst_378 [1] : vector<16x4xf32> to vector<16xf32>
    %653 = vector.shape_cast %652 : vector<16xf32> to vector<16x1xf32>
    %cst_379 = arith.constant 2.500000e-01 : f32
    %654 = vector.broadcast %cst_379 : f32 to vector<16x1xf32>
    %655 = arith.mulf %653, %654 : vector<16x1xf32>
    %656 = arith.mulf %650, %650 : vector<16x1xf32>
    %657 = arith.subf %655, %656 : vector<16x1xf32>
    %658 = vector.broadcast %650 : vector<16x1xf32> to vector<16x4xf32>
    %659 = arith.subf %646, %658 : vector<16x4xf32>
    %cst_380 = arith.constant 0.000000e+00 : f32
    %660 = vector.broadcast %cst_380 : f32 to vector<16x1xf32>
    %661 = arith.maximumf %657, %660 : vector<16x1xf32>
    %cst_381 = arith.constant 9.99999974E-6 : f32
    %662 = vector.broadcast %cst_381 : f32 to vector<16x1xf32>
    %663 = arith.addf %661, %662 : vector<16x1xf32>
    %664 = math.rsqrt %663 : vector<16x1xf32>
    %665 = vector.broadcast %664 : vector<16x1xf32> to vector<16x4xf32>
    %666 = arith.mulf %659, %665 : vector<16x4xf32>
    %667 = arith.addf %639, %666 : vector<16x4xf32>
    %cst_382 = arith.constant 0.000000e+00 : f32
    %668 = vector.broadcast %cst_382 : f32 to vector<16x4xf32>
    %669 = arith.maximumf %667, %668 : vector<16x4xf32>
    %670 = arith.truncf %669 : vector<16x4xf32> to vector<16x4xbf16>
    %c0_383 = arith.constant 0 : index
    %c0_384 = arith.constant 0 : index
    %c0_385 = arith.constant 0 : index
    %671 = vector.load %arg26[%c0_383, %c0_384, %c0_385] : memref<9x4x16xbf16, #tpu.memory_space<vmem>>, vector<1x4x16xbf16>
    %672 = vector.shape_cast %671 : vector<1x4x16xbf16> to vector<4x16xbf16>
    %cst_386 = arith.constant dense<0.000000e+00> : vector<16x16xf32>
    %673 = tpu.matmul %670, %672, %cst_386 {dimension_numbers = #tpu.dot_dimension_numbers<[1], [0], [0], [1], [0, 0, 1, 1], [], []>} : vector<16x4xbf16>, vector<4x16xbf16>, vector<16x16xf32> -> vector<16x16xf32>
    %c1_387 = arith.constant 1 : index
    %c0_388 = arith.constant 0 : index
    %c0_389 = arith.constant 0 : index
    %674 = vector.load %arg26[%c1_387, %c0_388, %c0_389] : memref<9x4x16xbf16, #tpu.memory_space<vmem>>, vector<1x4x16xbf16>
    %675 = vector.shape_cast %674 : vector<1x4x16xbf16> to vector<4x16xbf16>
    %cst_390 = arith.constant dense<0.000000e+00> : vector<16x16xf32>
    %676 = tpu.matmul %670, %675, %cst_390 {dimension_numbers = #tpu.dot_dimension_numbers<[1], [0], [0], [1], [0, 0, 1, 1], [], []>} : vector<16x4xbf16>, vector<4x16xbf16>, vector<16x16xf32> -> vector<16x16xf32>
    %c2_391 = arith.constant 2 : index
    %c0_392 = arith.constant 0 : index
    %c0_393 = arith.constant 0 : index
    %677 = vector.load %arg26[%c2_391, %c0_392, %c0_393] : memref<9x4x16xbf16, #tpu.memory_space<vmem>>, vector<1x4x16xbf16>
    %678 = vector.shape_cast %677 : vector<1x4x16xbf16> to vector<4x16xbf16>
    %cst_394 = arith.constant dense<0.000000e+00> : vector<16x16xf32>
    %679 = tpu.matmul %670, %678, %cst_394 {dimension_numbers = #tpu.dot_dimension_numbers<[1], [0], [0], [1], [0, 0, 1, 1], [], []>} : vector<16x4xbf16>, vector<4x16xbf16>, vector<16x16xf32> -> vector<16x16xf32>
    %c3_395 = arith.constant 3 : index
    %c0_396 = arith.constant 0 : index
    %c0_397 = arith.constant 0 : index
    %680 = vector.load %arg26[%c3_395, %c0_396, %c0_397] : memref<9x4x16xbf16, #tpu.memory_space<vmem>>, vector<1x4x16xbf16>
    %681 = vector.shape_cast %680 : vector<1x4x16xbf16> to vector<4x16xbf16>
    %cst_398 = arith.constant dense<0.000000e+00> : vector<16x16xf32>
    %682 = tpu.matmul %670, %681, %cst_398 {dimension_numbers = #tpu.dot_dimension_numbers<[1], [0], [0], [1], [0, 0, 1, 1], [], []>} : vector<16x4xbf16>, vector<4x16xbf16>, vector<16x16xf32> -> vector<16x16xf32>
    %c4_399 = arith.constant 4 : index
    %c0_400 = arith.constant 0 : index
    %c0_401 = arith.constant 0 : index
    %683 = vector.load %arg26[%c4_399, %c0_400, %c0_401] : memref<9x4x16xbf16, #tpu.memory_space<vmem>>, vector<1x4x16xbf16>
    %684 = vector.shape_cast %683 : vector<1x4x16xbf16> to vector<4x16xbf16>
    %cst_402 = arith.constant dense<0.000000e+00> : vector<16x16xf32>
    %685 = tpu.matmul %670, %684, %cst_402 {dimension_numbers = #tpu.dot_dimension_numbers<[1], [0], [0], [1], [0, 0, 1, 1], [], []>} : vector<16x4xbf16>, vector<4x16xbf16>, vector<16x16xf32> -> vector<16x16xf32>
    %c5_403 = arith.constant 5 : index
    %c0_404 = arith.constant 0 : index
    %c0_405 = arith.constant 0 : index
    %686 = vector.load %arg26[%c5_403, %c0_404, %c0_405] : memref<9x4x16xbf16, #tpu.memory_space<vmem>>, vector<1x4x16xbf16>
    %687 = vector.shape_cast %686 : vector<1x4x16xbf16> to vector<4x16xbf16>
    %cst_406 = arith.constant dense<0.000000e+00> : vector<16x16xf32>
    %688 = tpu.matmul %670, %687, %cst_406 {dimension_numbers = #tpu.dot_dimension_numbers<[1], [0], [0], [1], [0, 0, 1, 1], [], []>} : vector<16x4xbf16>, vector<4x16xbf16>, vector<16x16xf32> -> vector<16x16xf32>
    %c6_407 = arith.constant 6 : index
    %c0_408 = arith.constant 0 : index
    %c0_409 = arith.constant 0 : index
    %689 = vector.load %arg26[%c6_407, %c0_408, %c0_409] : memref<9x4x16xbf16, #tpu.memory_space<vmem>>, vector<1x4x16xbf16>
    %690 = vector.shape_cast %689 : vector<1x4x16xbf16> to vector<4x16xbf16>
    %cst_410 = arith.constant dense<0.000000e+00> : vector<16x16xf32>
    %691 = tpu.matmul %670, %690, %cst_410 {dimension_numbers = #tpu.dot_dimension_numbers<[1], [0], [0], [1], [0, 0, 1, 1], [], []>} : vector<16x4xbf16>, vector<4x16xbf16>, vector<16x16xf32> -> vector<16x16xf32>
    %c7_411 = arith.constant 7 : index
    %c0_412 = arith.constant 0 : index
    %c0_413 = arith.constant 0 : index
    %692 = vector.load %arg26[%c7_411, %c0_412, %c0_413] : memref<9x4x16xbf16, #tpu.memory_space<vmem>>, vector<1x4x16xbf16>
    %693 = vector.shape_cast %692 : vector<1x4x16xbf16> to vector<4x16xbf16>
    %cst_414 = arith.constant dense<0.000000e+00> : vector<16x16xf32>
    %694 = tpu.matmul %670, %693, %cst_414 {dimension_numbers = #tpu.dot_dimension_numbers<[1], [0], [0], [1], [0, 0, 1, 1], [], []>} : vector<16x4xbf16>, vector<4x16xbf16>, vector<16x16xf32> -> vector<16x16xf32>
    %c8_415 = arith.constant 8 : index
    %c0_416 = arith.constant 0 : index
    %c0_417 = arith.constant 0 : index
    %695 = vector.load %arg26[%c8_415, %c0_416, %c0_417] : memref<9x4x16xbf16, #tpu.memory_space<vmem>>, vector<1x4x16xbf16>
    %696 = vector.shape_cast %695 : vector<1x4x16xbf16> to vector<4x16xbf16>
    %cst_418 = arith.constant dense<0.000000e+00> : vector<16x16xf32>
    %697 = tpu.matmul %670, %696, %cst_418 {dimension_numbers = #tpu.dot_dimension_numbers<[1], [0], [0], [1], [0, 0, 1, 1], [], []>} : vector<16x4xbf16>, vector<4x16xbf16>, vector<16x16xf32> -> vector<16x16xf32>
    %698 = tpu.concatenate %673, %676, %679, %682, %685, %688, %691, %694, %697 in 0 : vector<16x16xf32>, vector<16x16xf32>, vector<16x16xf32>, vector<16x16xf32>, vector<16x16xf32>, vector<16x16xf32>, vector<16x16xf32>, vector<16x16xf32>, vector<16x16xf32> -> vector<144x16xf32>
    %699 = arith.truncf %698 : vector<144x16xf32> to vector<144x16xbf16>
    %c0_419 = arith.constant 0 : index
    %c0_420 = arith.constant 0 : index
    %700 = vector.load %arg12[%c0_419, %c0_420] : memref<16x144xbf16, #tpu.memory_space<vmem>>, vector<16x144xbf16>
    %cst_421 = arith.constant dense<0.000000e+00> : vector<16x16xf32>
    %701 = tpu.matmul %700, %699, %cst_421 {dimension_numbers = #tpu.dot_dimension_numbers<[1], [0], [0], [1], [0, 0, 1, 1], [], []>} : vector<16x144xbf16>, vector<144x16xbf16>, vector<16x16xf32> -> vector<16x16xf32>
    %cst_422 = arith.constant dense<0.000000e+00> : vector<16xf32>
    %702 = vector.multi_reduction <add>, %701, %cst_422 [1] : vector<16x16xf32> to vector<16xf32>
    %703 = vector.shape_cast %702 : vector<16xf32> to vector<16x1xf32>
    %cst_423 = arith.constant 6.250000e-02 : f32
    %704 = vector.broadcast %cst_423 : f32 to vector<16x1xf32>
    %705 = arith.mulf %703, %704 : vector<16x1xf32>
    %706 = arith.mulf %701, %701 : vector<16x16xf32>
    %cst_424 = arith.constant dense<0.000000e+00> : vector<16xf32>
    %707 = vector.multi_reduction <add>, %706, %cst_424 [1] : vector<16x16xf32> to vector<16xf32>
    %708 = vector.shape_cast %707 : vector<16xf32> to vector<16x1xf32>
    %cst_425 = arith.constant 6.250000e-02 : f32
    %709 = vector.broadcast %cst_425 : f32 to vector<16x1xf32>
    %710 = arith.mulf %708, %709 : vector<16x1xf32>
    %711 = arith.mulf %705, %705 : vector<16x1xf32>
    %712 = arith.subf %710, %711 : vector<16x1xf32>
    %713 = vector.broadcast %705 : vector<16x1xf32> to vector<16x16xf32>
    %714 = arith.subf %701, %713 : vector<16x16xf32>
    %cst_426 = arith.constant 0.000000e+00 : f32
    %715 = vector.broadcast %cst_426 : f32 to vector<16x1xf32>
    %716 = arith.maximumf %712, %715 : vector<16x1xf32>
    %cst_427 = arith.constant 9.99999974E-6 : f32
    %717 = vector.broadcast %cst_427 : f32 to vector<16x1xf32>
    %718 = arith.addf %716, %717 : vector<16x1xf32>
    %719 = math.rsqrt %718 : vector<16x1xf32>
    %720 = vector.broadcast %719 : vector<16x1xf32> to vector<16x16xf32>
    %721 = arith.mulf %714, %720 : vector<16x16xf32>
    %722 = arith.addf %721, %533 : vector<16x16xf32>
    %cst_428 = arith.constant 0.000000e+00 : f32
    %723 = vector.broadcast %cst_428 : f32 to vector<16x16xf32>
    %724 = arith.maximumf %722, %723 : vector<16x16xf32>
    %725 = arith.truncf %724 : vector<16x16xf32> to vector<16x16xbf16>
    %c0_429 = arith.constant 0 : index
    %c0_430 = arith.constant 0 : index
    %c0_431 = arith.constant 0 : index
    %726 = vector.load %arg27[%c0_429, %c0_430, %c0_431] : memref<9x16x64xbf16, #tpu.memory_space<vmem>>, vector<1x16x64xbf16>
    %727 = vector.shape_cast %726 : vector<1x16x64xbf16> to vector<16x64xbf16>
    %cst_432 = arith.constant dense<0.000000e+00> : vector<16x64xf32>
    %728 = tpu.matmul %725, %727, %cst_432 {dimension_numbers = #tpu.dot_dimension_numbers<[1], [0], [0], [1], [0, 0, 1, 1], [], []>} : vector<16x16xbf16>, vector<16x64xbf16>, vector<16x64xf32> -> vector<16x64xf32>
    %c1_433 = arith.constant 1 : index
    %c0_434 = arith.constant 0 : index
    %c0_435 = arith.constant 0 : index
    %729 = vector.load %arg27[%c1_433, %c0_434, %c0_435] : memref<9x16x64xbf16, #tpu.memory_space<vmem>>, vector<1x16x64xbf16>
    %730 = vector.shape_cast %729 : vector<1x16x64xbf16> to vector<16x64xbf16>
    %cst_436 = arith.constant dense<0.000000e+00> : vector<16x64xf32>
    %731 = tpu.matmul %725, %730, %cst_436 {dimension_numbers = #tpu.dot_dimension_numbers<[1], [0], [0], [1], [0, 0, 1, 1], [], []>} : vector<16x16xbf16>, vector<16x64xbf16>, vector<16x64xf32> -> vector<16x64xf32>
    %c2_437 = arith.constant 2 : index
    %c0_438 = arith.constant 0 : index
    %c0_439 = arith.constant 0 : index
    %732 = vector.load %arg27[%c2_437, %c0_438, %c0_439] : memref<9x16x64xbf16, #tpu.memory_space<vmem>>, vector<1x16x64xbf16>
    %733 = vector.shape_cast %732 : vector<1x16x64xbf16> to vector<16x64xbf16>
    %cst_440 = arith.constant dense<0.000000e+00> : vector<16x64xf32>
    %734 = tpu.matmul %725, %733, %cst_440 {dimension_numbers = #tpu.dot_dimension_numbers<[1], [0], [0], [1], [0, 0, 1, 1], [], []>} : vector<16x16xbf16>, vector<16x64xbf16>, vector<16x64xf32> -> vector<16x64xf32>
    %c3_441 = arith.constant 3 : index
    %c0_442 = arith.constant 0 : index
    %c0_443 = arith.constant 0 : index
    %735 = vector.load %arg27[%c3_441, %c0_442, %c0_443] : memref<9x16x64xbf16, #tpu.memory_space<vmem>>, vector<1x16x64xbf16>
    %736 = vector.shape_cast %735 : vector<1x16x64xbf16> to vector<16x64xbf16>
    %cst_444 = arith.constant dense<0.000000e+00> : vector<16x64xf32>
    %737 = tpu.matmul %725, %736, %cst_444 {dimension_numbers = #tpu.dot_dimension_numbers<[1], [0], [0], [1], [0, 0, 1, 1], [], []>} : vector<16x16xbf16>, vector<16x64xbf16>, vector<16x64xf32> -> vector<16x64xf32>
    %c4_445 = arith.constant 4 : index
    %c0_446 = arith.constant 0 : index
    %c0_447 = arith.constant 0 : index
    %738 = vector.load %arg27[%c4_445, %c0_446, %c0_447] : memref<9x16x64xbf16, #tpu.memory_space<vmem>>, vector<1x16x64xbf16>
    %739 = vector.shape_cast %738 : vector<1x16x64xbf16> to vector<16x64xbf16>
    %cst_448 = arith.constant dense<0.000000e+00> : vector<16x64xf32>
    %740 = tpu.matmul %725, %739, %cst_448 {dimension_numbers = #tpu.dot_dimension_numbers<[1], [0], [0], [1], [0, 0, 1, 1], [], []>} : vector<16x16xbf16>, vector<16x64xbf16>, vector<16x64xf32> -> vector<16x64xf32>
    %c5_449 = arith.constant 5 : index
    %c0_450 = arith.constant 0 : index
    %c0_451 = arith.constant 0 : index
    %741 = vector.load %arg27[%c5_449, %c0_450, %c0_451] : memref<9x16x64xbf16, #tpu.memory_space<vmem>>, vector<1x16x64xbf16>
    %742 = vector.shape_cast %741 : vector<1x16x64xbf16> to vector<16x64xbf16>
    %cst_452 = arith.constant dense<0.000000e+00> : vector<16x64xf32>
    %743 = tpu.matmul %725, %742, %cst_452 {dimension_numbers = #tpu.dot_dimension_numbers<[1], [0], [0], [1], [0, 0, 1, 1], [], []>} : vector<16x16xbf16>, vector<16x64xbf16>, vector<16x64xf32> -> vector<16x64xf32>
    %c6_453 = arith.constant 6 : index
    %c0_454 = arith.constant 0 : index
    %c0_455 = arith.constant 0 : index
    %744 = vector.load %arg27[%c6_453, %c0_454, %c0_455] : memref<9x16x64xbf16, #tpu.memory_space<vmem>>, vector<1x16x64xbf16>
    %745 = vector.shape_cast %744 : vector<1x16x64xbf16> to vector<16x64xbf16>
    %cst_456 = arith.constant dense<0.000000e+00> : vector<16x64xf32>
    %746 = tpu.matmul %725, %745, %cst_456 {dimension_numbers = #tpu.dot_dimension_numbers<[1], [0], [0], [1], [0, 0, 1, 1], [], []>} : vector<16x16xbf16>, vector<16x64xbf16>, vector<16x64xf32> -> vector<16x64xf32>
    %c7_457 = arith.constant 7 : index
    %c0_458 = arith.constant 0 : index
    %c0_459 = arith.constant 0 : index
    %747 = vector.load %arg27[%c7_457, %c0_458, %c0_459] : memref<9x16x64xbf16, #tpu.memory_space<vmem>>, vector<1x16x64xbf16>
    %748 = vector.shape_cast %747 : vector<1x16x64xbf16> to vector<16x64xbf16>
    %cst_460 = arith.constant dense<0.000000e+00> : vector<16x64xf32>
    %749 = tpu.matmul %725, %748, %cst_460 {dimension_numbers = #tpu.dot_dimension_numbers<[1], [0], [0], [1], [0, 0, 1, 1], [], []>} : vector<16x16xbf16>, vector<16x64xbf16>, vector<16x64xf32> -> vector<16x64xf32>
    %c8_461 = arith.constant 8 : index
    %c0_462 = arith.constant 0 : index
    %c0_463 = arith.constant 0 : index
    %750 = vector.load %arg27[%c8_461, %c0_462, %c0_463] : memref<9x16x64xbf16, #tpu.memory_space<vmem>>, vector<1x16x64xbf16>
    %751 = vector.shape_cast %750 : vector<1x16x64xbf16> to vector<16x64xbf16>
    %cst_464 = arith.constant dense<0.000000e+00> : vector<16x64xf32>
    %752 = tpu.matmul %725, %751, %cst_464 {dimension_numbers = #tpu.dot_dimension_numbers<[1], [0], [0], [1], [0, 0, 1, 1], [], []>} : vector<16x16xbf16>, vector<16x64xbf16>, vector<16x64xf32> -> vector<16x64xf32>
    %753 = tpu.concatenate %728, %731, %734, %737, %740, %743, %746, %749, %752 in 0 : vector<16x64xf32>, vector<16x64xf32>, vector<16x64xf32>, vector<16x64xf32>, vector<16x64xf32>, vector<16x64xf32>, vector<16x64xf32>, vector<16x64xf32>, vector<16x64xf32> -> vector<144x64xf32>
    %754 = arith.truncf %753 : vector<144x64xf32> to vector<144x64xbf16>
    %c0_465 = arith.constant 0 : index
    %c0_466 = arith.constant 0 : index
    %755 = vector.load %arg13[%c0_465, %c0_466] : memref<8x144xbf16, #tpu.memory_space<vmem>>, vector<8x144xbf16>
    %cst_467 = arith.constant dense<0.000000e+00> : vector<8x64xf32>
    %756 = tpu.matmul %755, %754, %cst_467 {dimension_numbers = #tpu.dot_dimension_numbers<[1], [0], [0], [1], [0, 0, 1, 1], [], []>} : vector<8x144xbf16>, vector<144x64xbf16>, vector<8x64xf32> -> vector<8x64xf32>
    %cst_468 = arith.constant dense<0.000000e+00> : vector<8xf32>
    %757 = vector.multi_reduction <add>, %756, %cst_468 [1] : vector<8x64xf32> to vector<8xf32>
    %758 = vector.shape_cast %757 : vector<8xf32> to vector<8x1xf32>
    %cst_469 = arith.constant 1.562500e-02 : f32
    %759 = vector.broadcast %cst_469 : f32 to vector<8x1xf32>
    %760 = arith.mulf %758, %759 : vector<8x1xf32>
    %761 = arith.mulf %756, %756 : vector<8x64xf32>
    %cst_470 = arith.constant dense<0.000000e+00> : vector<8xf32>
    %762 = vector.multi_reduction <add>, %761, %cst_470 [1] : vector<8x64xf32> to vector<8xf32>
    %763 = vector.shape_cast %762 : vector<8xf32> to vector<8x1xf32>
    %cst_471 = arith.constant 1.562500e-02 : f32
    %764 = vector.broadcast %cst_471 : f32 to vector<8x1xf32>
    %765 = arith.mulf %763, %764 : vector<8x1xf32>
    %766 = arith.mulf %760, %760 : vector<8x1xf32>
    %767 = arith.subf %765, %766 : vector<8x1xf32>
    %768 = vector.broadcast %760 : vector<8x1xf32> to vector<8x64xf32>
    %769 = arith.subf %756, %768 : vector<8x64xf32>
    %cst_472 = arith.constant 0.000000e+00 : f32
    %770 = vector.broadcast %cst_472 : f32 to vector<8x1xf32>
    %771 = arith.maximumf %767, %770 : vector<8x1xf32>
    %cst_473 = arith.constant 9.99999974E-6 : f32
    %772 = vector.broadcast %cst_473 : f32 to vector<8x1xf32>
    %773 = arith.addf %771, %772 : vector<8x1xf32>
    %774 = math.rsqrt %773 : vector<8x1xf32>
    %775 = vector.broadcast %774 : vector<8x1xf32> to vector<8x64xf32>
    %776 = arith.mulf %769, %775 : vector<8x64xf32>
    %777 = arith.addf %776, %397 : vector<8x64xf32>
    %cst_474 = arith.constant 0.000000e+00 : f32
    %778 = vector.broadcast %cst_474 : f32 to vector<8x64xf32>
    %779 = arith.maximumf %777, %778 : vector<8x64xf32>
    %c0_475 = arith.constant 0 : index
    %c0_476 = arith.constant 0 : index
    %c0_477 = arith.constant 0 : index
    %780 = vector.load %arg28[%c0_475, %c0_476, %c0_477] : memref<1x64x256xbf16, #tpu.memory_space<vmem>>, vector<1x64x256xbf16>
    %781 = vector.shape_cast %780 : vector<1x64x256xbf16> to vector<64x256xbf16>
    %782 = arith.truncf %779 : vector<8x64xf32> to vector<8x64xbf16>
    %cst_478 = arith.constant dense<0.000000e+00> : vector<8x256xf32>
    %783 = tpu.matmul %782, %781, %cst_478 {dimension_numbers = #tpu.dot_dimension_numbers<[1], [0], [0], [1], [0, 0, 1, 1], [], []>} : vector<8x64xbf16>, vector<64x256xbf16>, vector<8x256xf32> -> vector<8x256xf32>
    %cst_479 = arith.constant 0.000000e+00 : f32
    %784 = vector.broadcast %cst_479 : f32 to vector<4x256xf32>
    %c17_i32_480 = arith.constant 17 : i32
    %785 = tpu.dynamic_rotate %783 by %c17_i32_480 dim 1 : vector<8x256xf32>, i32 -> vector<8x256xf32>
    %c0_481 = arith.constant 0 : index
    %c0_482 = arith.constant 0 : index
    %786 = vector.load %arg17[%c0_481, %c0_482] : memref<9x256xf32, #tpu.memory_space<vmem>>, vector<1x256xf32>
    %787 = vector.broadcast %786 : vector<1x256xf32> to vector<8x256xf32>
    %788 = arith.mulf %785, %787 : vector<8x256xf32>
    %c16_i32_483 = arith.constant 16 : i32
    %789 = tpu.dynamic_rotate %783 by %c16_i32_483 dim 1 : vector<8x256xf32>, i32 -> vector<8x256xf32>
    %c1_484 = arith.constant 1 : index
    %c0_485 = arith.constant 0 : index
    %790 = vector.load %arg17[%c1_484, %c0_485] : memref<9x256xf32, #tpu.memory_space<vmem>>, vector<1x256xf32>
    %791 = vector.broadcast %790 : vector<1x256xf32> to vector<8x256xf32>
    %792 = arith.mulf %789, %791 : vector<8x256xf32>
    %c15_i32_486 = arith.constant 15 : i32
    %793 = tpu.dynamic_rotate %783 by %c15_i32_486 dim 1 : vector<8x256xf32>, i32 -> vector<8x256xf32>
    %c2_487 = arith.constant 2 : index
    %c0_488 = arith.constant 0 : index
    %794 = vector.load %arg17[%c2_487, %c0_488] : memref<9x256xf32, #tpu.memory_space<vmem>>, vector<1x256xf32>
    %795 = vector.broadcast %794 : vector<1x256xf32> to vector<8x256xf32>
    %796 = arith.mulf %793, %795 : vector<8x256xf32>
    %c1_i32_489 = arith.constant 1 : i32
    %797 = tpu.dynamic_rotate %783 by %c1_i32_489 dim 1 : vector<8x256xf32>, i32 -> vector<8x256xf32>
    %c3_490 = arith.constant 3 : index
    %c0_491 = arith.constant 0 : index
    %798 = vector.load %arg17[%c3_490, %c0_491] : memref<9x256xf32, #tpu.memory_space<vmem>>, vector<1x256xf32>
    %799 = vector.broadcast %798 : vector<1x256xf32> to vector<8x256xf32>
    %800 = arith.mulf %797, %799 : vector<8x256xf32>
    %c255_i32_492 = arith.constant 255 : i32
    %801 = tpu.dynamic_rotate %783 by %c255_i32_492 dim 1 : vector<8x256xf32>, i32 -> vector<8x256xf32>
    %c5_493 = arith.constant 5 : index
    %c0_494 = arith.constant 0 : index
    %802 = vector.load %arg17[%c5_493, %c0_494] : memref<9x256xf32, #tpu.memory_space<vmem>>, vector<1x256xf32>
    %803 = vector.broadcast %802 : vector<1x256xf32> to vector<8x256xf32>
    %804 = arith.mulf %801, %803 : vector<8x256xf32>
    %c241_i32_495 = arith.constant 241 : i32
    %805 = tpu.dynamic_rotate %783 by %c241_i32_495 dim 1 : vector<8x256xf32>, i32 -> vector<8x256xf32>
    %c6_496 = arith.constant 6 : index
    %c0_497 = arith.constant 0 : index
    %806 = vector.load %arg17[%c6_496, %c0_497] : memref<9x256xf32, #tpu.memory_space<vmem>>, vector<1x256xf32>
    %807 = vector.broadcast %806 : vector<1x256xf32> to vector<8x256xf32>
    %808 = arith.mulf %805, %807 : vector<8x256xf32>
    %c240_i32_498 = arith.constant 240 : i32
    %809 = tpu.dynamic_rotate %783 by %c240_i32_498 dim 1 : vector<8x256xf32>, i32 -> vector<8x256xf32>
    %c7_499 = arith.constant 7 : index
    %c0_500 = arith.constant 0 : index
    %810 = vector.load %arg17[%c7_499, %c0_500] : memref<9x256xf32, #tpu.memory_space<vmem>>, vector<1x256xf32>
    %811 = vector.broadcast %810 : vector<1x256xf32> to vector<8x256xf32>
    %812 = arith.mulf %809, %811 : vector<8x256xf32>
    %c239_i32_501 = arith.constant 239 : i32
    %813 = tpu.dynamic_rotate %783 by %c239_i32_501 dim 1 : vector<8x256xf32>, i32 -> vector<8x256xf32>
    %c8_502 = arith.constant 8 : index
    %c0_503 = arith.constant 0 : index
    %814 = vector.load %arg17[%c8_502, %c0_503] : memref<9x256xf32, #tpu.memory_space<vmem>>, vector<1x256xf32>
    %815 = vector.broadcast %814 : vector<1x256xf32> to vector<8x256xf32>
    %816 = arith.mulf %813, %815 : vector<8x256xf32>
    %817 = tpu.concatenate %788, %792, %796, %800, %783, %804, %808, %812, %816 in 0 : vector<8x256xf32>, vector<8x256xf32>, vector<8x256xf32>, vector<8x256xf32>, vector<8x256xf32>, vector<8x256xf32>, vector<8x256xf32>, vector<8x256xf32>, vector<8x256xf32> -> vector<72x256xf32>
    %818 = arith.truncf %817 : vector<72x256xf32> to vector<72x256xbf16>
    %c0_504 = arith.constant 0 : index
    %c0_505 = arith.constant 0 : index
    %819 = vector.load %arg14[%c0_504, %c0_505] : memref<4x72xbf16, #tpu.memory_space<vmem>>, vector<4x72xbf16>
    %cst_506 = arith.constant dense<0.000000e+00> : vector<4x256xf32>
    %820 = tpu.matmul %819, %818, %cst_506 {dimension_numbers = #tpu.dot_dimension_numbers<[1], [0], [0], [1], [0, 0, 1, 1], [], []>} : vector<4x72xbf16>, vector<72x256xbf16>, vector<4x256xf32> -> vector<4x256xf32>
    %821 = arith.addf %784, %820 : vector<4x256xf32>
    %cst_507 = arith.constant dense<0.000000e+00> : vector<4xf32>
    %822 = vector.multi_reduction <add>, %821, %cst_507 [1] : vector<4x256xf32> to vector<4xf32>
    %823 = vector.shape_cast %822 : vector<4xf32> to vector<4x1xf32>
    %cst_508 = arith.constant 3.906250e-03 : f32
    %824 = vector.broadcast %cst_508 : f32 to vector<4x1xf32>
    %825 = arith.mulf %823, %824 : vector<4x1xf32>
    %826 = arith.mulf %821, %821 : vector<4x256xf32>
    %cst_509 = arith.constant dense<0.000000e+00> : vector<4xf32>
    %827 = vector.multi_reduction <add>, %826, %cst_509 [1] : vector<4x256xf32> to vector<4xf32>
    %828 = vector.shape_cast %827 : vector<4xf32> to vector<4x1xf32>
    %cst_510 = arith.constant 3.906250e-03 : f32
    %829 = vector.broadcast %cst_510 : f32 to vector<4x1xf32>
    %830 = arith.mulf %828, %829 : vector<4x1xf32>
    %831 = arith.mulf %825, %825 : vector<4x1xf32>
    %832 = arith.subf %830, %831 : vector<4x1xf32>
    %833 = vector.broadcast %825 : vector<4x1xf32> to vector<4x256xf32>
    %834 = arith.subf %821, %833 : vector<4x256xf32>
    %cst_511 = arith.constant 0.000000e+00 : f32
    %835 = vector.broadcast %cst_511 : f32 to vector<4x1xf32>
    %836 = arith.maximumf %832, %835 : vector<4x1xf32>
    %cst_512 = arith.constant 9.99999974E-6 : f32
    %837 = vector.broadcast %cst_512 : f32 to vector<4x1xf32>
    %838 = arith.addf %836, %837 : vector<4x1xf32>
    %839 = math.rsqrt %838 : vector<4x1xf32>
    %840 = vector.broadcast %839 : vector<4x1xf32> to vector<4x256xf32>
    %841 = arith.mulf %834, %840 : vector<4x256xf32>
    %842 = arith.addf %841, %251 : vector<4x256xf32>
    %cst_513 = arith.constant 0.000000e+00 : f32
    %843 = vector.broadcast %cst_513 : f32 to vector<4x256xf32>
    %844 = arith.maximumf %842, %843 : vector<4x256xf32>
    %cst_514 = arith.constant 0.000000e+00 : f32
    %845 = vector.broadcast %cst_514 : f32 to vector<3x256xf32>
    %c51_i32_515 = arith.constant 51 : i32
    %846 = tpu.dynamic_rotate %844 by %c51_i32_515 dim 1 : vector<4x256xf32>, i32 -> vector<4x256xf32>
    %c0_516 = arith.constant 0 : index
    %c0_517 = arith.constant 0 : index
    %847 = vector.load %arg16[%c0_516, %c0_517] : memref<49x256xf32, #tpu.memory_space<vmem>>, vector<1x256xf32>
    %848 = vector.broadcast %847 : vector<1x256xf32> to vector<4x256xf32>
    %849 = arith.mulf %846, %848 : vector<4x256xf32>
    %c50_i32_518 = arith.constant 50 : i32
    %850 = tpu.dynamic_rotate %844 by %c50_i32_518 dim 1 : vector<4x256xf32>, i32 -> vector<4x256xf32>
    %c1_519 = arith.constant 1 : index
    %c0_520 = arith.constant 0 : index
    %851 = vector.load %arg16[%c1_519, %c0_520] : memref<49x256xf32, #tpu.memory_space<vmem>>, vector<1x256xf32>
    %852 = vector.broadcast %851 : vector<1x256xf32> to vector<4x256xf32>
    %853 = arith.mulf %850, %852 : vector<4x256xf32>
    %c49_i32_521 = arith.constant 49 : i32
    %854 = tpu.dynamic_rotate %844 by %c49_i32_521 dim 1 : vector<4x256xf32>, i32 -> vector<4x256xf32>
    %c2_522 = arith.constant 2 : index
    %c0_523 = arith.constant 0 : index
    %855 = vector.load %arg16[%c2_522, %c0_523] : memref<49x256xf32, #tpu.memory_space<vmem>>, vector<1x256xf32>
    %856 = vector.broadcast %855 : vector<1x256xf32> to vector<4x256xf32>
    %857 = arith.mulf %854, %856 : vector<4x256xf32>
    %c48_i32_524 = arith.constant 48 : i32
    %858 = tpu.dynamic_rotate %844 by %c48_i32_524 dim 1 : vector<4x256xf32>, i32 -> vector<4x256xf32>
    %c3_525 = arith.constant 3 : index
    %c0_526 = arith.constant 0 : index
    %859 = vector.load %arg16[%c3_525, %c0_526] : memref<49x256xf32, #tpu.memory_space<vmem>>, vector<1x256xf32>
    %860 = vector.broadcast %859 : vector<1x256xf32> to vector<4x256xf32>
    %861 = arith.mulf %858, %860 : vector<4x256xf32>
    %c47_i32_527 = arith.constant 47 : i32
    %862 = tpu.dynamic_rotate %844 by %c47_i32_527 dim 1 : vector<4x256xf32>, i32 -> vector<4x256xf32>
    %c4_528 = arith.constant 4 : index
    %c0_529 = arith.constant 0 : index
    %863 = vector.load %arg16[%c4_528, %c0_529] : memref<49x256xf32, #tpu.memory_space<vmem>>, vector<1x256xf32>
    %864 = vector.broadcast %863 : vector<1x256xf32> to vector<4x256xf32>
    %865 = arith.mulf %862, %864 : vector<4x256xf32>
    %c46_i32_530 = arith.constant 46 : i32
    %866 = tpu.dynamic_rotate %844 by %c46_i32_530 dim 1 : vector<4x256xf32>, i32 -> vector<4x256xf32>
    %c5_531 = arith.constant 5 : index
    %c0_532 = arith.constant 0 : index
    %867 = vector.load %arg16[%c5_531, %c0_532] : memref<49x256xf32, #tpu.memory_space<vmem>>, vector<1x256xf32>
    %868 = vector.broadcast %867 : vector<1x256xf32> to vector<4x256xf32>
    %869 = arith.mulf %866, %868 : vector<4x256xf32>
    %c45_i32_533 = arith.constant 45 : i32
    %870 = tpu.dynamic_rotate %844 by %c45_i32_533 dim 1 : vector<4x256xf32>, i32 -> vector<4x256xf32>
    %c6_534 = arith.constant 6 : index
    %c0_535 = arith.constant 0 : index
    %871 = vector.load %arg16[%c6_534, %c0_535] : memref<49x256xf32, #tpu.memory_space<vmem>>, vector<1x256xf32>
    %872 = vector.broadcast %871 : vector<1x256xf32> to vector<4x256xf32>
    %873 = arith.mulf %870, %872 : vector<4x256xf32>
    %874 = tpu.concatenate %849, %853, %857, %861, %865, %869, %873 in 0 : vector<4x256xf32>, vector<4x256xf32>, vector<4x256xf32>, vector<4x256xf32>, vector<4x256xf32>, vector<4x256xf32>, vector<4x256xf32> -> vector<28x256xf32>
    %875 = arith.truncf %874 : vector<28x256xf32> to vector<28x256xbf16>
    %c0_536 = arith.constant 0 : index
    %c0_537 = arith.constant 0 : index
    %876 = vector.load %arg15[%c0_536, %c0_537] : memref<3x196xbf16, #tpu.memory_space<vmem>>, vector<3x28xbf16>
    %cst_538 = arith.constant dense<0.000000e+00> : vector<3x256xf32>
    %877 = tpu.matmul %876, %875, %cst_538 {dimension_numbers = #tpu.dot_dimension_numbers<[1], [0], [0], [1], [0, 0, 1, 1], [], []>} : vector<3x28xbf16>, vector<28x256xbf16>, vector<3x256xf32> -> vector<3x256xf32>
    %878 = arith.addf %845, %877 : vector<3x256xf32>
    %c35_i32_539 = arith.constant 35 : i32
    %879 = tpu.dynamic_rotate %844 by %c35_i32_539 dim 1 : vector<4x256xf32>, i32 -> vector<4x256xf32>
    %c7_540 = arith.constant 7 : index
    %c0_541 = arith.constant 0 : index
    %880 = vector.load %arg16[%c7_540, %c0_541] : memref<49x256xf32, #tpu.memory_space<vmem>>, vector<1x256xf32>
    %881 = vector.broadcast %880 : vector<1x256xf32> to vector<4x256xf32>
    %882 = arith.mulf %879, %881 : vector<4x256xf32>
    %c34_i32_542 = arith.constant 34 : i32
    %883 = tpu.dynamic_rotate %844 by %c34_i32_542 dim 1 : vector<4x256xf32>, i32 -> vector<4x256xf32>
    %c8_543 = arith.constant 8 : index
    %c0_544 = arith.constant 0 : index
    %884 = vector.load %arg16[%c8_543, %c0_544] : memref<49x256xf32, #tpu.memory_space<vmem>>, vector<1x256xf32>
    %885 = vector.broadcast %884 : vector<1x256xf32> to vector<4x256xf32>
    %886 = arith.mulf %883, %885 : vector<4x256xf32>
    %c33_i32_545 = arith.constant 33 : i32
    %887 = tpu.dynamic_rotate %844 by %c33_i32_545 dim 1 : vector<4x256xf32>, i32 -> vector<4x256xf32>
    %c9_546 = arith.constant 9 : index
    %c0_547 = arith.constant 0 : index
    %888 = vector.load %arg16[%c9_546, %c0_547] : memref<49x256xf32, #tpu.memory_space<vmem>>, vector<1x256xf32>
    %889 = vector.broadcast %888 : vector<1x256xf32> to vector<4x256xf32>
    %890 = arith.mulf %887, %889 : vector<4x256xf32>
    %c32_i32_548 = arith.constant 32 : i32
    %891 = tpu.dynamic_rotate %844 by %c32_i32_548 dim 1 : vector<4x256xf32>, i32 -> vector<4x256xf32>
    %c10_549 = arith.constant 10 : index
    %c0_550 = arith.constant 0 : index
    %892 = vector.load %arg16[%c10_549, %c0_550] : memref<49x256xf32, #tpu.memory_space<vmem>>, vector<1x256xf32>
    %893 = vector.broadcast %892 : vector<1x256xf32> to vector<4x256xf32>
    %894 = arith.mulf %891, %893 : vector<4x256xf32>
    %c31_i32_551 = arith.constant 31 : i32
    %895 = tpu.dynamic_rotate %844 by %c31_i32_551 dim 1 : vector<4x256xf32>, i32 -> vector<4x256xf32>
    %c11_552 = arith.constant 11 : index
    %c0_553 = arith.constant 0 : index
    %896 = vector.load %arg16[%c11_552, %c0_553] : memref<49x256xf32, #tpu.memory_space<vmem>>, vector<1x256xf32>
    %897 = vector.broadcast %896 : vector<1x256xf32> to vector<4x256xf32>
    %898 = arith.mulf %895, %897 : vector<4x256xf32>
    %c30_i32_554 = arith.constant 30 : i32
    %899 = tpu.dynamic_rotate %844 by %c30_i32_554 dim 1 : vector<4x256xf32>, i32 -> vector<4x256xf32>
    %c12_555 = arith.constant 12 : index
    %c0_556 = arith.constant 0 : index
    %900 = vector.load %arg16[%c12_555, %c0_556] : memref<49x256xf32, #tpu.memory_space<vmem>>, vector<1x256xf32>
    %901 = vector.broadcast %900 : vector<1x256xf32> to vector<4x256xf32>
    %902 = arith.mulf %899, %901 : vector<4x256xf32>
    %c29_i32_557 = arith.constant 29 : i32
    %903 = tpu.dynamic_rotate %844 by %c29_i32_557 dim 1 : vector<4x256xf32>, i32 -> vector<4x256xf32>
    %c13_558 = arith.constant 13 : index
    %c0_559 = arith.constant 0 : index
    %904 = vector.load %arg16[%c13_558, %c0_559] : memref<49x256xf32, #tpu.memory_space<vmem>>, vector<1x256xf32>
    %905 = vector.broadcast %904 : vector<1x256xf32> to vector<4x256xf32>
    %906 = arith.mulf %903, %905 : vector<4x256xf32>
    %907 = tpu.concatenate %882, %886, %890, %894, %898, %902, %906 in 0 : vector<4x256xf32>, vector<4x256xf32>, vector<4x256xf32>, vector<4x256xf32>, vector<4x256xf32>, vector<4x256xf32>, vector<4x256xf32> -> vector<28x256xf32>
    %908 = arith.truncf %907 : vector<28x256xf32> to vector<28x256xbf16>
    %c0_560 = arith.constant 0 : index
    %c28_561 = arith.constant 28 : index
    %909 = vector.load %arg15[%c0_560, %c28_561] : memref<3x196xbf16, #tpu.memory_space<vmem>>, vector<3x28xbf16>
    %cst_562 = arith.constant dense<0.000000e+00> : vector<3x256xf32>
    %910 = tpu.matmul %909, %908, %cst_562 {dimension_numbers = #tpu.dot_dimension_numbers<[1], [0], [0], [1], [0, 0, 1, 1], [], []>} : vector<3x28xbf16>, vector<28x256xbf16>, vector<3x256xf32> -> vector<3x256xf32>
    %911 = arith.addf %878, %910 : vector<3x256xf32>
    %c19_i32_563 = arith.constant 19 : i32
    %912 = tpu.dynamic_rotate %844 by %c19_i32_563 dim 1 : vector<4x256xf32>, i32 -> vector<4x256xf32>
    %c14_564 = arith.constant 14 : index
    %c0_565 = arith.constant 0 : index
    %913 = vector.load %arg16[%c14_564, %c0_565] : memref<49x256xf32, #tpu.memory_space<vmem>>, vector<1x256xf32>
    %914 = vector.broadcast %913 : vector<1x256xf32> to vector<4x256xf32>
    %915 = arith.mulf %912, %914 : vector<4x256xf32>
    %c18_i32_566 = arith.constant 18 : i32
    %916 = tpu.dynamic_rotate %844 by %c18_i32_566 dim 1 : vector<4x256xf32>, i32 -> vector<4x256xf32>
    %c15_567 = arith.constant 15 : index
    %c0_568 = arith.constant 0 : index
    %917 = vector.load %arg16[%c15_567, %c0_568] : memref<49x256xf32, #tpu.memory_space<vmem>>, vector<1x256xf32>
    %918 = vector.broadcast %917 : vector<1x256xf32> to vector<4x256xf32>
    %919 = arith.mulf %916, %918 : vector<4x256xf32>
    %c17_i32_569 = arith.constant 17 : i32
    %920 = tpu.dynamic_rotate %844 by %c17_i32_569 dim 1 : vector<4x256xf32>, i32 -> vector<4x256xf32>
    %c16_570 = arith.constant 16 : index
    %c0_571 = arith.constant 0 : index
    %921 = vector.load %arg16[%c16_570, %c0_571] : memref<49x256xf32, #tpu.memory_space<vmem>>, vector<1x256xf32>
    %922 = vector.broadcast %921 : vector<1x256xf32> to vector<4x256xf32>
    %923 = arith.mulf %920, %922 : vector<4x256xf32>
    %c16_i32_572 = arith.constant 16 : i32
    %924 = tpu.dynamic_rotate %844 by %c16_i32_572 dim 1 : vector<4x256xf32>, i32 -> vector<4x256xf32>
    %c17_573 = arith.constant 17 : index
    %c0_574 = arith.constant 0 : index
    %925 = vector.load %arg16[%c17_573, %c0_574] : memref<49x256xf32, #tpu.memory_space<vmem>>, vector<1x256xf32>
    %926 = vector.broadcast %925 : vector<1x256xf32> to vector<4x256xf32>
    %927 = arith.mulf %924, %926 : vector<4x256xf32>
    %c15_i32_575 = arith.constant 15 : i32
    %928 = tpu.dynamic_rotate %844 by %c15_i32_575 dim 1 : vector<4x256xf32>, i32 -> vector<4x256xf32>
    %c18_576 = arith.constant 18 : index
    %c0_577 = arith.constant 0 : index
    %929 = vector.load %arg16[%c18_576, %c0_577] : memref<49x256xf32, #tpu.memory_space<vmem>>, vector<1x256xf32>
    %930 = vector.broadcast %929 : vector<1x256xf32> to vector<4x256xf32>
    %931 = arith.mulf %928, %930 : vector<4x256xf32>
    %c14_i32_578 = arith.constant 14 : i32
    %932 = tpu.dynamic_rotate %844 by %c14_i32_578 dim 1 : vector<4x256xf32>, i32 -> vector<4x256xf32>
    %c19_579 = arith.constant 19 : index
    %c0_580 = arith.constant 0 : index
    %933 = vector.load %arg16[%c19_579, %c0_580] : memref<49x256xf32, #tpu.memory_space<vmem>>, vector<1x256xf32>
    %934 = vector.broadcast %933 : vector<1x256xf32> to vector<4x256xf32>
    %935 = arith.mulf %932, %934 : vector<4x256xf32>
    %c13_i32_581 = arith.constant 13 : i32
    %936 = tpu.dynamic_rotate %844 by %c13_i32_581 dim 1 : vector<4x256xf32>, i32 -> vector<4x256xf32>
    %c20_582 = arith.constant 20 : index
    %c0_583 = arith.constant 0 : index
    %937 = vector.load %arg16[%c20_582, %c0_583] : memref<49x256xf32, #tpu.memory_space<vmem>>, vector<1x256xf32>
    %938 = vector.broadcast %937 : vector<1x256xf32> to vector<4x256xf32>
    %939 = arith.mulf %936, %938 : vector<4x256xf32>
    %940 = tpu.concatenate %915, %919, %923, %927, %931, %935, %939 in 0 : vector<4x256xf32>, vector<4x256xf32>, vector<4x256xf32>, vector<4x256xf32>, vector<4x256xf32>, vector<4x256xf32>, vector<4x256xf32> -> vector<28x256xf32>
    %941 = arith.truncf %940 : vector<28x256xf32> to vector<28x256xbf16>
    %c0_584 = arith.constant 0 : index
    %c56 = arith.constant 56 : index
    %942 = vector.load %arg15[%c0_584, %c56] : memref<3x196xbf16, #tpu.memory_space<vmem>>, vector<3x28xbf16>
    %cst_585 = arith.constant dense<0.000000e+00> : vector<3x256xf32>
    %943 = tpu.matmul %942, %941, %cst_585 {dimension_numbers = #tpu.dot_dimension_numbers<[1], [0], [0], [1], [0, 0, 1, 1], [], []>} : vector<3x28xbf16>, vector<28x256xbf16>, vector<3x256xf32> -> vector<3x256xf32>
    %944 = arith.addf %911, %943 : vector<3x256xf32>
    %c3_i32_586 = arith.constant 3 : i32
    %945 = tpu.dynamic_rotate %844 by %c3_i32_586 dim 1 : vector<4x256xf32>, i32 -> vector<4x256xf32>
    %c21_587 = arith.constant 21 : index
    %c0_588 = arith.constant 0 : index
    %946 = vector.load %arg16[%c21_587, %c0_588] : memref<49x256xf32, #tpu.memory_space<vmem>>, vector<1x256xf32>
    %947 = vector.broadcast %946 : vector<1x256xf32> to vector<4x256xf32>
    %948 = arith.mulf %945, %947 : vector<4x256xf32>
    %c2_i32_589 = arith.constant 2 : i32
    %949 = tpu.dynamic_rotate %844 by %c2_i32_589 dim 1 : vector<4x256xf32>, i32 -> vector<4x256xf32>
    %c22_590 = arith.constant 22 : index
    %c0_591 = arith.constant 0 : index
    %950 = vector.load %arg16[%c22_590, %c0_591] : memref<49x256xf32, #tpu.memory_space<vmem>>, vector<1x256xf32>
    %951 = vector.broadcast %950 : vector<1x256xf32> to vector<4x256xf32>
    %952 = arith.mulf %949, %951 : vector<4x256xf32>
    %c1_i32_592 = arith.constant 1 : i32
    %953 = tpu.dynamic_rotate %844 by %c1_i32_592 dim 1 : vector<4x256xf32>, i32 -> vector<4x256xf32>
    %c23_593 = arith.constant 23 : index
    %c0_594 = arith.constant 0 : index
    %954 = vector.load %arg16[%c23_593, %c0_594] : memref<49x256xf32, #tpu.memory_space<vmem>>, vector<1x256xf32>
    %955 = vector.broadcast %954 : vector<1x256xf32> to vector<4x256xf32>
    %956 = arith.mulf %953, %955 : vector<4x256xf32>
    %c255_i32_595 = arith.constant 255 : i32
    %957 = tpu.dynamic_rotate %844 by %c255_i32_595 dim 1 : vector<4x256xf32>, i32 -> vector<4x256xf32>
    %c25_596 = arith.constant 25 : index
    %c0_597 = arith.constant 0 : index
    %958 = vector.load %arg16[%c25_596, %c0_597] : memref<49x256xf32, #tpu.memory_space<vmem>>, vector<1x256xf32>
    %959 = vector.broadcast %958 : vector<1x256xf32> to vector<4x256xf32>
    %960 = arith.mulf %957, %959 : vector<4x256xf32>
    %c254_i32_598 = arith.constant 254 : i32
    %961 = tpu.dynamic_rotate %844 by %c254_i32_598 dim 1 : vector<4x256xf32>, i32 -> vector<4x256xf32>
    %c26_599 = arith.constant 26 : index
    %c0_600 = arith.constant 0 : index
    %962 = vector.load %arg16[%c26_599, %c0_600] : memref<49x256xf32, #tpu.memory_space<vmem>>, vector<1x256xf32>
    %963 = vector.broadcast %962 : vector<1x256xf32> to vector<4x256xf32>
    %964 = arith.mulf %961, %963 : vector<4x256xf32>
    %c253_i32_601 = arith.constant 253 : i32
    %965 = tpu.dynamic_rotate %844 by %c253_i32_601 dim 1 : vector<4x256xf32>, i32 -> vector<4x256xf32>
    %c27_602 = arith.constant 27 : index
    %c0_603 = arith.constant 0 : index
    %966 = vector.load %arg16[%c27_602, %c0_603] : memref<49x256xf32, #tpu.memory_space<vmem>>, vector<1x256xf32>
    %967 = vector.broadcast %966 : vector<1x256xf32> to vector<4x256xf32>
    %968 = arith.mulf %965, %967 : vector<4x256xf32>
    %969 = tpu.concatenate %948, %952, %956, %844, %960, %964, %968 in 0 : vector<4x256xf32>, vector<4x256xf32>, vector<4x256xf32>, vector<4x256xf32>, vector<4x256xf32>, vector<4x256xf32>, vector<4x256xf32> -> vector<28x256xf32>
    %970 = arith.truncf %969 : vector<28x256xf32> to vector<28x256xbf16>
    %c0_604 = arith.constant 0 : index
    %c84_605 = arith.constant 84 : index
    %971 = vector.load %arg15[%c0_604, %c84_605] : memref<3x196xbf16, #tpu.memory_space<vmem>>, vector<3x28xbf16>
    %cst_606 = arith.constant dense<0.000000e+00> : vector<3x256xf32>
    %972 = tpu.matmul %971, %970, %cst_606 {dimension_numbers = #tpu.dot_dimension_numbers<[1], [0], [0], [1], [0, 0, 1, 1], [], []>} : vector<3x28xbf16>, vector<28x256xbf16>, vector<3x256xf32> -> vector<3x256xf32>
    %973 = arith.addf %944, %972 : vector<3x256xf32>
    %c243_i32_607 = arith.constant 243 : i32
    %974 = tpu.dynamic_rotate %844 by %c243_i32_607 dim 1 : vector<4x256xf32>, i32 -> vector<4x256xf32>
    %c28_608 = arith.constant 28 : index
    %c0_609 = arith.constant 0 : index
    %975 = vector.load %arg16[%c28_608, %c0_609] : memref<49x256xf32, #tpu.memory_space<vmem>>, vector<1x256xf32>
    %976 = vector.broadcast %975 : vector<1x256xf32> to vector<4x256xf32>
    %977 = arith.mulf %974, %976 : vector<4x256xf32>
    %c242_i32_610 = arith.constant 242 : i32
    %978 = tpu.dynamic_rotate %844 by %c242_i32_610 dim 1 : vector<4x256xf32>, i32 -> vector<4x256xf32>
    %c29_611 = arith.constant 29 : index
    %c0_612 = arith.constant 0 : index
    %979 = vector.load %arg16[%c29_611, %c0_612] : memref<49x256xf32, #tpu.memory_space<vmem>>, vector<1x256xf32>
    %980 = vector.broadcast %979 : vector<1x256xf32> to vector<4x256xf32>
    %981 = arith.mulf %978, %980 : vector<4x256xf32>
    %c241_i32_613 = arith.constant 241 : i32
    %982 = tpu.dynamic_rotate %844 by %c241_i32_613 dim 1 : vector<4x256xf32>, i32 -> vector<4x256xf32>
    %c30_614 = arith.constant 30 : index
    %c0_615 = arith.constant 0 : index
    %983 = vector.load %arg16[%c30_614, %c0_615] : memref<49x256xf32, #tpu.memory_space<vmem>>, vector<1x256xf32>
    %984 = vector.broadcast %983 : vector<1x256xf32> to vector<4x256xf32>
    %985 = arith.mulf %982, %984 : vector<4x256xf32>
    %c240_i32_616 = arith.constant 240 : i32
    %986 = tpu.dynamic_rotate %844 by %c240_i32_616 dim 1 : vector<4x256xf32>, i32 -> vector<4x256xf32>
    %c31_617 = arith.constant 31 : index
    %c0_618 = arith.constant 0 : index
    %987 = vector.load %arg16[%c31_617, %c0_618] : memref<49x256xf32, #tpu.memory_space<vmem>>, vector<1x256xf32>
    %988 = vector.broadcast %987 : vector<1x256xf32> to vector<4x256xf32>
    %989 = arith.mulf %986, %988 : vector<4x256xf32>
    %c239_i32_619 = arith.constant 239 : i32
    %990 = tpu.dynamic_rotate %844 by %c239_i32_619 dim 1 : vector<4x256xf32>, i32 -> vector<4x256xf32>
    %c32_620 = arith.constant 32 : index
    %c0_621 = arith.constant 0 : index
    %991 = vector.load %arg16[%c32_620, %c0_621] : memref<49x256xf32, #tpu.memory_space<vmem>>, vector<1x256xf32>
    %992 = vector.broadcast %991 : vector<1x256xf32> to vector<4x256xf32>
    %993 = arith.mulf %990, %992 : vector<4x256xf32>
    %c238_i32_622 = arith.constant 238 : i32
    %994 = tpu.dynamic_rotate %844 by %c238_i32_622 dim 1 : vector<4x256xf32>, i32 -> vector<4x256xf32>
    %c33_623 = arith.constant 33 : index
    %c0_624 = arith.constant 0 : index
    %995 = vector.load %arg16[%c33_623, %c0_624] : memref<49x256xf32, #tpu.memory_space<vmem>>, vector<1x256xf32>
    %996 = vector.broadcast %995 : vector<1x256xf32> to vector<4x256xf32>
    %997 = arith.mulf %994, %996 : vector<4x256xf32>
    %c237_i32_625 = arith.constant 237 : i32
    %998 = tpu.dynamic_rotate %844 by %c237_i32_625 dim 1 : vector<4x256xf32>, i32 -> vector<4x256xf32>
    %c34_626 = arith.constant 34 : index
    %c0_627 = arith.constant 0 : index
    %999 = vector.load %arg16[%c34_626, %c0_627] : memref<49x256xf32, #tpu.memory_space<vmem>>, vector<1x256xf32>
    %1000 = vector.broadcast %999 : vector<1x256xf32> to vector<4x256xf32>
    %1001 = arith.mulf %998, %1000 : vector<4x256xf32>
    %1002 = tpu.concatenate %977, %981, %985, %989, %993, %997, %1001 in 0 : vector<4x256xf32>, vector<4x256xf32>, vector<4x256xf32>, vector<4x256xf32>, vector<4x256xf32>, vector<4x256xf32>, vector<4x256xf32> -> vector<28x256xf32>
    %1003 = arith.truncf %1002 : vector<28x256xf32> to vector<28x256xbf16>
    %c0_628 = arith.constant 0 : index
    %c112 = arith.constant 112 : index
    %1004 = vector.load %arg15[%c0_628, %c112] : memref<3x196xbf16, #tpu.memory_space<vmem>>, vector<3x28xbf16>
    %cst_629 = arith.constant dense<0.000000e+00> : vector<3x256xf32>
    %1005 = tpu.matmul %1004, %1003, %cst_629 {dimension_numbers = #tpu.dot_dimension_numbers<[1], [0], [0], [1], [0, 0, 1, 1], [], []>} : vector<3x28xbf16>, vector<28x256xbf16>, vector<3x256xf32> -> vector<3x256xf32>
    %1006 = arith.addf %973, %1005 : vector<3x256xf32>
    %c227_i32_630 = arith.constant 227 : i32
    %1007 = tpu.dynamic_rotate %844 by %c227_i32_630 dim 1 : vector<4x256xf32>, i32 -> vector<4x256xf32>
    %c35_631 = arith.constant 35 : index
    %c0_632 = arith.constant 0 : index
    %1008 = vector.load %arg16[%c35_631, %c0_632] : memref<49x256xf32, #tpu.memory_space<vmem>>, vector<1x256xf32>
    %1009 = vector.broadcast %1008 : vector<1x256xf32> to vector<4x256xf32>
    %1010 = arith.mulf %1007, %1009 : vector<4x256xf32>
    %c226_i32_633 = arith.constant 226 : i32
    %1011 = tpu.dynamic_rotate %844 by %c226_i32_633 dim 1 : vector<4x256xf32>, i32 -> vector<4x256xf32>
    %c36_634 = arith.constant 36 : index
    %c0_635 = arith.constant 0 : index
    %1012 = vector.load %arg16[%c36_634, %c0_635] : memref<49x256xf32, #tpu.memory_space<vmem>>, vector<1x256xf32>
    %1013 = vector.broadcast %1012 : vector<1x256xf32> to vector<4x256xf32>
    %1014 = arith.mulf %1011, %1013 : vector<4x256xf32>
    %c225_i32_636 = arith.constant 225 : i32
    %1015 = tpu.dynamic_rotate %844 by %c225_i32_636 dim 1 : vector<4x256xf32>, i32 -> vector<4x256xf32>
    %c37_637 = arith.constant 37 : index
    %c0_638 = arith.constant 0 : index
    %1016 = vector.load %arg16[%c37_637, %c0_638] : memref<49x256xf32, #tpu.memory_space<vmem>>, vector<1x256xf32>
    %1017 = vector.broadcast %1016 : vector<1x256xf32> to vector<4x256xf32>
    %1018 = arith.mulf %1015, %1017 : vector<4x256xf32>
    %c224_i32_639 = arith.constant 224 : i32
    %1019 = tpu.dynamic_rotate %844 by %c224_i32_639 dim 1 : vector<4x256xf32>, i32 -> vector<4x256xf32>
    %c38_640 = arith.constant 38 : index
    %c0_641 = arith.constant 0 : index
    %1020 = vector.load %arg16[%c38_640, %c0_641] : memref<49x256xf32, #tpu.memory_space<vmem>>, vector<1x256xf32>
    %1021 = vector.broadcast %1020 : vector<1x256xf32> to vector<4x256xf32>
    %1022 = arith.mulf %1019, %1021 : vector<4x256xf32>
    %c223_i32_642 = arith.constant 223 : i32
    %1023 = tpu.dynamic_rotate %844 by %c223_i32_642 dim 1 : vector<4x256xf32>, i32 -> vector<4x256xf32>
    %c39_643 = arith.constant 39 : index
    %c0_644 = arith.constant 0 : index
    %1024 = vector.load %arg16[%c39_643, %c0_644] : memref<49x256xf32, #tpu.memory_space<vmem>>, vector<1x256xf32>
    %1025 = vector.broadcast %1024 : vector<1x256xf32> to vector<4x256xf32>
    %1026 = arith.mulf %1023, %1025 : vector<4x256xf32>
    %c222_i32_645 = arith.constant 222 : i32
    %1027 = tpu.dynamic_rotate %844 by %c222_i32_645 dim 1 : vector<4x256xf32>, i32 -> vector<4x256xf32>
    %c40_646 = arith.constant 40 : index
    %c0_647 = arith.constant 0 : index
    %1028 = vector.load %arg16[%c40_646, %c0_647] : memref<49x256xf32, #tpu.memory_space<vmem>>, vector<1x256xf32>
    %1029 = vector.broadcast %1028 : vector<1x256xf32> to vector<4x256xf32>
    %1030 = arith.mulf %1027, %1029 : vector<4x256xf32>
    %c221_i32_648 = arith.constant 221 : i32
    %1031 = tpu.dynamic_rotate %844 by %c221_i32_648 dim 1 : vector<4x256xf32>, i32 -> vector<4x256xf32>
    %c41_649 = arith.constant 41 : index
    %c0_650 = arith.constant 0 : index
    %1032 = vector.load %arg16[%c41_649, %c0_650] : memref<49x256xf32, #tpu.memory_space<vmem>>, vector<1x256xf32>
    %1033 = vector.broadcast %1032 : vector<1x256xf32> to vector<4x256xf32>
    %1034 = arith.mulf %1031, %1033 : vector<4x256xf32>
    %1035 = tpu.concatenate %1010, %1014, %1018, %1022, %1026, %1030, %1034 in 0 : vector<4x256xf32>, vector<4x256xf32>, vector<4x256xf32>, vector<4x256xf32>, vector<4x256xf32>, vector<4x256xf32>, vector<4x256xf32> -> vector<28x256xf32>
    %1036 = arith.truncf %1035 : vector<28x256xf32> to vector<28x256xbf16>
    %c0_651 = arith.constant 0 : index
    %c140 = arith.constant 140 : index
    %1037 = vector.load %arg15[%c0_651, %c140] : memref<3x196xbf16, #tpu.memory_space<vmem>>, vector<3x28xbf16>
    %cst_652 = arith.constant dense<0.000000e+00> : vector<3x256xf32>
    %1038 = tpu.matmul %1037, %1036, %cst_652 {dimension_numbers = #tpu.dot_dimension_numbers<[1], [0], [0], [1], [0, 0, 1, 1], [], []>} : vector<3x28xbf16>, vector<28x256xbf16>, vector<3x256xf32> -> vector<3x256xf32>
    %1039 = arith.addf %1006, %1038 : vector<3x256xf32>
    %c211_i32_653 = arith.constant 211 : i32
    %1040 = tpu.dynamic_rotate %844 by %c211_i32_653 dim 1 : vector<4x256xf32>, i32 -> vector<4x256xf32>
    %c42_654 = arith.constant 42 : index
    %c0_655 = arith.constant 0 : index
    %1041 = vector.load %arg16[%c42_654, %c0_655] : memref<49x256xf32, #tpu.memory_space<vmem>>, vector<1x256xf32>
    %1042 = vector.broadcast %1041 : vector<1x256xf32> to vector<4x256xf32>
    %1043 = arith.mulf %1040, %1042 : vector<4x256xf32>
    %c210_i32_656 = arith.constant 210 : i32
    %1044 = tpu.dynamic_rotate %844 by %c210_i32_656 dim 1 : vector<4x256xf32>, i32 -> vector<4x256xf32>
    %c43_657 = arith.constant 43 : index
    %c0_658 = arith.constant 0 : index
    %1045 = vector.load %arg16[%c43_657, %c0_658] : memref<49x256xf32, #tpu.memory_space<vmem>>, vector<1x256xf32>
    %1046 = vector.broadcast %1045 : vector<1x256xf32> to vector<4x256xf32>
    %1047 = arith.mulf %1044, %1046 : vector<4x256xf32>
    %c209_i32_659 = arith.constant 209 : i32
    %1048 = tpu.dynamic_rotate %844 by %c209_i32_659 dim 1 : vector<4x256xf32>, i32 -> vector<4x256xf32>
    %c44_660 = arith.constant 44 : index
    %c0_661 = arith.constant 0 : index
    %1049 = vector.load %arg16[%c44_660, %c0_661] : memref<49x256xf32, #tpu.memory_space<vmem>>, vector<1x256xf32>
    %1050 = vector.broadcast %1049 : vector<1x256xf32> to vector<4x256xf32>
    %1051 = arith.mulf %1048, %1050 : vector<4x256xf32>
    %c208_i32_662 = arith.constant 208 : i32
    %1052 = tpu.dynamic_rotate %844 by %c208_i32_662 dim 1 : vector<4x256xf32>, i32 -> vector<4x256xf32>
    %c45_663 = arith.constant 45 : index
    %c0_664 = arith.constant 0 : index
    %1053 = vector.load %arg16[%c45_663, %c0_664] : memref<49x256xf32, #tpu.memory_space<vmem>>, vector<1x256xf32>
    %1054 = vector.broadcast %1053 : vector<1x256xf32> to vector<4x256xf32>
    %1055 = arith.mulf %1052, %1054 : vector<4x256xf32>
    %c207_i32_665 = arith.constant 207 : i32
    %1056 = tpu.dynamic_rotate %844 by %c207_i32_665 dim 1 : vector<4x256xf32>, i32 -> vector<4x256xf32>
    %c46_666 = arith.constant 46 : index
    %c0_667 = arith.constant 0 : index
    %1057 = vector.load %arg16[%c46_666, %c0_667] : memref<49x256xf32, #tpu.memory_space<vmem>>, vector<1x256xf32>
    %1058 = vector.broadcast %1057 : vector<1x256xf32> to vector<4x256xf32>
    %1059 = arith.mulf %1056, %1058 : vector<4x256xf32>
    %c206_i32_668 = arith.constant 206 : i32
    %1060 = tpu.dynamic_rotate %844 by %c206_i32_668 dim 1 : vector<4x256xf32>, i32 -> vector<4x256xf32>
    %c47_669 = arith.constant 47 : index
    %c0_670 = arith.constant 0 : index
    %1061 = vector.load %arg16[%c47_669, %c0_670] : memref<49x256xf32, #tpu.memory_space<vmem>>, vector<1x256xf32>
    %1062 = vector.broadcast %1061 : vector<1x256xf32> to vector<4x256xf32>
    %1063 = arith.mulf %1060, %1062 : vector<4x256xf32>
    %c205_i32_671 = arith.constant 205 : i32
    %1064 = tpu.dynamic_rotate %844 by %c205_i32_671 dim 1 : vector<4x256xf32>, i32 -> vector<4x256xf32>
    %c48_672 = arith.constant 48 : index
    %c0_673 = arith.constant 0 : index
    %1065 = vector.load %arg16[%c48_672, %c0_673] : memref<49x256xf32, #tpu.memory_space<vmem>>, vector<1x256xf32>
    %1066 = vector.broadcast %1065 : vector<1x256xf32> to vector<4x256xf32>
    %1067 = arith.mulf %1064, %1066 : vector<4x256xf32>
    %1068 = tpu.concatenate %1043, %1047, %1051, %1055, %1059, %1063, %1067 in 0 : vector<4x256xf32>, vector<4x256xf32>, vector<4x256xf32>, vector<4x256xf32>, vector<4x256xf32>, vector<4x256xf32>, vector<4x256xf32> -> vector<28x256xf32>
    %1069 = arith.truncf %1068 : vector<28x256xf32> to vector<28x256xbf16>
    %c0_674 = arith.constant 0 : index
    %c168 = arith.constant 168 : index
    %1070 = vector.load %arg15[%c0_674, %c168] : memref<3x196xbf16, #tpu.memory_space<vmem>>, vector<3x28xbf16>
    %cst_675 = arith.constant dense<0.000000e+00> : vector<3x256xf32>
    %1071 = tpu.matmul %1070, %1069, %cst_675 {dimension_numbers = #tpu.dot_dimension_numbers<[1], [0], [0], [1], [0, 0, 1, 1], [], []>} : vector<3x28xbf16>, vector<28x256xbf16>, vector<3x256xf32> -> vector<3x256xf32>
    %1072 = arith.addf %1039, %1071 : vector<3x256xf32>
    %cst_676 = arith.constant dense<0.000000e+00> : vector<3xf32>
    %1073 = vector.multi_reduction <add>, %1072, %cst_676 [1] : vector<3x256xf32> to vector<3xf32>
    %1074 = vector.shape_cast %1073 : vector<3xf32> to vector<3x1xf32>
    %cst_677 = arith.constant 3.906250e-03 : f32
    %1075 = vector.broadcast %cst_677 : f32 to vector<3x1xf32>
    %1076 = arith.mulf %1074, %1075 : vector<3x1xf32>
    %1077 = arith.mulf %1072, %1072 : vector<3x256xf32>
    %cst_678 = arith.constant dense<0.000000e+00> : vector<3xf32>
    %1078 = vector.multi_reduction <add>, %1077, %cst_678 [1] : vector<3x256xf32> to vector<3xf32>
    %1079 = vector.shape_cast %1078 : vector<3xf32> to vector<3x1xf32>
    %cst_679 = arith.constant 3.906250e-03 : f32
    %1080 = vector.broadcast %cst_679 : f32 to vector<3x1xf32>
    %1081 = arith.mulf %1079, %1080 : vector<3x1xf32>
    %1082 = arith.mulf %1076, %1076 : vector<3x1xf32>
    %1083 = arith.subf %1081, %1082 : vector<3x1xf32>
    %1084 = vector.broadcast %1076 : vector<3x1xf32> to vector<3x256xf32>
    %1085 = arith.subf %1072, %1084 : vector<3x256xf32>
    %cst_680 = arith.constant 0.000000e+00 : f32
    %1086 = vector.broadcast %cst_680 : f32 to vector<3x1xf32>
    %1087 = arith.maximumf %1083, %1086 : vector<3x1xf32>
    %cst_681 = arith.constant 9.99999974E-6 : f32
    %1088 = vector.broadcast %cst_681 : f32 to vector<3x1xf32>
    %1089 = arith.addf %1087, %1088 : vector<3x1xf32>
    %1090 = math.rsqrt %1089 : vector<3x1xf32>
    %1091 = vector.broadcast %1090 : vector<3x1xf32> to vector<3x256xf32>
    %1092 = arith.mulf %1085, %1091 : vector<3x256xf32>
    %1093 = math.tanh %1092 : vector<3x256xf32>
    %c0_682 = arith.constant 0 : index
    %c0_683 = arith.constant 0 : index
    %c0_684 = arith.constant 0 : index
    %1094 = vector.load %arg29[%c0_682, %c0_683, %c0_684] : memref<1x3x256xf32, #tpu.memory_space<vmem>>, vector<1x3x256xf32>
    %1095 = vector.shape_cast %1094 : vector<1x3x256xf32> to vector<3x256xf32>
    %1096 = vector.shape_cast %1093 : vector<3x256xf32> to vector<1x3x256xf32>
    tpu.vector_store %arg29[%c0_682, %c0_683, %c0_684], %1096 {strides = array<i32>} : memref<1x3x256xf32, #tpu.memory_space<vmem>>, vector<1x3x256xf32>,
    return
  }
  func.func @transform_0(%arg0: i32) -> (i32, i32, i32) {
    %c0_i32 = arith.constant 0 : i32
    %c0_i32_0 = arith.constant 0 : i32
    %c0_i32_1 = arith.constant 0 : i32
    return %arg0, %c0_i32, %c0_i32_0 : i32, i32, i32
  }
  func.func @transform_1(%arg0: i32) -> (i32, i32) {
    %c0_i32 = arith.constant 0 : i32
    %c0_i32_0 = arith.constant 0 : i32
    %c0_i32_1 = arith.constant 0 : i32
    return %c0_i32, %c0_i32_0 : i32, i32
  }
  func.func @transform_2(%arg0: i32) -> (i32, i32) {
    %c0_i32 = arith.constant 0 : i32
    %c0_i32_0 = arith.constant 0 : i32
    %c0_i32_1 = arith.constant 0 : i32
    return %c0_i32, %c0_i32_0 : i32, i32
  }
  func.func @transform_3(%arg0: i32) -> (i32, i32) {
    %c0_i32 = arith.constant 0 : i32
    %c0_i32_0 = arith.constant 0 : i32
    %c0_i32_1 = arith.constant 0 : i32
    return %c0_i32, %c0_i32_0 : i32, i32
  }
  func.func @transform_4(%arg0: i32) -> (i32, i32) {
    %c0_i32 = arith.constant 0 : i32
    %c0_i32_0 = arith.constant 0 : i32
    %c0_i32_1 = arith.constant 0 : i32
    return %c0_i32, %c0_i32_0 : i32, i32
  }
  func.func @transform_5(%arg0: i32) -> (i32, i32) {
    %c0_i32 = arith.constant 0 : i32
    %c0_i32_0 = arith.constant 0 : i32
    %c0_i32_1 = arith.constant 0 : i32
    return %c0_i32, %c0_i32_0 : i32, i32
  }
  func.func @transform_6(%arg0: i32) -> (i32, i32) {
    %c0_i32 = arith.constant 0 : i32
    %c0_i32_0 = arith.constant 0 : i32
    %c0_i32_1 = arith.constant 0 : i32
    return %c0_i32, %c0_i32_0 : i32, i32
  }
  func.func @transform_7(%arg0: i32) -> (i32, i32) {
    %c0_i32 = arith.constant 0 : i32
    %c0_i32_0 = arith.constant 0 : i32
    %c0_i32_1 = arith.constant 0 : i32
    return %c0_i32, %c0_i32_0 : i32, i32
  }
  func.func @transform_8(%arg0: i32) -> (i32, i32) {
    %c0_i32 = arith.constant 0 : i32
    %c0_i32_0 = arith.constant 0 : i32
    %c0_i32_1 = arith.constant 0 : i32
    return %c0_i32, %c0_i32_0 : i32, i32
  }
  func.func @transform_9(%arg0: i32) -> (i32, i32) {
    %c0_i32 = arith.constant 0 : i32
    %c0_i32_0 = arith.constant 0 : i32
    %c0_i32_1 = arith.constant 0 : i32
    return %c0_i32, %c0_i32_0 : i32, i32
  }
  func.func @transform_10(%arg0: i32) -> (i32, i32) {
    %c0_i32 = arith.constant 0 : i32
    %c0_i32_0 = arith.constant 0 : i32
    %c0_i32_1 = arith.constant 0 : i32
    return %c0_i32, %c0_i32_0 : i32, i32
  }
  func.func @transform_11(%arg0: i32) -> (i32, i32) {
    %c0_i32 = arith.constant 0 : i32
    %c0_i32_0 = arith.constant 0 : i32
    %c0_i32_1 = arith.constant 0 : i32
    return %c0_i32, %c0_i32_0 : i32, i32
  }
  func.func @transform_12(%arg0: i32) -> (i32, i32) {
    %c0_i32 = arith.constant 0 : i32
    %c0_i32_0 = arith.constant 0 : i32
    %c0_i32_1 = arith.constant 0 : i32
    return %c0_i32, %c0_i32_0 : i32, i32
  }
  func.func @transform_13(%arg0: i32) -> (i32, i32) {
    %c0_i32 = arith.constant 0 : i32
    %c0_i32_0 = arith.constant 0 : i32
    %c0_i32_1 = arith.constant 0 : i32
    return %c0_i32, %c0_i32_0 : i32, i32
  }
  func.func @transform_14(%arg0: i32) -> (i32, i32) {
    %c0_i32 = arith.constant 0 : i32
    %c0_i32_0 = arith.constant 0 : i32
    %c0_i32_1 = arith.constant 0 : i32
    return %c0_i32, %c0_i32_0 : i32, i32
  }
  func.func @transform_15(%arg0: i32) -> (i32, i32) {
    %c0_i32 = arith.constant 0 : i32
    %c0_i32_0 = arith.constant 0 : i32
    %c0_i32_1 = arith.constant 0 : i32
    return %c0_i32, %c0_i32_0 : i32, i32
  }
  func.func @transform_16(%arg0: i32) -> (i32, i32) {
    %c0_i32 = arith.constant 0 : i32
    %c0_i32_0 = arith.constant 0 : i32
    %c0_i32_1 = arith.constant 0 : i32
    return %c0_i32, %c0_i32_0 : i32, i32
  }
  func.func @transform_17(%arg0: i32) -> (i32, i32, i32) {
    %c0_i32 = arith.constant 0 : i32
    %c0_i32_0 = arith.constant 0 : i32
    %c0_i32_1 = arith.constant 0 : i32
    %c0_i32_2 = arith.constant 0 : i32
    return %c0_i32, %c0_i32_0, %c0_i32_1 : i32, i32, i32
  }
  func.func @transform_18(%arg0: i32) -> (i32, i32, i32) {
    %c0_i32 = arith.constant 0 : i32
    %c0_i32_0 = arith.constant 0 : i32
    %c0_i32_1 = arith.constant 0 : i32
    %c0_i32_2 = arith.constant 0 : i32
    return %c0_i32, %c0_i32_0, %c0_i32_1 : i32, i32, i32
  }
  func.func @transform_19(%arg0: i32) -> (i32, i32, i32) {
    %c0_i32 = arith.constant 0 : i32
    %c0_i32_0 = arith.constant 0 : i32
    %c0_i32_1 = arith.constant 0 : i32
    %c0_i32_2 = arith.constant 0 : i32
    return %c0_i32, %c0_i32_0, %c0_i32_1 : i32, i32, i32
  }
  func.func @transform_20(%arg0: i32) -> (i32, i32, i32) {
    %c0_i32 = arith.constant 0 : i32
    %c0_i32_0 = arith.constant 0 : i32
    %c0_i32_1 = arith.constant 0 : i32
    %c0_i32_2 = arith.constant 0 : i32
    return %c0_i32, %c0_i32_0, %c0_i32_1 : i32, i32, i32
  }
  func.func @transform_21(%arg0: i32) -> (i32, i32, i32) {
    %c0_i32 = arith.constant 0 : i32
    %c0_i32_0 = arith.constant 0 : i32
    %c0_i32_1 = arith.constant 0 : i32
    %c0_i32_2 = arith.constant 0 : i32
    return %c0_i32, %c0_i32_0, %c0_i32_1 : i32, i32, i32
  }
  func.func @transform_22(%arg0: i32) -> (i32, i32, i32) {
    %c0_i32 = arith.constant 0 : i32
    %c0_i32_0 = arith.constant 0 : i32
    %c0_i32_1 = arith.constant 0 : i32
    %c0_i32_2 = arith.constant 0 : i32
    return %c0_i32, %c0_i32_0, %c0_i32_1 : i32, i32, i32
  }
  func.func @transform_23(%arg0: i32) -> (i32, i32, i32) {
    %c0_i32 = arith.constant 0 : i32
    %c0_i32_0 = arith.constant 0 : i32
    %c0_i32_1 = arith.constant 0 : i32
    %c0_i32_2 = arith.constant 0 : i32
    return %c0_i32, %c0_i32_0, %c0_i32_1 : i32, i32, i32
  }
  func.func @transform_24(%arg0: i32) -> (i32, i32, i32) {
    %c0_i32 = arith.constant 0 : i32
    %c0_i32_0 = arith.constant 0 : i32
    %c0_i32_1 = arith.constant 0 : i32
    %c0_i32_2 = arith.constant 0 : i32
    return %c0_i32, %c0_i32_0, %c0_i32_1 : i32, i32, i32
  }
  func.func @transform_25(%arg0: i32) -> (i32, i32, i32) {
    %c0_i32 = arith.constant 0 : i32
    %c0_i32_0 = arith.constant 0 : i32
    %c0_i32_1 = arith.constant 0 : i32
    %c0_i32_2 = arith.constant 0 : i32
    return %c0_i32, %c0_i32_0, %c0_i32_1 : i32, i32, i32
  }
  func.func @transform_26(%arg0: i32) -> (i32, i32, i32) {
    %c0_i32 = arith.constant 0 : i32
    %c0_i32_0 = arith.constant 0 : i32
    %c0_i32_1 = arith.constant 0 : i32
    %c0_i32_2 = arith.constant 0 : i32
    return %c0_i32, %c0_i32_0, %c0_i32_1 : i32, i32, i32
  }
  func.func @transform_27(%arg0: i32) -> (i32, i32, i32) {
    %c0_i32 = arith.constant 0 : i32
    %c0_i32_0 = arith.constant 0 : i32
    %c0_i32_1 = arith.constant 0 : i32
    %c0_i32_2 = arith.constant 0 : i32
    return %c0_i32, %c0_i32_0, %c0_i32_1 : i32, i32, i32
  }
  func.func @transform_28(%arg0: i32) -> (i32, i32, i32) {
    %c0_i32 = arith.constant 0 : i32
    %c0_i32_0 = arith.constant 0 : i32
    %c0_i32_1 = arith.constant 0 : i32
    return %arg0, %c0_i32, %c0_i32_0 : i32, i32, i32
  }
}

</mosaic_0001>

<bundles_post_ra>
// kernel: autoencoder_forward.1
= control target key start
LH: loop header
LB: loop body
LE: loop exit
PB: predicated region body
PF: predicated region fallthrough
CT: control target
= control target key end

     0   :  { %s14845_s0 = inlined_call_operand.vmem [shape: f32[2,3,256], index: 0, kind: input, shape index: {}]   ;;  %s14846_s1 = inlined_call_operand.hbm [shape: bf16[4,147], index: 1, kind: input, shape index: {}]   ;;  %s14847_s2 = inlined_call_operand.hbm [shape: bf16[8,36], index: 2, kind: input, shape index: {}]   ;;  %s14848_s3 = inlined_call_operand.hbm [shape: bf16[8,72], index: 3, kind: input, shape index: {}]   ;;  %s14849_s4 = inlined_call_operand.vmem [shape: bf16[8,4], index: 4, kind: input, shape index: {}]   ;;  %s14850_s5 = inlined_call_operand.vmem [shape: bf16[16,72], index: 5, kind: input, shape index: {}]   ;;  %s14851_s6 = inlined_call_operand.vmem [shape: bf16[16,144], index: 6, kind: input, shape index: {}]   ;;  %s14852_s7 = inlined_call_operand.vmem [shape: bf16[16,8], index: 7, kind: input, shape index: {}]   ;;  %s14853_s8 = inlined_call_operand.vmem [shape: bf16[16,144], index: 8, kind: input, shape index: {}]   ;;  %s14854_s9 = inlined_call_operand.hbm [shape: bf16[16,144], index: 9, kind: input, shape index: {}]   ;;  %s14855_s10 = inlined_call_operand.hbm [shape: bf16[16,16], index: 10, kind: input, shape index: {}]   ;;  %s14856_s11 = inlined_call_operand.hbm [shape: bf16[16,144], index: 11, kind: input, shape index: {}]   ;;  %s14857_s12 = inlined_call_operand.hbm [shape: bf16[8,144], index: 12, kind: input, shape index: {}]   ;;  %s14858_s13 = inlined_call_operand.vmem [shape: bf16[4,72], index: 13, kind: input, shape index: {}]   ;;  %s14859_s14 = inlined_call_operand.hbm [shape: bf16[3,196], index: 14, kind: input, shape index: {}]   ;;  %s14860_s15 = inlined_call_operand.vmem [shape: f32[49,256], index: 15, kind: input, shape index: {}]   ;;  %s14861_s16 = inlined_call_operand.vmem [shape: f32[9,256], index: 16, kind: input, shape index: {}]   ;;  %s14862_s17 = inlined_call_operand.vmem [shape: bf16[1,256,64], index: 17, kind: input, shape index: {}]   ;;  %s14863_s18 = inlined_call_operand.vmem [shape: bf16[9,64,64], index: 18, kind: input, shape index: {}]   ;;  %s14864_s19 = inlined_call_operand.vmem [shape: bf16[9,64,16], index: 19, kind: input, shape index: {}]   ;;  %s14865_s20 = inlined_call_operand.vmem [shape: bf16[1,64,16], index: 20, kind: input, shape index: {}]   ;;  %s14866_s21 = inlined_call_operand.vmem [shape: bf16[9,16,16], index: 21, kind: input, shape index: {}]   ;;  %s14867_s22 = inlined_call_operand.vmem [shape: bf16[9,16,4], index: 22, kind: input, shape index: {}]   ;;  %s14868_s23 = inlined_call_operand.vmem [shape: bf16[1,16,4], index: 23, kind: input, shape index: {}]   ;;  %s14869_s24 = inlined_call_operand.vmem [shape: bf16[9,4,4], index: 24, kind: input, shape index: {}]   ;;  %s14870_s25 = inlined_call_operand.vmem [shape: bf16[9,4,16], index: 25, kind: input, shape index: {}]   ;;  %s14871_s26 = inlined_call_operand.vmem [shape: bf16[9,16,64], index: 26, kind: input, shape index: {}]   ;;  %s14872_s27 = inlined_call_operand.vmem [shape: bf16[1,64,256], index: 27, kind: input, shape index: {}]   ;;  %s14873_s28 = inlined_call_operand.vmem [shape: f32[2,3,256], index: 28, kind: output, shape index: {}]  }
   0x1   :  { %15125 = sst [smem:[#allocation109_spill]] %s14845_s0 }
   0x2   :  { %15126 = sst [smem:[#allocation110_spill]] %s14846_s1 }
   0x3   :  { %15127 = sst [smem:[#allocation111_spill]] %s14847_s2 }
   0x4   :  { %15128 = sst [smem:[#allocation112_spill]] %s14848_s3 }
   0x5   :  { %15129 = sst [smem:[#allocation113_spill]] %s14849_s4 }
   0x6   :  { %15130 = sst [smem:[#allocation114_spill]] %s14850_s5 }
   0x7   :  { %15131 = sst [smem:[#allocation115_spill]] %s14851_s6 }
   0x8   :  { %15132 = sst [smem:[#allocation116_spill]] %s14852_s7 }
   0x9   :  { %15133 = sst [smem:[#allocation117_spill]] %s14853_s8 }
   0xa   :  { %15134 = sst [smem:[#allocation118_spill]] %s14854_s9 }
   0xb   :  { %15135 = sst [smem:[#allocation119_spill]] %s14855_s10 }
   0xc   :  { %15136 = sst [smem:[#allocation120_spill]] %s14856_s11 }
   0xd   :  { %15137 = sst [smem:[#allocation121_spill]] %s14857_s12 }
   0xe   :  { %15138 = sst [smem:[#allocation122_spill]] %s14858_s13 }
   0xf   :  { %15139 = sst [smem:[#allocation123_spill]] %s14868_s23 }
  0x10   :  { %15140 = sst [smem:[#allocation124_spill]] %s14869_s24 }
  0x11   :  { %15141 = sst [smem:[#allocation125_spill]] %s14870_s25 }
  0x12   :  { %15142 = sst [smem:[#allocation126_spill]] %s14871_s26 }
  0x13   :  { %15143 = sst [smem:[#allocation127_spill]] %s14872_s27 }
  0x14   :  { %15144 = sst [smem:[#allocation128_spill]] %s14873_s28 }
  0x15   :  { %33 = vsyncpa [#allocation3], 0 }
  0x16   :  { %34 = vsyncpa [#allocation5], 0 }
  0x17   :  { %35 = vsyncpa [#allocation8], 0 }
  0x18   :  { %36 = vsyncpa [#allocation11], 0 }
  0x19   :  { %37 = vsyncpa [#allocation14], 0  ;;  %s11457_s8 = smov 0  }
  0x1a LB: > { %15145 = sst [smem:[#allocation20_spill]] %s11236_s8  ;;  %s11238_s5 = smov [#allocation4]   ;;  %s11236_s8 = sphi %s11457_s8, %s43_s8  }
  0x1b   : > { %s691_s9 = sshll.u32 %s11238_s5, 4  ;;  %s11463_s30 = sadd.s32 4294967295, %s11236_s8   ;;  %s11468_s9 = int_to_ptr.vmem [resolvable:$true] %s691_s9 }
  0x1c   : > { %p9263_p0 = scmp.ge.s32.totalorder %s11236_s8, 1  ;;  %p667_p1 = scmp.lt.s32.totalorder %s11236_s8, 3 }
  0x1d   : > { %p14888_p2 = scmp.eq.s32.totalorder %s11463_s30, 0  ;;  %s11239_s6 = smov [#allocation7]  }
  0x1e   : > { %p11470_p3 = pnand %p9263_p0, %p667_p1  ;;  %s727_s10 = sshll.u32 %s11239_s6, 4  ;;  %s11476_s10 = int_to_ptr.vmem [resolvable:$true] %s727_s10 }
  0x1f   : > { %s11240_s11 = smov [#allocation10]   ;;  %s11241_s2 = smov [#allocation2]  }
  0x20   : > { %s15146_s3 = scalar_select %p11470_p3, 1, 0 }
  0x21   : > { %p10665_p4 = pneg %p11470_p3  ;;  %s753_s29 = sshll.u32 %s11240_s11, 4  ;;  %s11484_s29 = int_to_ptr.vmem [resolvable:$true] %s753_s29 }
  0x22   : > { %s11486_s7 = sshll.u32 %s11241_s2, 4  ;;  %s15148_s4 = sld [smem:[#allocation111_spill]]  ;;  %s681_s7 = int_to_ptr.vmem [resolvable:$true] %s11486_s7 }
  0x23   : > { %p11480_p5 = pnand %p14888_p2, %p10665_p4 }
  0x25   : > { %p11496_p7 = pneg %p11480_p5 }
  0x28   : > { %s10986_s5 = scalar_lea.hbm %s15148_s4, 64 }
  0x29   : > { %p10987_p6 = scmp.ne.s32.totalorder %s15148_s4, %s10986_s5  ;;  %p10993_p10 = scmp.lt.u32.totalorder %s10986_s5, %s15148_s4 }
  0x2b   : > { %p10989_p8 = pnand %p11496_p7, %p10987_p6 }
  0x2d   : > { %p10990_p9 = pneg %p10989_p8 }
  0x2f   : > { %p10995_p11 = pnand %p10993_p10, %p10990_p9 }
  0x31   : > { %10998 = shalt.err (!%p10995_p11)
}
  0x32   : > { %s10999_s8 = scalar_lea.vmem %s11468_s9, 64  ;;  %p11007_p1 = scmp.lt.s32.totalorder %s11468_s9, %s11468_s9 }
  0x33   : > { %p11000_p12 = scmp.ne.s32.totalorder %s11468_s9, %s10999_s8  ;;  %p11008_p4 = scmp.lt.s32.totalorder %s10999_s8, %s10999_s8 }
  0x35   : > { %p11002_p13 = pnand %p11000_p12, %p11496_p7  ;;  %p11009_p6 = por %p11008_p4, %p11007_p1 }
  0x37   : > { %p11003_p0 = pneg %p11002_p13 }
  0x39   : > { %p11010_p8 = pnand %p11009_p6, %p11003_p0 }
  0x3b   : > { %11013 = shalt.err (!%p11010_p8)
}
  0x3c   : > { %10671 = dma.hbm_to_vmem [thread:$0]  (!%p11480_p5), %s15148_s4, 64, %s11468_s9, [#allocation5]  }
  0x3d   : > { %s15150_s11 = sld [smem:[#allocation118_spill]] }
  0x43   : > { %s11014_s2 = scalar_lea.hbm %s15150_s11, 256 }
  0x44   : > { %p11015_p9 = scmp.ne.s32.totalorder %s15150_s11, %s11014_s2  ;;  %p11021_p12 = scmp.lt.u32.totalorder %s11014_s2, %s15150_s11 }
  0x46   : > { %p11017_p10 = pnand %p11015_p9, %p11496_p7 }
  0x48   : > { %p11018_p11 = pneg %p11017_p10 }
  0x4a   : > { %p11023_p13 = pnand %p11021_p12, %p11018_p11 }
  0x4c   : > { %11026 = shalt.err (!%p11023_p13)
}
  0x4d   : > { %s11027_s9 = scalar_lea.vmem %s11476_s10, 256  ;;  %p11035_p6 = scmp.lt.s32.totalorder %s11476_s10, %s11476_s10 }
  0x4e   : > { %p11028_p0 = scmp.ne.s32.totalorder %s11476_s10, %s11027_s9  ;;  %p11036_p8 = scmp.lt.s32.totalorder %s11027_s9, %s11027_s9 }
  0x50   : > { %p11030_p1 = pnand %p11028_p0, %p11496_p7  ;;  %p11037_p9 = por %p11036_p8, %p11035_p6 }
  0x52   : > { %p11031_p4 = pneg %p11030_p1 }
  0x54   : > { %p11038_p10 = pnand %p11037_p9, %p11031_p4 }
  0x56   : > { %11041 = shalt.err (!%p11038_p10)
}
  0x57   : > { %s11242_s13 = smov 128   ;;  %s11243_s26 = smov 8  }
  0x58   : > { %10677 = dma.hbm_to_vmem [thread:$0]  (!%p11480_p5), %s15150_s11, 256, %s11476_s10, [#allocation8], %s11242_s13, %s11242_s13, %s11243_s26  }
  0x59   : > { %s15151_s6 = sld [smem:[#allocation120_spill]] }
  0x5f   : > { %s11042_s2 = scalar_lea.hbm %s15151_s6, 256 }
  0x60   : > { %p11043_p11 = scmp.ne.s32.totalorder %s15151_s6, %s11042_s2  ;;  %p11049_p0 = scmp.lt.u32.totalorder %s11042_s2, %s15151_s6 }
  0x62   : > { %p11045_p12 = pnand %p11043_p11, %p11496_p7 }
  0x64   : > { %p11046_p13 = pneg %p11045_p12 }
  0x66   : > { %p11051_p1 = pnand %p11049_p0, %p11046_p13 }
  0x68   : > { %11054 = shalt.err (!%p11051_p1)
}
  0x69   : > { %s11055_s10 = scalar_lea.vmem %s11484_s29, 256  ;;  %p11063_p9 = scmp.lt.s32.totalorder %s11484_s29, %s11484_s29 }
  0x6a   : > { %p11056_p4 = scmp.ne.s32.totalorder %s11484_s29, %s11055_s10  ;;  %p11064_p10 = scmp.lt.s32.totalorder %s11055_s10, %s11055_s10 }
  0x6c   : > { %p11058_p6 = pnand %p11056_p4, %p11496_p7  ;;  %p11065_p11 = por %p11064_p10, %p11063_p9 }
  0x6e   : > { %p11059_p8 = pneg %p11058_p6 }
  0x70   : > { %p11066_p12 = pnand %p11065_p11, %p11059_p8 }
  0x72   : > { %11069 = shalt.err (!%p11066_p12)
}
  0x73   : > { %10683 = dma.hbm_to_vmem [thread:$0]  (!%p11480_p5), %s15151_s6, 256, %s11484_s29, [#allocation11], %s11242_s13, %s11242_s13, %s11243_s26  }
  0x74   : > { %s15152_s1 = sld [smem:[#allocation110_spill]] }
  0x7a   : > { %s11070_s5 = scalar_lea.hbm %s15152_s1, 64 }
  0x7b   : > { %p11071_p13 = scmp.ne.s32.totalorder %s15152_s1, %s11070_s5  ;;  %p11077_p4 = scmp.lt.u32.totalorder %s11070_s5, %s15152_s1 }
  0x7d   : > { %p11073_p0 = pnand %p11071_p13, %p11496_p7 }
  0x7f   : > { %p11074_p1 = pneg %p11073_p0 }
  0x81   : > { %p11079_p6 = pnand %p11077_p4, %p11074_p1 }
  0x83   : > { %11082 = shalt.err (!%p11079_p6)
}
  0x84   : > { %s11083_s25 = scalar_lea.vmem %s681_s7, 64  ;;  %p11091_p11 = scmp.lt.s32.totalorder %s681_s7, %s681_s7 }
  0x85   : > { %p11084_p8 = scmp.ne.s32.totalorder %s681_s7, %s11083_s25  ;;  %p11092_p12 = scmp.lt.s32.totalorder %s11083_s25, %s11083_s25 }
  0x87   : > { %p11086_p9 = pnand %p11084_p8, %p11496_p7  ;;  %p11093_p2 = por %p11092_p12, %p11091_p11 }
  0x89   : > { %p11087_p10 = pneg %p11086_p9 }
  0x8b   : > { %p11094_p3 = pnand %p11093_p2, %p11087_p10 }
  0x8d   : > { %11097 = shalt.err (!%p11094_p3)
}
  0x8e   : > { %10668 = dma.hbm_to_vmem [thread:$0]  (!%p11480_p5), %s15152_s1, 64, %s681_s7, [#allocation3]  }
  0x8f   : > { %s11244_s26 = smov [#allocation6]   ;;  %s11245_s27 = smov [#allocation9]  }
  0x90   : > { %s702_s4 = sshll.u32 %s11244_s26, 4  ;;  %s740_s12 = sshll.u32 %s11245_s27, 4  ;;  %s703_s4 = int_to_ptr.vmem [resolvable:$true] %s702_s4  ;;  %s741_s12 = int_to_ptr.vmem [resolvable:$true] %s740_s12 }
  0x91   : > { %s15153_s8 = sld [smem:[#allocation112_spill]] }
  0x97   : > { %s15154_s9 = smov %s15153_s8  ;;  %s11098_s10 = scalar_lea.hbm %s15153_s8, 64 }
  0x98   : > { %p11099_p2 = scmp.ne.s32.totalorder %s15154_s9, %s11098_s10  ;;  %p11105_p0 = scmp.lt.u32.totalorder %s11098_s10, %s15154_s9 }
  0x9a   : > { %p11101_p3 = pnand %p11099_p2, %p11496_p7 }
  0x9c   : > { %p11102_p13 = pneg %p11101_p3 }
  0x9e   : > { %p11107_p1 = pnand %p11105_p0, %p11102_p13 }
  0xa0   : > { %11110 = shalt.err (!%p11107_p1)
}
  0xa1   : > { %s11111_s7 = scalar_lea.vmem %s703_s4, 64  ;;  %p11119_p9 = scmp.lt.s32.totalorder %s703_s4, %s703_s4 }
  0xa2   : > { %p11112_p4 = scmp.ne.s32.totalorder %s703_s4, %s11111_s7  ;;  %p11120_p10 = scmp.lt.s32.totalorder %s11111_s7, %s11111_s7 }
  0xa4   : > { %p11114_p6 = pnand %p11112_p4, %p11496_p7  ;;  %p11121_p11 = por %p11120_p10, %p11119_p9 }
  0xa6   : > { %p11115_p8 = pneg %p11114_p6 }
  0xa8   : > { %p11122_p12 = pnand %p11121_p11, %p11115_p8 }
  0xaa   : > { %11125 = shalt.err (!%p11122_p12)
}
  0xab   : > { %10674 = dma.hbm_to_vmem [thread:$0]  (!%p11480_p5), %s15154_s9, 64, %s703_s4, [#allocation5]  }
  0xac   : > { %s15155_s27 = sld [smem:[#allocation119_spill]] }
  0xb2   : > { %s11126_s5 = scalar_lea.hbm %s15155_s27, 128 }
  0xb3   : > { %p11127_p2 = scmp.ne.s32.totalorder %s15155_s27, %s11126_s5  ;;  %p11133_p0 = scmp.lt.u32.totalorder %s11126_s5, %s15155_s27 }
  0xb5   : > { %p11129_p3 = pnand %p11127_p2, %p11496_p7 }
  0xb7   : > { %p11130_p13 = pneg %p11129_p3 }
  0xb9   : > { %p11135_p1 = pnand %p11133_p0, %p11130_p13 }
  0xbb   : > { %11138 = shalt.err (!%p11135_p1)
}
  0xbc   : > { %s11139_s29 = scalar_lea.vmem %s741_s12, 128  ;;  %p11147_p9 = scmp.lt.s32.totalorder %s741_s12, %s741_s12 }
  0xbd   : > { %p11140_p4 = scmp.ne.s32.totalorder %s741_s12, %s11139_s29  ;;  %p11148_p10 = scmp.lt.s32.totalorder %s11139_s29, %s11139_s29 }
  0xbf   : > { %p11142_p6 = pnand %p11140_p4, %p11496_p7  ;;  %p11149_p11 = por %p11148_p10, %p11147_p9 }
  0xc1   : > { %p11143_p8 = pneg %p11142_p6 }
  0xc3   : > { %p11150_p12 = pnand %p11149_p11, %p11143_p8 }
  0xc5   : > { %11153 = shalt.err (!%p11150_p12)
}
  0xc6   : > { %s11246_s4 = smov 64   ;;  %s11247_s7 = smov 4  }
  0xc7   : > { %10680 = dma.hbm_to_vmem [thread:$0]  (!%p11480_p5), %s15155_s27, 128, %s741_s12, [#allocation8], %s11246_s4, %s11246_s4, %s11247_s7  }
  0xc8   : > { %s11248_s11 = smov [#allocation12]   ;;  %s11249_s5 = smov [#allocation13]  }
  0xc9   : > { %s767_s26 = sshll.u32 %s11248_s11, 4  ;;  %s781_s2 = sshll.u32 %s11249_s5, 4  ;;  %s768_s26 = int_to_ptr.vmem [resolvable:$true] %s767_s26  ;;  %s782_s2 = int_to_ptr.vmem [resolvable:$true] %s781_s2 }
  0xca   : > { %s15156_s25 = sld [smem:[#allocation121_spill]] }
  0xd0   : > { %s11154_s29 = scalar_lea.hbm %s15156_s25, 128 }
  0xd1   : > { %p11155_p2 = scmp.ne.s32.totalorder %s15156_s25, %s11154_s29  ;;  %p11161_p0 = scmp.lt.u32.totalorder %s11154_s29, %s15156_s25 }
  0xd3   : > { %p11157_p3 = pnand %p11155_p2, %p11496_p7 }
  0xd5   : > { %p11158_p13 = pneg %p11157_p3 }
  0xd7   : > { %p11163_p1 = pnand %p11161_p0, %p11158_p13 }
  0xd9   : > { %11166 = shalt.err (!%p11163_p1)
}
  0xda   : > { %s11167_s12 = scalar_lea.vmem %s768_s26, 128  ;;  %p11175_p9 = scmp.lt.s32.totalorder %s768_s26, %s768_s26 }
  0xdb   : > { %p11168_p4 = scmp.ne.s32.totalorder %s768_s26, %s11167_s12  ;;  %p11176_p10 = scmp.lt.s32.totalorder %s11167_s12, %s11167_s12 }
  0xdd   : > { %p11170_p6 = pnand %p11168_p4, %p11496_p7  ;;  %p11177_p11 = por %p11176_p10, %p11175_p9 }
  0xdf   : > { %p11171_p8 = pneg %p11170_p6 }
  0xe1   : > { %p11178_p12 = pnand %p11177_p11, %p11171_p8 }
  0xe3   : > { %11181 = shalt.err (!%p11178_p12)
}
  0xe4   : > { %10686 = dma.hbm_to_vmem [thread:$0]  (!%p11480_p5), %s15156_s25, 128, %s768_s26, [#allocation11]  }
  0xe5   : > { %s11182_s4 = scalar_lea.hbm %s14859_s14, 64 }
  0xe6   : > { %p11183_p2 = scmp.ne.s32.totalorder %s14859_s14, %s11182_s4  ;;  %p11189_p0 = scmp.lt.u32.totalorder %s11182_s4, %s14859_s14 }
  0xe8   : > { %p11185_p3 = pnand %p11183_p2, %p11496_p7 }
  0xea   : > { %p11186_p13 = pneg %p11185_p3 }
  0xec   : > { %p11191_p1 = pnand %p11189_p0, %p11186_p13 }
  0xee   : > { %11194 = shalt.err (!%p11191_p1)
}
  0xef   : > { %s11195_s5 = scalar_lea.vmem %s782_s2, 64  ;;  %p11203_p9 = scmp.lt.s32.totalorder %s782_s2, %s782_s2 }
  0xf0   : > { %p11196_p4 = scmp.ne.s32.totalorder %s782_s2, %s11195_s5  ;;  %p11204_p10 = scmp.lt.s32.totalorder %s11195_s5, %s11195_s5 }
  0xf2   : > { %p11198_p6 = pnand %p11196_p4, %p11496_p7  ;;  %p11205_p11 = por %p11204_p10, %p11203_p9 }
  0xf4   : > { %p11199_p8 = pneg %p11198_p6 }
  0xf6   : > { %p11206_p12 = pnand %p11205_p11, %p11199_p8 }
  0xf8   : > { %11209 = shalt.err (!%p11206_p12)
}
  0xf9   : > { %10689 = dma.hbm_to_vmem [thread:$0]  (!%p11480_p5), %s14859_s14, 64, %s782_s2, [#allocation14]  }
  0xfa   : > { %p15157_p2 = scmp.ne.s32.totalorder %s15146_s3, 0 }
  0xfc   : > { %841 = sbr.rel (%p15157_p2) target bundleno = 8035 (0x1f63), region = 132 }
 0x103   : > { %p15158_p3 = scmp.eq.s32.totalorder %s11463_s30, 0 }
 0x105   : > { %11215 = dma.done.wait (%p15158_p3), [#allocation3], 64   ;;  %p15159_p7 = pmov %p15158_p3 }
 0x106   : > { %p15160_p13 = pmov %p15158_p3 }
 0x107   : > { %11217 = vsyncadd (%p15159_p7), [#allocation3], 4294967232 }
 0x108   : > { %11219 = dma.done.wait (%p15160_p13), [#allocation5], 128   ;;  %p15161_p0 = pmov %p15158_p3 }
 0x10a   : > { %11221 = vsyncadd (%p15161_p0), [#allocation5], 4294967168  ;;  %p15162_p1 = pmov %p15161_p0 }
 0x10b   : > { %p15163_p5 = pmov %p15161_p0 }
 0x10c   : > { %11223 = dma.done.wait (%p15162_p1), [#allocation8], 384  }
 0x10d   : > { %11225 = vsyncadd (%p15163_p5), [#allocation8], 4294966912  ;;  %p15164_p4 = pmov %p15161_p0 }
 0x10e   : > { %p15165_p6 = pmov %p15161_p0 }
 0x10f   : > { %11227 = dma.done.wait (%p15164_p4), [#allocation11], 384  }
 0x110   : > { %11229 = vsyncadd (%p15165_p6), [#allocation11], 4294966912  ;;  %p15166_p8 = pmov %p15161_p0 }
 0x111   : > { %p15167_p9 = pmov %p15161_p0 }
 0x112   : > { %11231 = dma.done.wait (%p15166_p8), [#allocation14], 64  }
 0x113   : > { %11233 = vsyncadd (%p15167_p9), [#allocation14], 4294967232  ;;  %p943_p10 = scmp.lt.s32.totalorder %s11463_s30, 1  ;;  %s15168_s2 = sld [smem:[#allocation109_spill]]  ;;  %v14964_v2 = vmov 0   ;;  %v962_v4 = vlaneseq  ;;  %vm1155_vm5 = vcmask 1040384  }
 0x114   : > { %s14932_s29 = smov 48   ;;  %s14926_s12 = smov 49   ;;  %1482 = vmatprep.mubr.bf16.mxu0 %v14964_v2  ;;  %1432 = vmatprep.mubr.bf16.mxu1 %v14964_v2  ;;  %v11773_v3 = vld.sshfl [vmem:[#allocation2] sm:$0x3 pattern:$0x76325410] }
 0x115   : > { %s15535_s30 = smov (!%p943_p10, %s11463_s30), 1  ;;  %s14944_s1 = smov 50   ;;  %v11809_v5 = vshrl.u32 %v962_v4, 7  ;;  %v11815_v6 = vand.u32 127, %v962_v4  ;;  %vm1158_vm7 = vcmask 1043456   ;;  %vm1161_vm9 = vcmask 1046528  }
 0x116   : > { %s14895_s28 = sshll.u32 %s15535_s30, 3  ;;  %s14912_s9 = smov 47   ;;  %v9288_v12 = vld [vmem:[%s14860_s15 + $0x3] ss:$8 sm:$0x3]  ;;  %vm15103_vm10 = vcmask 1042432  }
 0x117   : > { %s14916_s23 = smov 46   ;;  %s14928_s24 = smov 51   ;;  %v11818_v9 = vsub.s32 0, %v11809_v5  ;;  %v11821_v10 = vsub.s32 1, %v11809_v5  ;;  %vm14963_vm0 = vcmp.lt.s32.totalorder %v11815_v6, 48  ;;  %vm14992_vm1 = vcmp.lt.s32.totalorder %v11815_v6, 50 }
 0x118   : > { %s14910_s4 = smov 45   ;;  %s11257_s7 = smov 17   ;;  %v9286_v14 = vld [vmem:[%s14860_s15 + $0x1] ss:$8 sm:$0x3]  ;;  %vm14951_vm2 = vcmp.lt.s32.totalorder %v11815_v6, 49 }
 0x119   : > { %s11686_s10 = scalar_lea.vmem %s15168_s2, %s14895_s28  ;;  %s11258_s6 = smov 16   ;;  %v9287_v15 = vld [vmem:[%s14860_s15 + $0x2] ss:$8 sm:$0x3]  ;;  %vm14949_vm3 = vcmp.lt.s32.totalorder %v11815_v6, 47  ;;  %vm14950_vm4 = vcmp.lt.s32.totalorder %v11815_v6, 46  ;;  %v11855_v21 = vrot.slane %v9288_v12, %v11818_v9  ;;  %v11858_v22 = vrot.slane %v9288_v12, %v11821_v10 }
 0x11a   : > { %v11689_v0 = vld [vmem:[%s11686_s10] sm:$0x77]  ;;  %s14904_s13 = smov 18   ;;  %s15123_s11 = smov 15   ;;  %v11861_v23 = vrot.slane %v9286_v14, %v11818_v9  ;;  %v11864_v24 = vrot.slane %v9286_v14, %v11821_v10  ;;  %v11867_v25 = vrot.slane %v9287_v15, %v11818_v9  ;;  %v11870_v26 = vrot.slane %v9287_v15, %v11821_v10 }
 0x11b   : > { %1025 = vrot.lane.b32.xlu1 %v11689_v0, %s14932_s29  ;;  %1003 = vrot.lane.b32.xlu0 %v11689_v0, %s14926_s12  ;;  %v11697_v1 = vcombine.high %v11689_v0, %v11689_v0  ;;  %s14898_s5 = smov 14   ;;  %s14900_s26 = smov 19   ;;  %v9289_v16 = vld [vmem:[%s14860_s15 + $0x4] ss:$8 sm:$0x3]  ;;  %15169 = vst [vmem:[#allocation21_spill] sm:$0xff] %v11855_v21 }
 0x11c   : > { %s14896_s8 = smov 13   ;;  %s15121_s3 = smov 1   ;;  %v9290_v19 = vld [vmem:[%s14860_s15 + $0x5] ss:$8 sm:$0x3]  ;;  %15170 = vst [vmem:[#allocation22_spill] sm:$0xff] %v11858_v22  ;;  %v11875_v27 = vrot.slane %v9289_v16, %v11818_v9  ;;  %v11884_v30 = vrot.slane %v9289_v16, %v11821_v10 }
 0x11d   : > { %s14987_s0 = smov 2   ;;  %s15119_s2 = smov 127   ;;  %v967_v20 = vld [vmem:[%s14860_s15] ss:$8 sm:$0x3]  ;;  %15171 = vst [vmem:[#allocation23_spill] sm:$0xff] %v11861_v23  ;;  %v11887_v31 = vrot.slane %v9290_v19, %v11818_v9  ;;  %v11890_v34 = vrot.slane %v9290_v19, %v11821_v10 }
 0x11e   : > { %s14902_s28 = smov 126   ;;  %15172 = vst [vmem:[#allocation24_spill] sm:$0xff] %v11864_v24  ;;  %15173 = vst [vmem:[#allocation25_spill] sm:$0xff] %v11867_v25  ;;  %vm14952_vm6 = vcmp.lt.s32.totalorder %v11815_v6, 51  ;;  %v11894_v35 = vrot.slane %v967_v20, %v11818_v9  ;;  %v11897_v36 = vrot.slane %v967_v20, %v11821_v10  ;;  %vm14948_vm8 = vcmp.lt.s32.totalorder %v11815_v6, 45 }
 0x11f   : > { %981 = vrot.lane.b32.xlu0 %v11689_v0, %s14944_s1  ;;  %1027 = vrot.lane.b32.xlu1 %v11697_v1, %s14932_s29  ;;  %15174 = vst [vmem:[#allocation26_spill] sm:$0xff] %v11870_v26  ;;  %s14936_s29 = smov 95   ;;  %15175 = vst [vmem:[#allocation27_spill] sm:$0xff] %v11875_v27  ;;  %v9291_v41 = vld [vmem:[%s14860_s15 + $0x6] ss:$8 sm:$0x3] }
 0x120   : > { %15176 = vst [vmem:[#allocation28_spill] sm:$0xff] %v11884_v30  ;;  %15177 = vst [vmem:[#allocation29_spill] sm:$0xff] %v11887_v31  ;;  %v11926_v52 = vrot.slane %v9291_v41, %v11818_v9  ;;  %v11929_v53 = vrot.slane %v9291_v41, %v11821_v10  ;;  %vm1152_vm11 = vcmask 1045504   ;;  %vm1164_vm12 = vcmask 1041408  }
 0x121   : > { %15178 = vst [vmem:[#allocation30_spill] sm:$0xff] %v11890_v34  ;;  %15179 = vst [vmem:[#allocation31_spill] sm:$0xff] %v11894_v35  ;;  %vm1561_vm13 = vcmp.lt.s32.totalorder %v11815_v6, 16  ;;  %vm15054_vm14 = vcmp.lt.s32.totalorder %v11815_v6, 17  ;;  %vm1388_vm15 = vcmask 171008  }
 0x122   : > { %15180 = vst [vmem:[#allocation32_spill] sm:$0xff] %v11897_v36  ;;  %15181 = vst [vmem:[#allocation33_spill] sm:$0xff] %v11926_v52 }
 0x123   : > { %983 = vrot.lane.b32.xlu1 %v11697_v1, %s14944_s1  ;;  %1005 = vrot.lane.b32.xlu0 %v11697_v1, %s14926_s12  ;;  %15182 = vst [vmem:[#allocation34_spill] sm:$0xff] %v11929_v53  ;;  %s14940_s12 = smov 99   ;;  %s15110_s1 = smov 34  }
 0x127   : > { %1049 = vrot.lane.b32.xlu1 %v11697_v1, %s14912_s9  ;;  %1047 = vrot.lane.b32.xlu0 %v11689_v0, %s14912_s9  ;;  %s14920_s9 = smov 109  }
 0x12b   : > { %1071 = vrot.lane.b32.xlu1 %v11697_v1, %s14916_s23  ;;  %1069 = vrot.lane.b32.xlu0 %v11689_v0, %s14916_s23  ;;  %s14918_s23 = smov 97  }
 0x12f   : > { %960 = vrot.lane.b32.xlu1 %v11697_v1, %s14928_s24  ;;  %958 = vrot.lane.b32.xlu0 %v11689_v0, %s14928_s24  ;;  %s14934_s24 = smov 93  }
 0x133   : > { %1093 = vrot.lane.b32.xlu1 %v11697_v1, %s14910_s4  ;;  %1091 = vrot.lane.b32.xlu0 %v11689_v0, %s14910_s4  ;;  %s14924_s4 = smov 115  }
 0x137   : > { %1537 = vrot.lane.b32.xlu1 %v11697_v1, %s11257_s7  ;;  %1535 = vrot.lane.b32.xlu0 %v11689_v0, %s11257_s7 }
 0x13b   : > { %1559 = vrot.lane.b32.xlu1 %v11697_v1, %s11258_s6  ;;  %1557 = vrot.lane.b32.xlu0 %v11689_v0, %s11258_s6 }
 0x13f   : > { %1515 = vrot.lane.b32.xlu1 %v11697_v1, %s14904_s13  ;;  %1513 = vrot.lane.b32.xlu0 %v11689_v0, %s14904_s13  ;;  %s15115_s13 = smov 112  }
 0x143   : > { %1581 = vrot.lane.b32.xlu1 %v11697_v1, %s15123_s11  ;;  %1579 = vrot.lane.b32.xlu0 %v11689_v0, %s15123_s11 }
 0x147   : > { %1603 = vrot.lane.b32.xlu1 %v11697_v1, %s14898_s5  ;;  %1601 = vrot.lane.b32.xlu0 %v11689_v0, %s14898_s5  ;;  %s14908_s5 = smov 125  }
 0x14b   : > { %1493 = vrot.lane.b32.xlu1 %v11697_v1, %s14900_s26  ;;  %1491 = vrot.lane.b32.xlu0 %v11689_v0, %s14900_s26  ;;  %s15117_s26 = smov 113  }
 0x14f   : > { %1625 = vrot.lane.b32.xlu1 %v11697_v1, %s14896_s8  ;;  %1623 = vrot.lane.b32.xlu0 %v11689_v0, %s14896_s8  ;;  %s14906_s8 = smov 3  }
 0x153   : > { %1806 = vrot.lane.b32.xlu1 %v11697_v1, %s15121_s3  ;;  %1804 = vrot.lane.b32.xlu0 %v11689_v0, %s15121_s3 }
 0x157   : > { %1784 = vrot.lane.b32.xlu1 %v11697_v1, %s14987_s0  ;;  %1782 = vrot.lane.b32.xlu0 %v11689_v0, %s14987_s0 }
 0x15b   : > { %1828 = vrot.lane.b32.xlu1 %v11697_v1, %s15119_s2  ;;  %1826 = vrot.lane.b32.xlu0 %v11689_v0, %s15119_s2 }
 0x15f   : > { %1850 = vrot.lane.b32.xlu1 %v11697_v1, %s14902_s28  ;;  %1848 = vrot.lane.b32.xlu0 %v11689_v0, %s14902_s28  ;;  %s11272_s28 = smov 86  }
 0x163   : > { %1762 = vrot.lane.b32.xlu1 %v11697_v1, %s14906_s8  ;;  %1760 = vrot.lane.b32.xlu0 %v11689_v0, %s14906_s8  ;;  %s14914_s8 = smov 114  }
 0x167   : > { %1872 = vrot.lane.b32.xlu1 %v11697_v1, %s14908_s5  ;;  %1870 = vrot.lane.b32.xlu0 %v11689_v0, %s14908_s5  ;;  %s15113_s5 = smov 111  }
 0x16b   : > { %2049 = vrot.lane.b32.xlu1 %v11689_v0, %s15117_s26  ;;  %1706 = vrot.lane.b32.xlu0 %v11773_v3, %s11272_s28  ;;  %s14922_s28 = smov 110  }
 0x16f   : > { %2071 = vrot.lane.b32.xlu1 %v11689_v0, %s15115_s13  ;;  %2051 = vrot.lane.b32.xlu0 %v11697_v1, %s15117_s26 }
 0x173   : > { %2027 = vrot.lane.b32.xlu1 %v11689_v0, %s14914_s8  ;;  %2073 = vrot.lane.b32.xlu0 %v11697_v1, %s15115_s13 }
 0x177   : > { %2093 = vrot.lane.b32.xlu1 %v11689_v0, %s15113_s5  ;;  %2029 = vrot.lane.b32.xlu0 %v11697_v1, %s14914_s8  ;;  %s11279_s8 = smov 65  }
 0x17b   : > { %2115 = vrot.lane.b32.xlu1 %v11689_v0, %s14922_s28  ;;  %2095 = vrot.lane.b32.xlu0 %v11697_v1, %s15113_s5 }
 0x17f   : > { %2005 = vrot.lane.b32.xlu1 %v11689_v0, %s14924_s4  ;;  %2117 = vrot.lane.b32.xlu0 %v11697_v1, %s14922_s28  ;;  %s15112_s28 = smov 44  }
 0x183   : > { %2137 = vrot.lane.b32.xlu1 %v11689_v0, %s14920_s9  ;;  %2007 = vrot.lane.b32.xlu0 %v11697_v1, %s14924_s4  ;;  %s14946_s4 = smov 33  }
 0x187   : > { %1951 = vrot.lane.b32.xlu1 %v11773_v3, %s11279_s8  ;;  %2139 = vrot.lane.b32.xlu0 %v11697_v1, %s14920_s9  ;;  %s14930_s8 = smov 96   ;;  %s14942_s9 = smov 98  }
 0x18b   : > { %2320 = vrot.lane.b32.xlu1 %v11697_v1, %s14918_s23  ;;  %2318 = vrot.lane.b32.xlu0 %v11689_v0, %s14918_s23  ;;  %s14938_s23 = smov 94  }
 0x18d   : > { %v1026_v7 = vpop.permute.xlu1 %1025  ;;  %v1004_v8 = vpop.permute.xlu0 %1003 }
 0x18f   : > { %2342 = vrot.lane.b32.xlu1 %v11697_v1, %s14930_s8  ;;  %2340 = vrot.lane.b32.xlu0 %v11689_v0, %s14930_s8  ;;  %s15108_s8 = smov 32  }
 0x191   : > { %v982_v11 = vpop.permute.xlu0 %981  ;;  %v1028_v13 = vpop.permute.xlu1 %1027 }
 0x192   : > { %v1030_v37 = vsel %vm14963_vm0, %v1026_v7, %v1028_v13  ;;  %v1031_v38 = vsel %vm14963_vm0, %v1028_v13, %v1026_v7  ;;  %vm14986_vm0 = vcmp.lt.s32.totalorder %v11815_v6, 3 }
 0x193   : > { %2298 = vrot.lane.b32.xlu1 %v11697_v1, %s14942_s9  ;;  %2296 = vrot.lane.b32.xlu0 %v11689_v0, %s14942_s9  ;;  %v1045_v48 = vmul.f32 %v11855_v21, %v1031_v38  ;;  %v1046_v49 = vmul.f32 %v11858_v22, %v1030_v37  ;;  %s14953_s9 = smov 81  }
 0x195   : > { %v984_v17 = vpop.permute.xlu1 %983  ;;  %v1006_v18 = vpop.permute.xlu0 %1005  ;;  %v1127_v4 = vrot.slane %v1045_v48, 7  ;;  %v1128_v7 = vrot.slane %v1046_v49, 7 }
 0x196   : > { %v1008_v28 = vsel %vm14951_vm2, %v1004_v8, %v1006_v18  ;;  %v1009_v29 = vsel %vm14951_vm2, %v1006_v18, %v1004_v8  ;;  %v986_v42 = vsel %vm14992_vm1, %v982_v11, %v984_v17  ;;  %v987_v43 = vsel %vm14992_vm1, %v984_v17, %v982_v11 }
 0x197   : > { %2364 = vrot.lane.b32.xlu1 %v11697_v1, %s14936_s29  ;;  %2362 = vrot.lane.b32.xlu0 %v11689_v0, %s14936_s29  ;;  %v1023_v44 = vmul.f32 %v11867_v25, %v1009_v29  ;;  %v1024_v45 = vmul.f32 %v11870_v26, %v1008_v28  ;;  %v1001_v54 = vmul.f32 %v11861_v23, %v987_v43  ;;  %vm14961_vm2 = vcmp.lt.s32.totalorder %v11815_v6, 19  ;;  %s15032_s29 = smov 35  }
 0x198   : > { %v1002_v55 = vmul.f32 %v11864_v24, %v986_v42  ;;  %vm15019_vm1 = vcmp.lt.s32.totalorder %v11815_v6, 114 }
 0x199   : > { %v1050_v32 = vpop.permute.xlu1 %1049  ;;  %v1048_v33 = vpop.permute.xlu0 %1047  ;;  %v1121_v58 = vrot.slane %v1023_v44, 2  ;;  %v1122_v59 = vrot.slane %v1024_v45, 2  ;;  %v1115_v14 = vrot.slane %v1001_v54, 5 }
 0x19a   : > { %v1052_v39 = vsel %vm14949_vm3, %v1048_v33, %v1050_v32  ;;  %v1053_v40 = vsel %vm14949_vm3, %v1050_v32, %v1048_v33  ;;  %v1116_v15 = vrot.slane %v1002_v55, 5  ;;  %vm14962_vm3 = vcmp.lt.s32.totalorder %v11815_v6, 18 }
 0x19b   : > { %2386 = vrot.lane.b32.xlu1 %v11697_v1, %s14938_s23  ;;  %v1067_v46 = vmul.f32 %v11875_v27, %v1053_v40  ;;  %v1068_v47 = vmul.f32 %v11884_v30, %v1052_v39  ;;  %2384 = vrot.lane.b32.xlu0 %v11689_v0, %s14938_s23  ;;  %v1157_v20 = vsel %vm1155_vm5, %v1122_v59, %v1128_v7  ;;  %s14956_s23 = smov 80  }
 0x19c   : > { %v1156_v28 = vsel %vm1155_vm5, %v1121_v58, %v1127_v4 }
 0x19d   : > { %v1072_v50 = vpop.permute.xlu1 %1071  ;;  %v1070_v51 = vpop.permute.xlu0 %1069  ;;  %v1133_v62 = vrot.slane %v1067_v46, 4  ;;  %v1134_v63 = vrot.slane %v1068_v47, 4 }
 0x19e   : > { %v1074_v56 = vsel %vm14950_vm4, %v1070_v51, %v1072_v50  ;;  %v1075_v57 = vsel %vm14950_vm4, %v1072_v50, %v1070_v51  ;;  %v11289_v50 = vmov 65535   ;;  %vm14960_vm4 = vcmp.lt.s32.totalorder %v11815_v6, 14 }
 0x19f   : > { %v1089_v60 = vmul.f32 %v11887_v31, %v1075_v57  ;;  %v1090_v61 = vmul.f32 %v11890_v34, %v1074_v56  ;;  %2276 = vrot.lane.b32.xlu1 %v11697_v1, %s14940_s12  ;;  %2274 = vrot.lane.b32.xlu0 %v11689_v0, %s14940_s12  ;;  %v1160_v29 = vsel %vm1158_vm7, %v1157_v20, %v1134_v63  ;;  %v1392_v51 = vsel %vm1164_vm12, 4294967295, %v11289_v50  ;;  %s14984_s12 = smov 31  }
 0x1a0   : > { %v1159_v32 = vsel %vm1158_vm7, %v1156_v28, %v1133_v62 }
 0x1a1   : > { %v1139_v8 = vrot.slane %v1089_v60, 1  ;;  %v1140_v11 = vrot.slane %v1090_v61, 1  ;;  %v961_v12 = vpop.permute.xlu1 %960  ;;  %v959_v13 = vpop.permute.xlu0 %958 }
 0x1a2   : > { %v965_v16 = vsel %vm14952_vm6, %v959_v13, %v961_v12  ;;  %v966_v17 = vsel %vm14952_vm6, %v961_v12, %v959_v13  ;;  %v9304_v12 = vld [vmem:[%s14860_s15 + $0x21] ss:$8 sm:$0x3]  ;;  %vm14955_vm6 = vcmp.lt.s32.totalorder %v11815_v6, 13 }
 0x1a3   : > { %v979_v18 = vmul.f32 %v11894_v35, %v966_v17  ;;  %v980_v19 = vmul.f32 %v11897_v36, %v965_v16  ;;  %2408 = vrot.lane.b32.xlu1 %v11697_v1, %s14934_s24  ;;  %2406 = vrot.lane.b32.xlu0 %v11689_v0, %s14934_s24  ;;  %v1163_v39 = vsel %vm1161_vm9, %v1160_v29, %v1140_v11  ;;  %v12022_v29 = vld [vmem:[%s11686_s10] sm:$0x77]  ;;  %s14958_s24 = smov 82   ;;  %s14981_s10 = smov 29  }
 0x1a4   : > { %v1162_v41 = vsel %vm1161_vm9, %v1159_v32, %v1139_v8  ;;  %v12009_v17 = vrot.slane %v9304_v12, %v11818_v9 }
 0x1a5   : > { %v1094_v33 = vpop.permute.xlu1 %1093  ;;  %v1092_v37 = vpop.permute.xlu0 %1091  ;;  %v1151_v38 = vsel %vm15103_vm10, %v980_v19, %v1116_v15  ;;  %v1150_v40 = vsel %vm15103_vm10, %v979_v18, %v1115_v14  ;;  %v12000_v15 = vld [vmem:[#allocation2] sm:$0x3]  ;;  %v12012_v18 = vrot.slane %v9304_v12, %v11821_v10  ;;  %v9302_v19 = vld [vmem:[%s14860_s15 + $0x17] ss:$8 sm:$0x3] }
 0x1a6   : > { %v1096_v42 = vsel %vm14948_vm8, %v1092_v37, %v1094_v33  ;;  %v1097_v43 = vsel %vm14948_vm8, %v1094_v33, %v1092_v37  ;;  %v1154_v44 = vsel %vm1152_vm11, %v1151_v38, %v1122_v59  ;;  %v1153_v45 = vsel %vm1152_vm11, %v1150_v40, %v1121_v58  ;;  %15185 = vst [vmem:[#allocation37_spill] sm:$0xff] %v12009_v17  ;;  %v9307_v12 = vld [vmem:[%s14860_s15 + $0x24] ss:$8 sm:$0x3] }
 0x1a7   : > { %v1111_v46 = vmul.f32 %v11926_v52, %v1097_v43  ;;  %v1112_v47 = vmul.f32 %v11929_v53, %v1096_v42  ;;  %1216 = vrot.lane.b32.xlu1 %v11689_v0, %s14946_s4  ;;  %v1168_v48 = vpack.c.bf16 %v1163_v39, %v1154_v44  ;;  %v1167_v49 = vpack.c.bf16 %v1162_v41, %v1153_v45  ;;  %v9306_v39 = vld [vmem:[%s14860_s15 + $0x23] ss:$8 sm:$0x3] }
 0x1a8   : > { %2220 = vrot.lane.b32.xlu0 %v11773_v3, %s15112_s28  ;;  %v11978_v59 = vsel %vm15103_vm10, %v1392_v51, 0  ;;  %15186 = vst [vmem:[#allocation38_spill] sm:$0xff] %v12012_v18  ;;  %vm15053_vm8 = vcmp.lt.s32.totalorder %v11815_v6, 15  ;;  %v12046_v40 = vrot.slane %v9302_v19, %v11818_v9  ;;  %v12049_v41 = vrot.slane %v9302_v19, %v11821_v10  ;;  %s11309_s28 = smov 72  }
 0x1a9   : > { %v1145_v54 = vrot.slane %v1111_v46, 6  ;;  %v1146_v55 = vrot.slane %v1112_v47, 6  ;;  %v1538_v56 = vpop.permute.xlu1 %1537  ;;  %1450 = vmatprep.subr.bf16.mxu0 %v1168_v48  ;;  %v1536_v57 = vpop.permute.xlu0 %1535  ;;  %v9301_v48 = vld [vmem:[%s14860_s15 + $0x16] ss:$8 sm:$0x3]  ;;  %v12069_v51 = vrot.slane %v9306_v39, %v11818_v9 }
 0x1aa   : > { %1451 = vmatpush1.bf16.msra.mxu0 %v1167_v49  ;;  %v1540_v33 = vsel %vm15054_vm14, %v1536_v57, %v1538_v56  ;;  %v1541_v37 = vsel %vm15054_vm14, %v1538_v56, %v1536_v57  ;;  %15189 = vst [vmem:[#allocation41_spill] sm:$0xff] %v12046_v40  ;;  %15190 = vst [vmem:[#allocation42_spill] sm:$0xff] %v12049_v41  ;;  %vm1286_vm14 = vcmp.lt.s32.totalorder %v11815_v6, 30 }
 0x1ab   : > { %1238 = vrot.lane.b32.xlu1 %v11689_v0, %s15108_s8  ;;  %v1166_v58 = vsel %vm1164_vm12, %v1140_v11, %v1146_v55  ;;  %v1165_v3 = vsel %vm1164_vm12, %v1139_v8, %v1145_v54  ;;  %v9303_v11 = vld [vmem:[%s14860_s15 + $0x20] ss:$8 sm:$0x3]  ;;  %v9305_v8 = vld [vmem:[%s14860_s15 + $0x22] ss:$8 sm:$0x3]  ;;  %v12072_v54 = vrot.slane %v9306_v39, %v11821_v10 }
 0x1ac   : > { %1218 = vrot.lane.b32.xlu0 %v11697_v1, %s14946_s4  ;;  %v1170_v60 = vpack.c.bf16 %v1166_v58, %v1166_v58  ;;  %v1169_v61 = vpack.c.bf16 %v1165_v3, %v1165_v3  ;;  %v12006_v16 = vrot.slane %v9303_v11, %v11821_v10  ;;  %v12028_v32 = vrot.slane %v9305_v8, %v11818_v9  ;;  %s14966_s4 = smov 79  }
 0x1ad   : > { %v1560_v62 = vpop.permute.xlu1 %1559  ;;  %v1558_v63 = vpop.permute.xlu0 %1557  ;;  %v12037_v38 = vrot.slane %v9305_v8, %v11821_v10  ;;  %15191 = vst [vmem:[#allocation43_spill] sm:$0xff] %v12069_v51  ;;  %15192 = vst [vmem:[#allocation44_spill] sm:$0xff] %v12072_v54 }
 0x1ae   : > { %v1448_v4 = vand.u32 %v11978_v59, %v1170_v60  ;;  %v1445_v7 = vand.u32 %v11978_v59, %v1169_v61  ;;  %15184 = vst [vmem:[#allocation36_spill] sm:$0xff] %v12006_v16  ;;  %v1562_v20 = vsel %vm1561_vm13, %v1558_v63, %v1560_v62  ;;  %v1563_v28 = vsel %vm1561_vm13, %v1560_v62, %v1558_v63 }
 0x1af   : > { %2587 = vrot.lane.b32.xlu1 %v11689_v0, %s14953_s9  ;;  %v12003_v0 = vrot.slane %v9303_v11, %v11818_v9  ;;  %15187 = vst [vmem:[#allocation39_spill] sm:$0xff] %v12028_v32  ;;  %15188 = vst [vmem:[#allocation40_spill] sm:$0xff] %v12037_v38  ;;  %v1577_v44 = vmul.f32 %v12009_v17, %v1563_v28  ;;  %v1578_v45 = vmul.f32 %v12012_v18, %v1562_v20 }
 0x1b0   : > { %1240 = vrot.lane.b32.xlu0 %v11697_v1, %s15108_s8  ;;  %1452 = vmatprep.subr.bf16.mxu0 %v1448_v4  ;;  %v1556_v50 = vmul.f32 %v12006_v16, %v1540_v33  ;;  %v12084_v61 = vrot.slane %v9301_v48, %v11818_v9  ;;  %v12087_v62 = vrot.slane %v9301_v48, %v11821_v10  ;;  %v9341_v16 = vld [vmem:[%s14860_s15 + $0x57] ss:$8 sm:$0x3]  ;;  %s15294_s8 = sld [smem:[#allocation127_spill]] }
 0x1b1   : > { %v1516_v13 = vpop.permute.xlu1 %1515  ;;  %1453 = vmatpush1.bf16.msra.mxu0 %v1445_v7  ;;  %v1514_v14 = vpop.permute.xlu0 %1513  ;;  %15183 = vst [vmem:[#allocation35_spill] sm:$0xff] %v12003_v0  ;;  %v12063_v49 = vmul.f32 %v12003_v0, %v1541_v37  ;;  %v1659_v63 = vrot.slane %v1577_v44, 7  ;;  %v1660_v4 = vrot.slane %v1578_v45, 7  ;;  %v12107_v45 = vrot.slane %v9307_v12, %v11818_v9 }
 0x1b2   : > { %v1518_v55 = vsel %vm14962_vm3, %v1514_v14, %v1516_v13  ;;  %v1519_v56 = vsel %vm14962_vm3, %v1516_v13, %v1514_v14  ;;  %15193 = vst [vmem:[#allocation45_spill] sm:$0xff] %v12084_v61  ;;  %15194 = vst [vmem:[#allocation46_spill] sm:$0xff] %v12087_v62  ;;  %v1654_v28 = vrot.slane %v1556_v50, 2  ;;  %vm14969_vm3 = vcmp.lt.s32.totalorder %v11815_v6, 126 }
 0x1b3   : > { %2609 = vrot.lane.b32.xlu1 %v12022_v29, %s14956_s23  ;;  %v1533_v8 = vmul.f32 %v12046_v40, %v1519_v56  ;;  %v1534_v13 = vmul.f32 %v12049_v41, %v1518_v55  ;;  %v1653_v20 = vrot.slane %v12063_v49, 2  ;;  %15195 = vst [vmem:[#allocation47_spill] sm:$0xff] %v12107_v45  ;;  %v12687_v17 = vrot.slane %v9341_v16, %v11818_v9 }
 0x1b4   : > { %2589 = vrot.lane.b32.xlu0 %v11697_v1, %s14953_s9  ;;  %9300 = vmatmul.mubr.msk.bf16.vlgmr.msra.gmra.mrb[0].mxu0 %vm1388_vm15, %v12000_v15  ;;  %v1686_v50 = vsel %vm1155_vm5, %v1654_v28, %v1660_v4  ;;  %s14989_s9 = smov 30   ;;  %v12690_v41 = vrot.slane %v9341_v16, %v11821_v10 }
 0x1b5   : > { %v1582_v42 = vpop.permute.xlu1 %1581  ;;  %v1580_v43 = vpop.permute.xlu0 %1579  ;;  %1749 = vmatprep.mubr.bf16.mxu0 %v14964_v2  ;;  %v1647_v55 = vrot.slane %v1533_v8, 5  ;;  %v1648_v56 = vrot.slane %v1534_v13, 5  ;;  %15250 = vst [vmem:[#allocation101_spill] sm:$0xff] %v12687_v17 }
 0x1b6   : > { %v1584_v46 = vsel %vm15053_vm8, %v1580_v43, %v1582_v42  ;;  %v1585_v47 = vsel %vm15053_vm8, %v1582_v42, %v1580_v43  ;;  %vm15105_vm8 = vcmp.lt.s32.totalorder %v11815_v6, 79  ;;  %15251 = vst [vmem:[#allocation102_spill] sm:$0xff] %v12690_v41 }
 0x1b7   : > { %1194 = vrot.lane.b32.xlu1 %v12022_v29, %s15110_s1  ;;  %v1599_v57 = vmul.f32 %v12028_v32, %v1585_v47  ;;  %v1600_v58 = vmul.f32 %v12037_v38, %v1584_v46  ;;  %v12110_v46 = vrot.slane %v9307_v12, %v11821_v10  ;;  %v1685_v47 = vsel %vm1155_vm5, %v1653_v20, %v1659_v63 }
 0x1b8   : > { %2611 = vrot.lane.b32.xlu0 %v11697_v1, %s14956_s23  ;;  %s14975_s23 = smov 78  }
 0x1b9   : > { %v1604_v3 = vpop.permute.xlu1 %1603  ;;  %v1602_v60 = vpop.permute.xlu0 %1601  ;;  %v1665_v33 = vrot.slane %v1599_v57, 4  ;;  %v1666_v37 = vrot.slane %v1600_v58, 4  ;;  %15196 = vst [vmem:[#allocation48_spill] sm:$0xff] %v12110_v46 }
 0x1ba   : > { %v1606_v7 = vsel %vm14960_vm4, %v1602_v60, %v1604_v3  ;;  %v1607_v11 = vsel %vm14960_vm4, %v1604_v3, %v1602_v60  ;;  %vm15040_vm4 = vcmp.lt.s32.totalorder %v11815_v6, 127 }
 0x1bb   : > { %v1621_v14 = vmul.f32 %v12069_v51, %v1607_v11  ;;  %v1622_v19 = vmul.f32 %v12072_v54, %v1606_v7  ;;  %1260 = vrot.lane.b32.xlu1 %v12022_v29, %s14984_s12  ;;  %v1687_v3 = vsel %vm1158_vm7, %v1685_v47, %v1665_v33  ;;  %v1688_v60 = vsel %vm1158_vm7, %v1686_v50, %v1666_v37 }
 0x1bc   : > { %1196 = vrot.lane.b32.xlu0 %v11697_v1, %s15110_s1  ;;  %s15319_s1 = smov 35  }
 0x1bd   : > { %v1671_v39 = vrot.slane %v1621_v14, 1  ;;  %v1672_v42 = vrot.slane %v1622_v19, 1  ;;  %v1494_v43 = vpop.permute.xlu1 %1493  ;;  %v1492_v44 = vpop.permute.xlu0 %1491 }
 0x1be   : > { %v1496_v48 = vsel %vm14961_vm2, %v1492_v44, %v1494_v43  ;;  %v1497_v49 = vsel %vm14961_vm2, %v1494_v43, %v1492_v44  ;;  %vm14991_vm2 = vcmp.lt.s32.totalorder %v11815_v6, 2 }
 0x1bf   : > { %v1511_v57 = vmul.f32 %v12084_v61, %v1497_v49  ;;  %v1512_v58 = vmul.f32 %v12087_v62, %v1496_v48  ;;  %2565 = vrot.lane.b32.xlu1 %v12022_v29, %s14958_s24  ;;  %v1690_v12 = vsel %vm1161_vm9, %v1688_v60, %v1672_v42  ;;  %v1689_v8 = vsel %vm1161_vm9, %v1687_v3, %v1671_v39 }
 0x1c0   : > { %1262 = vrot.lane.b32.xlu0 %v11697_v1, %s14984_s12  ;;  %s11305_s12 = smov 107  }
 0x1c1   : > { %v1681_v63 = vsel %vm15103_vm10, %v1511_v57, %v1647_v55  ;;  %v1626_v4 = vpop.permute.xlu1 %1625  ;;  %v1624_v7 = vpop.permute.xlu0 %1623  ;;  %v1682_v11 = vsel %vm15103_vm10, %v1512_v58, %v1648_v56  ;;  %v9312_v55 = vld [vmem:[%s14860_s15 + $0x27] ss:$8 sm:$0x3] }
 0x1c2   : > { %v1628_v13 = vsel %vm14955_vm6, %v1624_v7, %v1626_v4  ;;  %v1629_v14 = vsel %vm14955_vm6, %v1626_v4, %v1624_v7  ;;  %v1684_v19 = vsel %vm1152_vm11, %v1682_v11, %v1654_v28  ;;  %v1683_v33 = vsel %vm1152_vm11, %v1681_v63, %v1653_v20 }
 0x1c3   : > { %v1643_v37 = vmul.f32 %v12107_v45, %v1629_v14  ;;  %v1644_v43 = vmul.f32 %v12110_v46, %v1628_v13  ;;  %2631 = vrot.lane.b32.xlu1 %v12022_v29, %s14966_s4  ;;  %v1694_v44 = vpack.c.bf16 %v1690_v12, %v1684_v19  ;;  %v1693_v47 = vpack.c.bf16 %v1689_v8, %v1683_v33  ;;  %v9314_v19 = vld [vmem:[%s14860_s15 + $0x32] ss:$8 sm:$0x3] }
 0x1c4   : > { %2567 = vrot.lane.b32.xlu0 %v11697_v1, %s14958_s24  ;;  %vm15056_vm6 = vcmp.lt.s32.totalorder %v11815_v6, 1  ;;  %v12156_v63 = vrot.slane %v9312_v55, %v11818_v9  ;;  %v12159_v4 = vrot.slane %v9312_v55, %v11821_v10  ;;  %v1904_v33 = vrot.slane %v12022_v29, 7  ;;  %s14977_s24 = smov 77  }
 0x1c5   : > { %v1677_v48 = vrot.slane %v1643_v37, 6  ;;  %v1678_v49 = vrot.slane %v1644_v43, 6  ;;  %v1807_v50 = vpop.permute.xlu1 %1806  ;;  %1717 = vmatprep.subr.bf16.mxu0 %v1694_v44  ;;  %v1805_v28 = vpop.permute.xlu0 %1804  ;;  %v12209_v55 = vrot.slane %v9314_v19, %v11818_v9 }
 0x1c6   : > { %1718 = vmatpush1.bf16.msra.mxu0 %v1693_v47  ;;  %15197 = vst [vmem:[#allocation49_spill] sm:$0xff] %v12156_v63  ;;  %15198 = vst [vmem:[#allocation50_spill] sm:$0xff] %v12159_v4  ;;  %v1809_v12 = vsel %vm15056_vm6, %v1805_v28, %v1807_v50  ;;  %v1810_v8 = vsel %vm15056_vm6, %v1807_v50, %v1805_v28  ;;  %v9310_v28 = vld [vmem:[%s14860_s15 + $0x25] ss:$8 sm:$0x3]  ;;  %vm15106_vm6 = vcmp.lt.s32.totalorder %v11815_v6, 78 }
 0x1c7   : > { %v1691_v20 = vsel %vm1164_vm12, %v1671_v39, %v1677_v48  ;;  %1282 = vrot.lane.b32.xlu1 %v12022_v29, %s14989_s9  ;;  %v1692_v56 = vsel %vm1164_vm12, %v1672_v42, %v1678_v49  ;;  %v9313_v39 = vld [vmem:[%s14860_s15 + $0x31] ss:$8 sm:$0x3]  ;;  %v9311_v42 = vld [vmem:[%s14860_s15 + $0x26] ss:$8 sm:$0x3]  ;;  %v12190_v47 = vmul.f32 %v12156_v63, %v1810_v8  ;;  %v12193_v48 = vmul.f32 %v12159_v4, %v1809_v12 }
 0x1c8   : > { %2633 = vrot.lane.b32.xlu0 %v11697_v1, %s14966_s4  ;;  %v1696_v57 = vpack.c.bf16 %v1692_v56, %v1692_v56  ;;  %v1695_v58 = vpack.c.bf16 %v1691_v20, %v1691_v20  ;;  %v12176_v13 = vrot.slane %v9313_v39, %v11818_v9  ;;  %v12179_v14 = vrot.slane %v9313_v39, %v11821_v10  ;;  %s14979_s4 = smov 83  }
 0x1c9   : > { %v1785_v3 = vpop.permute.xlu1 %1784  ;;  %v1783_v60 = vpop.permute.xlu0 %1782  ;;  %v12187_v37 = vrot.slane %v9311_v42, %v11818_v9  ;;  %v12203_v20 = vrot.slane %v9311_v42, %v11821_v10  ;;  %15203 = vst [vmem:[#allocation55_spill] sm:$0xff] %v12209_v55  ;;  %v12212_v56 = vrot.slane %v9314_v19, %v11821_v10  ;;  %v12224_v12 = vrot.slane %v9310_v28, %v11818_v9 }
 0x1ca   : > { %v1715_v7 = vand.u32 %v1696_v57, %v11978_v59  ;;  %v1712_v11 = vand.u32 %v1695_v58, %v11978_v59  ;;  %15199 = vst [vmem:[#allocation51_spill] sm:$0xff] %v12176_v13  ;;  %15200 = vst [vmem:[#allocation52_spill] sm:$0xff] %v12179_v14  ;;  %v1787_v57 = vsel %vm14991_vm2, %v1783_v60, %v1785_v3  ;;  %v1905_v19 = vrot.slane %v11697_v1, 7 }
 0x1cb   : > { %2653 = vrot.lane.b32.xlu1 %v12022_v29, %s14975_s23  ;;  %15201 = vst [vmem:[#allocation53_spill] sm:$0xff] %v12187_v37  ;;  %15202 = vst [vmem:[#allocation54_spill] sm:$0xff] %v12203_v20  ;;  %v1788_v58 = vsel %vm14991_vm2, %v1785_v3, %v1783_v60  ;;  %v12227_v8 = vrot.slane %v9310_v28, %v11821_v10  ;;  %v1900_v3 = vrot.slane %v12190_v47, 2  ;;  %v1901_v60 = vrot.slane %v12193_v48, 2 }
 0x1cc   : > { %1284 = vrot.lane.b32.xlu0 %v11697_v1, %s14989_s9  ;;  %1719 = vmatprep.subr.bf16.mxu0 %v1715_v7  ;;  %15204 = vst [vmem:[#allocation56_spill] sm:$0xff] %v12212_v56  ;;  %15205 = vst [vmem:[#allocation57_spill] sm:$0xff] %v12224_v12  ;;  %v1803_v28 = vmul.f32 %v12203_v20, %v1787_v57  ;;  %vm14998_vm2 = vcmp.lt.s32.totalorder %v11815_v6, 111  ;;  %s15287_s9 = sld [smem:[#allocation116_spill]] }
 0x1cd   : > { %v1829_v43 = vpop.permute.xlu1 %1828  ;;  %1720 = vmatpush1.bf16.msra.mxu0 %v1712_v11  ;;  %v1827_v44 = vpop.permute.xlu0 %1826  ;;  %15206 = vst [vmem:[#allocation58_spill] sm:$0xff] %v12227_v8 }
 0x1ce   : > { %v1831_v49 = vsel %vm15040_vm4, %v1827_v44, %v1829_v43  ;;  %v1832_v50 = vsel %vm15040_vm4, %v1829_v43, %v1827_v44  ;;  %vm1198_vm4 = vcmp.lt.s32.totalorder %v11815_v6, 34 }
 0x1cf   : > { %1172 = vrot.lane.b32.xlu1 %v12022_v29, %s15032_s29  ;;  %v1846_v39 = vmul.f32 %v12176_v13, %v1831_v49  ;;  %v1847_v42 = vmul.f32 %v12179_v14, %v1832_v50  ;;  %v9315_v49 = vld [vmem:[%s14860_s15 + $0x33] ss:$8 sm:$0x3]  ;;  %v1802_v50 = vmul.f32 %v12187_v37, %v1788_v58 }
 0x1d0   : > { %2655 = vrot.lane.b32.xlu0 %v11697_v1, %s14975_s23  ;;  %v12249_v57 = vrot.slane %v9315_v49, %v11818_v9  ;;  %s11304_s23 = smov 23  }
 0x1d1   : > { %v1851_v7 = vpop.permute.xlu1 %1850  ;;  %v1849_v11 = vpop.permute.xlu0 %1848  ;;  %v1910_v48 = vrot.slane %v1846_v39, 4  ;;  %v1911_v14 = vrot.slane %v1847_v42, 4 }
 0x1d2   : > { %v1853_v43 = vsel %vm14969_vm3, %v1849_v11, %v1851_v7  ;;  %v1854_v44 = vsel %vm14969_vm3, %v1851_v7, %v1849_v11  ;;  %vm14983_vm3 = vcmp.lt.s32.totalorder %v11815_v6, 125  ;;  %15207 = vst [vmem:[#allocation59_spill] sm:$0xff] %v12249_v57 }
 0x1d3   : > { %v1868_v2 = vmul.f32 %v12209_v55, %v1853_v43  ;;  %v1869_v47 = vmul.f32 %v12212_v56, %v1854_v44  ;;  %2543 = vrot.lane.b32.xlu1 %v12022_v29, %s14979_s4  ;;  %v12252_v43 = vrot.slane %v9315_v49, %v11821_v10  ;;  %v1930_v44 = vsel %vm1155_vm5, %v1900_v3, %v1904_v33 }
 0x1d4   : > { %1174 = vrot.lane.b32.xlu0 %v11697_v1, %s15032_s29  ;;  %v1931_v56 = vsel %vm1155_vm5, %v1901_v60, %v1905_v19  ;;  %v11302_v49 = vmov 1983009808   ;;  %v1932_v63 = vsel %vm1158_vm7, %v1930_v44, %v1910_v48  ;;  %s11308_s29 = smov 100  }
 0x1d5   : > { %v1916_v7 = vrot.slane %v1868_v2, 1  ;;  %v1917_v11 = vrot.slane %v1869_v47, 1  ;;  %v1763_v58 = vpop.permute.xlu1 %1762  ;;  %v1761_v13 = vpop.permute.xlu0 %1760  ;;  %15208 = vst [vmem:[#allocation60_spill] sm:$0xff] %v12252_v43  ;;  %v1894_v2 = vrot.slane %v1802_v50, 5  ;;  %v1895_v47 = vrot.slane %v1803_v28, 5 }
 0x1d6   : > { %v1765_v39 = vsel %vm14986_vm0, %v1761_v13, %v1763_v58  ;;  %v1766_v42 = vsel %vm14986_vm0, %v1763_v58, %v1761_v13  ;;  %v1380_v33 = vunpack.c.l.s4 %v11302_v49  ;;  %v1933_v13 = vsel %vm1158_vm7, %v1931_v56, %v1911_v14 }
 0x1d7   : > { %v1780_v55 = vmul.f32 %v12224_v12, %v1766_v42  ;;  %v1781_v4 = vmul.f32 %v12227_v8, %v1765_v39  ;;  %1304 = vrot.lane.b32.xlu1 %v12022_v29, %s14981_s10  ;;  %v1935_v39 = vsel %vm1161_vm9, %v1933_v13, %v1917_v11  ;;  %v1934_v42 = vsel %vm1161_vm9, %v1932_v63, %v1916_v7 }
 0x1d8   : > { %2545 = vrot.lane.b32.xlu0 %v11697_v1, %s14979_s4  ;;  %vm14993_vm0 = vcmp.lt.s32.totalorder %v11815_v6, 113  ;;  %s15290_s4 = sld [smem:[#allocation123_spill]] }
 0x1d9   : > { %v1926_v19 = vsel %vm15103_vm10, %v1780_v55, %v1894_v2  ;;  %v1873_v50 = vpop.permute.xlu1 %1872  ;;  %v1871_v28 = vpop.permute.xlu0 %1870  ;;  %v1927_v58 = vsel %vm15103_vm10, %v1781_v4, %v1895_v47  ;;  %v1381_v2 = vunpack.c.0.s8 %v1380_v33  ;;  %v9343_v47 = vld.sshfl [vmem:[#allocation2] sm:$0x33 pattern:$0x76325410] }
 0x1da   : > { %v1875_v49 = vsel %vm14983_vm3, %v1871_v28, %v1873_v50  ;;  %v1876_v48 = vsel %vm14983_vm3, %v1873_v50, %v1871_v28  ;;  %v1929_v44 = vsel %vm1152_vm11, %v1927_v58, %v1901_v60  ;;  %v1928_v14 = vsel %vm1152_vm11, %v1926_v19, %v1900_v3  ;;  %v10985_v19 = vld.sshfl [vmem:[#allocation2] sm:$0x3 pattern:$0x76325410] }
 0x1db   : > { %v1890_v55 = vmul.f32 %v12249_v57, %v1875_v49  ;;  %v1891_v56 = vmul.f32 %v12252_v43, %v1876_v48  ;;  %2675 = vrot.lane.b32.xlu1 %v12022_v29, %s14977_s24  ;;  %v1939_v4 = vpack.c.bf16 %v1935_v39, %v1929_v44  ;;  %v1938_v63 = vpack.c.bf16 %v1934_v42, %v1928_v14 }
 0x1dc   : > { %1306 = vrot.lane.b32.xlu0 %v11697_v1, %s14981_s10  ;;  %v2758_v33 = vcombine.high %v9343_v47, %v9343_v47  ;;  %v12288_v58 = vsub.s32 %v1381_v2, %v11809_v5  ;;  %v15209_v49 = vmov 0   ;;  %vm14999_vm3 = vcmp.lt.s32.totalorder %v11815_v6, 112  ;;  %s15292_s10 = sld [smem:[#allocation126_spill]] }
 0x1dd   : > { %v1922_v13 = vrot.slane %v1890_v55, 6  ;;  %v1923_v50 = vrot.slane %v1891_v56, 6  ;;  %v2050_v60 = vpop.permute.xlu1 %2049  ;;  %v1707_v28 = vpop.permute.xlu0 %1706  ;;  %1962 = vmatprep.subr.bf16.mxu0 %v1939_v4  ;;  %v9320_v55 = vld [vmem:[%s14860_s15 + $0x36] ss:$8 sm:$0x3] }
 0x1de   : > { %9309 = vmatmul.mubr.msk.bf16.vlgmr.msra.gmra.mrb[0].mxu0 %vm1388_vm15, %v1707_v28  ;;  %v9321_v56 = vld [vmem:[%s14860_s15 + $0x37] ss:$8 sm:$0x3]  ;;  %v12311_v2 = vrot.slane %v9320_v55, %v11818_v9  ;;  %v12323_v28 = vrot.slane %v9320_v55, %v11821_v10 }
 0x1df   : > { %v1936_v3 = vsel %vm1164_vm12, %v1916_v7, %v1922_v13  ;;  %1963 = vmatpush1.bf16.msra.mxu0 %v1938_v63  ;;  %2489 = vrot.lane.b32.xlu1 %v10985_v19, %s11304_s23  ;;  %v1937_v29 = vsel %vm1164_vm12, %v1917_v11, %v1923_v50  ;;  %v1385_v11 = vrot.slane %v12000_v15, %v12288_v58  ;;  %v9322_v63 = vld [vmem:[%s14860_s15 + $0x40] ss:$8 sm:$0x3]  ;;  %v9319_v50 = vld [vmem:[%s14860_s15 + $0x35] ss:$8 sm:$0x3] }
 0x1e0   : > { %2677 = vrot.lane.b32.xlu0 %v11697_v1, %s14977_s24  ;;  %v1941_v39 = vpack.c.bf16 %v1937_v29, %v1937_v29  ;;  %v1940_v42 = vpack.c.bf16 %v1936_v3, %v1936_v3  ;;  %1994 = vmatprep.mubr.bf16.mxu0 %v15209_v49  ;;  %15210 = vst [vmem:[#allocation61_spill] sm:$0xff] %v12311_v2  ;;  %15213 = vst [vmem:[#allocation64_spill] sm:$0xff] %v12323_v28  ;;  %s15284_s23 = sld [smem:[#allocation113_spill]]  ;;  %s15295_s24 = smov %s15294_s8 }
 0x1e1   : > { %v2072_v48 = vpop.permute.xlu1 %2071  ;;  %v2052_v44 = vpop.permute.xlu0 %2051  ;;  %v12317_v13 = vrot.slane %v9321_v56, %v11821_v10 }
 0x1e2   : > { %v1960_v7 = vand.u32 %v1941_v39, %v11978_v59  ;;  %v1957_v14 = vand.u32 %v1940_v42, %v11978_v59  ;;  %v2054_v29 = vsel %vm14993_vm0, %v2050_v60, %v2052_v44  ;;  %v12335_v39 = vrot.slane %v9322_v63, %v11818_v9 }
 0x1e3   : > { %2761 = vrot.lane.b32.xlu1 %v2758_v33, %s14987_s0  ;;  %15212 = vst [vmem:[#allocation63_spill] sm:$0xff] %v12317_v13  ;;  %v2055_v33 = vsel %vm14993_vm0, %v2052_v44, %v2050_v60  ;;  %v12338_v42 = vrot.slane %v9322_v63, %v11821_v10  ;;  %vm15013_vm0 = vcmp.lt.s32.totalorder %v11815_v6, 110  ;;  %v9318_v63 = vld [vmem:[%s14860_s15 + $0x34] ss:$8 sm:$0x3] }
 0x1e4   : > { %1964 = vmatprep.subr.bf16.mxu0 %v1960_v7  ;;  %2759 = vrot.lane.b32.xlu0 %v9343_v47, %s14987_s0  ;;  %v12314_v47 = vrot.slane %v9321_v56, %v11818_v9  ;;  %15214 = vst [vmem:[#allocation65_spill] sm:$0xff] %v12335_v39  ;;  %v9323_v7 = vld [vmem:[%s14860_s15 + $0x41] ss:$8 sm:$0x3]  ;;  %v2070_v43 = vmul.f32 %v12323_v28, %v2055_v33  ;;  %s15285_s0 = sld [smem:[#allocation114_spill]] }
 0x1e5   : > { %v2028_v5 = vpop.permute.xlu1 %2027  ;;  %v2074_v1 = vpop.permute.xlu0 %2073  ;;  %1965 = vmatpush1.bf16.msra.mxu0 %v1957_v14  ;;  %15215 = vst [vmem:[#allocation66_spill] sm:$0xff] %v12338_v42  ;;  %v12348_v14 = vrot.slane %v9319_v50, %v11821_v10  ;;  %v12363_v57 = vrot.slane %v9323_v7, %v11818_v9  ;;  %v12376_v33 = vrot.slane %v9318_v63, %v11818_v9 }
 0x1e6   : > { %15211 = vst [vmem:[#allocation62_spill] sm:$0xff] %v12314_v47  ;;  %v2076_v3 = vsel %vm14999_vm3, %v2072_v48, %v2074_v1  ;;  %v2077_v19 = vsel %vm14999_vm3, %v2074_v1, %v2072_v48  ;;  %v12345_v48 = vrot.slane %v9319_v50, %v11818_v9  ;;  %v2069_v50 = vmul.f32 %v12311_v2, %v2054_v29 }
 0x1e7   : > { %15217 = vst [vmem:[#allocation68_spill] sm:$0xff] %v12348_v14  ;;  %v2091_v44 = vmul.f32 %v12314_v47, %v2076_v3  ;;  %v2092_v1 = vmul.f32 %v12317_v13, %v2077_v19  ;;  %15218 = vst [vmem:[#allocation69_spill] sm:$0xff] %v12363_v57  ;;  %v12366_v3 = vrot.slane %v9323_v7, %v11821_v10  ;;  %vm15012_vm3 = vcmp.lt.s32.totalorder %v11815_v6, 109 }
 0x1e8   : > { %1386 = vrot.lane.b32.xlu0 %v1385_v11, %s11305_s12  ;;  %15216 = vst [vmem:[#allocation67_spill] sm:$0xff] %v12345_v48  ;;  %15220 = vst [vmem:[#allocation71_spill] sm:$0xff] %v12376_v33  ;;  %v12379_v7 = vrot.slane %v9318_v63, %v11821_v10  ;;  %s15291_s12 = sld [smem:[#allocation125_spill]] }
 0x1e9   : > { %v2094_v15 = vpop.permute.xlu1 %2093  ;;  %v2030_v4 = vpop.permute.xlu0 %2029  ;;  %15219 = vst [vmem:[#allocation70_spill] sm:$0xff] %v12366_v3  ;;  %v2173_v28 = vrot.slane %v2091_v44, 7  ;;  %v2174_v2 = vrot.slane %v2092_v1, 7  ;;  %v2167_v44 = vrot.slane %v2069_v50, 2  ;;  %v2168_v1 = vrot.slane %v2070_v43, 2 }
 0x1ea   : > { %v2032_v19 = vsel %vm15019_vm1, %v2028_v5, %v2030_v4  ;;  %15221 = vst [vmem:[#allocation72_spill] sm:$0xff] %v12379_v7 }
 0x1ed   : > { %v2116_v11 = vpop.permute.xlu1 %2115  ;;  %v2096_v60 = vpop.permute.xlu0 %2095 }
 0x1ee   : > { %v2098_v55 = vsel %vm14998_vm2, %v2094_v15, %v2096_v60  ;;  %v2099_v56 = vsel %vm14998_vm2, %v2096_v60, %v2094_v15  ;;  %v2033_v15 = vsel %vm15019_vm1, %v2030_v4, %v2028_v5  ;;  %vm15014_vm2 = vcmp.lt.s32.totalorder %v11815_v6, 115 }
 0x1ef   : > { %v2113_v60 = vmul.f32 %v12335_v39, %v2098_v55  ;;  %v2114_v13 = vmul.f32 %v12338_v42, %v2099_v56  ;;  %v9324_v55 = vld [vmem:[%s14860_s15 + $0x42] ss:$8 sm:$0x3]  ;;  %v2047_v56 = vmul.f32 %v12345_v48, %v2032_v19  ;;  %v2048_v42 = vmul.f32 %v12348_v14, %v2033_v15 }
 0x1f0   : > { %v12397_v45 = vrot.slane %v9324_v55, %v11821_v10  ;;  %v2199_v19 = vsel %vm1155_vm5, %v2167_v44, %v2173_v28  ;;  %vm15034_vm1 = vcmp.lt.s32.totalorder %v11815_v6, 93 }
 0x1f1   : > { %v2006_v47 = vpop.permute.xlu1 %2005  ;;  %v2118_v29 = vpop.permute.xlu0 %2117  ;;  %v2179_v8 = vrot.slane %v2113_v60, 4  ;;  %v2180_v12 = vrot.slane %v2114_v13, 4  ;;  %v2200_v13 = vsel %vm1155_vm5, %v2168_v1, %v2174_v2  ;;  %v2161_v50 = vrot.slane %v2047_v56, 5 }
 0x1f2   : > { %v2120_v5 = vsel %vm15013_vm0, %v2116_v11, %v2118_v29  ;;  %v2121_v4 = vsel %vm15013_vm0, %v2118_v29, %v2116_v11  ;;  %v12394_v29 = vrot.slane %v9324_v55, %v11818_v9  ;;  %15223 = vst [vmem:[#allocation74_spill] sm:$0xff] %v12397_v45  ;;  %vm15016_vm0 = vcmp.lt.s32.totalorder %v11815_v6, 97 }
 0x1f3   : > { %v2135_v63 = vmul.f32 %v12363_v57, %v2120_v5  ;;  %v2136_v39 = vmul.f32 %v12366_v3, %v2121_v4  ;;  %v2201_v4 = vsel %vm1158_vm7, %v2199_v19, %v2179_v8  ;;  %v2202_v55 = vsel %vm1158_vm7, %v2200_v13, %v2180_v12 }
 0x1f4   : > { %15222 = vst [vmem:[#allocation73_spill] sm:$0xff] %v12394_v29 }
 0x1f5   : > { %v2185_v20 = vrot.slane %v2135_v63, 1  ;;  %v2186_v37 = vrot.slane %v2136_v39, 1  ;;  %v2138_v46 = vpop.permute.xlu1 %2137  ;;  %v2008_v11 = vpop.permute.xlu0 %2007  ;;  %v2162_v39 = vrot.slane %v2048_v42, 5 }
 0x1f6   : > { %v2010_v15 = vsel %vm15014_vm2, %v2006_v47, %v2008_v11  ;;  %v2011_v43 = vsel %vm15014_vm2, %v2008_v11, %v2006_v47  ;;  %vm15018_vm2 = vcmp.lt.s32.totalorder %v11815_v6, 95 }
 0x1f7   : > { %v2025_v60 = vmul.f32 %v12376_v33, %v2010_v15  ;;  %v2026_v5 = vmul.f32 %v12379_v7, %v2011_v43  ;;  %v2204_v47 = vsel %vm1161_vm9, %v2202_v55, %v2186_v37  ;;  %v2203_v2 = vsel %vm1161_vm9, %v2201_v4, %v2185_v20 }
 0x1f9   : > { %v2195_v28 = vsel %vm15103_vm10, %v2025_v60, %v2161_v50  ;;  %v1952_v63 = vpop.permute.xlu1 %1951  ;;  %v2140_v3 = vpop.permute.xlu0 %2139  ;;  %v2196_v57 = vsel %vm15103_vm10, %v2026_v5, %v2162_v39 }
 0x1fa   : > { %v2142_v42 = vsel %vm15012_vm3, %v2138_v46, %v2140_v3  ;;  %v2143_v56 = vsel %vm15012_vm3, %v2140_v3, %v2138_v46  ;;  %9317 = vmatmul.mubr.msk.bf16.vlgmr.msra.gmra.mrb[0].mxu0 %vm1388_vm15, %v1952_v63  ;;  %v2198_v12 = vsel %vm1152_vm11, %v2196_v57, %v2168_v1  ;;  %v2197_v8 = vsel %vm1152_vm11, %v2195_v28, %v2167_v44  ;;  %v9329_v28 = vld [vmem:[%s14860_s15 + $0x45] ss:$8 sm:$0x3]  ;;  %v9330_v63 = vld [vmem:[%s14860_s15 + $0x46] ss:$8 sm:$0x3] }
 0x1fb   : > { %v2157_v11 = vmul.f32 %v12394_v29, %v2142_v42  ;;  %v2158_v19 = vmul.f32 %v12397_v45, %v2143_v56  ;;  %v2208_v15 = vpack.c.bf16 %v2204_v47, %v2198_v12  ;;  %v2207_v43 = vpack.c.bf16 %v2203_v2, %v2197_v8  ;;  %2263 = vmatprep.mubr.bf16.mxu0 %v15209_v49  ;;  %v9331_v47 = vld [vmem:[%s14860_s15 + $0x47] ss:$8 sm:$0x3]  ;;  %v9328_v12 = vld [vmem:[%s14860_s15 + $0x44] ss:$8 sm:$0x3] }
 0x1fc   : > { %vm15015_vm3 = vcmp.lt.s32.totalorder %v11815_v6, 96  ;;  %v12439_v2 = vrot.slane %v9329_v28, %v11818_v9  ;;  %v12442_v42 = vrot.slane %v9330_v63, %v11818_v9  ;;  %v12445_v56 = vrot.slane %v9330_v63, %v11821_v10 }
 0x1fd   : > { %v2191_v13 = vrot.slane %v2157_v11, 6  ;;  %v2192_v50 = vrot.slane %v2158_v19, 6  ;;  %v2321_v39 = vpop.permute.xlu1 %2320  ;;  %v2319_v60 = vpop.permute.xlu0 %2318  ;;  %2231 = vmatprep.subr.bf16.mxu0 %v2208_v15  ;;  %v12451_v8 = vrot.slane %v9329_v28, %v11821_v10 }
 0x1fe   : > { %2232 = vmatpush1.bf16.msra.mxu0 %v2207_v43  ;;  %15224 = vst [vmem:[#allocation75_spill] sm:$0xff] %v12439_v2  ;;  %15225 = vst [vmem:[#allocation76_spill] sm:$0xff] %v12442_v42  ;;  %v2323_v15 = vsel %vm15016_vm0, %v2319_v60, %v2321_v39  ;;  %v2324_v43 = vsel %vm15016_vm0, %v2321_v39, %v2319_v60  ;;  %vm15035_vm0 = vcmp.lt.s32.totalorder %v11815_v6, 94 }
 0x1ff   : > { %v2205_v46 = vsel %vm1164_vm12, %v2185_v20, %v2191_v13  ;;  %v2206_v57 = vsel %vm1164_vm12, %v2186_v37, %v2192_v50  ;;  %15226 = vst [vmem:[#allocation77_spill] sm:$0xff] %v12445_v56  ;;  %15227 = vst [vmem:[#allocation78_spill] sm:$0xff] %v12451_v8  ;;  %v12463_v50 = vrot.slane %v9331_v47, %v11818_v9 }
 0x200   : > { %v2210_v3 = vpack.c.bf16 %v2206_v57, %v2206_v57  ;;  %v2209_v44 = vpack.c.bf16 %v2205_v46, %v2205_v46  ;;  %v12466_v46 = vrot.slane %v9331_v47, %v11821_v10  ;;  %v9332_v57 = vld [vmem:[%s14860_s15 + $0x50] ss:$8 sm:$0x3]  ;;  %v2338_v28 = vmul.f32 %v12439_v2, %v2323_v15 }
 0x201   : > { %v2343_v1 = vpop.permute.xlu1 %2342  ;;  %v2341_v5 = vpop.permute.xlu0 %2340  ;;  %15228 = vst [vmem:[#allocation79_spill] sm:$0xff] %v12463_v50  ;;  %v2339_v63 = vmul.f32 %v12451_v8, %v2324_v43  ;;  %v12491_v47 = vrot.slane %v9332_v57, %v11818_v9 }
 0x202   : > { %v2229_v4 = vand.u32 %v2210_v3, %v11978_v59  ;;  %v2226_v55 = vand.u32 %v2209_v44, %v11978_v59  ;;  %v2345_v11 = vsel %vm15015_vm3, %v2341_v5, %v2343_v1  ;;  %v2346_v19 = vsel %vm15015_vm3, %v2343_v1, %v2341_v5  ;;  %15229 = vst [vmem:[#allocation80_spill] sm:$0xff] %v12466_v46 }
 0x203   : > { %vm15037_vm3 = vcmp.lt.s32.totalorder %v11815_v6, 98  ;;  %v12473_v3 = vrot.slane %v9328_v12, %v11818_v9  ;;  %v12476_v44 = vrot.slane %v9328_v12, %v11821_v10  ;;  %v2360_v60 = vmul.f32 %v12442_v42, %v2345_v11  ;;  %15232 = vst [vmem:[#allocation83_spill] sm:$0xff] %v12491_v47 }
 0x204   : > { %2233 = vmatprep.subr.bf16.mxu0 %v2229_v4  ;;  %v2361_v1 = vmul.f32 %v12445_v56, %v2346_v19  ;;  %v12494_v12 = vrot.slane %v9332_v57, %v11821_v10 }
 0x205   : > { %v2299_v37 = vpop.permute.xlu1 %2298  ;;  %v2297_v20 = vpop.permute.xlu0 %2296  ;;  %2234 = vmatpush1.bf16.msra.mxu0 %v2226_v55  ;;  %15230 = vst [vmem:[#allocation81_spill] sm:$0xff] %v12473_v3  ;;  %15231 = vst [vmem:[#allocation82_spill] sm:$0xff] %v12476_v44  ;;  %v9327_v55 = vld [vmem:[%s14860_s15 + $0x43] ss:$8 sm:$0x3]  ;;  %v2442_v8 = vrot.slane %v2360_v60, 7 }
 0x206   : > { %15233 = vst [vmem:[#allocation84_spill] sm:$0xff] %v12494_v12  ;;  %v2301_v11 = vsel %vm15037_vm3, %v2297_v20, %v2299_v37  ;;  %v2302_v19 = vsel %vm15037_vm3, %v2299_v37, %v2297_v20  ;;  %v12504_v43 = vrot.slane %v9327_v55, %v11818_v9  ;;  %v12507_v57 = vrot.slane %v9327_v55, %v11821_v10 }
 0x207   : > { %v2443_v2 = vrot.slane %v2361_v1, 7  ;;  %v2436_v60 = vrot.slane %v2338_v28, 2  ;;  %v2437_v1 = vrot.slane %v2339_v63, 2  ;;  %vm15076_vm3 = vcmp.lt.s32.totalorder %v11815_v6, 80 }
 0x208   : > { %15234 = vst [vmem:[#allocation85_spill] sm:$0xff] %v12504_v43  ;;  %15235 = vst [vmem:[#allocation86_spill] sm:$0xff] %v12507_v57 }
 0x209   : > { %v2365_v13 = vpop.permute.xlu1 %2364  ;;  %v2363_v39 = vpop.permute.xlu0 %2362  ;;  %v2469_v63 = vsel %vm1155_vm5, %v2437_v1, %v2443_v2 }
 0x20a   : > { %v2367_v5 = vsel %vm15018_vm2, %v2363_v39, %v2365_v13  ;;  %v2368_v4 = vsel %vm15018_vm2, %v2365_v13, %v2363_v39  ;;  %vm15036_vm2 = vcmp.lt.s32.totalorder %v11815_v6, 99 }
 0x20b   : > { %v2382_v13 = vmul.f32 %v12463_v50, %v2367_v5  ;;  %v2383_v39 = vmul.f32 %v12466_v46, %v2368_v4  ;;  %v9333_v5 = vld [vmem:[%s14860_s15 + $0x51] ss:$8 sm:$0x3]  ;;  %v2316_v4 = vmul.f32 %v12473_v3, %v2301_v11  ;;  %v2317_v46 = vmul.f32 %v12476_v44, %v2302_v19 }
 0x20c   : > { %v12525_v14 = vrot.slane %v9333_v5, %v11821_v10  ;;  %v2468_v11 = vsel %vm1155_vm5, %v2436_v60, %v2442_v8 }
 0x20d   : > { %v2387_v56 = vpop.permute.xlu1 %2386  ;;  %v2385_v15 = vpop.permute.xlu0 %2384  ;;  %v2448_v42 = vrot.slane %v2382_v13, 4  ;;  %v2449_v45 = vrot.slane %v2383_v39, 4  ;;  %v2430_v13 = vrot.slane %v2316_v4, 5  ;;  %v2431_v39 = vrot.slane %v2317_v46, 5 }
 0x20e   : > { %v2389_v37 = vsel %vm15035_vm0, %v2385_v15, %v2387_v56  ;;  %v2390_v20 = vsel %vm15035_vm0, %v2387_v56, %v2385_v15  ;;  %v12522_v15 = vrot.slane %v9333_v5, %v11818_v9  ;;  %15237 = vst [vmem:[#allocation88_spill] sm:$0xff] %v12525_v14  ;;  %vm15045_vm0 = vcmp.lt.s32.totalorder %v11815_v6, 32 }
 0x20f   : > { %v2404_v55 = vmul.f32 %v12491_v47, %v2389_v37  ;;  %v2405_v50 = vmul.f32 %v12494_v12, %v2390_v20  ;;  %v2470_v20 = vsel %vm1158_vm7, %v2468_v11, %v2448_v42 }
 0x210   : > { %15236 = vst [vmem:[#allocation87_spill] sm:$0xff] %v12522_v15 }
 0x211   : > { %v2277_v29 = vpop.permute.xlu1 %2276  ;;  %v2454_v7 = vrot.slane %v2404_v55, 1  ;;  %v2455_v33 = vrot.slane %v2405_v50, 1  ;;  %v2275_v56 = vpop.permute.xlu0 %2274  ;;  %v2471_v55 = vsel %vm1158_vm7, %v2469_v63, %v2449_v45 }
 0x212   : > { %v2279_v19 = vsel %vm15036_vm2, %v2275_v56, %v2277_v29  ;;  %v2280_v28 = vsel %vm15036_vm2, %v2277_v29, %v2275_v56  ;;  %vm15067_vm2 = vcmp.lt.s32.totalorder %v11815_v6, 81 }
 0x213   : > { %v2294_v50 = vmul.f32 %v12504_v43, %v2279_v19  ;;  %v2295_v37 = vmul.f32 %v12507_v57, %v2280_v28  ;;  %v2473_v29 = vsel %vm1161_vm9, %v2471_v55, %v2455_v33  ;;  %v2472_v2 = vsel %vm1161_vm9, %v2470_v20, %v2454_v7  ;;  %v9340_v57 = vld [vmem:[%s14860_s15 + $0x56] ss:$8 sm:$0x3] }
 0x214   : > { %v12652_v51 = vrot.slane %v9340_v57, %v11818_v9 }
 0x215   : > { %v2409_v5 = vpop.permute.xlu1 %2408  ;;  %v2464_v8 = vsel %vm15103_vm10, %v2294_v50, %v2430_v13  ;;  %v2407_v12 = vpop.permute.xlu0 %2406  ;;  %v2465_v47 = vsel %vm15103_vm10, %v2295_v37, %v2431_v39 }
 0x216   : > { %v2411_v46 = vsel %vm15034_vm1, %v2407_v12, %v2409_v5  ;;  %v2412_v4 = vsel %vm15034_vm1, %v2409_v5, %v2407_v12  ;;  %v2467_v42 = vsel %vm1152_vm11, %v2465_v47, %v2437_v1  ;;  %v2466_v56 = vsel %vm1152_vm11, %v2464_v8, %v2436_v60  ;;  %15246 = vst [vmem:[#allocation97_spill] sm:$0xff] %v12652_v51 }
 0x217   : > { %v2426_v45 = vmul.f32 %v12522_v15, %v2411_v46  ;;  %v2427_v11 = vmul.f32 %v12525_v14, %v2412_v4  ;;  %v2477_v19 = vpack.c.bf16 %v2473_v29, %v2467_v42  ;;  %v2476_v28 = vpack.c.bf16 %v2472_v2, %v2466_v56  ;;  %v9295_v56 = vld [vmem:[%s14860_s15 + $0x12] ss:$8 sm:$0x3]  ;;  %v9337_v14 = vld [vmem:[%s14860_s15 + $0x53] ss:$8 sm:$0x3] }
 0x218   : > { %vm15049_vm1 = vcmp.lt.s32.totalorder %v11815_v6, 33  ;;  %v12643_v32 = vrot.slane %v9337_v14, %v11818_v9 }
 0x219   : > { %v1217_v63 = vpop.permute.xlu1 %1216  ;;  %v2460_v13 = vrot.slane %v2426_v45, 6  ;;  %v2461_v39 = vrot.slane %v2427_v11, 6  ;;  %2500 = vmatprep.subr.bf16.mxu0 %v2477_v19  ;;  %v9338_v11 = vld [vmem:[%s14860_s15 + $0x54] ss:$8 sm:$0x3] }
 0x21a   : > { %v2221_v50 = vpop.permute.xlu0 %2220  ;;  %v9339_v19 = vld [vmem:[%s14860_s15 + $0x55] ss:$8 sm:$0x3]  ;;  %15244 = vst [vmem:[#allocation95_spill] sm:$0xff] %v12643_v32 }
 0x21b   : > { %9326 = vmatmul.mubr.msk.bf16.vlgmr.msra.gmra.mrb[0].mxu0 %vm1388_vm15, %v2221_v50  ;;  %v2474_v37 = vsel %vm1164_vm12, %v2454_v7, %v2460_v13  ;;  %v2475_v47 = vsel %vm1164_vm12, %v2455_v33, %v2461_v39  ;;  %v9294_v33 = vld [vmem:[%s14860_s15 + $0x11] ss:$8 sm:$0x3]  ;;  %v9293_v39 = vld [vmem:[%s14860_s15 + $0x10] ss:$8 sm:$0x3]  ;;  %v12585_v50 = vrot.slane %v9295_v56, %v11818_v9 }
 0x21c   : > { %2501 = vmatpush1.bf16.msra.mxu0 %v2476_v28  ;;  %2532 = vmatprep.mubr.bf16.mxu0 %v15209_v49  ;;  %v2479_v60 = vpack.c.bf16 %v2475_v47, %v2475_v47  ;;  %v2478_v1 = vpack.c.bf16 %v2474_v37, %v2474_v37  ;;  %v12575_v28 = vrot.slane %v9294_v33, %v11818_v9 }
 0x21d   : > { %v1239_v12 = vpop.permute.xlu1 %1238  ;;  %v12578_v13 = vrot.slane %v9294_v33, %v11821_v10  ;;  %v12588_v37 = vrot.slane %v9295_v56, %v11821_v10  ;;  %v9296_v33 = vld [vmem:[%s14860_s15 + $0x13] ss:$8 sm:$0x3]  ;;  %v12628_v3 = vrot.slane %v9293_v39, %v11821_v10 }
 0x21e   : > { %v1219_v20 = vpop.permute.xlu0 %1218  ;;  %v2498_v5 = vand.u32 %v2479_v60, %v11978_v59  ;;  %v2495_v55 = vand.u32 %v2478_v1, %v11978_v59  ;;  %v12595_v60 = vrot.slane %v9338_v11, %v11818_v9  ;;  %v12598_v1 = vrot.slane %v9338_v11, %v11821_v10 }
 0x21f   : > { %v1221_v43 = vsel %vm15049_vm1, %v1217_v63, %v1219_v20  ;;  %v1222_v44 = vsel %vm15049_vm1, %v1219_v20, %v1217_v63  ;;  %v12638_v48 = vrot.slane %v9296_v33, %v11821_v10  ;;  %v12646_v63 = vrot.slane %v9337_v14, %v11821_v10 }
 0x220   : > { %2502 = vmatprep.subr.bf16.mxu0 %v2498_v5  ;;  %15238 = vst [vmem:[#allocation89_spill] sm:$0xff] %v12595_v60  ;;  %15239 = vst [vmem:[#allocation90_spill] sm:$0xff] %v12598_v1  ;;  %v12601_v5 = vrot.slane %v9339_v19, %v11818_v9  ;;  %vm15078_vm1 = vcmp.lt.s32.totalorder %v11815_v6, 82  ;;  %v12661_v14 = vmul.f32 %v12575_v28, %v1222_v44 }
 0x221   : > { %v2588_v8 = vpop.permute.xlu1 %2587  ;;  %2503 = vmatpush1.bf16.msra.mxu0 %v2495_v55  ;;  %v12604_v55 = vrot.slane %v9339_v19, %v11821_v10  ;;  %v12618_v19 = vrot.slane %v9293_v39, %v11818_v9  ;;  %15243 = vst [vmem:[#allocation94_spill] sm:$0xff] %v12638_v48  ;;  %15245 = vst [vmem:[#allocation96_spill] sm:$0xff] %v12646_v63 }
 0x222   : > { %v1241_v29 = vpop.permute.xlu0 %1240  ;;  %15240 = vst [vmem:[#allocation91_spill] sm:$0xff] %v12601_v5 }
 0x223   : > { %15241 = vst [vmem:[#allocation92_spill] sm:$0xff] %v12604_v55  ;;  %v1243_v15 = vsel %vm15045_vm0, %v1239_v12, %v1241_v29  ;;  %v1244_v11 = vsel %vm15045_vm0, %v1241_v29, %v1239_v12  ;;  %vm1264_vm0 = vcmp.lt.s32.totalorder %v11815_v6, 31  ;;  %v9297_v12 = vld [vmem:[%s14860_s15 + $0x14] ss:$8 sm:$0x3]  ;;  %v12635_v29 = vrot.slane %v9296_v33, %v11818_v9 }
 0x224   : > { %v1258_v20 = vmul.f32 %v12585_v50, %v1244_v11  ;;  %v1259_v39 = vmul.f32 %v12588_v37, %v1243_v15  ;;  %v12655_v33 = vrot.slane %v9340_v57, %v11821_v10  ;;  %v12664_v11 = vmul.f32 %v12578_v13, %v1221_v43  ;;  %v9292_v57 = vld [vmem:[%s14860_s15 + $0x7] ss:$8 sm:$0x3] }
 0x225   : > { %v2610_v2 = vpop.permute.xlu1 %2609  ;;  %15242 = vst [vmem:[#allocation93_spill] sm:$0xff] %v12635_v29  ;;  %v12669_v15 = vrot.slane %v9297_v12, %v11818_v9  ;;  %v12679_v43 = vrot.slane %v9297_v12, %v11821_v10  ;;  %v12696_v53 = vrot.slane %v9292_v57, %v11818_v9  ;;  %v12699_v52 = vrot.slane %v9292_v57, %v11821_v10 }
 0x226   : > { %v2590_v46 = vpop.permute.xlu0 %2589  ;;  %15247 = vst [vmem:[#allocation98_spill] sm:$0xff] %v12655_v33  ;;  %v1341_v12 = vrot.slane %v1259_v39, 7 }
 0x227   : > { %15248 = vst [vmem:[#allocation99_spill] sm:$0xff] %v12669_v15  ;;  %v2592_v0 = vsel %vm15067_vm2, %v2588_v8, %v2590_v46  ;;  %v2593_v44 = vsel %vm15067_vm2, %v2590_v46, %v2588_v8  ;;  %15249 = vst [vmem:[#allocation100_spill] sm:$0xff] %v12679_v43  ;;  %v9336_v8 = vld [vmem:[%s14860_s15 + $0x52] ss:$8 sm:$0x3]  ;;  %v1340_v46 = vrot.slane %v1258_v20, 7 }
 0x228   : > { %v12707_v30 = vmul.f32 %v12595_v60, %v2592_v0  ;;  %v12710_v20 = vmul.f32 %v12598_v1, %v2593_v44  ;;  %vm1176_vm2 = vcmp.lt.s32.totalorder %v11815_v6, 35  ;;  %v12722_v0 = vrot.slane %v9336_v8, %v11818_v9 }
 0x229   : > { %v12555_v7 = vpop.permute.xlu1 %1194  ;;  %v12725_v44 = vrot.slane %v9336_v8, %v11821_v10  ;;  %v15256_v8 = vrot.slane %v12664_v11, 2 }
 0x22a   : > { %v2612_v4 = vpop.permute.xlu0 %2611  ;;  %15252 = vst [vmem:[#allocation103_spill] sm:$0xff] %v12722_v0 }
 0x22b   : > { %v2614_v62 = vsel %vm15076_vm3, %v2610_v2, %v2612_v4  ;;  %v2615_v61 = vsel %vm15076_vm3, %v2612_v4, %v2610_v2  ;;  %v9298_v2 = vld [vmem:[%s14860_s15 + $0x15] ss:$8 sm:$0x3]  ;;  %15253 = vst [vmem:[#allocation104_spill] sm:$0xff] %v12725_v44  ;;  %v1367_v60 = vsel %vm1155_vm5, %v15256_v8, %v1341_v12  ;;  %vm2547_vm3 = vcmp.lt.s32.totalorder %v11815_v6, 83 }
 0x22c   : > { %v2629_v39 = vmul.f32 %v12601_v5, %v2614_v62  ;;  %v2630_v27 = vmul.f32 %v12604_v55, %v2615_v61  ;;  %v12728_v62 = vrot.slane %v9298_v2, %v11818_v9  ;;  %v12731_v61 = vrot.slane %v9298_v2, %v11821_v10 }
 0x22d   : > { %v12560_v42 = vpop.permute.xlu1 %1260  ;;  %v15257_v55 = vrot.slane %v12661_v14, 2 }
 0x22e   : > { %v12565_v45 = vpop.permute.xlu0 %1196  ;;  %15254 = vst [vmem:[#allocation105_spill] sm:$0xff] %v12728_v62  ;;  %15255 = vst [vmem:[#allocation106_spill] sm:$0xff] %v12731_v61  ;;  %v2711_v25 = vrot.slane %v2629_v39, 7  ;;  %v2712_v12 = vrot.slane %v2630_v27, 7 }
 0x22f   : > { %v1366_v2 = vsel %vm1155_vm5, %v15257_v55, %v1340_v46 }
 0x231   : > { %v12592_v47 = vpop.permute.xlu1 %2565 }
 0x232   : > { %v1263_v56 = vpop.permute.xlu0 %1262 }
 0x233   : > { %v1265_v57 = vsel %vm1264_vm0, %v12560_v42, %v1263_v56  ;;  %v1266_v16 = vsel %vm1264_vm0, %v1263_v56, %v12560_v42  ;;  %v1199_v42 = vsel %vm1198_vm4, %v12555_v7, %v12565_v45  ;;  %v1200_v56 = vsel %vm1198_vm4, %v12565_v45, %v12555_v7 }
 0x234   : > { %v1280_v5 = vmul.f32 %v12635_v29, %v1266_v16  ;;  %v1281_v34 = vmul.f32 %v12638_v48, %v1265_v57  ;;  %v15080_v7 = vrot.slane %v12707_v30, 2  ;;  %v1214_v39 = vmul.f32 %v12618_v19, %v1200_v56 }
 0x235   : > { %v12640_v38 = vpop.permute.xlu1 %2631  ;;  %v1215_v27 = vmul.f32 %v12628_v3, %v1199_v42 }
 0x236   : > { %v2568_v54 = vpop.permute.xlu0 %2567  ;;  %v2737_v42 = vsel %vm1155_vm5, %v15080_v7, %v2711_v25  ;;  %v1328_v25 = vrot.slane %v1214_v39, 5 }
 0x237   : > { %v2570_v55 = vsel %vm15078_vm1, %v12592_v47, %v2568_v54  ;;  %v2571_v46 = vsel %vm15078_vm1, %v2568_v54, %v12592_v47  ;;  %v1346_v47 = vrot.slane %v1280_v5, 4  ;;  %vm1308_vm1 = vcmp.lt.s32.totalorder %v11815_v6, 29 }
 0x238   : > { %v2585_v56 = vmul.f32 %v12643_v32, %v2570_v55  ;;  %v2586_v36 = vmul.f32 %v12646_v63, %v2571_v46  ;;  %v1329_v7 = vrot.slane %v1215_v27, 5 }
 0x239   : > { %v1283_v18 = vpop.permute.xlu1 %1282 }
 0x23a   : > { %v2634_v40 = vpop.permute.xlu0 %2633  ;;  %v2700_v39 = vrot.slane %v2586_v36, 5 }
 0x23b   : > { %v2636_v57 = vsel %vm15105_vm8, %v12640_v38, %v2634_v40  ;;  %v2637_v8 = vsel %vm15105_vm8, %v2634_v40, %v12640_v38  ;;  %v15258_v38 = vrot.slane %v12710_v20, 2  ;;  %vm4844_vm8 = vcmask 130048  }
 0x23c   : > { %v2651_v40 = vmul.f32 %v12652_v51, %v2636_v57  ;;  %v2652_v5 = vmul.f32 %v12655_v33, %v2637_v8 }
 0x23d   : > { %v2654_v4 = vpop.permute.xlu1 %2653 }
 0x23e   : > { %v1285_v1 = vpop.permute.xlu0 %1284 }
 0x23f   : > { %v1287_v31 = vsel %vm1286_vm14, %v1283_v18, %v1285_v1  ;;  %v1288_v26 = vsel %vm1286_vm14, %v1285_v1, %v1283_v18 }
 0x240   : > { %v12763_v16 = vmul.f32 %v12669_v15, %v1288_v26  ;;  %v12766_v18 = vmul.f32 %v12679_v43, %v1287_v31  ;;  %v1347_v26 = vrot.slane %v1281_v34, 4  ;;  %v2738_v34 = vsel %vm1155_vm5, %v15258_v38, %v2712_v12 }
 0x241   : > { %v1173_v1 = vpop.permute.xlu1 %1172  ;;  %v1368_v38 = vsel %vm1158_vm7, %v1366_v2, %v1346_v47  ;;  %vm15104_vm5 = vcmp.lt.s32.totalorder %v11815_v6, 77 }
 0x242   : > { %v2656_v54 = vpop.permute.xlu0 %2655  ;;  %v1369_v8 = vsel %vm1158_vm7, %v1367_v60, %v1347_v26  ;;  %v15259_v51 = vrot.slane %v12766_v18, 1 }
 0x243   : > { %v2658_v31 = vsel %vm15106_vm6, %v2654_v4, %v2656_v54  ;;  %v2659_v45 = vsel %vm15106_vm6, %v2656_v54, %v2654_v4  ;;  %v2699_v4 = vrot.slane %v2585_v56, 5  ;;  %v2718_v54 = vrot.slane %v2652_v5, 4  ;;  %v9342_v56 = vld [vmem:[%s14860_s15 + $0x60] ss:$8 sm:$0x3] }
 0x244   : > { %v12794_v55 = vmul.f32 %v12687_v17, %v2658_v31  ;;  %v12797_v46 = vmul.f32 %v12690_v41, %v2659_v45  ;;  %v2717_v45 = vrot.slane %v2651_v40, 4  ;;  %v1371_v41 = vsel %vm1161_vm9, %v1369_v8, %v15259_v51 }
 0x245   : > { %v2544_v35 = vpop.permute.xlu1 %2543  ;;  %v15261_v5 = vrot.slane %v12664_v11, 2  ;;  %v2740_v11 = vsel %vm1158_vm7, %v2738_v34, %v2718_v54  ;;  %vm5508_vm6 = vcmask 64512  }
 0x246   : > { %v1175_v63 = vpop.permute.xlu0 %1174  ;;  %v2723_v2 = vrot.slane %v12794_v55, 1  ;;  %v2724_v36 = vrot.slane %v12797_v46, 1  ;;  %v15262_v46 = vrot.slane %v12661_v14, 2 }
 0x247   : > { %v1177_v12 = vsel %vm1176_vm2, %v1173_v1, %v1175_v63  ;;  %v1178_v57 = vsel %vm1176_vm2, %v1175_v63, %v1173_v1  ;;  %v15260_v63 = vrot.slane %v12763_v16, 1 }
 0x248   : > { %v1192_v27 = vmul.f32 %v12696_v53, %v1178_v57  ;;  %v1193_v31 = vmul.f32 %v12699_v52, %v1177_v12 }
 0x249   : > { %v1305_v33 = vpop.permute.xlu1 %1304  ;;  %v1370_v60 = vsel %vm1161_vm9, %v1368_v38, %v15260_v63  ;;  %v2739_v38 = vsel %vm1158_vm7, %v2737_v42, %v2717_v45 }
 0x24a   : > { %v2546_v1 = vpop.permute.xlu0 %2545  ;;  %v1363_v47 = vsel %vm15103_vm10, %v1193_v31, %v1329_v7  ;;  %v1362_v26 = vsel %vm15103_vm10, %v1192_v27, %v1328_v25  ;;  %v12835_v31 = vrot.slane %v9342_v56, %v11818_v9 }
 0x24b   : > { %v2548_v51 = vsel %vm2547_vm3, %v2544_v35, %v2546_v1  ;;  %v2549_v40 = vsel %vm2547_vm3, %v2546_v1, %v2544_v35  ;;  %v1365_v55 = vsel %vm1152_vm11, %v1363_v47, %v15261_v5  ;;  %v1364_v7 = vsel %vm1152_vm11, %v1362_v26, %v15262_v46 }
 0x24c   : > { %v2563_v25 = vmul.f32 %v12722_v0, %v2548_v51  ;;  %v2564_v12 = vmul.f32 %v12725_v44, %v2549_v40  ;;  %v1375_v57 = vpack.c.bf16 %v1371_v41, %v1365_v55  ;;  %v1374_v8 = vpack.c.bf16 %v1370_v60, %v1364_v7  ;;  %15263 = vst [vmem:[#allocation107_spill] sm:$0xff] %v12835_v31 }
 0x24d   : > { %v2676_v27 = vpop.permute.xlu1 %2675  ;;  %v12838_v35 = vrot.slane %v9342_v56, %v11821_v10  ;;  %v2742_v41 = vsel %vm1161_vm9, %v2740_v11, %v2724_v36  ;;  %v2741_v60 = vsel %vm1161_vm9, %v2739_v38, %v2723_v2  ;;  %v15265_v47 = vrot.slane %v12710_v20, 2 }
 0x24e   : > { %v2733_v14 = vsel %vm15103_vm10, %v2563_v25, %v2699_v4  ;;  %1400 = vmatprep.subr.bf16.mxu1 %v1375_v57  ;;  %v1307_v63 = vpop.permute.xlu0 %1306  ;;  %v2734_v1 = vsel %vm15103_vm10, %v2564_v12, %v2700_v39  ;;  %v15266_v4 = vrot.slane %v12707_v30, 2  ;;  %v15267_v25 = vrot.slane %v12766_v18, 1 }
 0x24f   : > { %15264 = vst [vmem:[#allocation108_spill] sm:$0xff] %v12838_v35  ;;  %v1309_v42 = vsel %vm1308_vm1, %v1305_v33, %v1307_v63  ;;  %v1310_v45 = vsel %vm1308_vm1, %v1307_v63, %v1305_v33  ;;  %1401 = vmatpush1.bf16.msra.mxu1 %v1374_v8  ;;  %v2736_v34 = vsel %vm1152_vm11, %v2734_v1, %v15265_v47  ;;  %v15268_v57 = vrot.slane %v12763_v16, 1 }
 0x250   : > { %v2735_v54 = vsel %vm1152_vm11, %v2733_v14, %v15266_v4  ;;  %v1324_v39 = vmul.f32 %v12728_v62, %v1310_v45  ;;  %v1325_v26 = vmul.f32 %v12731_v61, %v1309_v42  ;;  %v2746_v56 = vpack.c.bf16 %v2742_v41, %v2736_v34  ;;  %v10813_v62 = vld [vmem:[%s14863_s18 + $0x40] sm:$0xff]  }
 0x251   : > { %v2745_v51 = vpack.c.bf16 %v2741_v60, %v2735_v54  ;;  %v2490_v40 = vpop.permute.xlu1 %2489  ;;  %vm2763_vm9 = vcmask 15360   ;;  %vm3953_vm10 = vcmask 588800  }
 0x252   : > { %v1358_v5 = vrot.slane %v1324_v39, 6  ;;  %v1359_v55 = vrot.slane %v1325_v26, 6  ;;  %v2678_v46 = vpop.permute.xlu0 %2677  ;;  %2774 = vmatprep.subr.bf16.mxu0 %v2746_v56  ;;  %9335 = vmatmul.mubr.msk.bf16.vlgmr.msra.gmra.mrb[0].mxu0 %vm1388_vm15, %v2490_v40 }
 0x253   : > { %v2680_v33 = vsel %vm15104_vm5, %v2676_v27, %v2678_v46  ;;  %v2681_v30 = vsel %vm15104_vm5, %v2678_v46, %v2676_v27  ;;  %2775 = vmatpush1.bf16.msra.mxu0 %v2745_v51  ;;  %2806 = vmatprep.mubr.bf16.mxu0 %v15209_v49  ;;  %vm4060_vm5 = vcmask 31744  }
 0x254   : > { %v2695_v20 = vmul.f32 %v12835_v31, %v2680_v33  ;;  %v2696_v7 = vmul.f32 %v12838_v35, %v2681_v30  ;;  %v1373_v12 = vsel %vm1164_vm12, %v15267_v25, %v1359_v55  ;;  %v1372_v8 = vsel %vm1164_vm12, %v15268_v57, %v1358_v5 }
 0x255   : > { %v1377_v38 = vpack.c.bf16 %v1373_v12, %v1373_v12  ;;  %v1376_v11 = vpack.c.bf16 %v1372_v8, %v1372_v8  ;;  %v2762_v4 = vpop.permute.xlu1 %2761 }
 0x256   : > { %v2729_v14 = vrot.slane %v2695_v20, 6  ;;  %v2730_v63 = vrot.slane %v2696_v7, 6  ;;  %v2760_v27 = vpop.permute.xlu0 %2759 }
 0x257   : > { %v1398_v1 = vand.u32 %v11978_v59, %v1377_v38  ;;  %v1395_v41 = vand.u32 %v11978_v59, %v1376_v11 }
 0x258   : > { %v2743_v60 = vsel %vm1164_vm12, %v2723_v2, %v2729_v14  ;;  %v2744_v42 = vsel %vm1164_vm12, %v2724_v36, %v2730_v63  ;;  %v2764_v2 = vsel %vm2763_vm9, %v2760_v27, %v2762_v4 }
 0x259   : > { %1402 = vmatprep.subr.bf16.mxu1 %v1398_v1  ;;  %v2748_v18 = vpack.c.bf16 %v2744_v42, %v2744_v42  ;;  %v2747_v45 = vpack.c.bf16 %v2743_v60, %v2743_v60 }
 0x25a   : > { %1403 = vmatpush1.bf16.msra.mxu1 %v1395_v41  ;;  %v1387_v16 = vpop.permute.xlu0 %1386 }
 0x25b   : > { %v2772_v47 = vand.u32 %v2748_v18, %v11978_v59  ;;  %v2769_v34 = vand.u32 %v2747_v45, %v11978_v59 }
 0x25d   : > { %2776 = vmatprep.subr.bf16.mxu0 %v2772_v47  ;;  %9299 = vmatmul.mubr.msk.bf16.vlgmr.msra.gmra.mrb[0].mxu1 %vm1388_vm15, %v1387_v16 }
 0x25e   : > { %2777 = vmatpush1.bf16.msra.mxu0 %v2769_v34  ;;  %3090 = vmatprep.mubr.bf16.mxu1 %v15209_v49 }
 0x261   : > { %9344 = vmatmul.mubr.msk.bf16.vlgmr.msra.gmra.mrb[0].mxu0 %vm1388_vm15, %v2764_v2  ;;  %vm15269_vm15 = vcmp.lt.s32.totalorder %v11815_v6, 1 }
 0x262   : > { %vm15270_vm9 = vmmov %vm15269_vm15 }
 0x330   : > { %v1434_v36 = vpop.f32.mrb[0].mxu1 }
 0x331   : > { %v1436_v54 = vpop.f32.mrb[1].mxu1 }
 0x332   : > { %v1438_v39 = vpop.f32.mrb[2].mxu1 }
 0x333   : > { %v1439_v26 = vpop.f32.mrb[3].mxu1 }
 0x334   : > { %v2808_v56 = vpop.f32.mrb[0].mxu0 }
 0x335   : > { %v10587_v51 = vadd.f32 %v2808_v56, %v1434_v36  ;;  %v2810_v40 = vpop.f32.mrb[1].mxu0  ;;  %v9345_v36 = vld [vmem:[%s14861_s16 + $0x1] ss:$8 sm:$0x3] }
 0x336   : > { %v10588_v5 = vadd.f32 %v2810_v40, %v1436_v54  ;;  %v2812_v59 = vpop.f32.mrb[2].mxu0  ;;  %v9347_v54 = vld [vmem:[%s14861_s16 + $0x3] ss:$8 sm:$0x3]  ;;  %v12927_v56 = vrot.slane %v9345_v36, %v11818_v9 }
 0x337   : > { %v2823_v55 = vmul.f32 %v10587_v51, %v10587_v51  ;;  %v2813_v46 = vpop.f32.mrb[3].mxu0  ;;  %v2817_v33 = vsel %vm1158_vm7, %v10587_v51, 0.0  ;;  %v2848_v40 = vld [vmem:[%s14861_s16] ss:$8 sm:$0x3] }
 0x338   : > { %v2824_v30 = vmul.f32 %v10588_v5, %v10588_v5  ;;  %v2818_v20 = vsel %vm1158_vm7, %v10588_v5, 0.0  ;;  %v12943_v46 = vrot.slane %v9347_v54, %v11821_v10 }
 0x339   : > { %v2819_v7 = vadd.f32 %v2818_v20, %v2817_v33  ;;  %v2825_v25 = vsel %vm1158_vm7, %v2823_v55, 0.0  ;;  %v12940_v55 = vrot.slane %v9347_v54, %v11818_v9  ;;  %v9346_v20 = vld [vmem:[%s14861_s16 + $0x2] ss:$8 sm:$0x3] }
 0x33a   : > { %v2826_v12 = vsel %vm1158_vm7, %v2824_v30, 0.0 }
 0x33b   : > { %2820 = vadd.xlane.f32.xlu1 %v2819_v7  ;;  %v2827_v57 = vadd.f32 %v2826_v12, %v2825_v25  ;;  %v12953_v25 = vrot.slane %v2848_v40, %v11818_v9  ;;  %v12956_v12 = vrot.slane %v2848_v40, %v11821_v10 }
 0x33d   : > { %2828 = vadd.xlane.f32.xlu0 %v2827_v57 }
 0x3c8   : > { %v2821_v8 = vpop.xlane.xlu1 %2820 }
 0x3c9   : > { %v2822_v38 = vmul.f32 0.00390625, %v2821_v8 }
 0x3ca   : > { %v2829_v11 = vpop.xlane.xlu0 %2828 }
 0x3cb   : > { %v2830_v14 = vmul.f32 0.00390625, %v2829_v11  ;;  %v2831_v63 = vmul.f32 %v2822_v38, %v2822_v38  ;;  %v2833_v60 = vsub.f32 %v10587_v51, %v2822_v38  ;;  %v2834_v42 = vsub.f32 %v10588_v5, %v2822_v38 }
 0x3cc   : > { %v12930_v51 = vrot.slane %v9345_v36, %v11821_v10 }
 0x3cd   : > { %v2832_v27 = vsub.f32 %v2830_v14, %v2831_v63 }
 0x3cf   : > { %v2835_v1 = vmax.f32 %v2832_v27, 0.0 }
 0x3d1   : > { %v2836_v41 = vadd.f32 1e-05, %v2835_v1  ;;  %v12967_v1 = vrot.slane %v9346_v20, %v11818_v9 }
 0x3d3   : > { %10938 = vrsqrt.f32 %v2836_v41  ;;  %v12970_v41 = vrot.slane %v9346_v20, %v11821_v10 }
 0x3dd   : > { %v10939_v18 = vpop.eup %10938 }
 0x3de   : > { %v2838_v45 = vmul.f32 %v10939_v18, %v2833_v60  ;;  %v2839_v16 = vmul.f32 %v10939_v18, %v2834_v42 }
 0x3e0   : > { %v12884_v47 = vmax.f32 %v2838_v45, 0.0  ;;  %v12886_v34 = vmax.f32 %v2839_v16, 0.0  ;;  %v9348_v16 = vld [vmem:[%s14861_s16 + $0x5] ss:$8 sm:$0x3] }
 0x3e2   : > { %2864 = vrot.lane.b32.xlu1 %v12886_v34, %s11258_s6  ;;  %2862 = vrot.lane.b32.xlu0 %v12884_v47, %s11258_s6 }
 0x3e6   : > { %2904 = vrot.lane.b32.xlu1 %v12884_v47, %s15121_s3  ;;  %2906 = vrot.lane.b32.xlu0 %v12886_v34, %s15121_s3  ;;  %s15298_s3 = smov 127  }
 0x3ea   : > { %2842 = vrot.lane.b32.xlu1 %v12884_v47, %s11257_s7  ;;  %2844 = vrot.lane.b32.xlu0 %v12886_v34, %s11257_s7 }
 0x3ee   : > { %2883 = vrot.lane.b32.xlu1 %v12884_v47, %s15123_s11  ;;  %2885 = vrot.lane.b32.xlu0 %v12886_v34, %s15123_s11  ;;  %s15296_s11 = smov 15  }
 0x3f2   : > { %2925 = vrot.lane.b32.xlu1 %v12884_v47, %s15119_s2  ;;  %2927 = vrot.lane.b32.xlu0 %v12886_v34, %s15119_s2  ;;  %s15299_s2 = smov 113  }
 0x3f6   : > { %2967 = vrot.lane.b32.xlu1 %v12884_v47, %s15115_s13  ;;  %2969 = vrot.lane.b32.xlu0 %v12886_v34, %s15115_s13  ;;  %s15302_s13 = smov 44  }
 0x3fa   : > { %2946 = vrot.lane.b32.xlu1 %v12884_v47, %s15117_s26  ;;  %2948 = vrot.lane.b32.xlu0 %v12886_v34, %s15117_s26  ;;  %s15297_s26 = smov 1  }
 0x3fe   : > { %2988 = vrot.lane.b32.xlu1 %v12884_v47, %s15113_s5  ;;  %2990 = vrot.lane.b32.xlu0 %v12886_v34, %s15113_s5  ;;  %s11310_s5 = smov 116  }
 0x454   : > { %v2865_v4 = vpop.permute.xlu1 %2864  ;;  %v2863_v2 = vpop.permute.xlu0 %2862 }
 0x455   : > { %v2866_v5 = vsel %vm1561_vm13, %v2863_v2, %v2865_v4  ;;  %v2867_v59 = vsel %vm1561_vm13, %v2865_v4, %v2863_v2 }
 0x456   : > { %v2881_v8 = vmul.f32 %v12927_v56, %v2867_v59  ;;  %v2882_v38 = vmul.f32 %v12930_v51, %v2866_v5  ;;  %v12984_v59 = vrot.slane %v9348_v16, %v11818_v9 }
 0x458   : > { %v2905_v39 = vpop.permute.xlu1 %2904  ;;  %v2907_v26 = vpop.permute.xlu0 %2906  ;;  %v3011_v4 = vrot.slane %v2881_v8, 4  ;;  %v3012_v2 = vrot.slane %v2882_v38, 4 }
 0x459   : > { %v2908_v33 = vsel %vm15269_vm15, %v2905_v39, %v2907_v26  ;;  %v2909_v30 = vsel %vm15270_vm9, %v2907_v26, %v2905_v39  ;;  %vm15271_vm15 = vcmp.lt.s32.totalorder %v11815_v6, 17 }
 0x45a   : > { %vm15272_vm9 = vmmov %vm15271_vm15  ;;  %v2923_v63 = vmul.f32 %v12940_v55, %v2909_v30  ;;  %v2924_v27 = vmul.f32 %v12943_v46, %v2908_v33  ;;  %v12987_v33 = vrot.slane %v9348_v16, %v11821_v10  ;;  %v9350_v30 = vld [vmem:[%s14861_s16 + $0x7] ss:$8 sm:$0x3] }
 0x45b   : > { %v13004_v16 = vrot.slane %v9350_v30, %v11821_v10 }
 0x45c   : > { %v2843_v7 = vpop.permute.xlu1 %2842  ;;  %v2845_v57 = vpop.permute.xlu0 %2844  ;;  %v3017_v39 = vrot.slane %v2923_v63, 4  ;;  %v3018_v26 = vrot.slane %v2924_v27, 4 }
 0x45d   : > { %v2846_v11 = vsel %vm15271_vm15, %v2843_v7, %v2845_v57  ;;  %v2847_v14 = vsel %vm15272_vm9, %v2845_v57, %v2843_v7  ;;  %vm15273_vm15 = vcmp.lt.s32.totalorder %v11815_v6, 15 }
 0x45e   : > { %v2860_v60 = vmul.f32 %v12953_v25, %v2847_v14  ;;  %v2861_v42 = vmul.f32 %v12956_v12, %v2846_v11  ;;  %vm15274_vm9 = vmmov %vm15273_vm15 }
 0x460   : > { %v2884_v18 = vpop.permute.xlu1 %2883  ;;  %v2886_v45 = vpop.permute.xlu0 %2885  ;;  %v3034_v57 = vsel %vm1158_vm7, %v2861_v42, %v3012_v2  ;;  %v3033_v38 = vsel %vm1158_vm7, %v2860_v60, %v3011_v4  ;;  %v9349_v60 = vld [vmem:[%s14861_s16 + $0x6] ss:$8 sm:$0x3] }
 0x461   : > { %v2887_v36 = vsel %vm15273_vm15, %v2884_v18, %v2886_v45  ;;  %v2888_v54 = vsel %vm15274_vm9, %v2886_v45, %v2884_v18  ;;  %vm15275_vm15 = vcmp.lt.s32.totalorder %v11815_v6, 127  ;;  %v13001_v45 = vrot.slane %v9350_v30, %v11818_v9 }
 0x462   : > { %v2902_v40 = vmul.f32 %v12967_v1, %v2888_v54  ;;  %v2903_v5 = vmul.f32 %v12970_v41, %v2887_v36  ;;  %vm15276_vm9 = vmmov %vm15275_vm15  ;;  %v13021_v30 = vrot.slane %v9349_v60, %v11821_v10 }
 0x464   : > { %v2926_v20 = vpop.permute.xlu1 %2925  ;;  %v2928_v7 = vpop.permute.xlu0 %2927  ;;  %v3036_v8 = vsel %vm1158_vm7, %v2903_v5, %v3018_v26  ;;  %v3035_v11 = vsel %vm1158_vm7, %v2902_v40, %v3017_v39  ;;  %v13018_v5 = vrot.slane %v9349_v60, %v11818_v9 }
 0x465   : > { %v2929_v14 = vsel %vm15275_vm15, %v2926_v20, %v2928_v7  ;;  %v2930_v63 = vsel %vm15276_vm9, %v2928_v7, %v2926_v20  ;;  %v3042_v27 = vpack.c.bf16 %v3036_v8, %v3034_v57  ;;  %v3041_v18 = vpack.c.bf16 %v3035_v11, %v3033_v38  ;;  %v9351_v20 = vld [vmem:[%s14861_s16 + $0x10] ss:$8 sm:$0x3] }
 0x466   : > { %v2944_v42 = vmul.f32 %v12984_v59, %v2929_v14  ;;  %v2945_v4 = vmul.f32 %v12987_v33, %v2930_v63  ;;  %vm15277_vm15 = vcmp.lt.s32.totalorder %v11815_v6, 112  ;;  %v13031_v63 = vrot.slane %v9351_v20, %v11818_v9 }
 0x467   : > { %3058 = vmatprep.subr.bf16.mxu1 %v3042_v27  ;;  %vm15278_vm9 = vmmov %vm15277_vm15  ;;  %v13034_v27 = vrot.slane %v9351_v20, %v11821_v10 }
 0x468   : > { %v2968_v2 = vpop.permute.xlu1 %2967  ;;  %3059 = vmatpush1.bf16.msra.mxu1 %v3041_v18  ;;  %v2970_v36 = vpop.permute.xlu0 %2969  ;;  %v3023_v7 = vrot.slane %v2944_v42, 4  ;;  %v3024_v57 = vrot.slane %v2945_v4, 4 }
 0x469   : > { %v2971_v54 = vsel %vm15277_vm15, %v2968_v2, %v2970_v36  ;;  %v2972_v39 = vsel %vm15278_vm9, %v2970_v36, %v2968_v2  ;;  %vm15279_vm15 = vcmp.lt.s32.totalorder %v11815_v6, 113 }
 0x46a   : > { %v2986_v26 = vmul.f32 %v13001_v45, %v2971_v54  ;;  %v2987_v40 = vmul.f32 %v13004_v16, %v2972_v39  ;;  %vm15280_vm9 = vmmov %vm15279_vm15  ;;  %v3038_v54 = vsel %vm1158_vm7, %v12886_v34, %v3024_v57  ;;  %v3037_v9 = vsel %vm1158_vm7, %v12884_v47, %v3023_v7  ;;  %v13053_v7 = vld [vmem:[%s14862_s17 + $0x40] sm:$0xff]  }
 0x46c   : > { %v2947_v8 = vpop.permute.xlu1 %2946  ;;  %v2949_v38 = vpop.permute.xlu0 %2948  ;;  %v3029_v18 = vrot.slane %v2986_v26, 4  ;;  %v3030_v60 = vrot.slane %v2987_v40, 4 }
 0x46d   : > { %v2950_v11 = vsel %vm15279_vm15, %v2947_v8, %v2949_v38  ;;  %v2951_v14 = vsel %vm15280_vm9, %v2949_v38, %v2947_v8  ;;  %vm15281_vm15 = vcmp.lt.s32.totalorder %v11815_v6, 111 }
 0x46e   : > { %v2965_v2 = vmul.f32 %v13018_v5, %v2950_v11  ;;  %v2966_v42 = vmul.f32 %v13021_v30, %v2951_v14  ;;  %vm15282_vm9 = vmmov %vm15281_vm15 }
 0x470   : > { %v2989_v4 = vpop.permute.xlu1 %2988  ;;  %v2991_v36 = vpop.permute.xlu0 %2990  ;;  %v3040_v39 = vsel %vm1158_vm7, %v2966_v42, %v3030_v60  ;;  %v3039_v8 = vsel %vm1158_vm7, %v2965_v2, %v3029_v18  ;;  %v3047_v60 = vld [vmem:[#allocation4] sm:$0xf]  ;;  %v13066_v42 = vld [vmem:[%s14862_s17 + $0x48] sm:$0xff]  }
 0x471   : > { %v2992_v10 = vsel %vm15281_vm15, %v2989_v4, %v2991_v36  ;;  %v2993_v26 = vsel %vm15282_vm9, %v2991_v36, %v2989_v4  ;;  %v3044_v40 = vpack.c.bf16 %v3040_v39, %v3038_v54  ;;  %v3043_v20 = vpack.c.bf16 %v3039_v8, %v3037_v9  ;;  %v13060_v2 = vld [vmem:[%s14862_s17] sm:$0xff]   ;;  %v13072_v4 = vld [vmem:[%s14862_s17 + $0x8] sm:$0xff]   ;;  %v13078_v36 = vld [vmem:[%s14862_s17 + $0x50] sm:$0xff]  }
 0x472   : > { %v3007_v38 = vmul.f32 %v13031_v63, %v2992_v10  ;;  %v3008_v11 = vmul.f32 %v13034_v27, %v2993_v26  ;;  %vm3048_vm15 = vcmask 293888   ;;  %v13084_v54 = vld [vmem:[%s14862_s17 + $0x10] sm:$0xff]   ;;  %v13090_v39 = vld [vmem:[%s14862_s17 + $0x58] sm:$0xff]   ;;  %v13102_v8 = vld [vmem:[%s14862_s17 + $0x60] sm:$0xff]   ;;  %vm3269_vm9 = vcmask 523264  }
 0x473   : > { %3060 = vmatprep.subr.bf16.mxu1 %v3044_v40  ;;  %v13096_v9 = vld [vmem:[%s14862_s17 + $0x18] sm:$0xff]   ;;  %v13108_v10 = vld [vmem:[%s14862_s17 + $0x20] sm:$0xff]   ;;  %v13114_v26 = vld [vmem:[%s14862_s17 + $0x68] sm:$0xff]  }
 0x474   : > { %v3045_v57 = vpack.c.bf16 %v3007_v38, %v3007_v38  ;;  %v3046_v14 = vpack.c.bf16 %v3008_v11, %v3008_v11  ;;  %3061 = vmatpush1.bf16.msra.mxu1 %v3043_v20  ;;  %v13120_v40 = vld [vmem:[%s14862_s17 + $0x28] sm:$0xff]   ;;  %v13126_v20 = vld [vmem:[%s14862_s17 + $0x70] sm:$0xff]   ;;  %v13139_v11 = vld [vmem:[%s14862_s17 + $0x78] sm:$0xff]  }
 0x475   : > { %v13132_v38 = vld [vmem:[%s14862_s17 + $0x30] sm:$0xff]  }
 0x476   : > { %9352 = vmatprep.subr.msk.bf16.mxu1 %vm1164_vm12, %v3046_v14  ;;  %v3053_v18 = vsel %vm1164_vm12, %v3045_v57, 0  ;;  %v13144_v57 = vld [vmem:[%s14862_s17 + $0x38] sm:$0xff]  }
 0x478   : > { %3063 = vmatpush1.bf16.msra.mxu1 %v3053_v18 }
 0x479   : > { %9788 = vmatprep.subr.bf16.mxu1 %v13053_v7 }
 0x47b   : > { %9353 = vmatmul.mubr.msk.bf16.vlgmr.msra.gmra.mrb[4].mxu1 %vm3048_vm15, %v3047_v60  ;;  %vm11307_vm15 = vmmov 0  }
 0x47c   : > { %9789 = vmatpush3.bf16.msra.mxu1 %v13060_v2 }
 0x47d   : > { %9790 = vmatprep.subr.bf16.mxu1 %v13066_v42 }
 0x480   : > { %9791 = vmatpush3.bf16.msra.mxu1 %v13072_v4 }
 0x481   : > { %9792 = vmatprep.subr.bf16.mxu1 %v13078_v36 }
 0x484   : > { %9793 = vmatpush3.bf16.msra.mxu1 %v13084_v54 }
 0x485   : > { %9794 = vmatprep.subr.bf16.mxu1 %v13090_v39 }
 0x488   : > { %9795 = vmatpush3.bf16.msra.mxu1 %v13096_v9 }
 0x489   : > { %9796 = vmatprep.subr.bf16.mxu1 %v13102_v8 }
 0x48c   : > { %9797 = vmatpush3.bf16.msra.mxu1 %v13108_v10 }
 0x48d   : > { %9798 = vmatprep.subr.bf16.mxu1 %v13114_v26 }
 0x490   : > { %9799 = vmatpush3.bf16.msra.mxu1 %v13120_v40 }
 0x491   : > { %9800 = vmatprep.subr.bf16.mxu1 %v13126_v20 }
 0x494   : > { %9801 = vmatpush3.bf16.msra.mxu1 %v13132_v38 }
 0x495   : > { %9802 = vmatprep.subr.bf16.mxu1 %v13139_v11 }
 0x498   : > { %9803 = vmatpush3.bf16.msra.mxu1 %v13144_v57 }
 0x54e   : > { %v3092_v14 = vpop.f32.mrb[4].mxu1 }
 0x54f   : > { %v3094_v18 = vpop.f32.mrb[5].mxu1  ;;  %v3131_v31 = vpack.c.bf16 %v3092_v14, %v3092_v14 }
 0x550   : > { %v3132_v60 = vpack.c.bf16 %v3094_v18, %v3094_v18  ;;  %v3096_v35 = vpop.f32.mrb[6].mxu1 }
 0x551   : > { %v3097_v17 = vpop.f32.mrb[7].mxu1  ;;  %v10805_v35 = vld [vmem:[%s14863_s18] sm:$0xff]  }
 0x552   : > { %3261 = vmatprep.mubr.bf16.mxu1 %v3132_v60  ;;  %v10806_v17 = vld [vmem:[%s14863_s18 + $0x20] sm:$0xff]  }
 0x553   : > { %3262 = vmatmul.mubr.bf16.vlgmr.msra.gmra.mrb[8].mxu1 %v3131_v31  ;;  %v15097_v31 = vmov 0.0  }
 0x554   : > { %10037 = vmatprep.subr.bf16.mxu1 %v15097_v31  ;;  %10049 = vmatprep.subr.bf16.mxu0 %v15097_v31 }
 0x555   : > { %10038 = vmatpush3.bf16.msra.mxu1 %v10805_v35  ;;  %10050 = vmatpush3.bf16.msra.mxu0 %v10806_v17 }
 0x556   : > { %10039 = vmatprep.subr.bf16.mxu1 %v15097_v31  ;;  %10051 = vmatprep.subr.bf16.mxu0 %v15097_v31 }
 0x557   : > { %10045 = vmatprep.mubr.msk.bf16.mxu1 %vm11307_vm15, %v15097_v31  ;;  %10057 = vmatprep.mubr.msk.bf16.mxu0 %vm11307_vm15, %v15097_v31 }
 0x626   : > { %v9804_v44 = vpop.f32.mrb[8].mxu1 }
 0x627   : > { %v9805_v0 = vpop.f32.mrb[9].mxu1 }
 0x628   : > { %v9806_v32 = vadd.f32 %v9805_v0, %v9804_v44  ;;  %v9807_v22 = vpop.f32.mrb[10].mxu1  ;;  %v10811_v0 = vld [vmem:[%s14863_s18 + $0x18] sm:$0xff]  }
 0x629   : > { %v9808_v21 = vpop.f32.mrb[11].mxu1  ;;  %v10808_v22 = vld [vmem:[%s14863_s18 + $0x28] sm:$0xff]   ;;  %v10812_v44 = vld [vmem:[%s14863_s18 + $0x38] sm:$0xff]  }
 0x62a   : > { %v3270_v24 = vsel %vm3269_vm9, %v9806_v32, 0.0  ;;  %v3274_v23 = vmul.f32 %v9806_v32, %v9806_v32  ;;  %v10807_v21 = vld [vmem:[%s14863_s18 + $0x8] sm:$0xff]   ;;  %10052 = vmatpush3.bf16.msra.mxu0 %v10808_v22 }
 0x62b   : > { %3271 = vadd.xlane.f32.xlu1 %v3270_v24  ;;  %10040 = vmatpush3.bf16.msra.mxu1 %v10807_v21  ;;  %v10810_v24 = vld [vmem:[%s14863_s18 + $0x30] sm:$0xff]  }
 0x62c   : > { %v3275_v61 = vsel %vm3269_vm9, %v3274_v23, 0.0  ;;  %10041 = vmatprep.subr.bf16.mxu1 %v15097_v31  ;;  %10053 = vmatprep.subr.bf16.mxu0 %v15097_v31  ;;  %v10809_v23 = vld [vmem:[%s14863_s18 + $0x10] sm:$0xff]  }
 0x62d   : > { %3276 = vadd.xlane.f32.xlu0 %v3275_v61 }
 0x62e   : > { %10054 = vmatpush3.bf16.msra.mxu0 %v10810_v24 }
 0x62f   : > { %10042 = vmatpush3.bf16.msra.mxu1 %v10809_v23  ;;  %10055 = vmatprep.subr.bf16.mxu0 %v15097_v31 }
 0x630   : > { %10043 = vmatprep.subr.bf16.mxu1 %v15097_v31 }
 0x632   : > { %10056 = vmatpush3.bf16.msra.mxu0 %v10812_v44 }
 0x633   : > { %10044 = vmatpush3.bf16.msra.mxu1 %v10811_v0  ;;  %10073 = vmatprep.subr.bf16.mxu0 %v15097_v31 }
 0x634   : > { %10061 = vmatprep.subr.bf16.mxu1 %v15097_v31  ;;  %v10814_v31 = vld [vmem:[%s14863_s18 + $0x60] sm:$0xff]  }
 0x6b8   : > { %v3272_v61 = vpop.xlane.xlu1 %3271 }
 0x6b9   : > { %v3273_v14 = vmul.f32 0.015625, %v3272_v61 }
 0x6ba   : > { %v3277_v18 = vpop.xlane.xlu0 %3276 }
 0x6bb   : > { %v3279_v60 = vmul.f32 %v3273_v14, %v3273_v14  ;;  %v3278_v35 = vmul.f32 0.015625, %v3277_v18  ;;  %v3281_v23 = vsub.f32 %v9806_v32, %v3273_v14  ;;  %v10815_v32 = vld [vmem:[%s14863_s18 + $0x48] sm:$0xff]   ;;  %v15283_v18 = vmov 0.0  }
 0x6bc   : > { %v10816_v14 = vld [vmem:[%s14863_s18 + $0x68] sm:$0xff]  }
 0x6bd   : > { %v3280_v17 = vsub.f32 %v3278_v35, %v3279_v60  ;;  %v10819_v60 = vld [vmem:[%s14863_s18 + $0x58] sm:$0xff]  }
 0x6be   : > { %v10820_v35 = vld [vmem:[%s14863_s18 + $0x78] sm:$0xff]  }
 0x6bf   : > { %v3282_v21 = vmax.f32 %v3280_v17, 0.0  ;;  %v10821_v17 = vld [vmem:[%s14863_s18 + $0x80] sm:$0xff]  }
 0x6c1   : > { %v3283_v22 = vadd.f32 1e-05, %v3282_v21  ;;  %v10822_v21 = vld [vmem:[%s14863_s18 + $0xa0] sm:$0xff]  }
 0x6c3   : > { %10940 = vrsqrt.f32 %v3283_v22  ;;  %v10823_v22 = vld [vmem:[%s14863_s18 + $0x88] sm:$0xff]  }
 0x6cd   : > { %v10941_v24 = vpop.eup %10940 }
 0x6ce   : > { %v3285_v0 = vmul.f32 %v10941_v24, %v3281_v23  ;;  %v10824_v23 = vld [vmem:[%s14863_s18 + $0xa8] sm:$0xff]   ;;  %v10825_v24 = vld [vmem:[%s14863_s18 + $0x90] sm:$0xff]  }
 0x6d0   : > { %v3286_v44 = vmax.f32 %v3285_v0, 0.0  ;;  %v10826_v0 = vld [vmem:[%s14863_s18 + $0xb0] sm:$0xff]  }
 0x6d2   : > { %v13194_v61 = vpack.c.bf16 %v3286_v44, %v3286_v44  ;;  %v10827_v44 = vld [vmem:[%s14863_s18 + $0x98] sm:$0xff]  }
 0x6d4   : > { %10046 = vmatmul.mubr.msk.bf16.vlgmr.msra.gmra.mrb[12].mxu1 %vm3269_vm9, %v13194_v61  ;;  %10058 = vmatmul.mubr.msk.bf16.vlgmr.msra.gmra.mrb[4].mxu0 %vm3269_vm9, %v13194_v61 }
 0x6d5   : > { %10062 = vmatpush3.bf16.msra.mxu1 %v10813_v62  ;;  %10074 = vmatpush3.bf16.msra.mxu0 %v10814_v31  ;;  %v10817_v62 = vld [vmem:[%s14863_s18 + $0x50] sm:$0xff]  }
 0x6d6   : > { %10063 = vmatprep.subr.bf16.mxu1 %v15283_v18  ;;  %10075 = vmatprep.subr.bf16.mxu0 %v15283_v18  ;;  %v10818_v31 = vld [vmem:[%s14863_s18 + $0x70] sm:$0xff]  }
 0x6d7   : > { %10069 = vmatprep.mubr.msk.bf16.mxu1 %vm11307_vm15, %v15283_v18  ;;  %10081 = vmatprep.mubr.msk.bf16.mxu0 %vm11307_vm15, %v15283_v18 }
 0x6d9   : > { %10064 = vmatpush3.bf16.msra.mxu1 %v10815_v32  ;;  %10076 = vmatpush3.bf16.msra.mxu0 %v10816_v14  ;;  %v10828_v32 = vld [vmem:[%s14863_s18 + $0xb8] sm:$0xff]   ;;  %v10829_v14 = vld [vmem:[%s14863_s18 + $0xc0] sm:$0xff]  }
 0x6da   : > { %10065 = vmatprep.subr.bf16.mxu1 %v15283_v18  ;;  %10077 = vmatprep.subr.bf16.mxu0 %v15283_v18 }
 0x6dd   : > { %10066 = vmatpush3.bf16.msra.mxu1 %v10817_v62  ;;  %10078 = vmatpush3.bf16.msra.mxu0 %v10818_v31  ;;  %v10830_v62 = vld [vmem:[%s14863_s18 + $0xe0] sm:$0xff]   ;;  %v10831_v31 = vld [vmem:[%s14863_s18 + $0xc8] sm:$0xff]  }
 0x6de   : > { %10067 = vmatprep.subr.bf16.mxu1 %v15283_v18  ;;  %10079 = vmatprep.subr.bf16.mxu0 %v15283_v18 }
 0x6e1   : > { %10068 = vmatpush3.bf16.msra.mxu1 %v10819_v60  ;;  %10080 = vmatpush3.bf16.msra.mxu0 %v10820_v35  ;;  %v10832_v60 = vld [vmem:[%s14863_s18 + $0xe8] sm:$0xff]   ;;  %v10833_v35 = vld [vmem:[%s14863_s18 + $0xd0] sm:$0xff]  }
 0x6e2   : > { %10085 = vmatprep.subr.bf16.mxu1 %v15283_v18  ;;  %10097 = vmatprep.subr.bf16.mxu0 %v15283_v18 }
 0x6e4   : > { %10070 = vmatmul.mubr.msk.bf16.vlgmr.msra.gmra.mrb[16].mxu1 %vm3269_vm9, %v13194_v61  ;;  %10082 = vmatmul.mubr.msk.bf16.vlgmr.msra.gmra.mrb[8].mxu0 %vm3269_vm9, %v13194_v61 }
 0x6e5   : > { %10086 = vmatpush3.bf16.msra.mxu1 %v10821_v17  ;;  %10098 = vmatpush3.bf16.msra.mxu0 %v10822_v21  ;;  %v10834_v17 = vld [vmem:[%s14863_s18 + $0xf0] sm:$0xff]   ;;  %v10835_v21 = vld [vmem:[%s14863_s18 + $0xd8] sm:$0xff]  }
 0x6e6   : > { %10087 = vmatprep.subr.bf16.mxu1 %v15283_v18  ;;  %10099 = vmatprep.subr.bf16.mxu0 %v15283_v18 }
 0x6e7   : > { %10093 = vmatprep.mubr.msk.bf16.mxu1 %vm11307_vm15, %v15283_v18  ;;  %10105 = vmatprep.mubr.msk.bf16.mxu0 %vm11307_vm15, %v15283_v18 }
 0x6e9   : > { %10088 = vmatpush3.bf16.msra.mxu1 %v10823_v22  ;;  %10100 = vmatpush3.bf16.msra.mxu0 %v10824_v23  ;;  %v10836_v22 = vld [vmem:[%s14863_s18 + $0xf8] sm:$0xff]   ;;  %v10837_v23 = vld [vmem:[%s14863_s18 + $0x100] sm:$0xff]  }
 0x6ea   : > { %10089 = vmatprep.subr.bf16.mxu1 %v15283_v18  ;;  %10101 = vmatprep.subr.bf16.mxu0 %v15283_v18 }
 0x6ed   : > { %10090 = vmatpush3.bf16.msra.mxu1 %v10825_v24  ;;  %10102 = vmatpush3.bf16.msra.mxu0 %v10826_v0  ;;  %v10838_v24 = vld [vmem:[%s14863_s18 + $0x108] sm:$0xff]   ;;  %v10839_v0 = vld [vmem:[%s14863_s18 + $0x110] sm:$0xff]  }
 0x6ee   : > { %10091 = vmatprep.subr.bf16.mxu1 %v15283_v18  ;;  %10103 = vmatprep.subr.bf16.mxu0 %v15283_v18 }
 0x6f1   : > { %10092 = vmatpush3.bf16.msra.mxu1 %v10827_v44  ;;  %10104 = vmatpush3.bf16.msra.mxu0 %v10828_v32  ;;  %v10840_v44 = vld [vmem:[%s14863_s18 + $0x118] sm:$0xff]  }
 0x6f2   : > { %10109 = vmatprep.subr.bf16.mxu1 %v15283_v18  ;;  %10121 = vmatprep.subr.bf16.mxu0 %v15283_v18 }
 0x6f4   : > { %10094 = vmatmul.mubr.msk.bf16.vlgmr.msra.gmra.mrb[20].mxu1 %vm3269_vm9, %v13194_v61  ;;  %10106 = vmatmul.mubr.msk.bf16.vlgmr.msra.gmra.mrb[12].mxu0 %vm3269_vm9, %v13194_v61 }
 0x6f5   : > { %10110 = vmatpush3.bf16.msra.mxu1 %v10829_v14  ;;  %10122 = vmatpush3.bf16.msra.mxu0 %v10830_v62 }
 0x6f6   : > { %10111 = vmatprep.subr.bf16.mxu1 %v15283_v18  ;;  %10123 = vmatprep.subr.bf16.mxu0 %v15283_v18 }
 0x6f7   : > { %10117 = vmatprep.mubr.msk.bf16.mxu1 %vm11307_vm15, %v15283_v18  ;;  %10129 = vmatprep.mubr.msk.bf16.mxu0 %vm11307_vm15, %v15283_v18 }
 0x6f9   : > { %10112 = vmatpush3.bf16.msra.mxu1 %v10831_v31  ;;  %10124 = vmatpush3.bf16.msra.mxu0 %v10832_v60 }
 0x6fa   : > { %10113 = vmatprep.subr.bf16.mxu1 %v15283_v18  ;;  %10125 = vmatprep.subr.bf16.mxu0 %v15283_v18 }
 0x6fd   : > { %10114 = vmatpush3.bf16.msra.mxu1 %v10833_v35  ;;  %10126 = vmatpush3.bf16.msra.mxu0 %v10834_v17 }
 0x6fe   : > { %10115 = vmatprep.subr.bf16.mxu1 %v15283_v18  ;;  %10127 = vmatprep.subr.bf16.mxu0 %v15283_v18 }
 0x701   : > { %10116 = vmatpush3.bf16.msra.mxu1 %v10835_v21  ;;  %10128 = vmatpush3.bf16.msra.mxu0 %v10836_v22 }
 0x702   : > { %10133 = vmatprep.subr.bf16.mxu1 %v15283_v18  ;;  %10159 = vmatprep.subr.bf16.mxu0 %v15283_v18 }
 0x704   : > { %10118 = vmatmul.mubr.msk.bf16.vlgmr.msra.gmra.mrb[24].mxu1 %vm3269_vm9, %v13194_v61  ;;  %10130 = vmatmul.mubr.msk.bf16.vlgmr.msra.gmra.mrb[16].mxu0 %vm3269_vm9, %v13194_v61 }
 0x705   : > { %10134 = vmatpush3.bf16.msra.mxu1 %v10837_v23  ;;  %10141 = vmatprep.mubr.msk.bf16.mxu1 %vm11307_vm15, %v15283_v18 }
 0x706   : > { %10135 = vmatprep.subr.bf16.mxu1 %v15283_v18  ;;  %10161 = vmatprep.mubr.msk.bf16.mxu0 %vm11307_vm15, %v15283_v18 }
 0x709   : > { %10136 = vmatpush3.bf16.msra.mxu1 %v10838_v24 }
 0x70a   : > { %10137 = vmatprep.subr.bf16.mxu1 %v15283_v18 }
 0x70d   : > { %10138 = vmatpush3.bf16.msra.mxu1 %v10839_v0 }
 0x70e   : > { %10139 = vmatprep.subr.bf16.mxu1 %v15283_v18 }
 0x711   : > { %10140 = vmatpush3.bf16.msra.mxu1 %v10840_v44 }
 0x712   : > { %10145 = vmatprep.subr.bf16.mxu1 %v15283_v18 }
 0x714   : > { %10142 = vmatmul.mubr.msk.bf16.vlgmr.msra.gmra.mrb[28].mxu1 %vm3269_vm9, %v13194_v61 }
 0x715   : > { %10155 = vmatprep.mubr.msk.bf16.mxu1 %vm11307_vm15, %v15283_v18 }
 0x7a7   : > { %v3357_v32 = vpop.f32.mrb[12].mxu1  ;;  %v3430_v14 = vpop.f32.mrb[4].mxu0 }
 0x7a8   : > { %v3947_v62 = vpack.c.bf16 %v3430_v14, %v3357_v32  ;;  %v10047_v31 = vpop.f32.mrb[13].mxu1  ;;  %v10059_v60 = vpop.f32.mrb[5].mxu0 }
 0x7a9   : > { %v3360_v35 = vpop.f32.mrb[14].mxu1  ;;  %v3433_v17 = vpop.f32.mrb[6].mxu0 }
 0x7aa   : > { %v10048_v21 = vpop.f32.mrb[15].mxu1  ;;  %v10060_v22 = vpop.f32.mrb[7].mxu0  ;;  %10146 = vmatpush3.bf16.msra.mxu1 %v3947_v62 }
 0x7ab   : > { %10147 = vmatprep.subr.bf16.mxu1 %v15283_v18 }
 0x7b7   : > { %v3503_v23 = vpop.f32.mrb[16].mxu1  ;;  %v3576_v24 = vpop.f32.mrb[8].mxu0 }
 0x7b8   : > { %v3948_v0 = vpack.c.bf16 %v3576_v24, %v3503_v23  ;;  %v10071_v44 = vpop.f32.mrb[17].mxu1  ;;  %v10083_v61 = vpop.f32.mrb[9].mxu0 }
 0x7b9   : > { %v3506_v48 = vpop.f32.mrb[18].mxu1  ;;  %v3579_v29 = vpop.f32.mrb[10].mxu0 }
 0x7ba   : > { %v10072_v43 = vpop.f32.mrb[19].mxu1  ;;  %v10084_v15 = vpop.f32.mrb[11].mxu0  ;;  %10148 = vmatpush3.bf16.msra.mxu1 %v3948_v0 }
 0x7bb   : > { %10149 = vmatprep.subr.bf16.mxu1 %v15283_v18 }
 0x7c7   : > { %v3649_v32 = vpop.f32.mrb[20].mxu1  ;;  %v3722_v14 = vpop.f32.mrb[12].mxu0 }
 0x7c8   : > { %v3949_v31 = vpack.c.bf16 %v3722_v14, %v3649_v32  ;;  %v10095_v60 = vpop.f32.mrb[21].mxu1  ;;  %v10107_v35 = vpop.f32.mrb[13].mxu0 }
 0x7c9   : > { %v3652_v62 = vpop.f32.mrb[22].mxu1  ;;  %v3725_v17 = vpop.f32.mrb[14].mxu0 }
 0x7ca   : > { %v10096_v21 = vpop.f32.mrb[23].mxu1  ;;  %v10108_v22 = vpop.f32.mrb[15].mxu0  ;;  %10150 = vmatpush3.bf16.msra.mxu1 %v3949_v31  ;;  %v3952_v17 = vld [vmem:[#allocation6] sm:$0xf] }
 0x7cb   : > { %10151 = vmatprep.subr.bf16.mxu1 %v15283_v18  ;;  %v4017_v21 = vpack.c.bf16 %v12886_v34, %v12886_v34 }
 0x7d7   : > { %v3795_v23 = vpop.f32.mrb[24].mxu1  ;;  %v3868_v48 = vpop.f32.mrb[16].mxu0 }
 0x7d8   : > { %v3950_v29 = vpack.c.bf16 %v3868_v48, %v3795_v23  ;;  %v10119_v43 = vpop.f32.mrb[25].mxu1  ;;  %v10131_v15 = vpop.f32.mrb[17].mxu0 }
 0x7d9   : > { %v3798_v24 = vpop.f32.mrb[26].mxu1  ;;  %v3871_v0 = vpop.f32.mrb[18].mxu0 }
 0x7da   : > { %v10120_v44 = vpop.f32.mrb[27].mxu1  ;;  %v10132_v61 = vpop.f32.mrb[19].mxu0  ;;  %10152 = vmatpush3.bf16.msra.mxu1 %v3950_v29  ;;  %v10841_v0 = vld [vmem:[%s14864_s19] sm:$0xff]  }
 0x7db   : > { %10153 = vmatprep.subr.bf16.mxu1 %v15283_v18  ;;  %v10842_v44 = vld [vmem:[%s14864_s19 + $0x20] sm:$0xff]   ;;  %v10843_v61 = vld [vmem:[%s14864_s19 + $0x8] sm:$0xff]  }
 0x7e7   : > { %v3941_v32 = vpop.f32.mrb[28].mxu1 }
 0x7e8   : > { %v3951_v14 = vpack.c.bf16 %v3941_v32, %v3941_v32  ;;  %v10143_v60 = vpop.f32.mrb[29].mxu1  ;;  %v10844_v32 = vld [vmem:[%s14864_s19 + $0x28] sm:$0xff]  }
 0x7e9   : > { %v3944_v35 = vpop.f32.mrb[30].mxu1  ;;  %v10846_v60 = vld [vmem:[%s14864_s19 + $0x30] sm:$0xff]  }
 0x7ea   : > { %v3958_v31 = vsel %vm1158_vm7, %v3951_v14, 0  ;;  %v10144_v62 = vpop.f32.mrb[31].mxu1  ;;  %v10845_v14 = vld [vmem:[%s14864_s19 + $0x10] sm:$0xff]   ;;  %v10847_v35 = vld [vmem:[%s14864_s19 + $0x18] sm:$0xff]  }
 0x7eb   : > { %10154 = vmatpush3.bf16.msra.mxu1 %v3958_v31  ;;  %v10848_v31 = vld [vmem:[%s14864_s19 + $0x38] sm:$0xff]  }
 0x7ec   : > { %9861 = vmatprep.subr.bf16.mxu1 %v13053_v7  ;;  %v4016_v7 = vpack.c.bf16 %v12884_v47, %v12884_v47 }
 0x7ee   : > { %10156 = vmatmul.mubr.msk.bf16.vlgmr.msra.gmra.mrb[32].mxu1 %vm3953_vm10, %v3952_v17 }
 0x7ef   : > { %9862 = vmatpush3.bf16.msra.mxu1 %v13060_v2  ;;  %4050 = vmatprep.mubr.bf16.mxu1 %v4017_v21 }
 0x7f0   : > { %9863 = vmatprep.subr.bf16.mxu1 %v13066_v42 }
 0x7f3   : > { %9864 = vmatpush3.bf16.msra.mxu1 %v13072_v4 }
 0x7f4   : > { %9865 = vmatprep.subr.bf16.mxu1 %v13078_v36 }
 0x7f7   : > { %9866 = vmatpush3.bf16.msra.mxu1 %v13084_v54 }
 0x7f8   : > { %9867 = vmatprep.subr.bf16.mxu1 %v13090_v39 }
 0x7fb   : > { %9868 = vmatpush3.bf16.msra.mxu1 %v13096_v9 }
 0x7fc   : > { %9869 = vmatprep.subr.bf16.mxu1 %v13102_v8 }
 0x7ff   : > { %9870 = vmatpush3.bf16.msra.mxu1 %v13108_v10 }
 0x800   : > { %9871 = vmatprep.subr.bf16.mxu1 %v13114_v26 }
 0x803   : > { %9872 = vmatpush3.bf16.msra.mxu1 %v13120_v40 }
 0x804   : > { %9873 = vmatprep.subr.bf16.mxu1 %v13126_v20 }
 0x807   : > { %9874 = vmatpush3.bf16.msra.mxu1 %v13132_v38 }
 0x808   : > { %9875 = vmatprep.subr.bf16.mxu1 %v13139_v11 }
 0x80b   : > { %9876 = vmatpush3.bf16.msra.mxu1 %v13144_v57  ;;  %v4059_v57 = vld [vmem:[%s15284_s23] sm:$0xf]  ;;  %s15286_s23 = sld [smem:[#allocation115_spill]] }
 0x80c   : > { %10177 = vmatprep.subr.bf16.mxu1 %v15283_v18 }
 0x80e   : > { %4051 = vmatmul.mubr.bf16.vlgmr.msra.gmra.mrb[36].mxu1 %v4016_v7 }
 0x80f   : > { %10185 = vmatprep.mubr.msk.bf16.mxu1 %vm11307_vm15, %v15283_v18  ;;  %10178 = vmatpush3.bf16.msra.mxu1 %v10842_v44  ;;  %v10850_v44 = vld [vmem:[%s14864_s19 + $0x60] sm:$0xff]  }
 0x810   : > { %10179 = vmatprep.subr.bf16.mxu1 %v15283_v18 }
 0x813   : > { %10180 = vmatpush3.bf16.msra.mxu1 %v10844_v32  ;;  %v10853_v32 = vld [vmem:[%s14864_s19 + $0x50] sm:$0xff]  }
 0x814   : > { %10181 = vmatprep.subr.bf16.mxu1 %v15283_v18 }
 0x817   : > { %10182 = vmatpush3.bf16.msra.mxu1 %v10846_v60  ;;  %v10855_v60 = vld [vmem:[%s14864_s19 + $0x58] sm:$0xff]  }
 0x818   : > { %10183 = vmatprep.subr.bf16.mxu1 %v15283_v18 }
 0x81b   : > { %10184 = vmatpush3.bf16.msra.mxu1 %v10848_v31  ;;  %v10857_v31 = vld [vmem:[%s14864_s19 + $0x80] sm:$0xff]  }
 0x81c   : > { %10201 = vmatprep.subr.bf16.mxu1 %v15283_v18 }
 0x8c1   : > { %v13367_v2 = vpop.f32.mrb[32].mxu1 }
 0x8c2   : > { %v4004_v42 = vmul.f32 %v13367_v2, %v13367_v2  ;;  %v10157_v4 = vpop.f32.mrb[33].mxu1  ;;  %v4000_v36 = vsel %vm3269_vm9, %v13367_v2, 0.0 }
 0x8c3   : > { %4001 = vadd.xlane.f32.xlu0 %v4000_v36  ;;  %v3997_v54 = vpop.f32.mrb[34].mxu1 }
 0x8c4   : > { %v10158_v39 = vpop.f32.mrb[35].mxu1  ;;  %v4005_v9 = vsel %vm3269_vm9, %v4004_v42, 0.0 }
 0x8c7   : > { %4006 = vadd.xlane.f32.xlu0 %v4005_v9 }
 0x8e1   : > { %v9877_v8 = vpop.f32.mrb[36].mxu1 }
 0x8e2   : > { %v9878_v10 = vpop.f32.mrb[37].mxu1 }
 0x8e3   : > { %v9879_v26 = vadd.f32 %v9878_v10, %v9877_v8  ;;  %v9880_v40 = vpop.f32.mrb[38].mxu1 }
 0x8e4   : > { %v9881_v20 = vpop.f32.mrb[39].mxu1 }
 0x8e5   : > { %v4058_v38 = vpack.c.bf16 %v9879_v26, %v9879_v26 }
 0x8e7   : > { %v4065_v11 = vsel %vm1164_vm12, %v4058_v38, 0 }
 0x8e8   : > { %10160 = vmatpush3.bf16.msra.mxu0 %v4065_v11 }
 0x8e9   : > { %10165 = vmatprep.subr.bf16.mxu0 %v15283_v18 }
 0x8eb   : > { %10162 = vmatmul.mubr.msk.bf16.vlgmr.msra.gmra.mrb[20].mxu0 %vm4060_vm5, %v4059_v57 }
 0x8ec   : > { %10173 = vmatprep.mubr.msk.bf16.mxu0 %vm11307_vm15, %v15283_v18  ;;  %10166 = vmatpush3.bf16.msra.mxu0 %v10841_v0  ;;  %v10849_v0 = vld [vmem:[%s14864_s19 + $0x40] sm:$0xff]  }
 0x8ed   : > { %10167 = vmatprep.subr.bf16.mxu0 %v15283_v18 }
 0x8f0   : > { %10168 = vmatpush3.bf16.msra.mxu0 %v10843_v61 }
 0x8f1   : > { %10169 = vmatprep.subr.bf16.mxu0 %v15283_v18 }
 0x8f4   : > { %10170 = vmatpush3.bf16.msra.mxu0 %v10845_v14  ;;  %v10854_v14 = vld [vmem:[%s14864_s19 + $0x70] sm:$0xff]  }
 0x8f5   : > { %10171 = vmatprep.subr.bf16.mxu0 %v15283_v18 }
 0x8f8   : > { %10172 = vmatpush3.bf16.msra.mxu0 %v10847_v35  ;;  %v10856_v35 = vld [vmem:[%s14864_s19 + $0x78] sm:$0xff]  }
 0x8f9   : > { %10189 = vmatprep.subr.bf16.mxu0 %v15283_v18 }
 0x950   : > { %v4002_v62 = vpop.xlane.xlu0 %4001 }
 0x951   : > { %v4003_v17 = vmul.f32 0.015625, %v4002_v62  ;;  %v10858_v62 = vld [vmem:[%s14864_s19 + $0xa0] sm:$0xff]  }
 0x953   : > { %v4009_v7 = vmul.f32 %v4003_v17, %v4003_v17  ;;  %v4011_v57 = vsub.f32 %v13367_v2, %v4003_v17  ;;  %v10851_v2 = vld [vmem:[%s14864_s19 + $0x48] sm:$0xff]  }
 0x954   : > { %v4007_v21 = vpop.xlane.xlu0 %4006  ;;  %v10859_v17 = vld [vmem:[%s14864_s19 + $0x88] sm:$0xff]  }
 0x955   : > { %v4008_v42 = vmul.f32 0.015625, %v4007_v21  ;;  %v10860_v21 = vld [vmem:[%s14864_s19 + $0xa8] sm:$0xff]  }
 0x957   : > { %v4010_v4 = vsub.f32 %v4008_v42, %v4009_v7  ;;  %v10861_v7 = vld [vmem:[%s14864_s19 + $0x90] sm:$0xff]  }
 0x958   : > { %v10862_v42 = vld [vmem:[%s14864_s19 + $0xb0] sm:$0xff]  }
 0x959   : > { %v4012_v39 = vmax.f32 %v4010_v4, 0.0  ;;  %v10863_v4 = vld [vmem:[%s14864_s19 + $0x98] sm:$0xff]  }
 0x95b   : > { %v4013_v26 = vadd.f32 1e-05, %v4012_v39  ;;  %v10866_v39 = vld [vmem:[%s14864_s19 + $0xe0] sm:$0xff]  }
 0x95d   : > { %10942 = vrsqrt.f32 %v4013_v26  ;;  %v10870_v26 = vld [vmem:[%s14864_s19 + $0xf0] sm:$0xff]  }
 0x967   : > { %v10943_v11 = vpop.eup %10942 }
 0x9be   : > { %v4101_v22 = vpop.f32.mrb[20].mxu0 }
 0x9bf   : > { %v4111_v23 = vmul.f32 %v4101_v22, %v4101_v22  ;;  %v10163_v48 = vpop.f32.mrb[21].mxu0  ;;  %v4107_v29 = vsel %vm3269_vm9, %v4101_v22, 0.0 }
 0x9c0   : > { %4108 = vadd.xlane.f32.xlu1 %v4107_v29  ;;  %v4104_v43 = vpop.f32.mrb[22].mxu0  ;;  %v4015_v29 = vmul.f32 %v10943_v11, %v4011_v57  ;;  %v10874_v11 = vld [vmem:[%s14864_s19 + $0x108] sm:$0xff]   ;;  %v10875_v57 = vld [vmem:[%s14864_s19 + $0x110] sm:$0xff]  }
 0x9c1   : > { %v10164_v15 = vpop.f32.mrb[23].mxu0  ;;  %v4112_v24 = vsel %vm3269_vm9, %v4111_v23, 0.0 }
 0x9c4   : > { %4113 = vadd.xlane.f32.xlu1 %v4112_v24 }
 0xa4d   : > { %v4109_v36 = vpop.xlane.xlu1 %4108 }
 0xa4e   : > { %v4110_v54 = vmul.f32 0.015625, %v4109_v36  ;;  %v10864_v36 = vld [vmem:[%s14864_s19 + $0xb8] sm:$0xff]  }
 0xa50   : > { %v4116_v8 = vmul.f32 %v4110_v54, %v4110_v54  ;;  %v4118_v23 = vsub.f32 %v4101_v22, %v4110_v54  ;;  %v10852_v22 = vld [vmem:[%s14864_s19 + $0x68] sm:$0xff]   ;;  %v10865_v54 = vld [vmem:[%s14864_s19 + $0xc0] sm:$0xff]  }
 0xa51   : > { %v4114_v9 = vpop.xlane.xlu1 %4113 }
 0xa52   : > { %v4115_v10 = vmul.f32 0.015625, %v4114_v9  ;;  %v10867_v9 = vld [vmem:[%s14864_s19 + $0xc8] sm:$0xff]  }
 0xa54   : > { %v4117_v40 = vsub.f32 %v4115_v10, %v4116_v8  ;;  %v10868_v8 = vld [vmem:[%s14864_s19 + $0xe8] sm:$0xff]   ;;  %v10869_v10 = vld [vmem:[%s14864_s19 + $0xd0] sm:$0xff]  }
 0xa56   : > { %v4119_v20 = vmax.f32 %v4117_v40, 0.0  ;;  %v10871_v40 = vld [vmem:[%s14864_s19 + $0xd8] sm:$0xff]  }
 0xa58   : > { %v4120_v38 = vadd.f32 1e-05, %v4119_v20  ;;  %v10872_v20 = vld [vmem:[%s14864_s19 + $0xf8] sm:$0xff]  }
 0xa5a   : > { %10944 = vrsqrt.f32 %v4120_v38  ;;  %v10873_v38 = vld [vmem:[%s14864_s19 + $0x100] sm:$0xff]  }
 0xa64   : > { %v10945_v48 = vpop.eup %10944 }
 0xa65   : > { %v4122_v43 = vmul.f32 %v10945_v48, %v4118_v23  ;;  %v10876_v23 = vld [vmem:[%s14864_s19 + $0x118] sm:$0xff]  }
 0xa67   : > { %v4123_v15 = vadd.f32 %v4122_v43, %v4015_v29 }
 0xa69   : > { %v13417_v24 = vmax.f32 %v4123_v15, 0.0 }
 0xa6b   : > { %v13427_v61 = vpack.c.bf16 %v13417_v24, %v13417_v24 }
 0xa6d   : > { %10174 = vmatmul.mubr.msk.bf16.vlgmr.msra.gmra.mrb[24].mxu0 %vm3269_vm9, %v13427_v61  ;;  %10186 = vmatmul.mubr.msk.bf16.vlgmr.msra.gmra.mrb[40].mxu1 %vm3269_vm9, %v13427_v61 }
 0xa6e   : > { %10190 = vmatpush3.bf16.msra.mxu0 %v10849_v0  ;;  %10202 = vmatpush3.bf16.msra.mxu1 %v10850_v44 }
 0xa6f   : > { %10191 = vmatprep.subr.bf16.mxu0 %v15283_v18  ;;  %10203 = vmatprep.subr.bf16.mxu1 %v15283_v18 }
 0xa70   : > { %10197 = vmatprep.mubr.msk.bf16.mxu0 %vm11307_vm15, %v15283_v18  ;;  %10209 = vmatprep.mubr.msk.bf16.mxu1 %vm11307_vm15, %v15283_v18 }
 0xa72   : > { %10192 = vmatpush3.bf16.msra.mxu0 %v10851_v2  ;;  %10204 = vmatpush3.bf16.msra.mxu1 %v10852_v22 }
 0xa73   : > { %10193 = vmatprep.subr.bf16.mxu0 %v15283_v18  ;;  %10205 = vmatprep.subr.bf16.mxu1 %v15283_v18 }
 0xa76   : > { %10194 = vmatpush3.bf16.msra.mxu0 %v10853_v32  ;;  %10206 = vmatpush3.bf16.msra.mxu1 %v10854_v14 }
 0xa77   : > { %10195 = vmatprep.subr.bf16.mxu0 %v15283_v18  ;;  %10207 = vmatprep.subr.bf16.mxu1 %v15283_v18 }
 0xa7a   : > { %10196 = vmatpush3.bf16.msra.mxu0 %v10855_v60  ;;  %10208 = vmatpush3.bf16.msra.mxu1 %v10856_v35 }
 0xa7b   : > { %10213 = vmatprep.subr.bf16.mxu0 %v15283_v18  ;;  %10225 = vmatprep.subr.bf16.mxu1 %v15283_v18 }
 0xa7d   : > { %10198 = vmatmul.mubr.msk.bf16.vlgmr.msra.gmra.mrb[28].mxu0 %vm3269_vm9, %v13427_v61  ;;  %10210 = vmatmul.mubr.msk.bf16.vlgmr.msra.gmra.mrb[44].mxu1 %vm3269_vm9, %v13427_v61 }
 0xa7e   : > { %10214 = vmatpush3.bf16.msra.mxu0 %v10857_v31  ;;  %10226 = vmatpush3.bf16.msra.mxu1 %v10858_v62 }
 0xa7f   : > { %10215 = vmatprep.subr.bf16.mxu0 %v15283_v18  ;;  %10227 = vmatprep.subr.bf16.mxu1 %v15283_v18 }
 0xa80   : > { %10221 = vmatprep.mubr.msk.bf16.mxu0 %vm11307_vm15, %v15283_v18  ;;  %10233 = vmatprep.mubr.msk.bf16.mxu1 %vm11307_vm15, %v15283_v18 }
 0xa82   : > { %10216 = vmatpush3.bf16.msra.mxu0 %v10859_v17  ;;  %10228 = vmatpush3.bf16.msra.mxu1 %v10860_v21 }
 0xa83   : > { %10217 = vmatprep.subr.bf16.mxu0 %v15283_v18  ;;  %10229 = vmatprep.subr.bf16.mxu1 %v15283_v18 }
 0xa86   : > { %10218 = vmatpush3.bf16.msra.mxu0 %v10861_v7  ;;  %10230 = vmatpush3.bf16.msra.mxu1 %v10862_v42 }
 0xa87   : > { %10219 = vmatprep.subr.bf16.mxu0 %v15283_v18  ;;  %10231 = vmatprep.subr.bf16.mxu1 %v15283_v18 }
 0xa8a   : > { %10220 = vmatpush3.bf16.msra.mxu0 %v10863_v4  ;;  %10232 = vmatpush3.bf16.msra.mxu1 %v10864_v36 }
 0xa8b   : > { %10237 = vmatprep.subr.bf16.mxu0 %v15283_v18  ;;  %10249 = vmatprep.subr.bf16.mxu1 %v15283_v18 }
 0xa8d   : > { %10222 = vmatmul.mubr.msk.bf16.vlgmr.msra.gmra.mrb[32].mxu0 %vm3269_vm9, %v13427_v61  ;;  %10234 = vmatmul.mubr.msk.bf16.vlgmr.msra.gmra.mrb[48].mxu1 %vm3269_vm9, %v13427_v61 }
 0xa8e   : > { %10238 = vmatpush3.bf16.msra.mxu0 %v10865_v54  ;;  %10250 = vmatpush3.bf16.msra.mxu1 %v10866_v39 }
 0xa8f   : > { %10239 = vmatprep.subr.bf16.mxu0 %v15283_v18  ;;  %10251 = vmatprep.subr.bf16.mxu1 %v15283_v18 }
 0xa90   : > { %10245 = vmatprep.mubr.msk.bf16.mxu0 %vm11307_vm15, %v15283_v18  ;;  %10257 = vmatprep.mubr.msk.bf16.mxu1 %vm11307_vm15, %v15283_v18 }
 0xa92   : > { %10240 = vmatpush3.bf16.msra.mxu0 %v10867_v9  ;;  %10252 = vmatpush3.bf16.msra.mxu1 %v10868_v8 }
 0xa93   : > { %10241 = vmatprep.subr.bf16.mxu0 %v15283_v18  ;;  %10253 = vmatprep.subr.bf16.mxu1 %v15283_v18 }
 0xa96   : > { %10242 = vmatpush3.bf16.msra.mxu0 %v10869_v10  ;;  %10254 = vmatpush3.bf16.msra.mxu1 %v10870_v26 }
 0xa97   : > { %10243 = vmatprep.subr.bf16.mxu0 %v15283_v18  ;;  %10255 = vmatprep.subr.bf16.mxu1 %v15283_v18 }
 0xa9a   : > { %10244 = vmatpush3.bf16.msra.mxu0 %v10871_v40  ;;  %10256 = vmatpush3.bf16.msra.mxu1 %v10872_v20 }
 0xa9b   : > { %10261 = vmatprep.subr.bf16.mxu0 %v15283_v18  ;;  %10273 = vmatprep.subr.bf16.mxu1 %v15283_v18 }
 0xa9d   : > { %10246 = vmatmul.mubr.msk.bf16.vlgmr.msra.gmra.mrb[36].mxu0 %vm3269_vm9, %v13427_v61  ;;  %10258 = vmatmul.mubr.msk.bf16.vlgmr.msra.gmra.mrb[52].mxu1 %vm3269_vm9, %v13427_v61 }
 0xa9e   : > { %10262 = vmatpush3.bf16.msra.mxu0 %v10873_v38  ;;  %10269 = vmatprep.mubr.msk.bf16.mxu0 %vm11307_vm15, %v15283_v18 }
 0xa9f   : > { %10263 = vmatprep.subr.bf16.mxu0 %v15283_v18  ;;  %10283 = vmatprep.mubr.msk.bf16.mxu1 %vm11307_vm15, %v15283_v18 }
 0xaa2   : > { %10264 = vmatpush3.bf16.msra.mxu0 %v10874_v11 }
 0xaa3   : > { %10265 = vmatprep.subr.bf16.mxu0 %v15283_v18 }
 0xaa6   : > { %10266 = vmatpush3.bf16.msra.mxu0 %v10875_v57 }
 0xaa7   : > { %10267 = vmatprep.subr.bf16.mxu0 %v15283_v18 }
 0xaaa   : > { %10268 = vmatpush3.bf16.msra.mxu0 %v10876_v23 }
 0xaab   : > { %10287 = vmatprep.subr.bf16.mxu0 %v15283_v18 }
 0xaad   : > { %10270 = vmatmul.mubr.msk.bf16.vlgmr.msra.gmra.mrb[40].mxu0 %vm3269_vm9, %v13427_v61 }
 0xaae   : > { %10289 = vmatprep.mubr.msk.bf16.mxu0 %vm11307_vm15, %v15283_v18 }
 0xb40   : > { %v4195_v48 = vpop.f32.mrb[24].mxu0  ;;  %v4268_v29 = vpop.f32.mrb[40].mxu1 }
 0xb41   : > { %v4785_v43 = vpack.c.bf16 %v4268_v29, %v4195_v48  ;;  %v10175_v15 = vpop.f32.mrb[25].mxu0  ;;  %v10187_v0 = vpop.f32.mrb[41].mxu1 }
 0xb42   : > { %v4198_v44 = vpop.f32.mrb[26].mxu0  ;;  %v4271_v2 = vpop.f32.mrb[42].mxu1 }
 0xb43   : > { %v10176_v22 = vpop.f32.mrb[27].mxu0  ;;  %v10188_v32 = vpop.f32.mrb[43].mxu1  ;;  %10274 = vmatpush3.bf16.msra.mxu1 %v4785_v43 }
 0xb44   : > { %10275 = vmatprep.subr.bf16.mxu1 %v15283_v18 }
 0xb50   : > { %v4341_v14 = vpop.f32.mrb[28].mxu0  ;;  %v4414_v60 = vpop.f32.mrb[44].mxu1 }
 0xb51   : > { %v4786_v35 = vpack.c.bf16 %v4414_v60, %v4341_v14  ;;  %v10199_v31 = vpop.f32.mrb[29].mxu0  ;;  %v10211_v62 = vpop.f32.mrb[45].mxu1  ;;  %v10877_v60 = vld [vmem:[%s15285_s0] sm:$0xff]   ;;  %s15289_s0 = sld [smem:[#allocation124_spill]] }
 0xb52   : > { %v4344_v17 = vpop.f32.mrb[30].mxu0  ;;  %v4417_v21 = vpop.f32.mrb[46].mxu1 }
 0xb53   : > { %v10200_v7 = vpop.f32.mrb[31].mxu0  ;;  %v10212_v42 = vpop.f32.mrb[47].mxu1  ;;  %10276 = vmatpush3.bf16.msra.mxu1 %v4786_v35 }
 0xb54   : > { %10277 = vmatprep.subr.bf16.mxu1 %v15283_v18 }
 0xb60   : > { %v4487_v4 = vpop.f32.mrb[32].mxu0  ;;  %v4560_v36 = vpop.f32.mrb[48].mxu1 }
 0xb61   : > { %v4787_v54 = vpack.c.bf16 %v4560_v36, %v4487_v4  ;;  %v10223_v39 = vpop.f32.mrb[33].mxu0  ;;  %v10235_v9 = vpop.f32.mrb[49].mxu1 }
 0xb62   : > { %v4490_v8 = vpop.f32.mrb[34].mxu0  ;;  %v4563_v10 = vpop.f32.mrb[50].mxu1  ;;  %v10878_v39 = vld [vmem:[%s14866_s21] sm:$0xff]   ;;  %v10879_v9 = vld [vmem:[%s14866_s21 + $0x10] sm:$0xff]  }
 0xb63   : > { %v10224_v26 = vpop.f32.mrb[35].mxu0  ;;  %v10236_v40 = vpop.f32.mrb[51].mxu1  ;;  %10278 = vmatpush3.bf16.msra.mxu1 %v4787_v54  ;;  %10288 = vmatpush3.bf16.msra.mxu0 %v10878_v39  ;;  %v10885_v39 = vld [vmem:[%s14866_s21 + $0x28] sm:$0xff]  }
 0xb64   : > { %10279 = vmatprep.subr.bf16.mxu1 %v15283_v18  ;;  %10293 = vmatprep.subr.bf16.mxu0 %v15283_v18 }
 0xb70   : > { %v4633_v20 = vpop.f32.mrb[36].mxu0  ;;  %v4706_v38 = vpop.f32.mrb[52].mxu1 }
 0xb71   : > { %v4788_v11 = vpack.c.bf16 %v4706_v38, %v4633_v20  ;;  %v10247_v57 = vpop.f32.mrb[37].mxu0  ;;  %v10259_v23 = vpop.f32.mrb[53].mxu1 }
 0xb72   : > { %v4636_v48 = vpop.f32.mrb[38].mxu0  ;;  %v4709_v29 = vpop.f32.mrb[54].mxu1 }
 0xb73   : > { %v10248_v43 = vpop.f32.mrb[39].mxu0  ;;  %v10260_v15 = vpop.f32.mrb[55].mxu1  ;;  %10280 = vmatpush3.bf16.msra.mxu1 %v4788_v11 }
 0xb74   : > { %10281 = vmatprep.subr.bf16.mxu1 %v15283_v18 }
 0xb80   : > { %v4779_v0 = vpop.f32.mrb[40].mxu0 }
 0xb81   : > { %v4789_v44 = vpack.c.bf16 %v4779_v0, %v4779_v0  ;;  %v10271_v2 = vpop.f32.mrb[41].mxu0 }
 0xb82   : > { %v4782_v22 = vpop.f32.mrb[42].mxu0 }
 0xb83   : > { %v4801_v32 = vsel %vm1158_vm7, %v4789_v44, 0  ;;  %v10272_v14 = vpop.f32.mrb[43].mxu0 }
 0xb84   : > { %10282 = vmatpush3.bf16.msra.mxu1 %v4801_v32 }
 0xb85   : > { %10299 = vmatprep.subr.bf16.mxu1 %v15283_v18 }
 0xb87   : > { %10284 = vmatmul.mubr.msk.bf16.vlgmr.msra.gmra.mrb[56].mxu1 %vm3953_vm10, %v10877_v60 }
 0xb88   : > { %10301 = vmatprep.mubr.msk.bf16.mxu1 %vm11307_vm15, %v15283_v18  ;;  %10300 = vmatpush3.bf16.msra.mxu1 %v10879_v9  ;;  %v10886_v9 = vld [vmem:[%s14865_s20] sm:$0xff]  }
 0xb89   : > { %10311 = vmatprep.subr.bf16.mxu1 %v15283_v18 }
 0xc5a   : > { %v4837_v35 = vpop.f32.mrb[56].mxu1 }
 0xc5b   : > { %v4853_v31 = vmul.f32 %v4837_v35, %v4837_v35  ;;  %v10285_v62 = vpop.f32.mrb[57].mxu1  ;;  %v4845_v17 = vsel %vm4844_vm8, %v4837_v35, 0.0 }
 0xc5c   : > { %4846 = vadd.xlane.f32.xlu0 %v4845_v17  ;;  %v4840_v21 = vpop.f32.mrb[58].mxu1 }
 0xc5d   : > { %v4854_v7 = vmul.f32 %v4840_v21, %v4840_v21  ;;  %v10286_v42 = vpop.f32.mrb[59].mxu1  ;;  %v4848_v4 = vsel %vm4844_vm8, %v4840_v21, 0.0  ;;  %v4855_v36 = vsel %vm4844_vm8, %v4853_v31, 0.0 }
 0xc5e   : > { %4849 = vadd.xlane.f32.xlu1 %v4848_v4  ;;  %v10880_v42 = vld [vmem:[%s14866_s21 + $0x8] sm:$0xff]   ;;  %v10881_v4 = vld [vmem:[%s14866_s21 + $0x20] sm:$0xff]  }
 0xc5f   : > { %v4858_v54 = vsel %vm4844_vm8, %v4854_v7, 0.0 }
 0xc60   : > { %4856 = vadd.xlane.f32.xlu0 %v4855_v36 }
 0xc62   : > { %4859 = vadd.xlane.f32.xlu1 %v4858_v54  ;;  %v10884_v54 = vld [vmem:[%s14866_s21 + $0x40] sm:$0xff]  }
 0xce9   : > { %v4847_v8 = vpop.xlane.xlu0 %4846 }
 0xcea   : > { %v4851_v10 = vmul.f32 0.0625, %v4847_v8  ;;  %v10888_v8 = vld [vmem:[%s14866_s21 + $0x38] sm:$0xff]  }
 0xceb   : > { %v4850_v26 = vpop.xlane.xlu1 %4849 }
 0xcec   : > { %v4852_v40 = vmul.f32 0.0625, %v4850_v26  ;;  %v4863_v38 = vmul.f32 %v4851_v10, %v4851_v10  ;;  %v4867_v22 = vsub.f32 %v4837_v35, %v4851_v10  ;;  %v10882_v35 = vld [vmem:[%s14866_s21 + $0x18] sm:$0xff]   ;;  %v10887_v10 = vld [vmem:[%s14865_s20 + $0x8] sm:$0xff]   ;;  %v10889_v26 = vld [vmem:[%s14865_s20 + $0x10] sm:$0xff]  }
 0xced   : > { %v4857_v20 = vpop.xlane.xlu0 %4856 }
 0xcee   : > { %v4861_v11 = vmul.f32 0.0625, %v4857_v20  ;;  %v4864_v23 = vmul.f32 %v4852_v40, %v4852_v40  ;;  %v4868_v14 = vsub.f32 %v4840_v21, %v4852_v40  ;;  %v10883_v21 = vld [vmem:[%s14866_s21 + $0x30] sm:$0xff]   ;;  %v10890_v40 = vld [vmem:[%s14865_s20 + $0x18] sm:$0xff]   ;;  %v10891_v20 = vld [vmem:[%s15286_s23 + $0x4] ss:$8 sps:$4 sm:$0xff]  }
 0xcef   : > { %v4860_v57 = vpop.xlane.xlu1 %4859 }
 0xcf0   : > { %v4865_v48 = vsub.f32 %v4861_v11, %v4863_v38  ;;  %v4862_v29 = vmul.f32 0.0625, %v4860_v57 }
 0xcf2   : > { %v4869_v43 = vmax.f32 %v4865_v48, 0.0  ;;  %v4866_v15 = vsub.f32 %v4862_v29, %v4864_v23 }
 0xcf4   : > { %v4871_v0 = vadd.f32 1e-05, %v4869_v43  ;;  %v4870_v44 = vmax.f32 %v4866_v15, 0.0 }
 0xcf6   : > { %10946 = vrsqrt.f32 %v4871_v0  ;;  %v4872_v2 = vadd.f32 1e-05, %v4870_v44 }
 0xcf8   : > { %10948 = vrsqrt.f32 %v4872_v2 }
 0xd00   : > { %v10947_v32 = vpop.eup %10946 }
 0xd01   : > { %v4875_v60 = vmul.f32 %v10947_v32, %v4867_v22 }
 0xd02   : > { %v10949_v31 = vpop.eup %10948 }
 0xd03   : > { %v4876_v62 = vmul.f32 %v10949_v31, %v4868_v14  ;;  %v4877_v17 = vmax.f32 %v4875_v60, 0.0 }
 0xd05   : > { %v4878_v7 = vmax.f32 %v4876_v62, 0.0 }
 0xd07   : > { %v4879_v36 = vpack.c.bf16 %v4878_v7, %v4877_v17 }
 0xd09   : > { %10290 = vmatmul.mubr.msk.bf16.vlgmr.msra.gmra.mrb[44].mxu0 %vm4844_vm8, %v4879_v36  ;;  %10302 = vmatmul.mubr.msk.bf16.vlgmr.msra.gmra.mrb[60].mxu1 %vm4844_vm8, %v4879_v36 }
 0xd0a   : > { %10294 = vmatpush3.bf16.msra.mxu0 %v10880_v42  ;;  %10312 = vmatpush3.bf16.msra.mxu1 %v10881_v4 }
 0xd0b   : > { %10295 = vmatprep.mubr.msk.bf16.mxu0 %vm11307_vm15, %v15283_v18  ;;  %10313 = vmatprep.mubr.msk.bf16.mxu1 %vm11307_vm15, %v15283_v18 }
 0xd0c   : > { %10305 = vmatprep.subr.bf16.mxu0 %v15283_v18  ;;  %10323 = vmatprep.subr.bf16.mxu1 %v15283_v18 }
 0xd11   : > { %10296 = vmatmul.mubr.msk.bf16.vlgmr.msra.gmra.mrb[48].mxu0 %vm4844_vm8, %v4879_v36  ;;  %10314 = vmatmul.mubr.msk.bf16.vlgmr.msra.gmra.mrb[64].mxu1 %vm4844_vm8, %v4879_v36 }
 0xd12   : > { %10306 = vmatpush3.bf16.msra.mxu0 %v10882_v35  ;;  %10324 = vmatpush3.bf16.msra.mxu1 %v10883_v21 }
 0xd13   : > { %10307 = vmatprep.mubr.msk.bf16.mxu0 %vm11307_vm15, %v15283_v18  ;;  %10325 = vmatprep.mubr.msk.bf16.mxu1 %vm11307_vm15, %v15283_v18 }
 0xd14   : > { %10335 = vmatprep.subr.bf16.mxu1 %v15283_v18  ;;  %10317 = vmatprep.subr.bf16.mxu0 %v15283_v18 }
 0xd19   : > { %10308 = vmatmul.mubr.msk.bf16.vlgmr.msra.gmra.mrb[52].mxu0 %vm4844_vm8, %v4879_v36  ;;  %10326 = vmatmul.mubr.msk.bf16.vlgmr.msra.gmra.mrb[68].mxu1 %vm4844_vm8, %v4879_v36 }
 0xd1a   : > { %10336 = vmatpush3.bf16.msra.mxu1 %v10884_v54  ;;  %10318 = vmatpush3.bf16.msra.mxu0 %v10885_v39 }
 0xd1b   : > { %10319 = vmatprep.mubr.msk.bf16.mxu0 %vm11307_vm15, %v15283_v18  ;;  %10337 = vmatprep.mubr.msk.bf16.mxu1 %vm11307_vm15, %v15283_v18 }
 0xd1c   : > { %10341 = vmatprep.subr.bf16.mxu1 %v15283_v18  ;;  %10329 = vmatprep.subr.bf16.mxu0 %v15283_v18 }
 0xd21   : > { %10320 = vmatmul.mubr.msk.bf16.vlgmr.msra.gmra.mrb[56].mxu0 %vm4844_vm8, %v4879_v36  ;;  %10338 = vmatmul.mubr.msk.bf16.vlgmr.msra.gmra.mrb[72].mxu1 %vm4844_vm8, %v4879_v36 }
 0xd22   : > { %10342 = vmatpush3.bf16.msra.mxu1 %v10886_v9  ;;  %10330 = vmatpush3.bf16.msra.mxu0 %v10888_v8 }
 0xd23   : > { %10343 = vmatprep.subr.bf16.mxu1 %v15283_v18  ;;  %10331 = vmatprep.mubr.msk.bf16.mxu0 %vm11307_vm15, %v15283_v18 }
 0xd24   : > { %10349 = vmatprep.mubr.msk.bf16.mxu1 %vm11307_vm15, %v15283_v18  ;;  %5355 = vmatprep.subr.bf16.mxu0 %v15209_v49 }
 0xd26   : > { %10344 = vmatpush3.bf16.msra.mxu1 %v10887_v10 }
 0xd27   : > { %10345 = vmatprep.subr.bf16.mxu1 %v15283_v18 }
 0xd29   : > { %10332 = vmatmul.mubr.msk.bf16.vlgmr.msra.gmra.mrb[60].mxu0 %vm4844_vm8, %v4879_v36 }
 0xd2a   : > { %10346 = vmatpush3.bf16.msra.mxu1 %v10889_v26  ;;  %9628 = vmatprep.mubr.msk.bf16.mxu0 %vm4844_vm8, %v10891_v20 }
 0xd2b   : > { %10347 = vmatprep.subr.bf16.mxu1 %v15283_v18 }
 0xd2e   : > { %10348 = vmatpush3.bf16.msra.mxu1 %v10890_v40 }
 0xd2f   : > { %10353 = vmatprep.subr.bf16.mxu1 %v15283_v18 }
 0xd31   : > { %10350 = vmatmul.mubr.msk.bf16.vlgmr.msra.gmra.mrb[76].mxu1 %vm3269_vm9, %v13427_v61 }
 0xd32   : > { %10355 = vmatprep.mubr.msk.bf16.mxu1 %vm11307_vm15, %v15283_v18 }
 0xddc   : > { %v4925_v38 = vpop.f32.mrb[44].mxu0  ;;  %v5025_v11 = vpop.f32.mrb[60].mxu1 }
 0xddd   : > { %v10291_v57 = vpop.f32.mrb[45].mxu0  ;;  %v10303_v23 = vpop.f32.mrb[61].mxu1 }
 0xdde   : > { %v4928_v48 = vpop.f32.mrb[46].mxu0  ;;  %v5028_v29 = vpop.f32.mrb[62].mxu1 }
 0xddf   : > { %v5332_v43 = vpack.c.bf16 %v4928_v48, %v4925_v38  ;;  %v5334_v15 = vpack.c.bf16 %v5028_v29, %v5025_v11  ;;  %v10292_v0 = vpop.f32.mrb[47].mxu0  ;;  %v10304_v44 = vpop.f32.mrb[63].mxu1 }
 0xde1   : > { %5356 = vmatpush1.bf16.msra.mxu0 %v5332_v43 }
 0xde2   : > { %5357 = vmatprep.subr.bf16.mxu0 %v15209_v49 }
 0xde4   : > { %v4975_v61 = vpop.f32.mrb[48].mxu0  ;;  %v5125_v2 = vpop.f32.mrb[64].mxu1 }
 0xde5   : > { %v10297_v22 = vpop.f32.mrb[49].mxu0  ;;  %v10315_v32 = vpop.f32.mrb[65].mxu1 }
 0xde6   : > { %v4978_v14 = vpop.f32.mrb[50].mxu0  ;;  %v5128_v60 = vpop.f32.mrb[66].mxu1  ;;  %v10893_v32 = vld [vmem:[%s15286_s23] ss:$8 sps:$4 sm:$0xff]  }
 0xde7   : > { %v5333_v31 = vpack.c.bf16 %v4978_v14, %v4975_v61  ;;  %v5336_v62 = vpack.c.bf16 %v5128_v60, %v5125_v2  ;;  %v10298_v17 = vpop.f32.mrb[51].mxu0  ;;  %v10316_v7 = vpop.f32.mrb[67].mxu1 }
 0xde8   : > { %v10894_v7 = vld [vmem:[%s15287_s9] sm:$0xff]   ;;  %s15288_s9 = sld [smem:[#allocation117_spill]] }
 0xde9   : > { %5358 = vmatpush1.bf16.msra.mxu0 %v5333_v31 }
 0xdea   : > { %5359 = vmatprep.subr.bf16.mxu0 %v15209_v49 }
 0xdec   : > { %v5075_v42 = vpop.f32.mrb[52].mxu0  ;;  %v5225_v4 = vpop.f32.mrb[68].mxu1 }
 0xded   : > { %v10309_v36 = vpop.f32.mrb[53].mxu0  ;;  %v10327_v35 = vpop.f32.mrb[69].mxu1  ;;  %5360 = vmatpush1.bf16.msra.mxu0 %v5334_v15 }
 0xdee   : > { %v5078_v21 = vpop.f32.mrb[54].mxu0  ;;  %v5228_v54 = vpop.f32.mrb[70].mxu1  ;;  %5361 = vmatprep.subr.bf16.mxu0 %v15209_v49 }
 0xdef   : > { %v5335_v39 = vpack.c.bf16 %v5078_v21, %v5075_v42  ;;  %v5338_v9 = vpack.c.bf16 %v5228_v54, %v5225_v4  ;;  %v10310_v8 = vpop.f32.mrb[55].mxu0  ;;  %v10328_v10 = vpop.f32.mrb[71].mxu1 }
 0xdf1   : > { %5362 = vmatpush1.bf16.msra.mxu0 %v5335_v39 }
 0xdf2   : > { %5363 = vmatprep.subr.bf16.mxu0 %v15209_v49 }
 0xdf4   : > { %v5175_v26 = vpop.f32.mrb[56].mxu0  ;;  %v5325_v40 = vpop.f32.mrb[72].mxu1 }
 0xdf5   : > { %v10321_v20 = vpop.f32.mrb[57].mxu0  ;;  %v10339_v38 = vpop.f32.mrb[73].mxu1  ;;  %5364 = vmatpush1.bf16.msra.mxu0 %v5336_v62 }
 0xdf6   : > { %v5178_v11 = vpop.f32.mrb[58].mxu0  ;;  %v5328_v57 = vpop.f32.mrb[74].mxu1  ;;  %5365 = vmatprep.subr.bf16.mxu0 %v15209_v49 }
 0xdf7   : > { %v5337_v23 = vpack.c.bf16 %v5178_v11, %v5175_v26  ;;  %v5340_v48 = vpack.c.bf16 %v5328_v57, %v5325_v40  ;;  %v10322_v29 = vpop.f32.mrb[59].mxu0  ;;  %v10340_v43 = vpop.f32.mrb[75].mxu1 }
 0xdf9   : > { %5366 = vmatpush1.bf16.msra.mxu0 %v5337_v23 }
 0xdfa   : > { %5367 = vmatprep.subr.bf16.mxu0 %v15209_v49 }
 0xdfc   : > { %v5275_v15 = vpop.f32.mrb[60].mxu0 }
 0xdfd   : > { %v10333_v0 = vpop.f32.mrb[61].mxu0  ;;  %5368 = vmatpush1.bf16.msra.mxu0 %v5338_v9 }
 0xdfe   : > { %v5278_v44 = vpop.f32.mrb[62].mxu0  ;;  %5369 = vmatprep.subr.bf16.mxu0 %v15209_v49  ;;  %v10896_v0 = vld [vmem:[%s14867_s22 + $0x8] sm:$0xff]  }
 0xdff   : > { %v5339_v61 = vpack.c.bf16 %v5278_v44, %v5275_v15  ;;  %v10334_v2 = vpop.f32.mrb[63].mxu0  ;;  %v10895_v15 = vld [vmem:[%s14867_s22] sm:$0xff]  }
 0xe01   : > { %5370 = vmatpush1.bf16.msra.mxu0 %v5339_v61 }
 0xe02   : > { %5371 = vmatprep.subr.bf16.mxu0 %v15209_v49 }
 0xe04   : > { %v5494_v22 = vpop.f32.mrb[76].mxu1 }
 0xe05   : > { %v5500_v14 = vpack.c.bf16 %v5494_v22, %v5494_v22  ;;  %v10351_v60 = vpop.f32.mrb[77].mxu1  ;;  %5372 = vmatpush1.bf16.msra.mxu0 %v5340_v48 }
 0xe06   : > { %v5497_v31 = vpop.f32.mrb[78].mxu1  ;;  %10365 = vmatprep.subr.bf16.mxu0 %v15283_v18 }
 0xe07   : > { %v5513_v62 = vsel %vm1158_vm7, %v5500_v14, 0  ;;  %v10352_v17 = vpop.f32.mrb[79].mxu1 }
 0xe08   : > { %10354 = vmatpush3.bf16.msra.mxu1 %v5513_v62  ;;  %5388 = vmatmul.mubr.bf16.vlgmr.msra.gmra.mrb[64].mxu0 %v10893_v32 }
 0xe09   : > { %10359 = vmatprep.subr.bf16.mxu1 %v15283_v18  ;;  %10367 = vmatprep.mubr.msk.bf16.mxu0 %vm11307_vm15, %v15283_v18 }
 0xe0a   : > { %10366 = vmatpush3.bf16.msra.mxu0 %v10896_v0 }
 0xe0b   : > { %10356 = vmatmul.mubr.msk.bf16.vlgmr.msra.gmra.mrb[80].mxu1 %vm5508_vm6, %v10894_v7  ;;  %10377 = vmatprep.subr.bf16.mxu0 %v15283_v18  ;;  %vm15303_vm6 = vcmp.lt.s32.totalorder %v11815_v6, 15 }
 0xe0c   : > { %10361 = vmatprep.mubr.msk.bf16.mxu1 %vm11307_vm15, %v15283_v18  ;;  %10360 = vmatpush3.bf16.msra.mxu1 %v10895_v15 }
 0xe0d   : > { %10371 = vmatprep.subr.bf16.mxu1 %v15283_v18 }
 0xedb   : > { %v13693_v42 = vpop.f32.mrb[64].mxu0 }
 0xedc   : > { %v5391_v4 = vpop.f32.mrb[65].mxu0  ;;  %v5396_v36 = vsel %vm4844_vm8, %v13693_v42, 0.0  ;;  %v5404_v10 = vmul.f32 %v13693_v42, %v13693_v42 }
 0xedd   : > { %5397 = vadd.xlane.f32.xlu0 %v5396_v36  ;;  %v13697_v35 = vpop.f32.mrb[66].mxu0 }
 0xede   : > { %v13699_v21 = vpop.f32.mrb[80].mxu1  ;;  %v5394_v54 = vpop.f32.mrb[67].mxu0  ;;  %v5399_v39 = vsel %vm4844_vm8, %v13697_v35, 0.0  ;;  %v5405_v20 = vmul.f32 %v13697_v35, %v13697_v35  ;;  %v5406_v57 = vsel %vm4844_vm8, %v5404_v10, 0.0 }
 0xedf   : > { %v10357_v9 = vpop.f32.mrb[81].mxu1  ;;  %5400 = vadd.xlane.f32.xlu1 %v5399_v39  ;;  %v5556_v8 = vsel %vm4844_vm8, %v13699_v21, 0.0  ;;  %v5564_v11 = vmul.f32 %v13699_v21, %v13699_v21 }
 0xee0   : > { %v13707_v26 = vpop.f32.mrb[82].mxu1  ;;  %v5409_v48 = vsel %vm4844_vm8, %v5405_v20, 0.0 }
 0xee1   : > { %v10358_v40 = vpop.f32.mrb[83].mxu1  ;;  %5557 = vadd.xlane.f32.xlu0 %v5556_v8  ;;  %v5559_v38 = vsel %vm4844_vm8, %v13707_v26, 0.0  ;;  %v5565_v23 = vmul.f32 %v13707_v26, %v13707_v26  ;;  %v5566_v29 = vsel %vm4844_vm8, %v5564_v11, 0.0 }
 0xee3   : > { %5560 = vadd.xlane.f32.xlu1 %v5559_v38  ;;  %v5569_v43 = vsel %vm4844_vm8, %v5565_v23, 0.0 }
 0xee5   : > { %5407 = vadd.xlane.f32.xlu0 %v5406_v57 }
 0xee7   : > { %5410 = vadd.xlane.f32.xlu1 %v5409_v48 }
 0xee9   : > { %5567 = vadd.xlane.f32.xlu0 %v5566_v29 }
 0xeeb   : > { %5570 = vadd.xlane.f32.xlu1 %v5569_v43 }
 0xf6a   : > { %v5398_v44 = vpop.xlane.xlu0 %5397 }
 0xf6b   : > { %v5402_v22 = vmul.f32 0.0625, %v5398_v44 }
 0xf6c   : > { %v5401_v61 = vpop.xlane.xlu1 %5400 }
 0xf6d   : > { %v5403_v14 = vmul.f32 0.0625, %v5401_v61  ;;  %v5414_v31 = vmul.f32 %v5402_v22, %v5402_v22 }
 0xf6e   : > { %v5558_v2 = vpop.xlane.xlu0 %5557 }
 0xf6f   : > { %v5562_v62 = vmul.f32 0.0625, %v5558_v2  ;;  %v5415_v36 = vmul.f32 %v5403_v14, %v5403_v14 }
 0xf70   : > { %v5561_v32 = vpop.xlane.xlu1 %5560 }
 0xf71   : > { %v5563_v7 = vmul.f32 0.0625, %v5561_v32  ;;  %v5574_v8 = vmul.f32 %v5562_v62, %v5562_v62 }
 0xf72   : > { %v5408_v60 = vpop.xlane.xlu0 %5407 }
 0xf73   : > { %v5412_v17 = vmul.f32 0.0625, %v5408_v60  ;;  %v5575_v38 = vmul.f32 %v5563_v7, %v5563_v7 }
 0xf74   : > { %v5411_v4 = vpop.xlane.xlu1 %5410 }
 0xf75   : > { %v5416_v54 = vsub.f32 %v5412_v17, %v5414_v31  ;;  %v5413_v39 = vmul.f32 0.0625, %v5411_v4  ;;  %v5418_v31 = vsub.f32 %v13693_v42, %v5402_v22  ;;  %v5578_v17 = vsub.f32 %v13699_v21, %v5562_v62  ;;  %v10897_v21 = vld [vmem:[%s14867_s22 + $0x10] sm:$0xff]   ;;  %v10899_v22 = vld [vmem:[%s14867_s22 + $0x20] sm:$0xff]  }
 0xf76   : > { %v5568_v9 = vpop.xlane.xlu0 %5567  ;;  %v10901_v62 = vld [vmem:[%s14867_s22 + $0x30] sm:$0xff]  }
 0xf77   : > { %v5420_v10 = vmax.f32 %v5416_v54, 0.0  ;;  %v5417_v40 = vsub.f32 %v5413_v39, %v5415_v36  ;;  %v5572_v20 = vmul.f32 0.0625, %v5568_v9  ;;  %v5419_v36 = vsub.f32 %v13697_v35, %v5403_v14  ;;  %v10898_v35 = vld [vmem:[%s14867_s22 + $0x18] sm:$0xff]   ;;  %v10900_v14 = vld [vmem:[%s14867_s22 + $0x28] sm:$0xff]  }
 0xf78   : > { %v5571_v11 = vpop.xlane.xlu1 %5570  ;;  %v5579_v54 = vsub.f32 %v13707_v26, %v5563_v7  ;;  %v10902_v7 = vld [vmem:[%s14867_s22 + $0x38] sm:$0xff]  }
 0xf79   : > { %v5422_v57 = vadd.f32 1e-05, %v5420_v10  ;;  %v5421_v23 = vmax.f32 %v5417_v40, 0.0  ;;  %v5576_v48 = vsub.f32 %v5572_v20, %v5574_v8  ;;  %v5573_v29 = vmul.f32 0.0625, %v5571_v11 }
 0xf7b   : > { %v5423_v43 = vadd.f32 1e-05, %v5421_v23  ;;  %v5580_v15 = vmax.f32 %v5576_v48, 0.0  ;;  %v5577_v0 = vsub.f32 %v5573_v29, %v5575_v38  ;;  %10950 = vrsqrt.f32 %v5422_v57  ;;  %v10903_v57 = vld [vmem:[%s14867_s22 + $0x40] sm:$0xff]  }
 0xf7c   : > { %v10904_v23 = vld [vmem:[%s15288_s9 + $0x4] ss:$8 sps:$4 sm:$0xff]  }
 0xf7d   : > { %v5582_v44 = vadd.f32 1e-05, %v5580_v15  ;;  %v5581_v61 = vmax.f32 %v5577_v0, 0.0  ;;  %10952 = vrsqrt.f32 %v5423_v43 }
 0xf7f   : > { %10954 = vrsqrt.f32 %v5582_v44  ;;  %v5583_v2 = vadd.f32 1e-05, %v5581_v61 }
 0xf81   : > { %10956 = vrsqrt.f32 %v5583_v2 }
 0xf85   : > { %v10951_v32 = vpop.eup %10950 }
 0xf86   : > { %v5426_v39 = vmul.f32 %v10951_v32, %v5418_v31 }
 0xf87   : > { %v10953_v60 = vpop.eup %10952 }
 0xf88   : > { %v5427_v10 = vmul.f32 %v10953_v60, %v5419_v36 }
 0xf89   : > { %v10955_v4 = vpop.eup %10954 }
 0xf8a   : > { %v5586_v9 = vmul.f32 %v10955_v4, %v5578_v17 }
 0xf8b   : > { %v10957_v8 = vpop.eup %10956 }
 0xf8c   : > { %v13733_v40 = vadd.f32 %v5586_v9, %v5426_v39  ;;  %v5587_v20 = vmul.f32 %v10957_v8, %v5579_v54 }
 0xf8e   : > { %v13735_v38 = vadd.f32 %v5587_v20, %v5427_v10  ;;  %v5590_v11 = vmax.f32 %v13733_v40, 0.0  ;;  %v10919_v40 = vld [vmem:[%s15292_s10 + $0x10] sm:$0xff]  }
 0xf90   : > { %v15107_v42 = vmax.f32 %v13735_v38, 0.0 }
 0xf92   : > { %v13749_v26 = vpack.c.bf16 %v15107_v42, %v5590_v11 }
 0xf94   : > { %10362 = vmatmul.mubr.msk.bf16.vlgmr.msra.gmra.mrb[84].mxu1 %vm4844_vm8, %v13749_v26  ;;  %10368 = vmatmul.mubr.msk.bf16.vlgmr.msra.gmra.mrb[68].mxu0 %vm4844_vm8, %v13749_v26 }
 0xf95   : > { %10372 = vmatpush3.bf16.msra.mxu1 %v10897_v21  ;;  %10378 = vmatpush3.bf16.msra.mxu0 %v10898_v35 }
 0xf96   : > { %10373 = vmatprep.mubr.msk.bf16.mxu1 %vm11307_vm15, %v15283_v18  ;;  %10379 = vmatprep.mubr.msk.bf16.mxu0 %vm11307_vm15, %v15283_v18 }
 0xf97   : > { %10383 = vmatprep.subr.bf16.mxu1 %v15283_v18  ;;  %10389 = vmatprep.subr.bf16.mxu0 %v15283_v18 }
 0xf9c   : > { %10374 = vmatmul.mubr.msk.bf16.vlgmr.msra.gmra.mrb[88].mxu1 %vm4844_vm8, %v13749_v26  ;;  %10380 = vmatmul.mubr.msk.bf16.vlgmr.msra.gmra.mrb[72].mxu0 %vm4844_vm8, %v13749_v26 }
 0xf9d   : > { %10384 = vmatpush3.bf16.msra.mxu1 %v10899_v22  ;;  %10390 = vmatpush3.bf16.msra.mxu0 %v10900_v14 }
 0xf9e   : > { %10385 = vmatprep.mubr.msk.bf16.mxu1 %vm11307_vm15, %v15283_v18  ;;  %10391 = vmatprep.mubr.msk.bf16.mxu0 %vm11307_vm15, %v15283_v18 }
 0xf9f   : > { %10395 = vmatprep.subr.bf16.mxu1 %v15283_v18  ;;  %10401 = vmatprep.subr.bf16.mxu0 %v15283_v18 }
 0xfa4   : > { %10386 = vmatmul.mubr.msk.bf16.vlgmr.msra.gmra.mrb[92].mxu1 %vm4844_vm8, %v13749_v26  ;;  %10392 = vmatmul.mubr.msk.bf16.vlgmr.msra.gmra.mrb[76].mxu0 %vm4844_vm8, %v13749_v26 }
 0xfa5   : > { %10396 = vmatpush3.bf16.msra.mxu1 %v10901_v62  ;;  %10402 = vmatpush3.bf16.msra.mxu0 %v10902_v7 }
 0xfa6   : > { %10397 = vmatprep.mubr.msk.bf16.mxu1 %vm11307_vm15, %v15283_v18  ;;  %10403 = vmatprep.mubr.msk.bf16.mxu0 %vm11307_vm15, %v15283_v18 }
 0xfa7   : > { %10407 = vmatprep.subr.bf16.mxu1 %v15283_v18  ;;  %6068 = vmatprep.subr.bf16.mxu0 %v15209_v49 }
 0xfac   : > { %10398 = vmatmul.mubr.msk.bf16.vlgmr.msra.gmra.mrb[96].mxu1 %vm4844_vm8, %v13749_v26  ;;  %10404 = vmatmul.mubr.msk.bf16.vlgmr.msra.gmra.mrb[80].mxu0 %vm4844_vm8, %v13749_v26 }
 0xfad   : > { %10408 = vmatpush3.bf16.msra.mxu1 %v10903_v57  ;;  %10409 = vmatprep.mubr.msk.bf16.mxu1 %vm11307_vm15, %v15283_v18 }
 0xfae   : > { %10413 = vmatprep.subr.bf16.mxu1 %v15283_v18  ;;  %9672 = vmatprep.mubr.msk.bf16.mxu0 %vm4844_vm8, %v10904_v23 }
 0xfb4   : > { %10410 = vmatmul.mubr.msk.bf16.vlgmr.msra.gmra.mrb[100].mxu1 %vm4844_vm8, %v13749_v26 }
 0xfb5   : > { %10415 = vmatprep.mubr.msk.bf16.mxu1 %vm11307_vm15, %v15283_v18 }
0x1067   : > { %v5638_v48 = vpop.f32.mrb[84].mxu1  ;;  %v5688_v29 = vpop.f32.mrb[68].mxu0 }
0x1068   : > { %v10363_v43 = vpop.f32.mrb[85].mxu1  ;;  %v10369_v15 = vpop.f32.mrb[69].mxu0 }
0x1069   : > { %v5641_v0 = vpop.f32.mrb[86].mxu1  ;;  %v5691_v44 = vpop.f32.mrb[70].mxu0 }
0x106a   : > { %v6045_v61 = vpack.c.bf16 %v5641_v0, %v5638_v48  ;;  %v6046_v2 = vpack.c.bf16 %v5691_v44, %v5688_v29  ;;  %v10364_v32 = vpop.f32.mrb[87].mxu1  ;;  %v10370_v60 = vpop.f32.mrb[71].mxu0 }
0x106c   : > { %6069 = vmatpush1.bf16.msra.mxu0 %v6045_v61 }
0x106d   : > { %6070 = vmatprep.subr.bf16.mxu0 %v15209_v49 }
0x106f   : > { %v5738_v31 = vpop.f32.mrb[88].mxu1  ;;  %v5788_v17 = vpop.f32.mrb[72].mxu0 }
0x1070   : > { %v10375_v4 = vpop.f32.mrb[89].mxu1  ;;  %v10381_v36 = vpop.f32.mrb[73].mxu0  ;;  %6071 = vmatpush1.bf16.msra.mxu0 %v6046_v2 }
0x1071   : > { %v5741_v54 = vpop.f32.mrb[90].mxu1  ;;  %v5791_v39 = vpop.f32.mrb[74].mxu0  ;;  %6072 = vmatprep.subr.bf16.mxu0 %v15209_v49 }
0x1072   : > { %v6047_v9 = vpack.c.bf16 %v5741_v54, %v5738_v31  ;;  %v6048_v8 = vpack.c.bf16 %v5791_v39, %v5788_v17  ;;  %v10376_v10 = vpop.f32.mrb[91].mxu1  ;;  %v10382_v20 = vpop.f32.mrb[75].mxu0 }
0x1074   : > { %6073 = vmatpush1.bf16.msra.mxu0 %v6047_v9 }
0x1075   : > { %6074 = vmatprep.subr.bf16.mxu0 %v15209_v49 }
0x1077   : > { %v5838_v21 = vpop.f32.mrb[92].mxu1  ;;  %v5888_v35 = vpop.f32.mrb[76].mxu0 }
0x1078   : > { %v10387_v22 = vpop.f32.mrb[93].mxu1  ;;  %v10393_v14 = vpop.f32.mrb[77].mxu0  ;;  %6075 = vmatpush1.bf16.msra.mxu0 %v6048_v8  ;;  %v10906_v8 = vld [vmem:[%s15288_s9] ss:$8 sps:$4 sm:$0xff]  }
0x1079   : > { %v5841_v62 = vpop.f32.mrb[94].mxu1  ;;  %v5891_v7 = vpop.f32.mrb[78].mxu0  ;;  %6076 = vmatprep.subr.bf16.mxu0 %v15209_v49 }
0x107a   : > { %v6049_v57 = vpack.c.bf16 %v5841_v62, %v5838_v21  ;;  %v6050_v23 = vpack.c.bf16 %v5891_v7, %v5888_v35  ;;  %v10388_v48 = vpop.f32.mrb[95].mxu1  ;;  %v10394_v29 = vpop.f32.mrb[79].mxu0 }
0x107b   : > { %v6144_v48 = vld [vmem:[%s15289_s0] sm:$0x3]  ;;  %v9682_v29 = vld [vmem:[%s15289_s0 + $0xa] sm:$0x3] }
0x107c   : > { %6077 = vmatpush1.bf16.msra.mxu0 %v6049_v57 }
0x107d   : > { %6078 = vmatprep.subr.bf16.mxu0 %v15209_v49 }
0x107f   : > { %v5938_v43 = vpop.f32.mrb[96].mxu1  ;;  %v5988_v15 = vpop.f32.mrb[80].mxu0 }
0x1080   : > { %v10399_v0 = vpop.f32.mrb[97].mxu1  ;;  %v10405_v44 = vpop.f32.mrb[81].mxu0  ;;  %6079 = vmatpush1.bf16.msra.mxu0 %v6050_v23 }
0x1081   : > { %v5941_v61 = vpop.f32.mrb[98].mxu1  ;;  %v5991_v2 = vpop.f32.mrb[82].mxu0  ;;  %6080 = vmatprep.subr.bf16.mxu0 %v15209_v49 }
0x1082   : > { %v6051_v32 = vpack.c.bf16 %v5941_v61, %v5938_v43  ;;  %v6052_v60 = vpack.c.bf16 %v5991_v2, %v5988_v15  ;;  %v10400_v31 = vpop.f32.mrb[99].mxu1  ;;  %v10406_v17 = vpop.f32.mrb[83].mxu0  ;;  %v6149_v43 = vsel %vm1164_vm12, %v6144_v48, 0  ;;  %v6379_v15 = vsel %vm1164_vm12, %v9682_v29, 0  ;;  %v9674_v48 = vld [vmem:[%s15289_s0 + $0x2] sm:$0x3] }
0x1083   : > { %10414 = vmatpush3.bf16.msra.mxu1 %v6149_v43  ;;  %v9686_v29 = vld [vmem:[%s15289_s0 + $0xe] sm:$0x3] }
0x1084   : > { %6081 = vmatpush1.bf16.msra.mxu0 %v6051_v32  ;;  %10419 = vmatprep.subr.bf16.mxu1 %v15283_v18 }
0x1085   : > { %6082 = vmatprep.subr.bf16.mxu0 %v15209_v49 }
0x1087   : > { %v6038_v4 = vpop.f32.mrb[100].mxu1 }
0x1088   : > { %v10411_v36 = vpop.f32.mrb[101].mxu1  ;;  %6083 = vmatpush1.bf16.msra.mxu0 %v6052_v60 }
0x1089   : > { %v6041_v54 = vpop.f32.mrb[102].mxu1  ;;  %6084 = vmatprep.subr.bf16.mxu0 %v15209_v49 }
0x108a   : > { %v6053_v39 = vpack.c.bf16 %v6041_v54, %v6038_v4  ;;  %v10412_v9 = vpop.f32.mrb[103].mxu1 }
0x108c   : > { %6085 = vmatpush1.bf16.msra.mxu0 %v6053_v39 }
0x108d   : > { %10443 = vmatprep.subr.bf16.mxu0 %v15283_v18 }
0x108f   : > { %6101 = vmatmul.mubr.bf16.vlgmr.msra.gmra.mrb[84].mxu0 %v10906_v8 }
0x1090   : > { %10445 = vmatprep.mubr.msk.bf16.mxu0 %vm11307_vm15, %v15283_v18  ;;  %10444 = vmatpush3.bf16.msra.mxu0 %v6379_v15 }
0x1091   : > { %10455 = vmatprep.subr.bf16.mxu0 %v15283_v18 }
0x1162   : > { %v6102_v10 = vpop.f32.mrb[84].mxu0 }
0x1163   : > { %v6117_v20 = vmul.f32 %v6102_v10, %v6102_v10  ;;  %v6104_v21 = vpop.f32.mrb[85].mxu0  ;;  %v6109_v35 = vsel %vm4060_vm5, %v6102_v10, 0.0 }
0x1164   : > { %6110 = vadd.xlane.f32.xlu0 %v6109_v35  ;;  %v6105_v22 = vpop.f32.mrb[86].mxu0 }
0x1165   : > { %v6118_v14 = vmul.f32 %v6105_v22, %v6105_v22  ;;  %v6107_v62 = vpop.f32.mrb[87].mxu0  ;;  %v6112_v7 = vsel %vm4060_vm5, %v6105_v22, 0.0  ;;  %v6119_v57 = vsel %vm4060_vm5, %v6117_v20, 0.0 }
0x1166   : > { %6113 = vadd.xlane.f32.xlu1 %v6112_v7 }
0x1167   : > { %v6122_v23 = vsel %vm4060_vm5, %v6118_v14, 0.0 }
0x1168   : > { %6120 = vadd.xlane.f32.xlu0 %v6119_v57 }
0x116a   : > { %6123 = vadd.xlane.f32.xlu1 %v6122_v23 }
0x11f1   : > { %v6111_v0 = vpop.xlane.xlu0 %6110 }
0x11f2   : > { %v6115_v44 = vmul.f32 0.25, %v6111_v0 }
0x11f3   : > { %v6114_v61 = vpop.xlane.xlu1 %6113 }
0x11f4   : > { %v6116_v2 = vmul.f32 0.25, %v6114_v61  ;;  %v6127_v60 = vmul.f32 %v6115_v44, %v6115_v44  ;;  %v6131_v35 = vsub.f32 %v6102_v10, %v6115_v44  ;;  %v6195_v61 = vsel %vm1164_vm12, %v9674_v48, 0 }
0x11f5   : > { %v6121_v32 = vpop.xlane.xlu0 %6120  ;;  %v6471_v10 = vsel %vm1164_vm12, %v9686_v29, 0 }
0x11f6   : > { %v6125_v31 = vmul.f32 0.25, %v6121_v32  ;;  %v6128_v4 = vmul.f32 %v6116_v2, %v6116_v2  ;;  %v6132_v62 = vsub.f32 %v6105_v22, %v6116_v2  ;;  %v9676_v22 = vld [vmem:[%s15289_s0 + $0x4] sm:$0x3]  ;;  %v9678_v2 = vld [vmem:[%s15289_s0 + $0x6] sm:$0x3] }
0x11f7   : > { %v6124_v17 = vpop.xlane.xlu1 %6123  ;;  %v6241_v44 = vsel %vm1164_vm12, %v9676_v22, 0  ;;  %v6287_v32 = vsel %vm1164_vm12, %v9678_v2, 0 }
0x11f8   : > { %v6129_v36 = vsub.f32 %v6125_v31, %v6127_v60  ;;  %v6126_v54 = vmul.f32 0.25, %v6124_v17  ;;  %v9680_v60 = vld [vmem:[%s15289_s0 + $0x8] sm:$0x3]  ;;  %v9684_v17 = vld [vmem:[%s15289_s0 + $0xc] sm:$0x3] }
0x11f9   : > { %v6333_v31 = vsel %vm1164_vm12, %v9680_v60, 0 }
0x11fa   : > { %v6133_v39 = vmax.f32 %v6129_v36, 0.0  ;;  %v6130_v9 = vsub.f32 %v6126_v54, %v6128_v4  ;;  %v6425_v4 = vsel %vm1164_vm12, %v9684_v17, 0  ;;  %v9688_v36 = vld [vmem:[%s15289_s0 + $0x10] sm:$0x3] }
0x11fb   : > { %v6517_v54 = vsel %vm1164_vm12, %v9688_v36, 0 }
0x11fc   : > { %v6135_v8 = vadd.f32 1e-05, %v6133_v39  ;;  %v6134_v20 = vmax.f32 %v6130_v9, 0.0  ;;  %v10907_v39 = vld [vmem:[%s15290_s4] sm:$0xff]   ;;  %v10908_v9 = vld [vmem:[#allocation7 + $0x4] ss:$8 sps:$4 sm:$0xff]  }
0x11fd   : > { %s15301_s4 = smov 111  }
0x11fe   : > { %10958 = vrsqrt.f32 %v6135_v8  ;;  %v6136_v21 = vadd.f32 1e-05, %v6134_v20 }
0x1200   : > { %10960 = vrsqrt.f32 %v6136_v21 }
0x1208   : > { %v10959_v14 = vpop.eup %10958 }
0x1209   : > { %v6139_v7 = vmul.f32 %v10959_v14, %v6131_v35 }
0x120a   : > { %v10961_v57 = vpop.eup %10960 }
0x120b   : > { %v6140_v23 = vmul.f32 %v10961_v57, %v6132_v62  ;;  %v6141_v43 = vmax.f32 %v6139_v7, 0.0 }
0x120d   : > { %v6142_v15 = vmax.f32 %v6140_v23, 0.0 }
0x120f   : > { %v6143_v0 = vpack.c.bf16 %v6142_v15, %v6141_v43 }
0x1211   : > { %10416 = vmatmul.mubr.msk.bf16.vlgmr.msra.gmra.mrb[104].mxu1 %vm4060_vm5, %v6143_v0  ;;  %10446 = vmatmul.mubr.msk.bf16.vlgmr.msra.gmra.mrb[88].mxu0 %vm4060_vm5, %v6143_v0 }
0x1212   : > { %10420 = vmatpush3.bf16.msra.mxu1 %v6195_v61  ;;  %10456 = vmatpush3.bf16.msra.mxu0 %v6471_v10 }
0x1213   : > { %10421 = vmatprep.mubr.msk.bf16.mxu1 %vm11307_vm15, %v15283_v18  ;;  %10457 = vmatprep.mubr.msk.bf16.mxu0 %vm11307_vm15, %v15283_v18 }
0x1214   : > { %10425 = vmatprep.subr.bf16.mxu1 %v15283_v18  ;;  %6583 = vmatprep.subr.bf16.mxu0 %v15209_v49 }
0x1219   : > { %10422 = vmatmul.mubr.msk.bf16.vlgmr.msra.gmra.mrb[108].mxu1 %vm4060_vm5, %v6143_v0  ;;  %10458 = vmatmul.mubr.msk.bf16.vlgmr.msra.gmra.mrb[92].mxu0 %vm4060_vm5, %v6143_v0 }
0x121a   : > { %10426 = vmatpush3.bf16.msra.mxu1 %v6241_v44  ;;  %10427 = vmatprep.mubr.msk.bf16.mxu1 %vm11307_vm15, %v15283_v18 }
0x121b   : > { %10431 = vmatprep.subr.bf16.mxu1 %v15283_v18  ;;  %9692 = vmatprep.mubr.msk.bf16.mxu0 %vm4844_vm8, %v10908_v9 }
0x1221   : > { %10428 = vmatmul.mubr.msk.bf16.vlgmr.msra.gmra.mrb[112].mxu1 %vm4060_vm5, %v6143_v0 }
0x1222   : > { %10432 = vmatpush3.bf16.msra.mxu1 %v6287_v32  ;;  %10433 = vmatprep.mubr.msk.bf16.mxu1 %vm11307_vm15, %v15283_v18 }
0x1223   : > { %10437 = vmatprep.subr.bf16.mxu1 %v15283_v18 }
0x1229   : > { %10434 = vmatmul.mubr.msk.bf16.vlgmr.msra.gmra.mrb[116].mxu1 %vm4060_vm5, %v6143_v0 }
0x122a   : > { %10438 = vmatpush3.bf16.msra.mxu1 %v6333_v31  ;;  %10439 = vmatprep.mubr.msk.bf16.mxu1 %vm11307_vm15, %v15283_v18 }
0x122b   : > { %10449 = vmatprep.subr.bf16.mxu1 %v15283_v18 }
0x1231   : > { %10440 = vmatmul.mubr.msk.bf16.vlgmr.msra.gmra.mrb[120].mxu1 %vm4060_vm5, %v6143_v0 }
0x1232   : > { %10450 = vmatpush3.bf16.msra.mxu1 %v6425_v4  ;;  %10451 = vmatprep.mubr.msk.bf16.mxu1 %vm11307_vm15, %v15283_v18 }
0x1233   : > { %10461 = vmatprep.subr.bf16.mxu1 %v15283_v18 }
0x1239   : > { %10452 = vmatmul.mubr.msk.bf16.vlgmr.msra.gmra.mrb[124].mxu1 %vm4060_vm5, %v6143_v0 }
0x123a   : > { %10462 = vmatpush3.bf16.msra.mxu1 %v6517_v54  ;;  %10463 = vmatprep.mubr.msk.bf16.mxu1 %vm11307_vm15, %v15283_v18 }
0x123b   : > { %10467 = vmatprep.subr.bf16.mxu1 %v15283_v18 }
0x1241   : > { %10464 = vmatmul.mubr.msk.bf16.vlgmr.msra.gmra.mrb[128].mxu1 %vm4060_vm5, %v6143_v0 }
0x1242   : > { %10468 = vmatpush3.bf16.msra.mxu1 %v10907_v39  ;;  %10469 = vmatprep.mubr.msk.bf16.mxu1 %vm11307_vm15, %v15283_v18 }
0x1243   : > { %10473 = vmatprep.subr.bf16.mxu1 %v15283_v18 }
0x1249   : > { %10470 = vmatmul.mubr.msk.bf16.vlgmr.msra.gmra.mrb[132].mxu1 %vm4844_vm8, %v13749_v26 }
0x124a   : > { %10475 = vmatprep.mubr.msk.bf16.mxu1 %vm11307_vm15, %v15283_v18 }
0x12e4   : > { %v6185_v8 = vpop.f32.mrb[104].mxu1  ;;  %v6415_v20 = vpop.f32.mrb[88].mxu0 }
0x12e5   : > { %v10417_v21 = vpop.f32.mrb[105].mxu1  ;;  %v10447_v35 = vpop.f32.mrb[89].mxu0 }
0x12e6   : > { %v6188_v14 = vpop.f32.mrb[106].mxu1  ;;  %v6418_v62 = vpop.f32.mrb[90].mxu0 }
0x12e7   : > { %v6560_v7 = vpack.c.bf16 %v6188_v14, %v6185_v8  ;;  %v6565_v57 = vpack.c.bf16 %v6418_v62, %v6415_v20  ;;  %v10418_v23 = vpop.f32.mrb[107].mxu1  ;;  %v10448_v48 = vpop.f32.mrb[91].mxu0 }
0x12e9   : > { %6584 = vmatpush1.bf16.msra.mxu0 %v6560_v7 }
0x12ea   : > { %6585 = vmatprep.subr.bf16.mxu0 %v15209_v49 }
0x12ec   : > { %v6231_v26 = vpop.f32.mrb[108].mxu1  ;;  %v6507_v29 = vpop.f32.mrb[92].mxu0 }
0x12ed   : > { %v10423_v43 = vpop.f32.mrb[109].mxu1  ;;  %v10459_v15 = vpop.f32.mrb[93].mxu0 }
0x12ee   : > { %v6234_v0 = vpop.f32.mrb[110].mxu1  ;;  %v6510_v61 = vpop.f32.mrb[94].mxu0 }
0x12ef   : > { %v6561_v10 = vpack.c.bf16 %v6234_v0, %v6231_v26  ;;  %v6567_v22 = vpack.c.bf16 %v6510_v61, %v6507_v29  ;;  %v10424_v44 = vpop.f32.mrb[111].mxu1  ;;  %v10460_v2 = vpop.f32.mrb[95].mxu0 }
0x12f0   : > { %v10910_v44 = vld [vmem:[#allocation7] ss:$8 sps:$4 sm:$0xff]  }
0x12f1   : > { %6586 = vmatpush1.bf16.msra.mxu0 %v6561_v10 }
0x12f2   : > { %6587 = vmatprep.subr.bf16.mxu0 %v15209_v49 }
0x12f4   : > { %v6277_v32 = vpop.f32.mrb[112].mxu1 }
0x12f5   : > { %v10429_v60 = vpop.f32.mrb[113].mxu1 }
0x12f6   : > { %v6280_v31 = vpop.f32.mrb[114].mxu1 }
0x12f7   : > { %v6562_v17 = vpack.c.bf16 %v6280_v31, %v6277_v32  ;;  %v10430_v4 = vpop.f32.mrb[115].mxu1 }
0x12f9   : > { %6588 = vmatpush1.bf16.msra.mxu0 %v6562_v17  ;;  %v10911_v17 = vld [vmem:[#allocation9] sm:$0xff]  }
0x12fa   : > { %6589 = vmatprep.subr.bf16.mxu0 %v15209_v49 }
0x12fc   : > { %v6323_v36 = vpop.f32.mrb[116].mxu1 }
0x12fd   : > { %v10435_v54 = vpop.f32.mrb[117].mxu1 }
0x12fe   : > { %v6326_v39 = vpop.f32.mrb[118].mxu1 }
0x12ff   : > { %v6563_v9 = vpack.c.bf16 %v6326_v39, %v6323_v36  ;;  %v10436_v8 = vpop.f32.mrb[119].mxu1 }
0x1301   : > { %6590 = vmatpush1.bf16.msra.mxu0 %v6563_v9 }
0x1302   : > { %6591 = vmatprep.subr.bf16.mxu0 %v15209_v49 }
0x1304   : > { %v6369_v20 = vpop.f32.mrb[120].mxu1 }
0x1305   : > { %v10441_v21 = vpop.f32.mrb[121].mxu1 }
0x1306   : > { %v6372_v35 = vpop.f32.mrb[122].mxu1 }
0x1307   : > { %v6564_v14 = vpack.c.bf16 %v6372_v35, %v6369_v20  ;;  %v10442_v62 = vpop.f32.mrb[123].mxu1 }
0x1309   : > { %6592 = vmatpush1.bf16.msra.mxu0 %v6564_v14 }
0x130a   : > { %6593 = vmatprep.subr.bf16.mxu0 %v15209_v49 }
0x130c   : > { %v6461_v7 = vpop.f32.mrb[124].mxu1 }
0x130d   : > { %v10453_v23 = vpop.f32.mrb[125].mxu1  ;;  %6594 = vmatpush1.bf16.msra.mxu0 %v6565_v57 }
0x130e   : > { %v6464_v48 = vpop.f32.mrb[126].mxu1  ;;  %6595 = vmatprep.subr.bf16.mxu0 %v15209_v49 }
0x130f   : > { %v6566_v26 = vpack.c.bf16 %v6464_v48, %v6461_v7  ;;  %v10454_v29 = vpop.f32.mrb[127].mxu1 }
0x1311   : > { %6596 = vmatpush1.bf16.msra.mxu0 %v6566_v26 }
0x1312   : > { %6597 = vmatprep.subr.bf16.mxu0 %v15209_v49 }
0x1314   : > { %v6553_v43 = vpop.f32.mrb[128].mxu1 }
0x1315   : > { %v10465_v15 = vpop.f32.mrb[129].mxu1  ;;  %6598 = vmatpush1.bf16.msra.mxu0 %v6567_v22 }
0x1316   : > { %v6556_v0 = vpop.f32.mrb[130].mxu1  ;;  %6599 = vmatprep.subr.bf16.mxu0 %v15209_v49 }
0x1317   : > { %v6568_v61 = vpack.c.bf16 %v6556_v0, %v6553_v43  ;;  %v10466_v10 = vpop.f32.mrb[131].mxu1 }
0x1318   : > { %v9700_v10 = vld [vmem:[%s15291_s12 + $0x4] sm:$0x3] }
0x1319   : > { %6600 = vmatpush1.bf16.msra.mxu0 %v6568_v61  ;;  %v6794_v61 = vld [vmem:[%s15291_s12] sm:$0x3] }
0x131a   : > { %10491 = vmatprep.subr.bf16.mxu0 %v15283_v18 }
0x131c   : > { %6616 = vmatmul.mubr.bf16.vlgmr.msra.gmra.mrb[96].mxu0 %v10910_v44  ;;  %v6698_v57 = vpop.f32.mrb[132].mxu1  ;;  %v6799_v44 = vsel %vm1164_vm12, %v6794_v61, 0 }
0x131d   : > { %v10471_v2 = vpop.f32.mrb[133].mxu1  ;;  %10493 = vmatprep.mubr.msk.bf16.mxu0 %vm11307_vm15, %v15283_v18 }
0x131e   : > { %v6701_v32 = vpop.f32.mrb[134].mxu1 }
0x131f   : > { %v6705_v60 = vpack.c.bf16 %v6701_v32, %v6698_v57  ;;  %v10472_v31 = vpop.f32.mrb[135].mxu1  ;;  %v6891_v57 = vsel %vm1164_vm12, %v9700_v10, 0 }
0x1320   : > { %10492 = vmatpush3.bf16.msra.mxu0 %v6891_v57 }
0x1321   : > { %10474 = vmatpush3.bf16.msra.mxu1 %v6705_v60  ;;  %10503 = vmatprep.subr.bf16.mxu0 %v15283_v18 }
0x1322   : > { %10479 = vmatprep.subr.bf16.mxu1 %v15283_v18 }
0x1324   : > { %10476 = vmatmul.mubr.msk.bf16.vlgmr.msra.gmra.mrb[136].mxu1 %vm4844_vm8, %v10911_v17 }
0x1325   : > { %10481 = vmatprep.mubr.msk.bf16.mxu1 %vm11307_vm15, %v15283_v18  ;;  %10480 = vmatpush3.bf16.msra.mxu1 %v6799_v44 }
0x1326   : > { %10485 = vmatprep.subr.bf16.mxu1 %v15283_v18 }
0x13ef   : > { %v13923_v22 = vpop.f32.mrb[96].mxu0 }
0x13f0   : > { %v6632_v4 = vmul.f32 %v13923_v22, %v13923_v22  ;;  %v6619_v36 = vpop.f32.mrb[97].mxu0  ;;  %v6624_v54 = vsel %vm4060_vm5, %v13923_v22, 0.0 }
0x13f1   : > { %6625 = vadd.xlane.f32.xlu0 %v6624_v54  ;;  %v13929_v39 = vpop.f32.mrb[98].mxu0 }
0x13f2   : > { %v6633_v9 = vmul.f32 %v13929_v39, %v13929_v39  ;;  %v6622_v8 = vpop.f32.mrb[99].mxu0  ;;  %v6627_v20 = vsel %vm4060_vm5, %v13929_v39, 0.0  ;;  %v6634_v21 = vsel %vm4060_vm5, %v6632_v4, 0.0 }
0x13f3   : > { %6628 = vadd.xlane.f32.xlu1 %v6627_v20 }
0x13f4   : > { %v6637_v35 = vsel %vm4060_vm5, %v6633_v9, 0.0 }
0x13f5   : > { %6635 = vadd.xlane.f32.xlu0 %v6634_v21 }
0x13f7   : > { %v13937_v14 = vpop.f32.mrb[136].mxu1  ;;  %6638 = vadd.xlane.f32.xlu1 %v6637_v35 }
0x13f8   : > { %v6765_v62 = vmul.f32 %v13937_v14, %v13937_v14  ;;  %v10477_v7 = vpop.f32.mrb[137].mxu1  ;;  %v6757_v23 = vsel %vm4060_vm5, %v13937_v14, 0.0 }
0x13f9   : > { %v13943_v48 = vpop.f32.mrb[138].mxu1  ;;  %6758 = vadd.xlane.f32.xlu0 %v6757_v23 }
0x13fa   : > { %v6766_v26 = vmul.f32 %v13943_v48, %v13943_v48  ;;  %v10478_v29 = vpop.f32.mrb[139].mxu1  ;;  %v6760_v43 = vsel %vm4060_vm5, %v13943_v48, 0.0  ;;  %v6767_v15 = vsel %vm4060_vm5, %v6765_v62, 0.0 }
0x13fb   : > { %6761 = vadd.xlane.f32.xlu1 %v6760_v43 }
0x13fc   : > { %v6770_v0 = vsel %vm4060_vm5, %v6766_v26, 0.0 }
0x13fd   : > { %6768 = vadd.xlane.f32.xlu0 %v6767_v15 }
0x13ff   : > { %6771 = vadd.xlane.f32.xlu1 %v6770_v0 }
0x147e   : > { %v6626_v2 = vpop.xlane.xlu0 %6625 }
0x147f   : > { %v6630_v32 = vmul.f32 0.25, %v6626_v2 }
0x1480   : > { %v6629_v60 = vpop.xlane.xlu1 %6628 }
0x1481   : > { %v6631_v31 = vmul.f32 0.25, %v6629_v60  ;;  %v6642_v4 = vmul.f32 %v6630_v32, %v6630_v32 }
0x1482   : > { %v6636_v17 = vpop.xlane.xlu0 %6635 }
0x1483   : > { %v6640_v36 = vmul.f32 0.25, %v6636_v17  ;;  %v6643_v9 = vmul.f32 %v6631_v31, %v6631_v31 }
0x1484   : > { %v6639_v54 = vpop.xlane.xlu1 %6638 }
0x1485   : > { %v6644_v8 = vsub.f32 %v6640_v36, %v6642_v4  ;;  %v6641_v20 = vmul.f32 0.25, %v6639_v54 }
0x1486   : > { %v6759_v21 = vpop.xlane.xlu0 %6758 }
0x1487   : > { %v6645_v35 = vsub.f32 %v6641_v20, %v6643_v9  ;;  %v6763_v62 = vmul.f32 0.25, %v6759_v21  ;;  %v6648_v23 = vmax.f32 %v6644_v8, 0.0  ;;  %v6646_v20 = vsub.f32 %v13923_v22, %v6630_v32  ;;  %v9704_v22 = vld [vmem:[%s15291_s12 + $0x8] sm:$0x3] }
0x1488   : > { %v6762_v7 = vpop.xlane.xlu1 %6761 }
0x1489   : > { %v6649_v26 = vmax.f32 %v6645_v35, 0.0  ;;  %v6764_v29 = vmul.f32 0.25, %v6762_v7  ;;  %v6775_v15 = vmul.f32 %v6763_v62, %v6763_v62  ;;  %v6650_v10 = vadd.f32 1e-05, %v6648_v23 }
0x148a   : > { %v6769_v43 = vpop.xlane.xlu0 %6768  ;;  %v6779_v21 = vsub.f32 %v13937_v14, %v6763_v62  ;;  %v6647_v7 = vsub.f32 %v13929_v39, %v6631_v31  ;;  %v9702_v62 = vld [vmem:[%s15291_s12 + $0x6] sm:$0x3] }
0x148b   : > { %v6773_v0 = vmul.f32 0.25, %v6769_v43  ;;  %v6776_v44 = vmul.f32 %v6764_v29, %v6764_v29  ;;  %v6651_v60 = vadd.f32 1e-05, %v6649_v26  ;;  %10962 = vrsqrt.f32 %v6650_v10 }
0x148c   : > { %v6772_v61 = vpop.xlane.xlu1 %6771  ;;  %v6780_v26 = vsub.f32 %v13943_v48, %v6764_v29  ;;  %v6983_v48 = vsel %vm1164_vm12, %v9704_v22, 0  ;;  %v9708_v29 = vld [vmem:[%s15291_s12 + $0xc] sm:$0x3] }
0x148d   : > { %v6777_v57 = vsub.f32 %v6773_v0, %v6775_v15  ;;  %v6774_v2 = vmul.f32 0.25, %v6772_v61  ;;  %10964 = vrsqrt.f32 %v6651_v60  ;;  %v9706_v60 = vld [vmem:[%s15291_s12 + $0xa] sm:$0x3] }
0x148f   : > { %v6781_v17 = vmax.f32 %v6777_v57, 0.0  ;;  %v6778_v42 = vsub.f32 %v6774_v2, %v6776_v44  ;;  %v9698_v44 = vld [vmem:[%s15291_s12 + $0x2] sm:$0x3]  ;;  %v6937_v57 = vsel %vm1164_vm12, %v9702_v62, 0  ;;  %v7075_v2 = vsel %vm1164_vm12, %v9708_v29, 0 }
0x1490   : > { %v6845_v31 = vsel %vm1164_vm12, %v9698_v44, 0 }
0x1491   : > { %v6783_v4 = vadd.f32 1e-05, %v6781_v17  ;;  %v6782_v36 = vmax.f32 %v6778_v42, 0.0  ;;  %v9712_v17 = vld [vmem:[%s15291_s12 + $0x10] sm:$0x3] }
0x1493   : > { %10966 = vrsqrt.f32 %v6783_v4  ;;  %v6784_v54 = vadd.f32 1e-05, %v6782_v36  ;;  %v7029_v4 = vsel %vm1164_vm12, %v9706_v60, 0  ;;  %v7167_v36 = vsel %vm1164_vm12, %v9712_v17, 0 }
0x1495   : > { %10968 = vrsqrt.f32 %v6784_v54  ;;  %v10963_v9 = vpop.eup %10962  ;;  %v9710_v54 = vld [vmem:[%s15291_s12 + $0xe] sm:$0x3] }
0x1496   : > { %v6654_v23 = vmul.f32 %v10963_v9, %v6646_v20  ;;  %v7121_v9 = vsel %vm1164_vm12, %v9710_v54, 0  ;;  %vm15304_vm12 = vcmp.lt.s32.totalorder %v11815_v6, 1 }
0x1497   : > { %v10965_v8 = vpop.eup %10964 }
0x1498   : > { %v6655_v0 = vmul.f32 %v10965_v8, %v6647_v7  ;;  %v10912_v8 = vld [vmem:[#allocation10 + $0x4] ss:$8 sps:$4 sm:$0xff]  }
0x149d   : > { %v10967_v35 = vpop.eup %10966 }
0x149e   : > { %v6787_v43 = vmul.f32 %v10967_v35, %v6779_v21 }
0x149f   : > { %v10969_v15 = vpop.eup %10968 }
0x14a0   : > { %v6789_v42 = vadd.f32 %v6787_v43, %v6654_v23  ;;  %v6788_v61 = vmul.f32 %v10969_v15, %v6780_v26 }
0x14a2   : > { %v6790_v10 = vadd.f32 %v6788_v61, %v6655_v0  ;;  %v6791_v14 = vmax.f32 %v6789_v42, 0.0 }
0x14a4   : > { %v6792_v32 = vmax.f32 %v6790_v10, 0.0 }
0x14a6   : > { %v6793_v39 = vpack.c.bf16 %v6792_v32, %v6791_v14 }
0x14a8   : > { %10482 = vmatmul.mubr.msk.bf16.vlgmr.msra.gmra.mrb[140].mxu1 %vm4060_vm5, %v6793_v39  ;;  %10494 = vmatmul.mubr.msk.bf16.vlgmr.msra.gmra.mrb[100].mxu0 %vm4060_vm5, %v6793_v39 }
0x14a9   : > { %10486 = vmatpush3.bf16.msra.mxu1 %v6845_v31  ;;  %10504 = vmatpush3.bf16.msra.mxu0 %v6983_v48 }
0x14aa   : > { %10487 = vmatprep.mubr.msk.bf16.mxu1 %vm11307_vm15, %v15283_v18  ;;  %10505 = vmatprep.mubr.msk.bf16.mxu0 %vm11307_vm15, %v15283_v18 }
0x14ab   : > { %10497 = vmatprep.subr.bf16.mxu1 %v15283_v18  ;;  %10515 = vmatprep.subr.bf16.mxu0 %v15283_v18 }
0x14b0   : > { %10488 = vmatmul.mubr.msk.bf16.vlgmr.msra.gmra.mrb[144].mxu1 %vm4060_vm5, %v6793_v39  ;;  %10506 = vmatmul.mubr.msk.bf16.vlgmr.msra.gmra.mrb[104].mxu0 %vm4060_vm5, %v6793_v39 }
0x14b1   : > { %10498 = vmatpush3.bf16.msra.mxu1 %v6937_v57  ;;  %10516 = vmatpush3.bf16.msra.mxu0 %v7075_v2 }
0x14b2   : > { %10499 = vmatprep.mubr.msk.bf16.mxu1 %vm11307_vm15, %v15283_v18  ;;  %10517 = vmatprep.mubr.msk.bf16.mxu0 %vm11307_vm15, %v15283_v18 }
0x14b3   : > { %10509 = vmatprep.subr.bf16.mxu1 %v15283_v18  ;;  %10527 = vmatprep.subr.bf16.mxu0 %v15283_v18 }
0x14b8   : > { %10500 = vmatmul.mubr.msk.bf16.vlgmr.msra.gmra.mrb[148].mxu1 %vm4060_vm5, %v6793_v39  ;;  %10518 = vmatmul.mubr.msk.bf16.vlgmr.msra.gmra.mrb[108].mxu0 %vm4060_vm5, %v6793_v39 }
0x14b9   : > { %10510 = vmatpush3.bf16.msra.mxu1 %v7029_v4  ;;  %10528 = vmatpush3.bf16.msra.mxu0 %v7167_v36 }
0x14ba   : > { %10511 = vmatprep.mubr.msk.bf16.mxu1 %vm11307_vm15, %v15283_v18  ;;  %10529 = vmatprep.mubr.msk.bf16.mxu0 %vm11307_vm15, %v15283_v18 }
0x14bb   : > { %10521 = vmatprep.subr.bf16.mxu1 %v15283_v18  ;;  %10533 = vmatprep.subr.bf16.mxu0 %v15283_v18 }
0x14c0   : > { %10512 = vmatmul.mubr.msk.bf16.vlgmr.msra.gmra.mrb[152].mxu1 %vm4060_vm5, %v6793_v39  ;;  %10530 = vmatmul.mubr.msk.bf16.vlgmr.msra.gmra.mrb[112].mxu0 %vm4060_vm5, %v6793_v39 }
0x14c1   : > { %10522 = vmatpush3.bf16.msra.mxu1 %v7121_v9  ;;  %10523 = vmatprep.mubr.msk.bf16.mxu1 %vm11307_vm15, %v15283_v18 }
0x14c2   : > { %7233 = vmatprep.subr.bf16.mxu1 %v15209_v49  ;;  %10535 = vmatprep.mubr.msk.bf16.mxu0 %vm11307_vm15, %v15283_v18 }
0x14c8   : > { %10524 = vmatmul.mubr.msk.bf16.vlgmr.msra.gmra.mrb[156].mxu1 %vm4060_vm5, %v6793_v39  ;;  %vm15305_vm5 = vcmp.lt.s32.totalorder %v11815_v6, 17 }
0x14c9   : > { %9716 = vmatprep.mubr.msk.bf16.mxu1 %vm4844_vm8, %v10912_v8 }
0x157b   : > { %v6835_v20 = vpop.f32.mrb[140].mxu1  ;;  %v6927_v21 = vpop.f32.mrb[100].mxu0 }
0x157c   : > { %v10483_v35 = vpop.f32.mrb[141].mxu1  ;;  %v10495_v7 = vpop.f32.mrb[101].mxu0 }
0x157d   : > { %v6838_v23 = vpop.f32.mrb[142].mxu1  ;;  %v6930_v26 = vpop.f32.mrb[102].mxu0 }
0x157e   : > { %v7210_v43 = vpack.c.bf16 %v6838_v23, %v6835_v20  ;;  %v7212_v15 = vpack.c.bf16 %v6930_v26, %v6927_v21  ;;  %v10484_v0 = vpop.f32.mrb[143].mxu1  ;;  %v10496_v42 = vpop.f32.mrb[103].mxu0 }
0x1580   : > { %7234 = vmatpush1.bf16.msra.mxu1 %v7210_v43 }
0x1581   : > { %7235 = vmatprep.subr.bf16.mxu1 %v15209_v49 }
0x1583   : > { %v6881_v61 = vpop.f32.mrb[144].mxu1  ;;  %v7019_v10 = vpop.f32.mrb[104].mxu0 }
0x1584   : > { %v10489_v44 = vpop.f32.mrb[145].mxu1  ;;  %v10507_v22 = vpop.f32.mrb[105].mxu0 }
0x1585   : > { %v6884_v14 = vpop.f32.mrb[146].mxu1  ;;  %v7022_v32 = vpop.f32.mrb[106].mxu0 }
0x1586   : > { %v7211_v39 = vpack.c.bf16 %v6884_v14, %v6881_v61  ;;  %v7214_v31 = vpack.c.bf16 %v7022_v32, %v7019_v10  ;;  %v10490_v48 = vpop.f32.mrb[147].mxu1  ;;  %v10508_v62 = vpop.f32.mrb[107].mxu0  ;;  %v10914_v32 = vld [vmem:[#allocation10] ss:$8 sps:$4 sm:$0xff]  }
0x1588   : > { %7236 = vmatpush1.bf16.msra.mxu1 %v7211_v39 }
0x1589   : > { %7237 = vmatprep.subr.bf16.mxu1 %v15209_v49 }
0x158b   : > { %v6973_v29 = vpop.f32.mrb[148].mxu1  ;;  %v7111_v57 = vpop.f32.mrb[108].mxu0 }
0x158c   : > { %v10501_v2 = vpop.f32.mrb[149].mxu1  ;;  %v10519_v60 = vpop.f32.mrb[109].mxu0  ;;  %7238 = vmatpush1.bf16.msra.mxu1 %v7212_v15 }
0x158d   : > { %v6976_v17 = vpop.f32.mrb[150].mxu1  ;;  %v7114_v4 = vpop.f32.mrb[110].mxu0  ;;  %7239 = vmatprep.subr.bf16.mxu1 %v15209_v49 }
0x158e   : > { %v7213_v36 = vpack.c.bf16 %v6976_v17, %v6973_v29  ;;  %v7216_v54 = vpack.c.bf16 %v7114_v4, %v7111_v57  ;;  %v10502_v9 = vpop.f32.mrb[151].mxu1  ;;  %v10520_v8 = vpop.f32.mrb[111].mxu0 }
0x1590   : > { %7240 = vmatpush1.bf16.msra.mxu1 %v7213_v36  ;;  %v10915_v36 = vld [vmem:[%s15292_s10] sm:$0xff]  }
0x1591   : > { %7241 = vmatprep.subr.bf16.mxu1 %v15209_v49  ;;  %10534 = vmatpush3.bf16.msra.mxu0 %v10915_v36 }
0x1592   : > { %10539 = vmatprep.subr.bf16.mxu0 %v15283_v18 }
0x1593   : > { %v7065_v20 = vpop.f32.mrb[152].mxu1  ;;  %v7203_v21 = vpop.f32.mrb[112].mxu0 }
0x1594   : > { %v10513_v35 = vpop.f32.mrb[153].mxu1  ;;  %v10531_v7 = vpop.f32.mrb[113].mxu0  ;;  %7242 = vmatpush1.bf16.msra.mxu1 %v7214_v31 }
0x1595   : > { %v7068_v23 = vpop.f32.mrb[154].mxu1  ;;  %v7206_v26 = vpop.f32.mrb[114].mxu0  ;;  %7243 = vmatprep.subr.bf16.mxu1 %v15209_v49 }
0x1596   : > { %v7215_v43 = vpack.c.bf16 %v7068_v23, %v7065_v20  ;;  %v7218_v15 = vpack.c.bf16 %v7206_v26, %v7203_v21  ;;  %v10514_v0 = vpop.f32.mrb[155].mxu1  ;;  %v10532_v42 = vpop.f32.mrb[115].mxu0 }
0x1598   : > { %7244 = vmatpush1.bf16.msra.mxu1 %v7215_v43 }
0x1599   : > { %7245 = vmatprep.subr.bf16.mxu1 %v15209_v49 }
0x159b   : > { %v7157_v61 = vpop.f32.mrb[156].mxu1 }
0x159c   : > { %v10525_v10 = vpop.f32.mrb[157].mxu1  ;;  %7246 = vmatpush1.bf16.msra.mxu1 %v7216_v54  ;;  %v10916_v54 = vld [vmem:[%s15292_s10 + $0x20] sm:$0xff]  }
0x159d   : > { %v7160_v44 = vpop.f32.mrb[158].mxu1  ;;  %7247 = vmatprep.subr.bf16.mxu1 %v15209_v49 }
0x159e   : > { %v7217_v22 = vpack.c.bf16 %v7160_v44, %v7157_v61  ;;  %v10526_v14 = vpop.f32.mrb[159].mxu1 }
0x15a0   : > { %7248 = vmatpush1.bf16.msra.mxu1 %v7217_v22 }
0x15a1   : > { %7249 = vmatprep.subr.bf16.mxu1 %v15209_v49 }
0x15a4   : > { %7250 = vmatpush1.bf16.msra.mxu1 %v7218_v15 }
0x15a5   : > { %10557 = vmatprep.subr.bf16.mxu1 %v15283_v18 }
0x15a7   : > { %7266 = vmatmul.mubr.bf16.vlgmr.msra.gmra.mrb[160].mxu1 %v10914_v32 }
0x15a8   : > { %10559 = vmatprep.mubr.msk.bf16.mxu1 %vm11307_vm15, %v15283_v18  ;;  %10558 = vmatpush3.bf16.msra.mxu1 %v10916_v54  ;;  %v10917_v54 = vld [vmem:[%s15292_s10 + $0x8] sm:$0xff]  }
0x15a9   : > { %10569 = vmatprep.subr.bf16.mxu1 %v15283_v18 }
0x167a   : > { %v7267_v39 = vpop.f32.mrb[160].mxu1 }
0x167b   : > { %v7282_v31 = vmul.f32 %v7267_v39, %v7267_v39  ;;  %v7269_v48 = vpop.f32.mrb[161].mxu1  ;;  %v7274_v62 = vsel %vm4844_vm8, %v7267_v39, 0.0 }
0x167c   : > { %7275 = vadd.xlane.f32.xlu0 %v7274_v62  ;;  %v7270_v29 = vpop.f32.mrb[162].mxu1 }
0x167d   : > { %v7283_v57 = vmul.f32 %v7270_v29, %v7270_v29  ;;  %v7272_v2 = vpop.f32.mrb[163].mxu1  ;;  %v7277_v60 = vsel %vm4844_vm8, %v7270_v29, 0.0  ;;  %v7284_v17 = vsel %vm4844_vm8, %v7282_v31, 0.0 }
0x167e   : > { %7278 = vadd.xlane.f32.xlu1 %v7277_v60  ;;  %v15293_v60 = vmax.f32 %v13735_v38, 0.0  ;;  %v10920_v38 = vld [vmem:[%s15292_s10 + $0x40] sm:$0xff]  }
0x167f   : > { %v7287_v4 = vsel %vm4844_vm8, %v7283_v57, 0.0 }
0x1680   : > { %7285 = vadd.xlane.f32.xlu0 %v7284_v17 }
0x1682   : > { %7288 = vadd.xlane.f32.xlu1 %v7287_v4 }
0x1709   : > { %v7276_v9 = vpop.xlane.xlu0 %7275 }
0x170a   : > { %v7280_v8 = vmul.f32 0.0625, %v7276_v9  ;;  %v10922_v9 = vld [vmem:[%s15292_s10 + $0x28] sm:$0xff]  }
0x170b   : > { %v7279_v20 = vpop.xlane.xlu1 %7278 }
0x170c   : > { %v7281_v21 = vmul.f32 0.0625, %v7279_v20  ;;  %v7292_v7 = vmul.f32 %v7280_v8, %v7280_v8  ;;  %v7296_v14 = vsub.f32 %v7267_v39, %v7280_v8  ;;  %v10918_v39 = vld [vmem:[%s15292_s10 + $0x30] sm:$0xff]   ;;  %v10923_v8 = vld [vmem:[%s15292_s10 + $0x38] sm:$0xff]  }
0x170d   : > { %v7286_v35 = vpop.xlane.xlu0 %7285  ;;  %v14104_v20 = vld [vmem:[#allocation12] sm:$0xff] }
0x170e   : > { %v7290_v23 = vmul.f32 0.0625, %v7286_v35  ;;  %v7293_v43 = vmul.f32 %v7281_v21, %v7281_v21  ;;  %v7297_v31 = vsub.f32 %v7270_v29, %v7281_v21  ;;  %v9752_v21 = vcombine.high %v14104_v20, %v14104_v20 }
0x170f   : > { %v7289_v26 = vpop.xlane.xlu1 %7288 }
0x1710   : > { %v7294_v15 = vsub.f32 %v7290_v23, %v7292_v7  ;;  %v7291_v0 = vmul.f32 0.0625, %v7289_v26 }
0x1712   : > { %v7298_v42 = vmax.f32 %v7294_v15, 0.0  ;;  %v7295_v61 = vsub.f32 %v7291_v0, %v7293_v43 }
0x1714   : > { %v7300_v10 = vadd.f32 1e-05, %v7298_v42  ;;  %v7299_v44 = vmax.f32 %v7295_v61, 0.0 }
0x1716   : > { %10970 = vrsqrt.f32 %v7300_v10  ;;  %v7301_v22 = vadd.f32 1e-05, %v7299_v44 }
0x1718   : > { %10972 = vrsqrt.f32 %v7301_v22 }
0x1720   : > { %v10971_v32 = vpop.eup %10970 }
0x1721   : > { %v7304_v48 = vmul.f32 %v10971_v32, %v7296_v14 }
0x1722   : > { %v10973_v62 = vpop.eup %10972 }
0x1723   : > { %v7306_v57 = vadd.f32 %v7304_v48, %v5590_v11  ;;  %v7305_v2 = vmul.f32 %v10973_v62, %v7297_v31  ;;  %v10921_v11 = vld [vmem:[%s15292_s10 + $0x18] sm:$0xff]  }
0x1725   : > { %v7307_v17 = vadd.f32 %v7305_v2, %v15293_v60  ;;  %v7308_v4 = vmax.f32 %v7306_v57, 0.0 }
0x1727   : > { %v7309_v36 = vmax.f32 %v7307_v17, 0.0 }
0x1729   : > { %v7310_v29 = vpack.c.bf16 %v7309_v36, %v7308_v4 }
0x172b   : > { %10536 = vmatmul.mubr.msk.bf16.vlgmr.msra.gmra.mrb[116].mxu0 %vm4844_vm8, %v7310_v29  ;;  %10560 = vmatmul.mubr.msk.bf16.vlgmr.msra.gmra.mrb[164].mxu1 %vm4844_vm8, %v7310_v29 }
0x172c   : > { %10540 = vmatpush3.bf16.msra.mxu0 %v10917_v54  ;;  %10570 = vmatpush3.bf16.msra.mxu1 %v10918_v39 }
0x172d   : > { %10541 = vmatprep.mubr.msk.bf16.mxu0 %vm11307_vm15, %v15283_v18  ;;  %10571 = vmatprep.mubr.msk.bf16.mxu1 %vm11307_vm15, %v15283_v18 }
0x172e   : > { %10545 = vmatprep.subr.bf16.mxu0 %v15283_v18  ;;  %10581 = vmatprep.subr.bf16.mxu1 %v15283_v18 }
0x1733   : > { %10542 = vmatmul.mubr.msk.bf16.vlgmr.msra.gmra.mrb[120].mxu0 %vm4844_vm8, %v7310_v29  ;;  %10572 = vmatmul.mubr.msk.bf16.vlgmr.msra.gmra.mrb[168].mxu1 %vm4844_vm8, %v7310_v29 }
0x1734   : > { %10546 = vmatpush3.bf16.msra.mxu0 %v10919_v40  ;;  %10582 = vmatpush3.bf16.msra.mxu1 %v10920_v38 }
0x1735   : > { %10547 = vmatprep.mubr.msk.bf16.mxu0 %vm11307_vm15, %v15283_v18  ;;  %10583 = vmatprep.mubr.msk.bf16.mxu1 %vm11307_vm15, %v15283_v18 }
0x1736   : > { %10551 = vmatprep.subr.bf16.mxu0 %v15283_v18 }
0x173b   : > { %10548 = vmatmul.mubr.msk.bf16.vlgmr.msra.gmra.mrb[124].mxu0 %vm4844_vm8, %v7310_v29  ;;  %10584 = vmatmul.mubr.msk.bf16.vlgmr.msra.gmra.mrb[172].mxu1 %vm4844_vm8, %v7310_v29 }
0x173c   : > { %10552 = vmatpush3.bf16.msra.mxu0 %v10921_v11  ;;  %10553 = vmatprep.mubr.msk.bf16.mxu0 %vm11307_vm15, %v15283_v18 }
0x173d   : > { %10563 = vmatprep.subr.bf16.mxu0 %v15283_v18  ;;  %7924 = vmatprep.mubr.bf16.mxu1 %v15209_v49 }
0x1743   : > { %10554 = vmatmul.mubr.msk.bf16.vlgmr.msra.gmra.mrb[128].mxu0 %vm4844_vm8, %v7310_v29 }
0x1744   : > { %10564 = vmatpush3.bf16.msra.mxu0 %v10922_v9  ;;  %10565 = vmatprep.mubr.msk.bf16.mxu0 %vm11307_vm15, %v15283_v18 }
0x1745   : > { %10575 = vmatprep.subr.bf16.mxu0 %v15283_v18 }
0x174b   : > { %10566 = vmatmul.mubr.msk.bf16.vlgmr.msra.gmra.mrb[132].mxu0 %vm4844_vm8, %v7310_v29 }
0x174c   : > { %10576 = vmatpush3.bf16.msra.mxu0 %v10923_v8  ;;  %10577 = vmatprep.mubr.msk.bf16.mxu0 %vm11307_vm15, %v15283_v18  ;;  %vm15307_vm15 = vmmov %vm15304_vm12 }
0x174d   : > { %7782 = vmatprep.subr.bf16.mxu0 %v15209_v49 }
0x1753   : > { %10578 = vmatmul.mubr.msk.bf16.vlgmr.msra.gmra.mrb[136].mxu0 %vm4844_vm8, %v7310_v29 }
0x1754   : > { %9753 = vmatprep.mubr.msk.bf16.mxu0 %vm4844_vm8, %v9752_v21 }
0x17fe   : > { %v7356_v35 = vpop.f32.mrb[116].mxu0  ;;  %v7556_v7 = vpop.f32.mrb[164].mxu1 }
0x17ff   : > { %v10537_v23 = vpop.f32.mrb[117].mxu0  ;;  %v10561_v26 = vpop.f32.mrb[165].mxu1 }
0x1800   : > { %v7359_v43 = vpop.f32.mrb[118].mxu0  ;;  %v7559_v15 = vpop.f32.mrb[166].mxu1 }
0x1801   : > { %v7763_v0 = vpack.c.bf16 %v7359_v43, %v7356_v35  ;;  %v7767_v42 = vpack.c.bf16 %v7559_v15, %v7556_v7  ;;  %v10538_v18 = vpop.f32.mrb[119].mxu0  ;;  %v10562_v61 = vpop.f32.mrb[167].mxu1 }
0x1803   : > { %7783 = vmatpush1.bf16.msra.mxu0 %v7763_v0 }
0x1804   : > { %7784 = vmatprep.subr.bf16.mxu0 %v15209_v49 }
0x1806   : > { %v7406_v10 = vpop.f32.mrb[120].mxu0  ;;  %v7656_v44 = vpop.f32.mrb[168].mxu1 }
0x1807   : > { %v10543_v22 = vpop.f32.mrb[121].mxu0  ;;  %v10573_v14 = vpop.f32.mrb[169].mxu1 }
0x1808   : > { %v7409_v32 = vpop.f32.mrb[122].mxu0  ;;  %v7659_v31 = vpop.f32.mrb[170].mxu1 }
0x1809   : > { %v7764_v48 = vpack.c.bf16 %v7409_v32, %v7406_v10  ;;  %v7769_v62 = vpack.c.bf16 %v7659_v31, %v7656_v44  ;;  %v10544_v57 = vpop.f32.mrb[123].mxu0  ;;  %v10574_v2 = vpop.f32.mrb[171].mxu1 }
0x180b   : > { %7785 = vmatpush1.bf16.msra.mxu0 %v7764_v48 }
0x180c   : > { %7786 = vmatprep.subr.bf16.mxu0 %v15209_v49 }
0x180e   : > { %v7456_v60 = vpop.f32.mrb[124].mxu0  ;;  %v7756_v17 = vpop.f32.mrb[172].mxu1 }
0x180f   : > { %v10549_v4 = vpop.f32.mrb[125].mxu0  ;;  %v10585_v36 = vpop.f32.mrb[173].mxu1 }
0x1810   : > { %v7459_v54 = vpop.f32.mrb[126].mxu0  ;;  %v7759_v39 = vpop.f32.mrb[174].mxu1  ;;  %v10929_v4 = vld [vmem:[%s15295_s24 + $0x10] ss:$8 sps:$4 sm:$0xff]   ;;  %v10934_v36 = vld [vmem:[%s15295_s24 + $0x24] ss:$8 sps:$4 sm:$0xff]  }
0x1811   : > { %v7765_v29 = vpack.c.bf16 %v7459_v54, %v7456_v60  ;;  %v7771_v40 = vpack.c.bf16 %v7759_v39, %v7756_v17  ;;  %v10550_v38 = vpop.f32.mrb[127].mxu0  ;;  %v10586_v11 = vpop.f32.mrb[175].mxu1  ;;  %v10926_v60 = vld [vmem:[%s15294_s8] ss:$8 sps:$4 sm:$0xff]   ;;  %v10931_v17 = vld [vmem:[%s15295_s24 + $0x14] ss:$8 sps:$4 sm:$0xff]  }
0x1812   : > { %v10932_v54 = vld [vmem:[%s15295_s24 + $0x20] ss:$8 sps:$4 sm:$0xff]   ;;  %v10937_v39 = vld [vmem:[%s15295_s24 + $0x34] ss:$8 sps:$4 sm:$0xff]   ;;  %s15300_s8 = smov 112  }
0x1813   : > { %7787 = vmatpush1.bf16.msra.mxu0 %v7765_v29  ;;  %v10935_v29 = vld [vmem:[%s15295_s24 + $0x30] ss:$8 sps:$4 sm:$0xff]  }
0x1814   : > { %7788 = vmatprep.subr.bf16.mxu0 %v15209_v49 }
0x1816   : > { %v7506_v9 = vpop.f32.mrb[128].mxu0 }
0x1817   : > { %v10555_v8 = vpop.f32.mrb[129].mxu0 }
0x1818   : > { %v7509_v21 = vpop.f32.mrb[130].mxu0 }
0x1819   : > { %v7766_v35 = vpack.c.bf16 %v7509_v21, %v7506_v9  ;;  %v10556_v7 = vpop.f32.mrb[131].mxu0 }
0x181b   : > { %7789 = vmatpush1.bf16.msra.mxu0 %v7766_v35 }
0x181c   : > { %7790 = vmatprep.subr.bf16.mxu0 %v15209_v49 }
0x181e   : > { %v7606_v23 = vpop.f32.mrb[132].mxu0 }
0x181f   : > { %v10567_v26 = vpop.f32.mrb[133].mxu0  ;;  %7791 = vmatpush1.bf16.msra.mxu0 %v7767_v42  ;;  %v9751_v42 = vcombine.low %v14104_v20, %v14104_v20  ;;  %v10928_v20 = vld [vmem:[%s15295_s24 + $0x4] ss:$8 sps:$4 sm:$0xff]  }
0x1820   : > { %v7609_v43 = vpop.f32.mrb[134].mxu0  ;;  %7792 = vmatprep.subr.bf16.mxu0 %v15209_v49  ;;  %7892 = vmatprep.subr.bf16.mxu1 %v10928_v20 }
0x1821   : > { %v7768_v15 = vpack.c.bf16 %v7609_v43, %v7606_v23  ;;  %v10568_v0 = vpop.f32.mrb[135].mxu0  ;;  %7893 = vmatpush1.bf16.msra.mxu1 %v10926_v60 }
0x1822   : > { %7894 = vmatprep.subr.bf16.mxu1 %v10931_v17 }
0x1823   : > { %7793 = vmatpush1.bf16.msra.mxu0 %v7768_v15 }
0x1824   : > { %7794 = vmatprep.subr.bf16.mxu0 %v15209_v49 }
0x1825   : > { %7895 = vmatpush1.bf16.msra.mxu1 %v10929_v4 }
0x1826   : > { %v7706_v18 = vpop.f32.mrb[136].mxu0  ;;  %7896 = vmatprep.subr.bf16.mxu1 %v10934_v36 }
0x1827   : > { %v10579_v61 = vpop.f32.mrb[137].mxu0  ;;  %7795 = vmatpush1.bf16.msra.mxu0 %v7769_v62 }
0x1828   : > { %v7709_v10 = vpop.f32.mrb[138].mxu0  ;;  %7796 = vmatprep.subr.bf16.mxu0 %v15209_v49 }
0x1829   : > { %v7770_v44 = vpack.c.bf16 %v7709_v10, %v7706_v18  ;;  %v10580_v22 = vpop.f32.mrb[139].mxu0  ;;  %7897 = vmatpush1.bf16.msra.mxu1 %v10932_v54 }
0x182a   : > { %7898 = vmatprep.subr.bf16.mxu1 %v10937_v39 }
0x182b   : > { %7797 = vmatpush1.bf16.msra.mxu0 %v7770_v44 }
0x182c   : > { %7798 = vmatprep.subr.bf16.mxu0 %v15209_v49 }
0x182d   : > { %7899 = vmatpush1.bf16.msra.mxu1 %v10935_v29 }
0x182f   : > { %7799 = vmatpush1.bf16.msra.mxu0 %v7771_v40 }
0x1832   : > { %7815 = vmatmul.mubr.bf16.vlgmr.msra.gmra.mrb[140].mxu0 %v9751_v42 }
0x1833   : > { %8306 = vmatprep.mubr.bf16.mxu0 %v15209_v49 }
0x1905   : > { %v7816_v14 = vpop.f32.mrb[140].mxu0 }
0x1906   : > { %v7826_v32 = vmul.f32 %v7816_v14, %v7816_v14  ;;  %v7818_v31 = vpop.f32.mrb[141].mxu0  ;;  %v7822_v48 = vsel %vm3269_vm9, %v7816_v14, 0.0 }
0x1907   : > { %7823 = vadd.xlane.f32.xlu0 %v7822_v48  ;;  %v7819_v62 = vpop.f32.mrb[142].mxu0  ;;  %v14191_v48 = vld.sshfl [vmem:[#allocation13 + $0x2] sm:$0x3 pattern:$0x76325410] }
0x1908   : > { %v7820_v57 = vpop.f32.mrb[143].mxu0  ;;  %v7827_v2 = vsel %vm3269_vm9, %v7826_v32, 0.0  ;;  %v9775_v32 = vld.sshfl [vmem:[#allocation13] sm:$0x33 pattern:$0x76325410] }
0x1909   : > { %7828 = vadd.xlane.f32.xlu1 %v7827_v2  ;;  %v8744_v31 = vcombine.high %v9775_v32, %v9775_v32 }
0x1994   : > { %v7824_v40 = vpop.xlane.xlu0 %7823 }
0x1995   : > { %v7825_v38 = vmul.f32 0.015625, %v7824_v40 }
0x1996   : > { %v7829_v11 = vpop.xlane.xlu1 %7828 }
0x1997   : > { %v7831_v9 = vmul.f32 %v7825_v38, %v7825_v38  ;;  %v7830_v8 = vmul.f32 0.015625, %v7829_v11  ;;  %v7833_v23 = vsub.f32 %v7816_v14, %v7825_v38  ;;  %v9772_v14 = vld.sshfl [vmem:[#allocation13] sm:$0x3 pattern:$0x76325410] }
0x1999   : > { %v7832_v21 = vsub.f32 %v7830_v8, %v7831_v9 }
0x199b   : > { %v7834_v35 = vmax.f32 %v7832_v21, 0.0 }
0x199d   : > { %v7835_v7 = vadd.f32 1e-05, %v7834_v35 }
0x199f   : > { %10974 = vrsqrt.f32 %v7835_v7 }
0x19a9   : > { %v10975_v26 = vpop.eup %10974 }
0x19aa   : > { %v7837_v43 = vmul.f32 %v10975_v26, %v7833_v23 }
0x19ac   : > { %v7838_v15 = vadd.f32 %v7837_v43, %v13417_v24  ;;  %v14181_v24 = vld [vmem:[#allocation13] sm:$0x3] }
0x19ad   : > { %v8261_v42 = vrot.slane %v14181_v24, %v12288_v58 }
0x19ae   : > { %v7839_v0 = vmax.f32 %v7838_v15, 0.0 }
0x19b0   : > { %v7848_v18 = vpack.c.bf16 %v7839_v0, %v7839_v0 }
0x19b2   : > { %9762 = vmatmul.mubr.msk.bf16.vlgmr.msra.gmra.mrb[176].mxu1 %vm3269_vm9, %v7848_v18  ;;  %vm15306_vm9 = vmmov %vm15305_vm5 }
0x19b3   : > { %8049 = vmatprep.mubr.bf16.mxu1 %v15209_v49 }
0x1a85   : > { %v14149_v61 = vpop.f32.mrb[176].mxu1 }
0x1a86   : > { %7941 = vrot.lane.b32.xlu1 %v14149_v61, %s11258_s6  ;;  %7933 = vrot.lane.b32.xlu0 %v14149_v61, %s11257_s7  ;;  %v14155_v10 = vpop.f32.mrb[177].mxu1 }
0x1a87   : > { %v7930_v44 = vpop.f32.mrb[178].mxu1 }
0x1a88   : > { %v7931_v22 = vpop.f32.mrb[179].mxu1 }
0x1a8a   : > { %7949 = vrot.lane.b32.xlu1 %v14149_v61, %s15296_s11  ;;  %7943 = vrot.lane.b32.xlu0 %v14155_v10, %s11258_s6 }
0x1a8e   : > { %7957 = vrot.lane.b32.xlu1 %v14149_v61, %s15297_s26  ;;  %7951 = vrot.lane.b32.xlu0 %v14155_v10, %s15296_s11 }
0x1a92   : > { %7959 = vrot.lane.b32.xlu0 %v14155_v10, %s15297_s26  ;;  %7935 = vrot.lane.b32.xlu1 %v14155_v10, %s11257_s7 }
0x1a96   : > { %7967 = vrot.lane.b32.xlu0 %v14155_v10, %s15298_s3  ;;  %7965 = vrot.lane.b32.xlu1 %v14149_v61, %s15298_s3 }
0x1a9a   : > { %7975 = vrot.lane.b32.xlu0 %v14155_v10, %s15299_s2  ;;  %7973 = vrot.lane.b32.xlu1 %v14149_v61, %s15299_s2 }
0x1a9e   : > { %7983 = vrot.lane.b32.xlu0 %v14155_v10, %s15300_s8  ;;  %7981 = vrot.lane.b32.xlu1 %v14149_v61, %s15300_s8 }
0x1aa2   : > { %7991 = vrot.lane.b32.xlu0 %v14155_v10, %s15301_s4  ;;  %7989 = vrot.lane.b32.xlu1 %v14149_v61, %s15301_s4 }
0x1aa6   : > { %8262 = vrot.lane.b32.xlu1 %v8261_v42, %s11308_s29  ;;  %8458 = vrot.lane.b32.xlu0 %v9772_v14, %s11309_s28  ;;  %s15316_s28 = sld [smem:[#allocation122_spill]]  ;;  %s15320_s29 = smov 33  }
0x1aaa   : > { %8597 = vrot.lane.b32.xlu1 %v9772_v14, %s15302_s13  ;;  %8745 = vrot.lane.b32.xlu0 %v9775_v32, %s11258_s6  ;;  %s15317_s13 = smov 34  }
0x1aae   : > { %8747 = vrot.lane.b32.xlu1 %v8744_v31, %s11258_s6  ;;  %8896 = vrot.lane.b32.xlu0 %v14191_v48, %s11310_s5  ;;  %s15318_s5 = smov 32  }
0x1af8   : > { %v7942_v62 = vpop.permute.xlu1 %7941  ;;  %v7934_v58 = vpop.permute.xlu0 %7933 }
0x1afc   : > { %v7950_v57 = vpop.permute.xlu1 %7949  ;;  %v7944_v2 = vpop.permute.xlu0 %7943 }
0x1afd   : > { %v7945_v17 = vsel %vm1561_vm13, %v7942_v62, %v7944_v2  ;;  %v7946_v4 = vsel %vm1561_vm13, %v7944_v2, %v7942_v62 }
0x1afe   : > { %v7947_v36 = vmul.f32 %v7946_v4, %v12927_v56  ;;  %v7948_v54 = vmul.f32 %v7945_v17, %v12930_v51 }
0x1b00   : > { %v7958_v60 = vpop.permute.xlu1 %7957  ;;  %v7952_v20 = vpop.permute.xlu0 %7951 }
0x1b01   : > { %v7953_v40 = vsel %vm15303_vm6, %v7950_v57, %v7952_v20  ;;  %v7954_v35 = vsel %vm15303_vm6, %v7952_v20, %v7950_v57  ;;  %vm15312_vm6 = vcmp.lt.s32.totalorder %v11815_v6, 112 }
0x1b02   : > { %v7956_v7 = vmul.f32 %v7953_v40, %v12970_v41  ;;  %v7955_v44 = vmul.f32 %v7954_v35, %v12967_v1 }
0x1b04   : > { %v7960_v39 = vpop.permute.xlu0 %7959  ;;  %v7936_v29 = vpop.permute.xlu1 %7935 }
0x1b05   : > { %v7961_v38 = vsel %vm15304_vm12, %v7958_v60, %v7960_v39  ;;  %v7937_v11 = vsel %vm15305_vm5, %v7934_v58, %v7936_v29  ;;  %v7938_v9 = vsel %vm15306_vm9, %v7936_v29, %v7934_v58  ;;  %v7962_v8 = vsel %vm15307_vm15, %v7960_v39, %v7958_v60  ;;  %v8007_v29 = vld [vmem:[%s15316_s28] sm:$0x3]  ;;  %s15321_s28 = smov 30  }
0x1b06   : > { %v7964_v56 = vmul.f32 %v7961_v38, %v12943_v46  ;;  %v7939_v51 = vmul.f32 %v7938_v9, %v12953_v25  ;;  %v7940_v21 = vmul.f32 %v7937_v11, %v12956_v12  ;;  %v7963_v0 = vmul.f32 %v7962_v8, %v12940_v55 }
0x1b07   : > { %vm15308_vm12 = vcmp.lt.s32.totalorder %v11815_v6, 127  ;;  %vm15310_vm9 = vcmp.lt.s32.totalorder %v11815_v6, 113 }
0x1b08   : > { %v7997_v23 = vpack.c.bf16 %v7947_v36, %v7939_v51  ;;  %v7968_v26 = vpop.permute.xlu0 %7967  ;;  %v7966_v43 = vpop.permute.xlu1 %7965  ;;  %v7998_v15 = vpack.c.bf16 %v7948_v54, %v7940_v21  ;;  %vm15309_vm5 = vmmov %vm15308_vm12  ;;  %v8000_v12 = vpack.c.bf16 %v7964_v56, %v7956_v7  ;;  %v7999_v42 = vpack.c.bf16 %v7963_v0, %v7955_v44 }
0x1b09   : > { %v7970_v18 = vsel %vm15308_vm12, %v7968_v26, %v7966_v43  ;;  %v7969_v46 = vsel %vm15309_vm5, %v7966_v43, %v7968_v26  ;;  %vm15311_vm15 = vmmov %vm15310_vm9  ;;  %vm15314_vm5 = vcmp.lt.s32.totalorder %v11815_v6, 111 }
0x1b0a   : > { %v7972_v25 = vmul.f32 %v7970_v18, %v12987_v33  ;;  %8017 = vmatprep.subr.bf16.mxu1 %v7998_v15  ;;  %v7971_v14 = vmul.f32 %v7969_v46, %v12984_v59  ;;  %vm15313_vm12 = vmmov %vm15312_vm6 }
0x1b0b   : > { %8018 = vmatpush1.bf16.msra.mxu1 %v7997_v23 }
0x1b0c   : > { %v7976_v41 = vpop.permute.xlu0 %7975  ;;  %8019 = vmatprep.subr.bf16.mxu1 %v8000_v12  ;;  %v7974_v22 = vpop.permute.xlu1 %7973  ;;  %v8002_v55 = vpack.c.bf16 %v7972_v25, %v14155_v10  ;;  %v8001_v1 = vpack.c.bf16 %v7971_v14, %v14149_v61 }
0x1b0d   : > { %v7977_v32 = vsel %vm15310_vm9, %v7974_v22, %v7976_v41  ;;  %v7978_v31 = vsel %vm15311_vm15, %v7976_v41, %v7974_v22  ;;  %vm15315_vm9 = vmmov %vm15314_vm5 }
0x1b0e   : > { %v7979_v10 = vmul.f32 %v7977_v32, %v13018_v5  ;;  %v7980_v57 = vmul.f32 %v7978_v31, %v13021_v30 }
0x1b0f   : > { %8020 = vmatpush1.bf16.msra.mxu1 %v7999_v42 }
0x1b10   : > { %v7984_v33 = vpop.permute.xlu0 %7983  ;;  %8021 = vmatprep.subr.bf16.mxu1 %v8002_v55  ;;  %v7982_v62 = vpop.permute.xlu1 %7981 }
0x1b11   : > { %v7985_v58 = vsel %vm15312_vm6, %v7982_v62, %v7984_v33  ;;  %v7986_v59 = vsel %vm15313_vm12, %v7984_v33, %v7982_v62  ;;  %vm15359_vm6 = vcmp.lt.s32.totalorder %v11815_v6, 48 }
0x1b12   : > { %v7987_v2 = vmul.f32 %v7985_v58, %v13001_v45  ;;  %v7988_v60 = vmul.f32 %v7986_v59, %v13004_v16  ;;  %vm15360_vm12 = vmmov %vm15359_vm6 }
0x1b13   : > { %8022 = vmatpush1.bf16.msra.mxu1 %v8001_v1 }
0x1b14   : > { %v8003_v20 = vpack.c.bf16 %v7987_v2, %v7979_v10  ;;  %v7992_v17 = vpop.permute.xlu0 %7991  ;;  %v7990_v4 = vpop.permute.xlu1 %7989  ;;  %v8004_v36 = vpack.c.bf16 %v7988_v60, %v7980_v57 }
0x1b15   : > { %v7993_v61 = vsel %vm15314_vm5, %v7990_v4, %v7992_v17  ;;  %v7994_v54 = vsel %vm15315_vm9, %v7992_v17, %v7990_v4  ;;  %vm15363_vm5 = vcmp.lt.s32.totalorder %v11815_v6, 51 }
0x1b16   : > { %v7995_v39 = vmul.f32 %v7993_v61, %v13031_v63  ;;  %v7996_v5 = vmul.f32 %v7994_v54, %v13034_v27  ;;  %8023 = vmatprep.subr.bf16.mxu1 %v8004_v36  ;;  %vm15364_vm9 = vmmov %vm15363_vm5 }
0x1b17   : > { %8024 = vmatpush1.bf16.msra.mxu1 %v8003_v20 }
0x1b18   : > { %v8005_v45 = vpack.c.bf16 %v7995_v39, %v7995_v39  ;;  %v8006_v30 = vpack.c.bf16 %v7996_v5, %v7996_v5  ;;  %v14255_v23 = vpop.permute.xlu1 %8262  ;;  %v14257_v26 = vpop.permute.xlu0 %8458 }
0x1b1a   : > { %9763 = vmatprep.subr.msk.bf16.mxu1 %vm1158_vm7, %v8006_v30  ;;  %v8012_v16 = vsel %vm1158_vm7, %v8005_v45, 0 }
0x1b1b   : > { %8026 = vmatpush1.bf16.msra.mxu1 %v8012_v16 }
0x1b1c   : > { %v14259_v43 = vpop.permute.xlu1 %8597  ;;  %v14261_v15 = vpop.permute.xlu0 %8745 }
0x1b1e   : > { %9764 = vmatmul.mubr.msk.bf16.vlgmr.msra.gmra.mrb[180].mxu1 %vm3953_vm10, %v8007_v29  ;;  %vm15341_vm10 = vcmp.lt.s32.totalorder %v11815_v6, 32 }
0x1b1f   : > { %vm15342_vm15 = vmmov %vm15341_vm10 }
0x1b20   : > { %v14263_v0 = vpop.permute.xlu1 %8747  ;;  %v14265_v18 = vpop.permute.xlu0 %8896 }
0x1bf1   : > { %v8051_v40 = vpop.f32.mrb[180].mxu1 }
0x1bf2   : > { %v8058_v63 = vsel %vm1158_vm7, %v8051_v40, 0.0  ;;  %v8064_v38 = vmul.f32 %v8051_v40, %v8051_v40  ;;  %v8053_v27 = vpop.f32.mrb[181].mxu1 }
0x1bf3   : > { %v8059_v11 = vsel %vm1158_vm7, %v8053_v27, 0.0  ;;  %v8065_v9 = vmul.f32 %v8053_v27, %v8053_v27  ;;  %v8055_v8 = vpop.f32.mrb[182].mxu1 }
0x1bf4   : > { %v8056_v56 = vpop.f32.mrb[183].mxu1  ;;  %v8060_v51 = vadd.f32 %v8059_v11, %v8058_v63  ;;  %v8066_v21 = vsel %vm1158_vm7, %v8064_v38, 0.0 }
0x1bf5   : > { %v8067_v35 = vsel %vm1158_vm7, %v8065_v9, 0.0 }
0x1bf6   : > { %8061 = vadd.xlane.f32.xlu1 %v8060_v51  ;;  %v8068_v7 = vadd.f32 %v8067_v35, %v8066_v21 }
0x1bf8   : > { %8069 = vadd.xlane.f32.xlu0 %v8068_v7 }
0x1c83   : > { %v8062_v46 = vpop.xlane.xlu1 %8061 }
0x1c84   : > { %v8063_v25 = vmul.f32 0.00390625, %v8062_v46 }
0x1c85   : > { %v8070_v12 = vpop.xlane.xlu0 %8069 }
0x1c86   : > { %v8071_v44 = vmul.f32 0.00390625, %v8070_v12  ;;  %v8072_v41 = vmul.f32 %v8063_v25, %v8063_v25  ;;  %v8074_v55 = vsub.f32 %v8051_v40, %v8063_v25  ;;  %v8075_v32 = vsub.f32 %v8053_v27, %v8063_v25 }
0x1c88   : > { %v8073_v22 = vsub.f32 %v8071_v44, %v8072_v41  ;;  %v15347_v44 = vld [vmem:[#allocation99_spill] sm:$0xff] }
0x1c8a   : > { %v8076_v42 = vmax.f32 %v8073_v22, 0.0  ;;  %v15348_v22 = vld [vmem:[#allocation100_spill] sm:$0xff] }
0x1c8c   : > { %v8077_v14 = vadd.f32 1e-05, %v8076_v42 }
0x1c8e   : > { %10976 = vrsqrt.f32 %v8077_v14 }
0x1c98   : > { %v10977_v31 = vpop.eup %10976 }
0x1c99   : > { %v8079_v33 = vmul.f32 %v10977_v31, %v8074_v55  ;;  %v8080_v62 = vmul.f32 %v10977_v31, %v8075_v32  ;;  %v15350_v32 = vld [vmem:[#allocation93_spill] sm:$0xff] }
0x1c9b   : > { %v8081_v1 = vadd.f32 %v8079_v33, %v12884_v47  ;;  %v8082_v58 = vadd.f32 %v8080_v62, %v12886_v34  ;;  %v15351_v33 = vld [vmem:[#allocation94_spill] sm:$0xff] }
0x1c9d   : > { %v14269_v59 = vmax.f32 %v8081_v1, 0.0  ;;  %v14271_v10 = vmax.f32 %v8082_v58, 0.0 }
0x1c9f   : > { %8180 = vrot.lane.b32.xlu1 %v14271_v10, %s15317_s13  ;;  %8178 = vrot.lane.b32.xlu0 %v14269_v59, %s15317_s13  ;;  %s15322_s13 = smov 31  }
0x1ca3   : > { %8194 = vrot.lane.b32.xlu1 %v14269_v59, %s15318_s5  ;;  %8196 = vrot.lane.b32.xlu0 %v14271_v10, %s15318_s5  ;;  %s15323_s5 = smov 29  }
0x1ca7   : > { %8170 = vrot.lane.b32.xlu1 %v14269_v59, %s15319_s1  ;;  %8172 = vrot.lane.b32.xlu0 %v14271_v10, %s15319_s1  ;;  %s15324_s1 = smov 50  }
0x1cab   : > { %8186 = vrot.lane.b32.xlu1 %v14269_v59, %s15320_s29  ;;  %8188 = vrot.lane.b32.xlu0 %v14271_v10, %s15320_s29  ;;  %s15325_s29 = smov 48  }
0x1caf   : > { %8210 = vrot.lane.b32.xlu1 %v14269_v59, %s15321_s28  ;;  %8212 = vrot.lane.b32.xlu0 %v14271_v10, %s15321_s28  ;;  %s15326_s28 = smov 51  }
0x1cb3   : > { %8202 = vrot.lane.b32.xlu1 %v14269_v59, %s15322_s13  ;;  %8204 = vrot.lane.b32.xlu0 %v14271_v10, %s15322_s13  ;;  %s15327_s13 = smov 49  }
0x1cb7   : > { %8218 = vrot.lane.b32.xlu1 %v14269_v59, %s15323_s5  ;;  %8220 = vrot.lane.b32.xlu0 %v14271_v10, %s15323_s5  ;;  %s15328_s5 = smov 46  }
0x1cbb   : > { %8093 = vrot.lane.b32.xlu1 %v14269_v59, %s15324_s1  ;;  %8095 = vrot.lane.b32.xlu0 %v14271_v10, %s15324_s1  ;;  %s15329_s1 = smov 47  }
0x1cbf   : > { %8109 = vrot.lane.b32.xlu1 %v14269_v59, %s15325_s29  ;;  %8111 = vrot.lane.b32.xlu0 %v14271_v10, %s15325_s29  ;;  %s15330_s29 = smov 45  }
0x1cc3   : > { %8085 = vrot.lane.b32.xlu1 %v14269_v59, %s15326_s28  ;;  %8087 = vrot.lane.b32.xlu0 %v14271_v10, %s15326_s28  ;;  %s15331_s28 = smov 18  }
0x1cc7   : > { %8101 = vrot.lane.b32.xlu1 %v14269_v59, %s15327_s13  ;;  %8103 = vrot.lane.b32.xlu0 %v14271_v10, %s15327_s13  ;;  %s15332_s13 = smov 19  }
0x1ccb   : > { %8125 = vrot.lane.b32.xlu1 %v14269_v59, %s15328_s5  ;;  %8127 = vrot.lane.b32.xlu0 %v14271_v10, %s15328_s5  ;;  %s15333_s5 = smov 14  }
0x1ccf   : > { %8119 = vrot.lane.b32.xlu1 %v14271_v10, %s15329_s1  ;;  %8117 = vrot.lane.b32.xlu0 %v14269_v59, %s15329_s1  ;;  %s15335_s1 = smov 2  }
0x1cd3   : > { %8135 = vrot.lane.b32.xlu1 %v14271_v10, %s15330_s29  ;;  %8133 = vrot.lane.b32.xlu0 %v14269_v59, %s15330_s29  ;;  %s15338_s29 = smov 125  }
0x1cd7   : > { %8375 = vrot.lane.b32.xlu1 %v14271_v10, %s15331_s28  ;;  %8373 = vrot.lane.b32.xlu0 %v14269_v59, %s15331_s28  ;;  %s15339_s28 = smov 114  }
0x1cdb   : > { %8391 = vrot.lane.b32.xlu1 %v14271_v10, %s11258_s6  ;;  %8389 = vrot.lane.b32.xlu0 %v14269_v59, %s11258_s6  ;;  %s15334_s6 = smov 13  }
0x1cdf   : > { %8367 = vrot.lane.b32.xlu1 %v14271_v10, %s15332_s13  ;;  %8365 = vrot.lane.b32.xlu0 %v14269_v59, %s15332_s13  ;;  %s15355_s13 = smov 99  }
0x1ce3   : > { %8383 = vrot.lane.b32.xlu1 %v14271_v10, %s11257_s7  ;;  %8381 = vrot.lane.b32.xlu0 %v14269_v59, %s11257_s7  ;;  %s15336_s7 = smov 3  }
0x1ce7   : > { %8407 = vrot.lane.b32.xlu1 %v14271_v10, %s15333_s5  ;;  %8405 = vrot.lane.b32.xlu0 %v14269_v59, %s15333_s5  ;;  %s15358_s5 = smov 97  }
0x1ceb   : > { %8399 = vrot.lane.b32.xlu1 %v14271_v10, %s15296_s11  ;;  %8397 = vrot.lane.b32.xlu0 %v14269_v59, %s15296_s11  ;;  %s15337_s11 = smov 126  }
0x1cef   : > { %8415 = vrot.lane.b32.xlu1 %v14271_v10, %s15334_s6  ;;  %8413 = vrot.lane.b32.xlu0 %v14269_v59, %s15334_s6  ;;  %s15367_s6 = smov 94  }
0x1cf3   : > { %8522 = vrot.lane.b32.xlu1 %v14271_v10, %s15335_s1  ;;  %8520 = vrot.lane.b32.xlu0 %v14269_v59, %s15335_s1  ;;  %s15374_s1 = smov 95  }
0x1cf7   : > { %8514 = vrot.lane.b32.xlu1 %v14271_v10, %s15336_s7  ;;  %8512 = vrot.lane.b32.xlu0 %v14269_v59, %s15336_s7  ;;  %s15377_s7 = smov 93  }
0x1cfb   : > { %8530 = vrot.lane.b32.xlu1 %v14271_v10, %s15297_s26  ;;  %8528 = vrot.lane.b32.xlu0 %v14269_v59, %s15297_s26  ;;  %s15340_s26 = smov 115  }
0x1cff   : > { %8544 = vrot.lane.b32.xlu1 %v14269_v59, %s15337_s11  ;;  %8546 = vrot.lane.b32.xlu0 %v14271_v10, %s15337_s11  ;;  %s15382_s11 = smov 82  }
0x1d03   : > { %8536 = vrot.lane.b32.xlu1 %v14269_v59, %s15298_s3  ;;  %8538 = vrot.lane.b32.xlu0 %v14271_v10, %s15298_s3  ;;  %s15343_s3 = smov 110  }
0x1d07   : > { %8552 = vrot.lane.b32.xlu1 %v14269_v59, %s15338_s29  ;;  %8554 = vrot.lane.b32.xlu0 %v14271_v10, %s15338_s29  ;;  %s15389_s29 = smov 80  }
0x1d0b   : > { %8659 = vrot.lane.b32.xlu1 %v14269_v59, %s15339_s28  ;;  %8661 = vrot.lane.b32.xlu0 %v14271_v10, %s15339_s28  ;;  %s15390_s28 = smov 83  }
0x1d0f   : > { %8675 = vrot.lane.b32.xlu1 %v14269_v59, %s15300_s8  ;;  %8677 = vrot.lane.b32.xlu0 %v14271_v10, %s15300_s8  ;;  %s15349_s8 = smov 98  }
0x1d11   : > { %v8181_v47 = vpop.permute.xlu1 %8180  ;;  %v8179_v34 = vpop.permute.xlu0 %8178 }
0x1d12   : > { %v8182_v60 = vsel %vm1198_vm4, %v8179_v34, %v8181_v47  ;;  %v8183_v20 = vsel %vm1198_vm4, %v8181_v47, %v8179_v34 }
0x1d13   : > { %8651 = vrot.lane.b32.xlu1 %v14269_v59, %s15340_s26  ;;  %8653 = vrot.lane.b32.xlu0 %v14271_v10, %s15340_s26  ;;  %v8184_v54 = vmul.f32 %v8183_v20, %v12618_v19  ;;  %v8185_v39 = vmul.f32 %v8182_v60, %v12628_v3  ;;  %v15352_v60 = vld [vmem:[#allocation105_spill] sm:$0xff]  ;;  %s15393_s26 = smov 81  }
0x1d15   : > { %v8195_v57 = vpop.permute.xlu1 %8194  ;;  %v8197_v2 = vpop.permute.xlu0 %8196  ;;  %v8228_v63 = vrot.slane %v8184_v54, 4  ;;  %v8229_v38 = vrot.slane %v8185_v39, 4 }
0x1d16   : > { %v8198_v17 = vsel %vm15341_vm10, %v8195_v57, %v8197_v2  ;;  %v8199_v4 = vsel %vm15342_vm15, %v8197_v2, %v8195_v57  ;;  %vm15370_vm10 = vcmp.lt.s32.totalorder %v11815_v6, 49 }
0x1d17   : > { %8667 = vrot.lane.b32.xlu1 %v14269_v59, %s15299_s2  ;;  %8669 = vrot.lane.b32.xlu0 %v14271_v10, %s15299_s2  ;;  %v8200_v30 = vmul.f32 %v8199_v4, %v12585_v50  ;;  %v8201_v16 = vmul.f32 %v8198_v17, %v12588_v37  ;;  %s15346_s2 = smov 109   ;;  %v15353_v17 = vld [vmem:[#allocation106_spill] sm:$0xff]  ;;  %vm15371_vm15 = vmmov %vm15370_vm10 }
0x1d19   : > { %v8171_v36 = vpop.permute.xlu1 %8170  ;;  %v8173_v61 = vpop.permute.xlu0 %8172  ;;  %v8234_v37 = vrot.slane %v8200_v30, 4  ;;  %v8235_v11 = vrot.slane %v8201_v16, 4 }
0x1d1a   : > { %v8174_v5 = vsel %vm1176_vm2, %v8171_v36, %v8173_v61  ;;  %v8175_v45 = vsel %vm1176_vm2, %v8173_v61, %v8171_v36  ;;  %vm15344_vm2 = vcmp.lt.s32.totalorder %v11815_v6, 33 }
0x1d1b   : > { %8693 = vrot.lane.b32.xlu1 %v14271_v10, %s15343_s3  ;;  %8691 = vrot.lane.b32.xlu0 %v14269_v59, %s15343_s3  ;;  %v8176_v19 = vmul.f32 %v8175_v45, %v12696_v53  ;;  %v8177_v3 = vmul.f32 %v8174_v5, %v12699_v52  ;;  %vm15345_vm4 = vmmov %vm15344_vm2  ;;  %s15400_s3 = smov 78  }
0x1d1d   : > { %v8187_v29 = vpop.permute.xlu1 %8186  ;;  %v8189_v40 = vpop.permute.xlu0 %8188  ;;  %v8244_v52 = vsel %vm1158_vm7, %v8176_v19, %v8228_v63  ;;  %v8245_v21 = vsel %vm1158_vm7, %v8177_v3, %v8229_v38 }
0x1d1e   : > { %v8190_v27 = vsel %vm15344_vm2, %v8187_v29, %v8189_v40  ;;  %v8191_v50 = vsel %vm15345_vm4, %v8189_v40, %v8187_v29  ;;  %vm15375_vm2 = vcmp.lt.s32.totalorder %v11815_v6, 46 }
0x1d1f   : > { %v8192_v9 = vmul.f32 %v8191_v50, %v12575_v28  ;;  %v8193_v8 = vmul.f32 %v8190_v27, %v12578_v13  ;;  %8685 = vrot.lane.b32.xlu1 %v14271_v10, %s15301_s4  ;;  %8683 = vrot.lane.b32.xlu0 %v14269_v59, %s15301_s4  ;;  %s15354_s4 = smov 96   ;;  %v15361_v50 = vld [vmem:[#allocation23_spill] sm:$0xff]  ;;  %vm15376_vm4 = vmmov %vm15375_vm2 }
0x1d21   : > { %v8246_v53 = vsel %vm1158_vm7, %v8192_v9, %v8234_v37  ;;  %v8211_v56 = vpop.permute.xlu1 %8210  ;;  %v8213_v51 = vpop.permute.xlu0 %8212  ;;  %v8247_v35 = vsel %vm1158_vm7, %v8193_v8, %v8235_v11  ;;  %v15362_v11 = vld [vmem:[#allocation24_spill] sm:$0xff] }
0x1d22   : > { %v8251_v7 = vpack.c.bf16 %v8247_v35, %v8245_v21  ;;  %v8250_v28 = vpack.c.bf16 %v8246_v53, %v8244_v52  ;;  %v8214_v13 = vsel %vm1286_vm14, %v8211_v56, %v8213_v51  ;;  %v8215_v46 = vsel %vm1286_vm14, %v8213_v51, %v8211_v56  ;;  %v15365_v53 = vld [vmem:[#allocation21_spill] sm:$0xff]  ;;  %v15366_v51 = vld [vmem:[#allocation22_spill] sm:$0xff] }
0x1d23   : > { %8701 = vrot.lane.b32.xlu1 %v14271_v10, %s15346_s2  ;;  %8699 = vrot.lane.b32.xlu0 %v14269_v59, %s15346_s2  ;;  %v8216_v41 = vmul.f32 %v8215_v46, %v15347_v44  ;;  %v8217_v42 = vmul.f32 %v8214_v13, %v15348_v22  ;;  %s15407_s2 = smov 79  }
0x1d24   : > { %8274 = vmatprep.subr.bf16.mxu0 %v8251_v7  ;;  %v15369_v7 = vld [vmem:[#allocation32_spill] sm:$0xff] }
0x1d25   : > { %v8203_v25 = vpop.permute.xlu1 %8202  ;;  %8275 = vmatpush1.bf16.msra.mxu0 %v8250_v28  ;;  %v8205_v12 = vpop.permute.xlu0 %8204  ;;  %v8240_v47 = vrot.slane %v8216_v41, 4  ;;  %v8241_v34 = vrot.slane %v8217_v42, 4 }
0x1d26   : > { %v8206_v14 = vsel %vm1264_vm0, %v8203_v25, %v8205_v12  ;;  %v8207_v55 = vsel %vm1264_vm0, %v8205_v12, %v8203_v25  ;;  %vm8264_vm0 = vcmask 228352  }
0x1d27   : > { %8813 = vrot.lane.b32.xlu1 %v14271_v10, %s15349_s8  ;;  %8811 = vrot.lane.b32.xlu0 %v14269_v59, %s15349_s8  ;;  %v8208_v31 = vmul.f32 %v8207_v55, %v15350_v32  ;;  %v8209_v62 = vmul.f32 %v8206_v14, %v15351_v33  ;;  %v15372_v14 = vld [vmem:[#allocation25_spill] sm:$0xff]  ;;  %v15373_v32 = vld [vmem:[#allocation26_spill] sm:$0xff]  ;;  %s15410_s8 = smov 77  }
0x1d29   : > { %v8219_v1 = vpop.permute.xlu1 %8218  ;;  %v8221_v58 = vpop.permute.xlu0 %8220  ;;  %v8248_v36 = vsel %vm1158_vm7, %v8208_v31, %v8240_v47  ;;  %v8249_v61 = vsel %vm1158_vm7, %v8209_v62, %v8241_v34 }
0x1d2a   : > { %v8222_v57 = vsel %vm1308_vm1, %v8219_v1, %v8221_v58  ;;  %v8223_v2 = vsel %vm1308_vm1, %v8221_v58, %v8219_v1  ;;  %vm15356_vm1 = vcmp.lt.s32.totalorder %v11815_v6, 50 }
0x1d2b   : > { %v8224_v20 = vmul.f32 %v8223_v2, %v15352_v60  ;;  %v8225_v4 = vmul.f32 %v8222_v57, %v15353_v17  ;;  %8829 = vrot.lane.b32.xlu1 %v14271_v10, %s15354_s4  ;;  %8827 = vrot.lane.b32.xlu0 %v14269_v59, %s15354_s4  ;;  %vm15357_vm14 = vmmov %vm15356_vm1  ;;  %s11311_s4 = smov 88  }
0x1d2d   : > { %v8252_v54 = vpack.c.bf16 %v8224_v20, %v8248_v36  ;;  %v8253_v39 = vpack.c.bf16 %v8225_v4, %v8249_v61  ;;  %v8094_v5 = vpop.permute.xlu1 %8093  ;;  %v8096_v45 = vpop.permute.xlu0 %8095  ;;  %v15378_v36 = vld [vmem:[#allocation29_spill] sm:$0xff] }
0x1d2e   : > { %v8097_v3 = vsel %vm15356_vm1, %v8094_v5, %v8096_v45  ;;  %v8098_v29 = vsel %vm15357_vm14, %v8096_v45, %v8094_v5  ;;  %vm15380_vm1 = vcmp.lt.s32.totalorder %v11815_v6, 47 }
0x1d2f   : > { %8805 = vrot.lane.b32.xlu1 %v14271_v10, %s15355_s13  ;;  %8803 = vrot.lane.b32.xlu0 %v14269_v59, %s15355_s13  ;;  %v8269_v30 = vsel %vm1152_vm11, %v8252_v54, 0  ;;  %v8099_v37 = vmul.f32 %v8098_v29, %v15361_v50  ;;  %v8100_v9 = vmul.f32 %v8097_v3, %v15362_v11  ;;  %v15379_v54 = vld [vmem:[#allocation30_spill] sm:$0xff]  ;;  %vm15381_vm14 = vmmov %vm15380_vm1  ;;  %s15531_s13 = sshll.u32 %s15535_s30, 3 }
0x1d30   : > { %9765 = vmatprep.subr.msk.bf16.mxu0 %vm1152_vm11, %v8253_v39 }
0x1d31   : > { %8277 = vmatpush1.bf16.msra.mxu0 %v8269_v30  ;;  %v8110_v16 = vpop.permute.xlu1 %8109  ;;  %v8112_v19 = vpop.permute.xlu0 %8111  ;;  %v8143_v25 = vrot.slane %v8099_v37, 4  ;;  %v8144_v12 = vrot.slane %v8100_v9, 4  ;;  %v15383_v30 = vld [vmem:[#allocation27_spill] sm:$0xff]  ;;  %v15387_v37 = vld [vmem:[#allocation33_spill] sm:$0xff]  ;;  %v15388_v9 = vld [vmem:[#allocation34_spill] sm:$0xff] }
0x1d32   : > { %v8113_v40 = vsel %vm15359_vm6, %v8110_v16, %v8112_v19  ;;  %v8114_v63 = vsel %vm15360_vm12, %v8112_v19, %v8110_v16  ;;  %v15384_v19 = vld [vmem:[#allocation28_spill] sm:$0xff]  ;;  %vm15385_vm6 = vcmp.lt.s32.totalorder %v11815_v6, 45 }
0x1d33   : > { %8821 = vrot.lane.b32.xlu1 %v14271_v10, %s15358_s5  ;;  %8819 = vrot.lane.b32.xlu0 %v14269_v59, %s15358_s5  ;;  %v8115_v56 = vmul.f32 %v8114_v63, %v15365_v53  ;;  %v8116_v21 = vmul.f32 %v8113_v40, %v15366_v51  ;;  %vm15386_vm12 = vmmov %vm15385_vm6 }
0x1d34   : > { %9766 = vmatmul.mubr.msk.bf16.vlgmr.msra.gmra.mrb[144].mxu0 %vm8264_vm0, %v14255_v23  ;;  %v15368_v23 = vld [vmem:[#allocation31_spill] sm:$0xff] }
0x1d35   : > { %v8086_v38 = vpop.permute.xlu1 %8085  ;;  %v8088_v27 = vpop.permute.xlu0 %8087  ;;  %8356 = vmatprep.mubr.bf16.mxu0 %v15209_v49  ;;  %v8149_v22 = vrot.slane %v8115_v56, 4  ;;  %v8150_v42 = vrot.slane %v8116_v21, 4 }
0x1d36   : > { %v8089_v8 = vsel %vm15363_vm5, %v8086_v38, %v8088_v27  ;;  %v8090_v52 = vsel %vm15364_vm9, %v8088_v27, %v8086_v38  ;;  %vm15391_vm5 = vcmp.lt.s32.totalorder %v11815_v6, 18 }
0x1d37   : > { %8845 = vrot.lane.b32.xlu1 %v14271_v10, %s15367_s6  ;;  %8843 = vrot.lane.b32.xlu0 %v14269_v59, %s15367_s6  ;;  %v8091_v35 = vmul.f32 %v8090_v52, %v15368_v23  ;;  %v8092_v28 = vmul.f32 %v8089_v8, %v15369_v7  ;;  %vm15392_vm9 = vmmov %vm15391_vm5 }
0x1d39   : > { %v8102_v13 = vpop.permute.xlu1 %8101  ;;  %v8104_v46 = vpop.permute.xlu0 %8103  ;;  %v8159_v33 = vsel %vm1158_vm7, %v8091_v35, %v8143_v25  ;;  %v8160_v47 = vsel %vm1158_vm7, %v8092_v28, %v8144_v12 }
0x1d3a   : > { %v8105_v44 = vsel %vm15370_vm10, %v8102_v13, %v8104_v46  ;;  %v8106_v41 = vsel %vm15371_vm15, %v8104_v46, %v8102_v13  ;;  %vm15396_vm10 = vcmp.lt.s32.totalorder %v11815_v6, 19 }
0x1d3b   : > { %v8107_v55 = vmul.f32 %v8106_v41, %v15372_v14  ;;  %v8108_v31 = vmul.f32 %v8105_v44, %v15373_v32  ;;  %8837 = vrot.lane.b32.xlu1 %v14271_v10, %s15374_s1  ;;  %8835 = vrot.lane.b32.xlu0 %v14269_v59, %s15374_s1  ;;  %v15395_v14 = vld [vmem:[#allocation42_spill] sm:$0xff]  ;;  %vm15397_vm15 = vmmov %vm15396_vm10  ;;  %s15532_s1 = sld [smem:[#allocation128_spill]] }
0x1d3d   : > { %v8161_v62 = vsel %vm1158_vm7, %v8107_v55, %v8149_v22  ;;  %v8126_v1 = vpop.permute.xlu1 %8125  ;;  %v8128_v58 = vpop.permute.xlu0 %8127  ;;  %v8162_v34 = vsel %vm1158_vm7, %v8108_v31, %v8150_v42  ;;  %v15394_v22 = vld [vmem:[#allocation41_spill] sm:$0xff] }
0x1d3e   : > { %v8166_v57 = vpack.c.bf16 %v8162_v34, %v8160_v47  ;;  %v8165_v2 = vpack.c.bf16 %v8161_v62, %v8159_v33  ;;  %v8129_v60 = vsel %vm15375_vm2, %v8126_v1, %v8128_v58  ;;  %v8130_v20 = vsel %vm15376_vm4, %v8128_v58, %v8126_v1  ;;  %v15398_v33 = vld [vmem:[#allocation37_spill] sm:$0xff]  ;;  %v15399_v1 = vld [vmem:[#allocation38_spill] sm:$0xff] }
0x1d3f   : > { %8853 = vrot.lane.b32.xlu1 %v14271_v10, %s15377_s7  ;;  %8851 = vrot.lane.b32.xlu0 %v14269_v59, %s15377_s7  ;;  %v8131_v61 = vmul.f32 %v8130_v20, %v15378_v36  ;;  %v8132_v39 = vmul.f32 %v8129_v60, %v15379_v54  ;;  %v15402_v34 = vld [vmem:[#allocation46_spill] sm:$0xff]  ;;  %vm15408_vm4 = vcmp.lt.s32.totalorder %v11815_v6, 14 }
0x1d40   : > { %8324 = vmatprep.subr.bf16.mxu0 %v8166_v57 }
0x1d41   : > { %v8120_v17 = vpop.permute.xlu1 %8119  ;;  %8325 = vmatpush1.bf16.msra.mxu0 %v8165_v2  ;;  %v8118_v4 = vpop.permute.xlu0 %8117  ;;  %v8155_v63 = vrot.slane %v8131_v61, 4  ;;  %v8156_v38 = vrot.slane %v8132_v39, 4  ;;  %v15405_v39 = vld [vmem:[#allocation35_spill] sm:$0xff]  ;;  %s952_s7 = scalar_lea.vmem %s15532_s1, %s15531_s13 }
0x1d42   : > { %v8121_v5 = vsel %vm15380_vm1, %v8118_v4, %v8120_v17  ;;  %v8122_v45 = vsel %vm15381_vm14, %v8120_v17, %v8118_v4  ;;  %vm15409_vm1 = vmmov %vm15408_vm4  ;;  %vm15413_vm14 = vcmp.lt.s32.totalorder %v11815_v6, 15 }
0x1d43   : > { %8960 = vrot.lane.b32.xlu1 %v14271_v10, %s15382_s11  ;;  %8958 = vrot.lane.b32.xlu0 %v14269_v59, %s15382_s11  ;;  %v8123_v16 = vmul.f32 %v8122_v45, %v15383_v30  ;;  %v8124_v3 = vmul.f32 %v8121_v5, %v15384_v19  ;;  %v15406_v45 = vld [vmem:[#allocation36_spill] sm:$0xff] }
0x1d45   : > { %v8136_v29 = vpop.permute.xlu1 %8135  ;;  %v8134_v40 = vpop.permute.xlu0 %8133  ;;  %v8163_v52 = vsel %vm1158_vm7, %v8123_v16, %v8155_v63  ;;  %v8164_v53 = vsel %vm1158_vm7, %v8124_v3, %v8156_v38 }
0x1d46   : > { %v8137_v27 = vsel %vm15385_vm6, %v8134_v40, %v8136_v29  ;;  %v8138_v50 = vsel %vm15386_vm12, %v8136_v29, %v8134_v40  ;;  %vm15414_vm6 = vmmov %vm15413_vm14  ;;  %vm15417_vm12 = vcmp.lt.s32.totalorder %v11815_v6, 13 }
0x1d47   : > { %v8139_v11 = vmul.f32 %v8138_v50, %v15387_v37  ;;  %v8140_v8 = vmul.f32 %v8137_v27, %v15388_v9  ;;  %8976 = vrot.lane.b32.xlu1 %v14271_v10, %s15389_s29  ;;  %8974 = vrot.lane.b32.xlu0 %v14269_v59, %s15389_s29 }
0x1d49   : > { %v8167_v56 = vpack.c.bf16 %v8139_v11, %v8163_v52  ;;  %v8168_v51 = vpack.c.bf16 %v8140_v8, %v8164_v53  ;;  %v8376_v21 = vpop.permute.xlu1 %8375  ;;  %v8374_v23 = vpop.permute.xlu0 %8373  ;;  %v15411_v8 = vld [vmem:[#allocation43_spill] sm:$0xff]  ;;  %v15412_v53 = vld [vmem:[#allocation44_spill] sm:$0xff] }
0x1d4a   : > { %v8377_v13 = vsel %vm15391_vm5, %v8374_v23, %v8376_v21  ;;  %v8378_v46 = vsel %vm15392_vm9, %v8376_v21, %v8374_v23  ;;  %v15415_v23 = vld [vmem:[#allocation39_spill] sm:$0xff]  ;;  %vm15418_vm5 = vmmov %vm15417_vm12  ;;  %vm15421_vm9 = vcmp.lt.s32.totalorder %v11815_v6, 2 }
0x1d4b   : > { %8952 = vrot.lane.b32.xlu1 %v14271_v10, %s15390_s28  ;;  %8950 = vrot.lane.b32.xlu0 %v14269_v59, %s15390_s28  ;;  %v8319_v35 = vsel %vm1152_vm11, %v8167_v56, 0  ;;  %v8379_v42 = vmul.f32 %v8378_v46, %v15394_v22  ;;  %v8380_v55 = vmul.f32 %v8377_v13, %v15395_v14  ;;  %v15419_v22 = vld [vmem:[#allocation47_spill] sm:$0xff]  ;;  %v15420_v14 = vld [vmem:[#allocation48_spill] sm:$0xff] }
0x1d4c   : > { %9767 = vmatprep.subr.msk.bf16.mxu0 %vm1152_vm11, %v8168_v51 }
0x1d4d   : > { %8327 = vmatpush1.bf16.msra.mxu0 %v8319_v35  ;;  %v8392_v7 = vpop.permute.xlu1 %8391  ;;  %v8390_v28 = vpop.permute.xlu0 %8389  ;;  %v8423_v20 = vrot.slane %v8379_v42, 4  ;;  %v8424_v17 = vrot.slane %v8380_v55, 4 }
0x1d4e   : > { %v8393_v25 = vsel %vm1561_vm13, %v8390_v28, %v8392_v7  ;;  %v8394_v12 = vsel %vm1561_vm13, %v8392_v7, %v8390_v28  ;;  %vm15403_vm13 = vcmp.lt.s32.totalorder %v11815_v6, 17  ;;  %v15416_v7 = vld [vmem:[#allocation40_spill] sm:$0xff] }
0x1d4f   : > { %8968 = vrot.lane.b32.xlu1 %v14271_v10, %s15393_s26  ;;  %8966 = vrot.lane.b32.xlu0 %v14269_v59, %s15393_s26  ;;  %v8395_v62 = vmul.f32 %v8394_v12, %v15398_v33  ;;  %v8396_v58 = vmul.f32 %v8393_v25, %v15399_v1  ;;  %vm15404_vm2 = vmmov %vm15403_vm13 }
0x1d50   : > { %9768 = vmatmul.mubr.msk.bf16.vlgmr.msra.gmra.mrb[144].mxu0 %vm8264_vm0, %v14181_v24  ;;  %v15401_v24 = vld [vmem:[#allocation45_spill] sm:$0xff] }
0x1d51   : > { %v8368_v44 = vpop.permute.xlu1 %8367  ;;  %v8366_v41 = vpop.permute.xlu0 %8365  ;;  %8501 = vmatprep.mubr.bf16.mxu0 %v15209_v49  ;;  %v8429_v61 = vrot.slane %v8395_v62, 4  ;;  %v8430_v54 = vrot.slane %v8396_v58, 4 }
0x1d52   : > { %v8369_v32 = vsel %vm15396_vm10, %v8366_v41, %v8368_v44  ;;  %v8370_v31 = vsel %vm15397_vm15, %v8368_v44, %v8366_v41  ;;  %vm15422_vm10 = vmmov %vm15421_vm9  ;;  %vm15423_vm15 = vcmp.lt.s32.totalorder %v11815_v6, 3 }
0x1d53   : > { %8990 = vrot.lane.b32.xlu1 %v14269_v59, %s15400_s3  ;;  %8992 = vrot.lane.b32.xlu0 %v14271_v10, %s15400_s3  ;;  %v8371_v47 = vmul.f32 %v8370_v31, %v15401_v24  ;;  %v8372_v57 = vmul.f32 %v8369_v32, %v15402_v34 }
0x1d55   : > { %v8384_v2 = vpop.permute.xlu1 %8383  ;;  %v8382_v60 = vpop.permute.xlu0 %8381  ;;  %v8439_v16 = vsel %vm1158_vm7, %v8371_v47, %v8423_v20  ;;  %v8440_v40 = vsel %vm1158_vm7, %v8372_v57, %v8424_v17  ;;  %v15425_v20 = vld [vmem:[#allocation53_spill] sm:$0xff] }
0x1d56   : > { %v8385_v4 = vsel %vm15403_vm13, %v8382_v60, %v8384_v2  ;;  %v8386_v36 = vsel %vm15404_vm2, %v8384_v2, %v8382_v60  ;;  %vm15424_vm13 = vmmov %vm15423_vm15  ;;  %vm15429_vm2 = vcmp.lt.s32.totalorder %v11815_v6, 1 }
0x1d57   : > { %v8387_v5 = vmul.f32 %v8386_v36, %v15405_v39  ;;  %v8388_v30 = vmul.f32 %v8385_v4, %v15406_v45  ;;  %8982 = vrot.lane.b32.xlu1 %v14269_v59, %s15407_s2  ;;  %8984 = vrot.lane.b32.xlu0 %v14271_v10, %s15407_s2  ;;  %v15426_v4 = vld [vmem:[#allocation54_spill] sm:$0xff] }
0x1d58   : > { %v15428_v39 = vld [vmem:[#allocation58_spill] sm:$0xff] }
0x1d59   : > { %v8441_v19 = vsel %vm1158_vm7, %v8387_v5, %v8429_v61  ;;  %v8408_v3 = vpop.permute.xlu1 %8407  ;;  %v8406_v29 = vpop.permute.xlu0 %8405  ;;  %v8442_v63 = vsel %vm1158_vm7, %v8388_v30, %v8430_v54  ;;  %v15427_v61 = vld [vmem:[#allocation57_spill] sm:$0xff] }
0x1d5a   : > { %v8446_v38 = vpack.c.bf16 %v8442_v63, %v8440_v40  ;;  %v8445_v27 = vpack.c.bf16 %v8441_v19, %v8439_v16  ;;  %v8409_v50 = vsel %vm15408_vm4, %v8406_v29, %v8408_v3  ;;  %v8410_v37 = vsel %vm15409_vm1, %v8408_v3, %v8406_v29  ;;  %vm15430_vm4 = vmmov %vm15429_vm2  ;;  %v15431_v63 = vld [vmem:[#allocation49_spill] sm:$0xff] }
0x1d5b   : > { %8998 = vrot.lane.b32.xlu1 %v14269_v59, %s15410_s8  ;;  %9000 = vrot.lane.b32.xlu0 %v14271_v10, %s15410_s8  ;;  %v8411_v52 = vmul.f32 %v8410_v37, %v15411_v8  ;;  %v8412_v56 = vmul.f32 %v8409_v50, %v15412_v53  ;;  %v8568_v3 = vrot.slane %v14269_v59, 4  ;;  %v8569_v29 = vrot.slane %v14271_v10, 4 }
0x1d5c   : > { %8469 = vmatprep.subr.bf16.mxu0 %v8446_v38  ;;  %vm15433_vm1 = vcmp.lt.s32.totalorder %v11815_v6, 126 }
0x1d5d   : > { %v8400_v11 = vpop.permute.xlu1 %8399  ;;  %8470 = vmatpush1.bf16.msra.mxu0 %v8445_v27  ;;  %v8398_v9 = vpop.permute.xlu0 %8397  ;;  %v8435_v25 = vrot.slane %v8411_v52, 4  ;;  %v8436_v12 = vrot.slane %v8412_v56, 4  ;;  %v15432_v27 = vld [vmem:[#allocation50_spill] sm:$0xff] }
0x1d5e   : > { %v8401_v51 = vsel %vm15413_vm14, %v8398_v9, %v8400_v11  ;;  %v8402_v21 = vsel %vm15414_vm6, %v8400_v11, %v8398_v9  ;;  %vm15434_vm14 = vmmov %vm15433_vm1  ;;  %vm15437_vm6 = vcmp.lt.s32.totalorder %v11815_v6, 127 }
0x1d5f   : > { %9043 = vrot.lane.b32.xlu1 %v14191_v48, %s11311_s4  ;;  %v8403_v35 = vmul.f32 %v8402_v21, %v15415_v23  ;;  %v8404_v28 = vmul.f32 %v8401_v51, %v15416_v7 }
0x1d61   : > { %v8416_v13 = vpop.permute.xlu1 %8415  ;;  %v8414_v46 = vpop.permute.xlu0 %8413  ;;  %v8443_v48 = vsel %vm1158_vm7, %v8403_v35, %v8435_v25  ;;  %v8444_v32 = vsel %vm1158_vm7, %v8404_v28, %v8436_v12  ;;  %v15435_v35 = vld [vmem:[#allocation55_spill] sm:$0xff]  ;;  %v15436_v28 = vld [vmem:[#allocation56_spill] sm:$0xff] }
0x1d62   : > { %v8417_v44 = vsel %vm15417_vm12, %v8414_v46, %v8416_v13  ;;  %v8418_v41 = vsel %vm15418_vm5, %v8416_v13, %v8414_v46  ;;  %vm15438_vm12 = vmmov %vm15437_vm6  ;;  %v15439_v12 = vld [vmem:[#allocation51_spill] sm:$0xff]  ;;  %vm15441_vm5 = vcmp.lt.s32.totalorder %v11815_v6, 125 }
0x1d63   : > { %v8419_v42 = vmul.f32 %v8418_v41, %v15419_v22  ;;  %v8420_v55 = vmul.f32 %v8417_v44, %v15420_v14  ;;  %v15440_v41 = vld [vmem:[#allocation52_spill] sm:$0xff] }
0x1d65   : > { %v8447_v31 = vpack.c.bf16 %v8419_v42, %v8443_v48  ;;  %v8448_v33 = vpack.c.bf16 %v8420_v55, %v8444_v32  ;;  %v8523_v62 = vpop.permute.xlu1 %8522  ;;  %v8521_v1 = vpop.permute.xlu0 %8520 }
0x1d66   : > { %v8524_v24 = vsel %vm15421_vm9, %v8521_v1, %v8523_v62  ;;  %v8525_v47 = vsel %vm15422_vm10, %v8523_v62, %v8521_v1  ;;  %vm15442_vm9 = vmmov %vm15441_vm5  ;;  %v15444_v1 = vld [vmem:[#allocation60_spill] sm:$0xff]  ;;  %vm15445_vm10 = vcmp.lt.s32.totalorder %v11815_v6, 114 }
0x1d67   : > { %9770 = vmatprep.subr.msk.bf16.mxu0 %vm1152_vm11, %v8448_v33  ;;  %v8464_v58 = vsel %vm1152_vm11, %v8447_v31, 0  ;;  %v8526_v17 = vmul.f32 %v8525_v47, %v15425_v20  ;;  %v8527_v36 = vmul.f32 %v8524_v24, %v15426_v4  ;;  %v15443_v33 = vld [vmem:[#allocation59_spill] sm:$0xff] }
0x1d68   : > { %8472 = vmatpush1.bf16.msra.mxu0 %v8464_v58 }
0x1d69   : > { %v8515_v34 = vpop.permute.xlu1 %8514  ;;  %v8513_v57 = vpop.permute.xlu0 %8512  ;;  %v8562_v40 = vrot.slane %v8526_v17, 4 }
0x1d6a   : > { %v8516_v2 = vsel %vm15423_vm15, %v8513_v57, %v8515_v34  ;;  %v8517_v60 = vsel %vm15424_vm13, %v8515_v34, %v8513_v57  ;;  %vm15446_vm15 = vmmov %vm15445_vm10  ;;  %vm15447_vm13 = vcmp.lt.s32.totalorder %v11815_v6, 112 }
0x1d6b   : > { %9771 = vmatmul.mubr.msk.bf16.vlgmr.msra.gmra.mrb[144].mxu0 %vm8264_vm0, %v14257_v26  ;;  %v8518_v54 = vmul.f32 %v8517_v60, %v15427_v61  ;;  %v8519_v5 = vmul.f32 %v8516_v2, %v15428_v39  ;;  %v8563_v26 = vrot.slane %v8527_v36, 4 }
0x1d6c   : > { %8640 = vmatprep.mubr.bf16.mxu0 %v15209_v49 }
0x1d6d   : > { %v8531_v45 = vpop.permute.xlu1 %8530  ;;  %v8529_v30 = vpop.permute.xlu0 %8528  ;;  %v8578_v37 = vsel %vm1158_vm7, %v8518_v54, %v8562_v40  ;;  %v8579_v52 = vsel %vm1158_vm7, %v8519_v5, %v8563_v26  ;;  %v15453_v40 = vld [vmem:[#allocation62_spill] sm:$0xff] }
0x1d6e   : > { %v8532_v16 = vsel %vm15429_vm2, %v8529_v30, %v8531_v45  ;;  %v8533_v19 = vsel %vm15430_vm4, %v8531_v45, %v8529_v30  ;;  %vm15448_vm2 = vmmov %vm15447_vm13  ;;  %v15449_v30 = vld [vmem:[#allocation67_spill] sm:$0xff]  ;;  %vm15451_vm4 = vcmp.lt.s32.totalorder %v11815_v6, 115 }
0x1d6f   : > { %v8534_v38 = vmul.f32 %v8533_v19, %v15431_v63  ;;  %v8535_v50 = vmul.f32 %v8532_v16, %v15432_v27  ;;  %v15450_v19 = vld [vmem:[#allocation68_spill] sm:$0xff]  ;;  %v15454_v63 = vld [vmem:[#allocation63_spill] sm:$0xff] }
0x1d70   : > { %v15455_v27 = vld [vmem:[#allocation71_spill] sm:$0xff] }
0x1d71   : > { %v8580_v11 = vsel %vm1158_vm7, %v8534_v38, %v8568_v3  ;;  %v8545_v9 = vpop.permute.xlu1 %8544  ;;  %v8547_v8 = vpop.permute.xlu0 %8546  ;;  %v8581_v53 = vsel %vm1158_vm7, %v8535_v50, %v8569_v29 }
0x1d72   : > { %v8585_v56 = vpack.c.bf16 %v8581_v53, %v8579_v52  ;;  %v8584_v59 = vpack.c.bf16 %v8580_v11, %v8578_v37  ;;  %v8548_v10 = vsel %vm15433_vm1, %v8545_v9, %v8547_v8  ;;  %v8549_v51 = vsel %vm15434_vm14, %v8547_v8, %v8545_v9  ;;  %vm15452_vm1 = vmmov %vm15451_vm4  ;;  %v15456_v37 = vld [vmem:[#allocation72_spill] sm:$0xff] }
0x1d73   : > { %v8550_v7 = vmul.f32 %v8548_v10, %v15435_v35  ;;  %v8551_v13 = vmul.f32 %v8549_v51, %v15436_v28  ;;  %vm15457_vm14 = vcmp.lt.s32.totalorder %v11815_v6, 113  ;;  %v15460_v35 = vld [vmem:[#allocation64_spill] sm:$0xff] }
0x1d74   : > { %8608 = vmatprep.subr.bf16.mxu0 %v8585_v56 }
0x1d75   : > { %v8537_v21 = vpop.permute.xlu1 %8536  ;;  %v8539_v23 = vpop.permute.xlu0 %8538  ;;  %8609 = vmatpush1.bf16.msra.mxu0 %v8584_v59  ;;  %v8574_v55 = vrot.slane %v8550_v7, 4  ;;  %v8575_v48 = vrot.slane %v8551_v13, 4 }
0x1d76   : > { %v8540_v46 = vsel %vm15437_vm6, %v8537_v21, %v8539_v23  ;;  %v8541_v25 = vsel %vm15438_vm12, %v8539_v23, %v8537_v21  ;;  %vm15458_vm6 = vmmov %vm15457_vm14  ;;  %v15459_v21 = vld [vmem:[#allocation61_spill] sm:$0xff]  ;;  %vm15461_vm12 = vcmp.lt.s32.totalorder %v11815_v6, 110 }
0x1d77   : > { %v8542_v44 = vmul.f32 %v8540_v46, %v15439_v12  ;;  %v8543_v22 = vmul.f32 %v8541_v25, %v15440_v41 }
0x1d79   : > { %v8553_v42 = vpop.permute.xlu1 %8552  ;;  %v8555_v14 = vpop.permute.xlu0 %8554  ;;  %v8582_v24 = vsel %vm1158_vm7, %v8542_v44, %v8574_v55  ;;  %v8583_v47 = vsel %vm1158_vm7, %v8543_v22, %v8575_v48 }
0x1d7a   : > { %v8556_v32 = vsel %vm15441_vm5, %v8553_v42, %v8555_v14  ;;  %v8557_v31 = vsel %vm15442_vm9, %v8555_v14, %v8553_v42  ;;  %vm15462_vm5 = vmmov %vm15461_vm12  ;;  %vm15465_vm9 = vcmp.lt.s32.totalorder %v11815_v6, 111 }
0x1d7b   : > { %v8558_v62 = vmul.f32 %v8556_v32, %v15443_v33  ;;  %v8559_v58 = vmul.f32 %v8557_v31, %v15444_v1  ;;  %v15463_v32 = vld [vmem:[#allocation69_spill] sm:$0xff]  ;;  %v15464_v33 = vld [vmem:[#allocation70_spill] sm:$0xff] }
0x1d7d   : > { %v8586_v34 = vpack.c.bf16 %v8558_v62, %v8582_v24  ;;  %v8587_v57 = vpack.c.bf16 %v8559_v58, %v8583_v47  ;;  %v8660_v2 = vpop.permute.xlu1 %8659  ;;  %v8662_v60 = vpop.permute.xlu0 %8661  ;;  %v15467_v24 = vld [vmem:[#allocation65_spill] sm:$0xff] }
0x1d7e   : > { %v8663_v36 = vsel %vm15445_vm10, %v8660_v2, %v8662_v60  ;;  %v8664_v61 = vsel %vm15446_vm15, %v8662_v60, %v8660_v2  ;;  %vm15466_vm10 = vmmov %vm15465_vm9  ;;  %vm15469_vm15 = vcmp.lt.s32.totalorder %v11815_v6, 109 }
0x1d7f   : > { %9773 = vmatprep.subr.msk.bf16.mxu0 %vm1152_vm11, %v8587_v57  ;;  %v8603_v20 = vsel %vm1152_vm11, %v8586_v34, 0  ;;  %v8665_v16 = vmul.f32 %v8663_v36, %v15449_v30  ;;  %v8666_v3 = vmul.f32 %v8664_v61, %v15450_v19  ;;  %v15468_v34 = vld [vmem:[#allocation66_spill] sm:$0xff]  ;;  %v15471_v61 = vld [vmem:[#allocation73_spill] sm:$0xff] }
0x1d80   : > { %8611 = vmatpush1.bf16.msra.mxu0 %v8603_v20 }
0x1d81   : > { %v8676_v17 = vpop.permute.xlu1 %8675  ;;  %v8678_v4 = vpop.permute.xlu0 %8677  ;;  %v8709_v52 = vrot.slane %v8665_v16, 4  ;;  %v8710_v53 = vrot.slane %v8666_v3, 4 }
0x1d82   : > { %v8679_v54 = vsel %vm15447_vm13, %v8676_v17, %v8678_v4  ;;  %v8680_v39 = vsel %vm15448_vm2, %v8678_v4, %v8676_v17  ;;  %vm15470_vm13 = vmmov %vm15469_vm15  ;;  %vm15473_vm2 = vcmp.lt.s32.totalorder %v11815_v6, 98 }
0x1d83   : > { %9774 = vmatmul.mubr.msk.bf16.vlgmr.msra.gmra.mrb[144].mxu0 %vm8264_vm0, %v14259_v43  ;;  %v8681_v26 = vmul.f32 %v8679_v54, %v15453_v40  ;;  %v8682_v38 = vmul.f32 %v8680_v39, %v15454_v63  ;;  %v15472_v39 = vld [vmem:[#allocation74_spill] sm:$0xff]  ;;  %v8750_v63 = vsel %vm4844_vm8, %v14261_v15, %v14263_v0  ;;  %vm15479_vm8 = vcmp.lt.s32.totalorder %v11815_v6, 99 }
0x1d84   : > { %8792 = vmatprep.mubr.bf16.mxu0 %v15209_v49  ;;  %v15478_v0 = vld [vmem:[#allocation82_spill] sm:$0xff] }
0x1d85   : > { %v8652_v5 = vpop.permute.xlu1 %8651  ;;  %v8654_v45 = vpop.permute.xlu0 %8653  ;;  %v8715_v10 = vrot.slane %v8681_v26, 4  ;;  %v8716_v51 = vrot.slane %v8682_v38, 4 }
0x1d86   : > { %v8655_v29 = vsel %vm15451_vm4, %v8652_v5, %v8654_v45  ;;  %v8656_v43 = vsel %vm15452_vm1, %v8654_v45, %v8652_v5  ;;  %vm15474_vm4 = vmmov %vm15473_vm2  ;;  %vm15475_vm1 = vcmp.lt.s32.totalorder %v11815_v6, 96 }
0x1d87   : > { %v8657_v50 = vmul.f32 %v8655_v29, %v15455_v27  ;;  %v8658_v11 = vmul.f32 %v8656_v43, %v15456_v37 }
0x1d89   : > { %v8668_v9 = vpop.permute.xlu1 %8667  ;;  %v8670_v8 = vpop.permute.xlu0 %8669  ;;  %v8725_v28 = vsel %vm1158_vm7, %v8657_v50, %v8709_v52  ;;  %v8726_v12 = vsel %vm1158_vm7, %v8658_v11, %v8710_v53 }
0x1d8a   : > { %v8671_v56 = vsel %vm15457_vm14, %v8668_v9, %v8670_v8  ;;  %v8672_v59 = vsel %vm15458_vm6, %v8670_v8, %v8668_v9  ;;  %vm15476_vm14 = vmmov %vm15475_vm1  ;;  %v15477_v8 = vld [vmem:[#allocation81_spill] sm:$0xff] }
0x1d8b   : > { %v8673_v23 = vmul.f32 %v8671_v56, %v15459_v21  ;;  %v8674_v7 = vmul.f32 %v8672_v59, %v15460_v35  ;;  %vm15480_vm6 = vmmov %vm15479_vm8  ;;  %v15481_v59 = vld [vmem:[#allocation76_spill] sm:$0xff] }
0x1d8d   : > { %v8727_v13 = vsel %vm1158_vm7, %v8673_v23, %v8715_v10  ;;  %v8694_v46 = vpop.permute.xlu1 %8693  ;;  %v8692_v25 = vpop.permute.xlu0 %8691  ;;  %v8728_v44 = vsel %vm1158_vm7, %v8674_v7, %v8716_v51  ;;  %v15482_v51 = vld [vmem:[#allocation77_spill] sm:$0xff]  ;;  %v15484_v7 = vld [vmem:[#allocation86_spill] sm:$0xff] }
0x1d8e   : > { %v8732_v41 = vpack.c.bf16 %v8728_v44, %v8726_v12  ;;  %v8731_v22 = vpack.c.bf16 %v8727_v13, %v8725_v28  ;;  %v8695_v42 = vsel %vm15461_vm12, %v8692_v25, %v8694_v46  ;;  %v8696_v14 = vsel %vm15462_vm5, %v8694_v46, %v8692_v25  ;;  %v15483_v23 = vld [vmem:[#allocation85_spill] sm:$0xff] }
0x1d8f   : > { %v8697_v31 = vmul.f32 %v8695_v42, %v15463_v32  ;;  %v8698_v62 = vmul.f32 %v8696_v14, %v15464_v33  ;;  %vm15485_vm12 = vcmp.lt.s32.totalorder %v11815_v6, 97  ;;  %v15487_v14 = vld [vmem:[#allocation75_spill] sm:$0xff] }
0x1d90   : > { %8760 = vmatprep.subr.bf16.mxu0 %v8732_v41  ;;  %vm15486_vm5 = vmmov %vm15485_vm12 }
0x1d91   : > { %v8686_v55 = vpop.permute.xlu1 %8685  ;;  %v8684_v48 = vpop.permute.xlu0 %8683  ;;  %8761 = vmatpush1.bf16.msra.mxu0 %v8731_v22  ;;  %v8721_v20 = vrot.slane %v8697_v31, 4  ;;  %v8722_v17 = vrot.slane %v8698_v62, 4 }
0x1d92   : > { %v8687_v1 = vsel %vm15465_vm9, %v8684_v48, %v8686_v55  ;;  %v8688_v58 = vsel %vm15466_vm10, %v8686_v55, %v8684_v48  ;;  %v15488_v48 = vld [vmem:[#allocation78_spill] sm:$0xff]  ;;  %vm15489_vm9 = vcmp.lt.s32.totalorder %v11815_v6, 94 }
0x1d93   : > { %v8689_v47 = vmul.f32 %v8687_v1, %v15467_v24  ;;  %v8690_v57 = vmul.f32 %v8688_v58, %v15468_v34  ;;  %vm15490_vm10 = vmmov %vm15489_vm9 }
0x1d95   : > { %v8702_v2 = vpop.permute.xlu1 %8701  ;;  %v8700_v60 = vpop.permute.xlu0 %8699  ;;  %v8729_v45 = vsel %vm1158_vm7, %v8689_v47, %v8721_v20  ;;  %v8730_v30 = vsel %vm1158_vm7, %v8690_v57, %v8722_v17  ;;  %v15491_v17 = vld [vmem:[#allocation83_spill] sm:$0xff] }
0x1d96   : > { %v8703_v4 = vsel %vm15469_vm15, %v8700_v60, %v8702_v2  ;;  %v8704_v36 = vsel %vm15470_vm13, %v8702_v2, %v8700_v60  ;;  %vm15493_vm15 = vcmp.lt.s32.totalorder %v11815_v6, 95 }
0x1d97   : > { %v8705_v54 = vmul.f32 %v8703_v4, %v15471_v61  ;;  %v8706_v5 = vmul.f32 %v8704_v36, %v15472_v39  ;;  %v15492_v36 = vld [vmem:[#allocation84_spill] sm:$0xff]  ;;  %vm15494_vm13 = vmmov %vm15493_vm15 }
0x1d99   : > { %v8733_v16 = vpack.c.bf16 %v8705_v54, %v8729_v45  ;;  %v8734_v19 = vpack.c.bf16 %v8706_v5, %v8730_v30  ;;  %v8814_v3 = vpop.permute.xlu1 %8813  ;;  %v8812_v29 = vpop.permute.xlu0 %8811  ;;  %v15495_v5 = vld [vmem:[#allocation79_spill] sm:$0xff]  ;;  %v15496_v30 = vld [vmem:[#allocation80_spill] sm:$0xff] }
0x1d9a   : > { %v8815_v38 = vsel %vm15473_vm2, %v8812_v29, %v8814_v3  ;;  %v8816_v27 = vsel %vm15474_vm4, %v8814_v3, %v8812_v29  ;;  %vm15497_vm2 = vcmp.lt.s32.totalorder %v11815_v6, 93 }
0x1d9b   : > { %9776 = vmatprep.subr.msk.bf16.mxu0 %vm1152_vm11, %v8734_v19  ;;  %v8755_v43 = vsel %vm1152_vm11, %v8733_v16, 0  ;;  %v8817_v15 = vmul.f32 %v8815_v38, %v15477_v8  ;;  %v8818_v52 = vmul.f32 %v8816_v27, %v15478_v0  ;;  %vm15498_vm4 = vmmov %vm15497_vm2  ;;  %v15500_v27 = vld [vmem:[#allocation88_spill] sm:$0xff] }
0x1d9c   : > { %8763 = vmatpush1.bf16.msra.mxu0 %v8755_v43 }
0x1d9d   : > { %v8830_v40 = vpop.permute.xlu1 %8829  ;;  %v8828_v26 = vpop.permute.xlu0 %8827  ;;  %v8861_v25 = vrot.slane %v8817_v15, 4  ;;  %v8862_v12 = vrot.slane %v8818_v52, 4 }
0x1d9e   : > { %v8831_v50 = vsel %vm15475_vm1, %v8828_v26, %v8830_v40  ;;  %v8832_v37 = vsel %vm15476_vm14, %v8830_v40, %v8828_v26  ;;  %vm15501_vm1 = vcmp.lt.s32.totalorder %v11815_v6, 82 }
0x1d9f   : > { %9777 = vmatmul.mubr.msk.bf16.vlgmr.msra.gmra.mrb[144].mxu0 %vm8264_vm0, %v8750_v63  ;;  %v8833_v10 = vmul.f32 %v8831_v50, %v15481_v59  ;;  %v8834_v21 = vmul.f32 %v8832_v37, %v15482_v51  ;;  %v15499_v63 = vld [vmem:[#allocation87_spill] sm:$0xff]  ;;  %vm15502_vm14 = vmmov %vm15501_vm1 }
0x1da0   : > { %8939 = vmatprep.mubr.bf16.mxu0 %v15209_v49 }
0x1da1   : > { %v8806_v11 = vpop.permute.xlu1 %8805  ;;  %v8804_v9 = vpop.permute.xlu0 %8803  ;;  %v8867_v22 = vrot.slane %v8833_v10, 4  ;;  %v8868_v42 = vrot.slane %v8834_v21, 4 }
0x1da2   : > { %v8807_v53 = vsel %vm15479_vm8, %v8804_v9, %v8806_v11  ;;  %v8808_v56 = vsel %vm15480_vm6, %v8806_v11, %v8804_v9  ;;  %vm15503_vm8 = vcmp.lt.s32.totalorder %v11815_v6, 80 }
0x1da3   : > { %v8809_v35 = vmul.f32 %v8807_v53, %v15483_v23  ;;  %v8810_v28 = vmul.f32 %v8808_v56, %v15484_v7  ;;  %vm15504_vm6 = vmmov %vm15503_vm8  ;;  %v15505_v7 = vld [vmem:[#allocation95_spill] sm:$0xff] }
0x1da5   : > { %v8822_v13 = vpop.permute.xlu1 %8821  ;;  %v8820_v46 = vpop.permute.xlu0 %8819  ;;  %v8877_v31 = vsel %vm1158_vm7, %v8809_v35, %v8861_v25  ;;  %v8878_v58 = vsel %vm1158_vm7, %v8810_v28, %v8862_v12  ;;  %v15507_v12 = vld [vmem:[#allocation91_spill] sm:$0xff] }
0x1da6   : > { %v8823_v44 = vsel %vm15485_vm12, %v8820_v46, %v8822_v13  ;;  %v8824_v41 = vsel %vm15486_vm5, %v8822_v13, %v8820_v46  ;;  %v15506_v13 = vld [vmem:[#allocation96_spill] sm:$0xff]  ;;  %vm15511_vm12 = vcmp.lt.s32.totalorder %v11815_v6, 81 }
0x1da7   : > { %v8825_v55 = vmul.f32 %v8823_v44, %v15487_v14  ;;  %v8826_v32 = vmul.f32 %v8824_v41, %v15488_v48  ;;  %v15508_v41 = vld [vmem:[#allocation92_spill] sm:$0xff]  ;;  %vm15512_vm5 = vmmov %vm15511_vm12 }
0x1da9   : > { %v8879_v33 = vsel %vm1158_vm7, %v8825_v55, %v8867_v22  ;;  %v8846_v62 = vpop.permute.xlu1 %8845  ;;  %v8844_v1 = vpop.permute.xlu0 %8843  ;;  %v8880_v24 = vsel %vm1158_vm7, %v8826_v32, %v8868_v42  ;;  %v15509_v42 = vld [vmem:[#allocation103_spill] sm:$0xff]  ;;  %v15510_v55 = vld [vmem:[#allocation104_spill] sm:$0xff] }
0x1daa   : > { %v8884_v47 = vpack.c.bf16 %v8880_v24, %v8878_v58  ;;  %v8883_v34 = vpack.c.bf16 %v8879_v33, %v8877_v31  ;;  %v8847_v57 = vsel %vm15489_vm9, %v8844_v1, %v8846_v62  ;;  %v8848_v2 = vsel %vm15490_vm10, %v8846_v62, %v8844_v1 }
0x1dab   : > { %v8849_v4 = vmul.f32 %v8847_v57, %v15491_v17  ;;  %v8850_v61 = vmul.f32 %v8848_v2, %v15492_v36  ;;  %v15514_v57 = vld [vmem:[#allocation90_spill] sm:$0xff]  ;;  %vm15519_vm10 = vcmp.lt.s32.totalorder %v11815_v6, 79 }
0x1dac   : > { %8907 = vmatprep.subr.bf16.mxu0 %v8884_v47  ;;  %v15513_v47 = vld [vmem:[#allocation89_spill] sm:$0xff] }
0x1dad   : > { %v8838_v60 = vpop.permute.xlu1 %8837  ;;  %v8836_v20 = vpop.permute.xlu0 %8835  ;;  %8908 = vmatpush1.bf16.msra.mxu0 %v8883_v34  ;;  %v8873_v29 = vrot.slane %v8849_v4, 4  ;;  %v8874_v43 = vrot.slane %v8850_v61, 4 }
0x1dae   : > { %v8839_v54 = vsel %vm15493_vm15, %v8836_v20, %v8838_v60  ;;  %v8840_v39 = vsel %vm15494_vm13, %v8838_v60, %v8836_v20  ;;  %vm15520_vm15 = vmmov %vm15519_vm10  ;;  %vm15523_vm13 = vcmp.lt.s32.totalorder %v11815_v6, 77 }
0x1daf   : > { %v8841_v45 = vmul.f32 %v8839_v54, %v15495_v5  ;;  %v8842_v16 = vmul.f32 %v8840_v39, %v15496_v30 }
0x1db1   : > { %v8854_v19 = vpop.permute.xlu1 %8853  ;;  %v8852_v3 = vpop.permute.xlu0 %8851  ;;  %v8881_v37 = vsel %vm1158_vm7, %v8841_v45, %v8873_v29  ;;  %v8882_v11 = vsel %vm1158_vm7, %v8842_v16, %v8874_v43  ;;  %v15518_v29 = vld [vmem:[#allocation102_spill] sm:$0xff] }
0x1db2   : > { %v8855_v40 = vsel %vm15497_vm2, %v8852_v3, %v8854_v19  ;;  %v8856_v26 = vsel %vm15498_vm4, %v8854_v19, %v8852_v3  ;;  %v15517_v19 = vld [vmem:[#allocation101_spill] sm:$0xff]  ;;  %vm15524_vm2 = vmmov %vm15523_vm13  ;;  %vm15527_vm4 = vcmask 1042432  }
0x1db3   : > { %v8857_v38 = vmul.f32 %v8855_v40, %v15499_v63  ;;  %v8858_v50 = vmul.f32 %v8856_v26, %v15500_v27  ;;  %v15521_v63 = vld [vmem:[#allocation97_spill] sm:$0xff]  ;;  %v15522_v27 = vld [vmem:[#allocation98_spill] sm:$0xff] }
0x1db5   : > { %v8885_v9 = vpack.c.bf16 %v8857_v38, %v8881_v37  ;;  %v8886_v8 = vpack.c.bf16 %v8858_v50, %v8882_v11  ;;  %v8961_v15 = vpop.permute.xlu1 %8960  ;;  %v8959_v0 = vpop.permute.xlu0 %8958 }
0x1db6   : > { %v8962_v59 = vsel %vm15501_vm1, %v8959_v0, %v8961_v15  ;;  %v8963_v10 = vsel %vm15502_vm14, %v8961_v15, %v8959_v0  ;;  %vm15528_vm1 = vmmov %vm15527_vm4 }
0x1db7   : > { %9779 = vmatprep.subr.msk.bf16.mxu0 %vm1152_vm11, %v8886_v8  ;;  %v8902_v52 = vsel %vm1152_vm11, %v8885_v9, 0  ;;  %v8964_v28 = vmul.f32 %v8962_v59, %v15505_v7  ;;  %v8965_v46 = vmul.f32 %v8963_v10, %v15506_v13  ;;  %vm15530_vm14 = vmmov %vm15528_vm1 }
0x1db8   : > { %8910 = vmatpush1.bf16.msra.mxu0 %v8902_v52  ;;  %v15525_v52 = vld [vmem:[#allocation107_spill] sm:$0xff] }
0x1db9   : > { %v8977_v53 = vpop.permute.xlu1 %8976  ;;  %v8975_v56 = vpop.permute.xlu0 %8974  ;;  %v9008_v31 = vrot.slane %v8964_v28, 4  ;;  %v9009_v33 = vrot.slane %v8965_v46, 4 }
0x1dba   : > { %v8978_v51 = vsel %vm15503_vm8, %v8975_v56, %v8977_v53  ;;  %v8979_v21 = vsel %vm15504_vm6, %v8977_v53, %v8975_v56  ;;  %v15526_v56 = vld [vmem:[#allocation108_spill] sm:$0xff] }
0x1dbb   : > { %9780 = vmatmul.mubr.msk.bf16.vlgmr.msra.gmra.mrb[144].mxu0 %vm8264_vm0, %v14265_v18  ;;  %v8980_v44 = vmul.f32 %v8978_v51, %v15507_v12  ;;  %v8981_v22 = vmul.f32 %v8979_v21, %v15508_v41 }
0x1dbc   : > { %9086 = vmatprep.mubr.bf16.mxu0 %v15209_v49 }
0x1dbd   : > { %v8953_v23 = vpop.permute.xlu1 %8952  ;;  %v8951_v35 = vpop.permute.xlu0 %8950  ;;  %v9014_v58 = vrot.slane %v8980_v44, 4  ;;  %v9015_v24 = vrot.slane %v8981_v22, 4 }
0x1dbe   : > { %v8954_v25 = vsel %vm2547_vm3, %v8951_v35, %v8953_v23  ;;  %v8955_v18 = vsel %vm2547_vm3, %v8953_v23, %v8951_v35  ;;  %vm15515_vm3 = vcmp.lt.s32.totalorder %v11815_v6, 78 }
0x1dbf   : > { %v8956_v14 = vmul.f32 %v8954_v25, %v15509_v42  ;;  %v8957_v49 = vmul.f32 %v8955_v18, %v15510_v55  ;;  %vm15516_vm9 = vmmov %vm15515_vm3 }
0x1dc1   : > { %v8969_v48 = vpop.permute.xlu1 %8968  ;;  %v8967_v32 = vpop.permute.xlu0 %8966  ;;  %v9024_v60 = vsel %vm1158_vm7, %v8956_v14, %v9008_v31  ;;  %v9025_v36 = vsel %vm1158_vm7, %v8957_v49, %v9009_v33 }
0x1dc2   : > { %v8970_v62 = vsel %vm15511_vm12, %v8967_v32, %v8969_v48  ;;  %v8971_v1 = vsel %vm15512_vm5, %v8969_v48, %v8967_v32 }
0x1dc3   : > { %v8972_v34 = vmul.f32 %v8970_v62, %v15513_v47  ;;  %v8973_v2 = vmul.f32 %v8971_v1, %v15514_v57 }
0x1dc5   : > { %v9026_v20 = vsel %vm1158_vm7, %v8972_v34, %v9014_v58  ;;  %v8991_v17 = vpop.permute.xlu1 %8990  ;;  %v8993_v4 = vpop.permute.xlu0 %8992  ;;  %v9027_v61 = vsel %vm1158_vm7, %v8973_v2, %v9015_v24 }
0x1dc6   : > { %v9031_v54 = vpack.c.bf16 %v9027_v61, %v9025_v36  ;;  %v9030_v39 = vpack.c.bf16 %v9026_v20, %v9024_v60  ;;  %v8994_v5 = vsel %vm15515_vm3, %v8991_v17, %v8993_v4  ;;  %v8995_v45 = vsel %vm15516_vm9, %v8993_v4, %v8991_v17 }
0x1dc7   : > { %v8996_v3 = vmul.f32 %v8994_v5, %v15517_v19  ;;  %v8997_v43 = vmul.f32 %v8995_v45, %v15518_v29 }
0x1dc8   : > { %9054 = vmatprep.subr.bf16.mxu0 %v9031_v54 }
0x1dc9   : > { %v8983_v30 = vpop.permute.xlu1 %8982  ;;  %v8985_v16 = vpop.permute.xlu0 %8984  ;;  %9055 = vmatpush1.bf16.msra.mxu0 %v9030_v39  ;;  %v9020_v9 = vrot.slane %v8996_v3, 4  ;;  %v9021_v8 = vrot.slane %v8997_v43, 4 }
0x1dca   : > { %v8986_v40 = vsel %vm15519_vm10, %v8983_v30, %v8985_v16  ;;  %v8987_v26 = vsel %vm15520_vm15, %v8985_v16, %v8983_v30 }
0x1dcb   : > { %v8988_v38 = vmul.f32 %v8986_v40, %v15521_v63  ;;  %v8989_v50 = vmul.f32 %v8987_v26, %v15522_v27 }
0x1dcd   : > { %v8999_v37 = vpop.permute.xlu1 %8998  ;;  %v9001_v11 = vpop.permute.xlu0 %9000  ;;  %v9028_v10 = vsel %vm1158_vm7, %v8988_v38, %v9020_v9  ;;  %v9029_v51 = vsel %vm1158_vm7, %v8989_v50, %v9021_v8  ;;  %vm15529_vm7 = vmmov %vm15528_vm1 }
0x1dce   : > { %v9002_v15 = vsel %vm15523_vm13, %v8999_v37, %v9001_v11  ;;  %v9003_v0 = vsel %vm15524_vm2, %v9001_v11, %v8999_v37 }
0x1dcf   : > { %v9004_v53 = vmul.f32 %v9002_v15, %v15525_v52  ;;  %v9005_v59 = vmul.f32 %v9003_v0, %v15526_v56 }
0x1dd1   : > { %v9032_v21 = vpack.c.bf16 %v9004_v53, %v9028_v10  ;;  %v9033_v23 = vpack.c.bf16 %v9005_v59, %v9029_v51  ;;  %v9044_v7 = vpop.permute.xlu1 %9043 }
0x1dd3   : > { %9782 = vmatprep.subr.msk.bf16.mxu0 %vm1152_vm11, %v9033_v23  ;;  %v9049_v35 = vsel %vm1152_vm11, %v9032_v21, 0 }
0x1dd4   : > { %9057 = vmatpush1.bf16.msra.mxu0 %v9049_v35 }
0x1dd7   : > { %9783 = vmatmul.mubr.msk.bf16.vlgmr.msra.gmra.mrb[144].mxu0 %vm8264_vm0, %v9044_v7 }
0x1eaa   : > { %v9088_v6 = vpop.f32.mrb[144].mxu0 }
0x1eab   : > { %v9097_v28 = vsel %vm15527_vm4, %v9088_v6, 0.0  ;;  %v9103_v13 = vmul.f32 %v9088_v6, %v9088_v6  ;;  %v9090_v46 = vpop.f32.mrb[145].mxu0 }
0x1eac   : > { %v9098_v25 = vsel %vm15528_vm1, %v9090_v46, 0.0  ;;  %v9104_v18 = vmul.f32 %v9090_v46, %v9090_v46  ;;  %v9092_v12 = vpop.f32.mrb[146].mxu0 }
0x1ead   : > { %v9093_v44 = vpop.f32.mrb[147].mxu0  ;;  %v9099_v41 = vadd.f32 %v9098_v25, %v9097_v28  ;;  %v9105_v22 = vsel %vm15529_vm7, %v9103_v13, 0.0 }
0x1eae   : > { %v9106_v42 = vsel %vm15530_vm14, %v9104_v18, 0.0 }
0x1eaf   : > { %9100 = vadd.xlane.f32.xlu0 %v9099_v41  ;;  %v9107_v14 = vadd.f32 %v9106_v42, %v9105_v22 }
0x1eb1   : > { %9108 = vadd.xlane.f32.xlu1 %v9107_v14 }
0x1f3c   : > { %v9101_v55 = vpop.xlane.xlu0 %9100 }
0x1f3d   : > { %v9102_v49 = vmul.f32 0.00390625, %v9101_v55 }
0x1f3e   : > { %v9109_v48 = vpop.xlane.xlu1 %9108 }
0x1f3f   : > { %v9110_v32 = vmul.f32 0.00390625, %v9109_v48  ;;  %v9111_v31 = vmul.f32 %v9102_v49, %v9102_v49  ;;  %v9113_v58 = vsub.f32 %v9088_v6, %v9102_v49  ;;  %v9114_v24 = vsub.f32 %v9090_v46, %v9102_v49 }
0x1f41   : > { %v9112_v33 = vsub.f32 %v9110_v32, %v9111_v31 }
0x1f43   : > { %v9115_v62 = vmax.f32 %v9112_v33, 0.0 }
0x1f45   : > { %v9116_v1 = vadd.f32 1e-05, %v9115_v62 }
0x1f47   : > { %10978 = vrsqrt.f32 %v9116_v1 }
0x1f51   : > { %v10979_v47 = vpop.eup %10978 }
0x1f52   : > { %v9118_v34 = vmul.f32 %v10979_v47, %v9113_v58  ;;  %v9119_v57 = vmul.f32 %v10979_v47, %v9114_v24 }
0x1f54   : > { %10980 = vtanh.f32 %v9118_v34 }
0x1f55   : > { %10982 = vtanh.f32 %v9119_v57 }
0x1f5e   : > { %v10981_v2 = vpop.eup %10980 }
0x1f5f   : > { %v10983_v60 = vpop.eup %10982 }
0x1f60   : > { %v9124_v20 = vcombine.low %v10981_v2, %v10983_v60 }
0x1f62   : > { %9126 = vst [vmem:[%s952_s7] sm:$0x77] %v9124_v20 }
0x1f63 PF: > { %s15533_s11 = sld [smem:[#allocation20_spill]] }
0x1f69   : > { %s43_s8 = sadd.s32 1, %s15533_s11  }
0x1f6a   : > { %p40_p11 = scmp.ge.s32.totalorder %s43_s8, 4  }
0x1f6c   :  { %42 = sbr.rel (!%p40_p11) target bundleno = 26 (0x1a), region = 305 }
0x1f73   :  { %9148 = vsyncpa [#allocation3], 1 }
0x1f74   :  { %9150 = vsyncpa [#allocation3 + $0x1], 1 }
0x1f75   :  { %9151 = vsyncpa [#allocation5], 1 }
0x1f76   :  { %9152 = vsyncpa [#allocation8], 1 }
0x1f77   :  { %9153 = vsyncpa [#allocation11], 1 }
0x1f78   :  { %9154 = vsyncpa [#allocation14], 1 }

</bundles_post_ra>
